<compile_context>
chip_gen: v6e
topology: v6e:2x2x1
jax: 0.10.0
libtpu: 0.0.40
codegen_flags: <defaults>
</compile_context>

<pallas_src>
import math
import functools

import jax
import jax.numpy as jnp
from jax.experimental import pallas as pl
from jax.experimental.pallas import tpu as pltpu


# ----------------------------- Pallas kernels --------------------------------
def _matmul_bias_act_kernel(a_ref, b_ref, bias_ref, o_ref, *, apply_relu):
    r = jnp.dot(a_ref[...], b_ref[...], preferred_element_type=jnp.float32)
    r = r + bias_ref[...]
    if apply_relu:
        r = jnp.maximum(r, 0.0)
    o_ref[...] = r.astype(o_ref.dtype)


def matmul_bias_act(a, b_bf, bias2, *, apply_relu=True, out_dtype=jnp.bfloat16):
    """act((M,K) @ (K,N) + bias). b_bf is a pre-cast bf16 (K,N) weight,
    bias2 a pre-shaped (1,N) f32 bias. No host-side padding or output slicing."""
    M, K = a.shape
    N = b_bf.shape[1]
    a_bf = a.astype(jnp.bfloat16)
    # Split M into two "parallel" row blocks only when it divides cleanly
    # (feeds both v7x TensorCores for conv1; costs one ~0.35us grid step on
    #  single-TC v5e/v6e). Otherwise a single full-dim block (Mosaic pads it).
    if M > 128 and M % 2 == 0 and (M // 2) % 8 == 0:
        tm, gm = M // 2, 2
    else:
        tm, gm = M, 1
    flops = 2 * M * K * N
    bytes_accessed = (a_bf.size * 2 + b_bf.size * 2 + bias2.size * 4
                      + M * N * jnp.dtype(out_dtype).itemsize)
    return pl.pallas_call(
        functools.partial(_matmul_bias_act_kernel, apply_relu=apply_relu),
        out_shape=jax.ShapeDtypeStruct((M, N), out_dtype),
        grid_spec=pltpu.PrefetchScalarGridSpec(
            num_scalar_prefetch=0,
            grid=(gm,),
            in_specs=[
                pl.BlockSpec((tm, K), lambda i: (i, 0)),
                pl.BlockSpec((K, N), lambda i: (0, 0)),
                pl.BlockSpec((1, N), lambda i: (0, 0)),
            ],
            out_specs=pl.BlockSpec((tm, N), lambda i: (i, 0)),
        ),
        compiler_params=pltpu.CompilerParams(
            dimension_semantics=("parallel",)),
        cost_estimate=pl.CostEstimate(flops=int(flops), transcendentals=0,
                                      bytes_accessed=int(bytes_accessed)),
    )(a_bf, b_bf, bias2)


def _fire_chain_kernel(*refs, H, W, sqs):
    """Runs a chain of Fire blocks on one image entirely in VMEM.

    refs layout: x_ref, then (ws, bs, we, be) per block, then o_ref,
    then per-block padded-squeeze scratches, then per-block im2col scratches.
    Everything is kept 2D (rows = flattened spatial, lanes = channels) so only
    static slices / dots are emitted (no in-kernel reshapes).
    """
    nb = len(sqs)
    x_ref = refs[0]
    w_refs = refs[1:1 + 4 * nb]
    o_ref = refs[1 + 4 * nb]
    pad_refs = refs[2 + 4 * nb:2 + 5 * nb]
    a3_refs = refs[2 + 5 * nb:]
    Wp = W + 2

    v = x_ref[0]                                    # (H*W, C_in), bf16
    for b in range(nb):
        ws_ref, bs_ref, we_ref, be_ref = w_refs[4 * b:4 * (b + 1)]
        sq = sqs[b]
        spad = pad_refs[b]                          # ((H+2)*(W+2), sq)
        a3 = a3_refs[b]                             # (H*W, 9*sq)

        # squeeze 1x1 conv + bias + ReLU (never leaves VMEM)
        s = jnp.dot(v, ws_ref[...], preferred_element_type=jnp.float32)
        s = jnp.maximum(s + bs_ref[...], 0.0).astype(jnp.bfloat16)

        # zero-padded squeeze map, stored row-major as ((H+2)*(W+2), sq)
        spad[...] = jnp.zeros(spad.shape, spad.dtype)
        for h in range(H):
            dst = (h + 1) * Wp + 1
            spad[dst:dst + W, :] = s[h * W:(h + 1) * W, :]

        # 3x3 im2col operand built from shifted slices of the padded map
        # (column group g = (kh, kw), matching the (kh, kw, c) weight rows)
        for g, (di, dj) in enumerate([(i, j) for i in range(3) for j in range(3)]):
            for h in range(H):
                src = (h + di) * Wp + dj
                a3[h * W:(h + 1) * W, g * sq:(g + 1) * sq] = spad[src:src + W, :]

        # fused expand: ONE MXU pass computes [expand1x1 | expand3x3]
        # (the 1x1 weight lives in the center (kh=kw=1) rows of we)
        r = jnp.dot(a3[...], we_ref[...], preferred_element_type=jnp.float32)
        v = jnp.maximum(r + be_ref[...], 0.0).astype(jnp.bfloat16)

    o_ref[0] = v.astype(o_ref.dtype)


def fire_chain(x, blocks):
    """Run a list of Fire blocks sharing one spatial resolution in ONE pallas_call.

    x: (N, H, W, C) activation. blocks: prepared (ws, bs, we, be) tuples with
    ws (C_in, sq) bf16, bs (1, sq) f32, we (9*sq, e1+e3) bf16 (1x1 expand folded
    into rows [4*sq, 5*sq) of the first e1 columns), be (1, e1+e3) f32.
    """
    n, h, w, c = x.shape
    hw = h * w
    sqs = tuple(int(bp[0].shape[1]) for bp in blocks)
    out_c = int(blocks[-1][2].shape[1])
    xf = x.astype(jnp.bfloat16).reshape(n, hw, c)   # free host-side reshape

    const2 = lambda b: (0, 0)
    in_specs = [pl.BlockSpec((1, hw, c), lambda b: (b, 0, 0))]
    operands = [xf]
    flops = 0
    bytes_accessed = xf.size * 2 + n * hw * out_c * 2
    cin = c
    for (ws, bs, we, be) in blocks:
        for arr in (ws, bs, we, be):
            in_specs.append(pl.BlockSpec(arr.shape, const2))
            operands.append(arr)
        sq, oc = int(ws.shape[1]), int(we.shape[1])
        flops += 2 * n * hw * (cin * sq + 9 * sq * oc)
        bytes_accessed += (ws.size + we.size) * 2 + (bs.size + be.size) * 4
        cin = oc

    out = pl.pallas_call(
        functools.partial(_fire_chain_kernel, H=h, W=w, sqs=sqs),
        out_shape=jax.ShapeDtypeStruct((n, hw, out_c), jnp.bfloat16),
        grid_spec=pltpu.PrefetchScalarGridSpec(
            num_scalar_prefetch=0,
            grid=(n,),
            in_specs=in_specs,
            out_specs=pl.BlockSpec((1, hw, out_c), lambda b: (b, 0, 0)),
            scratch_shapes=(
                [pltpu.VMEM(((h + 2) * (w + 2), sq), jnp.bfloat16) for sq in sqs]
                + [pltpu.VMEM((hw, 9 * sq), jnp.bfloat16) for sq in sqs]),
        ),
        compiler_params=pltpu.CompilerParams(
            dimension_semantics=("parallel",)),
        cost_estimate=pl.CostEstimate(flops=int(flops), transcendentals=0,
                                      bytes_accessed=int(bytes_accessed)),
    )(*operands)
    return out.reshape(n, h, w, out_c)


# ------------------------------- conv / pool ---------------------------------
def _im2col_nhwc(x, kh, kw, stride, padding):
    """NHWC patch extraction; columns ordered (kh, kw, c) to match _wmat()."""
    if padding > 0:
        x = jnp.pad(x, ((0, 0), (padding, padding), (padding, padding), (0, 0)))
    n, h, w, c = x.shape
    oh = (h - kh) // stride + 1
    ow = (w - kw) // stride + 1
    if kh == 1 and kw == 1 and stride == 1:
        return x.reshape(n * oh * ow, c), oh, ow
    cols = [x[:, i:i + stride * oh:stride, j:j + stride * ow:stride, :]
            for i in range(kh) for j in range(kw)]
    patches = jnp.concatenate(cols, axis=-1)            # (N, OH, OW, KH*KW*C)
    return patches.reshape(n * oh * ow, kh * kw * c), oh, ow


def _wmat(w):
    """(OC, IC, KH, KW) -> (KH*KW*IC, OC), matching im2col column order."""
    oc, ic, kh, kw = w.shape
    return w.transpose(2, 3, 1, 0).reshape(kh * kw * ic, oc)


def _expand_weight(w1, w3):
    """Fold the expand-1x1 conv into the expand-3x3 weight.

    Returns (9*sq, e1+e3): first e1 columns are zero except rows [4*sq,5*sq)
    (the kh=kw=1 center group) holding the 1x1 weight; last e3 columns are the
    im2col-ordered 3x3 weight.
    """
    e1, sq = w1.shape[0], w1.shape[1]
    w3m = _wmat(w3)                                      # (9*sq, e3)
    w1m = _wmat(w1)                                      # (sq, e1)
    left = jnp.zeros((9 * sq, e1), jnp.float32).at[4 * sq:5 * sq, :].set(w1m)
    return jnp.concatenate([left, w3m], axis=1)          # (9*sq, e1+e3)


def conv1_nhwc(x, w_mat, bias2):
    """First layer: Conv2d(in, 64, k=3, s=2) + ReLU via im2col + fused matmul."""
    n = x.shape[0]
    patches, oh, ow = _im2col_nhwc(x, 3, 3, 2, 0)
    out = matmul_bias_act(patches, w_mat, bias2, apply_relu=True,
                          out_dtype=jnp.bfloat16)        # (N*OH*OW, 64)
    return out.reshape(n, oh, ow, -1)                    # NHWC


def maxpool_ceil_nhwc(x, k=3, s=2):
    """MaxPool2d(kernel_size=3, stride=2, ceil_mode=True), padding=0, NHWC."""
    n, h, w, c = x.shape

    def out_size(d):
        o = math.ceil((d - k) / s) + 1
        if (o - 1) * s >= d:
            o -= 1
        return o

    oh, ow = out_size(h), out_size(w)
    ph = max((oh - 1) * s + k - h, 0)
    pw = max((ow - 1) * s + k - w, 0)
    xp = x
    if ph or pw:
        xp = jnp.pad(x, ((0, 0), (0, ph), (0, pw), (0, 0)),
                     constant_values=-float("inf"))
    out = None
    for i in range(k):                                   # maximum-fold (no stack)
        for j in range(k):
            sl = xp[:, i:i + s * oh:s, j:j + s * ow:s, :]
            out = sl if out is None else jnp.maximum(out, sl)
    return out


# ------------------------------ parameters -----------------------------------
FIRE_CFG = [(64, 16, 64, 64), (128, 16, 64, 64), (128, 32, 128, 128),
            (256, 32, 128, 128), (256, 48, 192, 192), (384, 48, 192, 192),
            (384, 64, 256, 256), (512, 64, 256, 256)]


def _init_conv(key, oc, ic, kh, kw, final=False):
    if final:
        w = 0.01 * jax.random.normal(key, (oc, ic, kh, kw), jnp.float32)
    else:  # kaiming_uniform_: bound = sqrt(6 / fan_in)
        bound = math.sqrt(6.0 / (ic * kh * kw))
        w = jax.random.uniform(key, (oc, ic, kh, kw), jnp.float32, -bound, bound)
    return w, jnp.zeros((oc,), jnp.float32)


def init_params(key, in_channels, num_classes):
    keys = jax.random.split(key, 2 + 3 * len(FIRE_CFG))
    params = {"conv1": _init_conv(keys[0], 64, in_channels, 3, 3)}
    for idx, (ic, sq, e1, e3) in enumerate(FIRE_CFG):
        k0, k1, k2 = keys[1 + 3 * idx], keys[2 + 3 * idx], keys[3 + 3 * idx]
        params[f"fire{idx}_squeeze"] = _init_conv(k0, sq, ic, 1, 1)
        params[f"fire{idx}_e1"] = _init_conv(k1, e1, sq, 1, 1)
        params[f"fire{idx}_e3"] = _init_conv(k2, e3, sq, 3, 3)
    params["final"] = _init_conv(keys[-1], num_classes, 512, 1, 1, final=True)
    return params


def prepare_params(params):
    """One-time weight prep: im2col-ordered, bf16-cast, (1,N) f32 biases,
    expand-1x1 folded into the expand-3x3 weight."""
    prep = {}
    w, b = params["conv1"]
    prep["conv1"] = (_wmat(w).astype(jnp.bfloat16),
                     b.reshape(1, -1).astype(jnp.float32))
    for idx in range(len(FIRE_CFG)):
        ws, bs = params[f"fire{idx}_squeeze"]
        w1, b1 = params[f"fire{idx}_e1"]
        w3, b3 = params[f"fire{idx}_e3"]
        we = _expand_weight(w1, w3)
        be = jnp.concatenate([b1, b3]).reshape(1, -1)
        prep[f"fire{idx}"] = (_wmat(ws).astype(jnp.bfloat16),
                              bs.reshape(1, -1).astype(jnp.float32),
                              we.astype(jnp.bfloat16),
                              be.astype(jnp.float32))
    wf, bf = params["final"]
    prep["final"] = (_wmat(wf).astype(jnp.bfloat16),
                     bf.reshape(1, -1).astype(jnp.float32))
    return prep


# -------------------------------- forward ------------------------------------
def squeezenet_forward(prep, x):
    x = x.transpose(0, 2, 3, 1).astype(jnp.bfloat16)     # NCHW -> NHWC once
    w1, b1 = prep["conv1"]
    x = conv1_nhwc(x, w1, b1)                            # Conv 3x3 s2 + ReLU
    x = maxpool_ceil_nhwc(x)
    x = fire_chain(x, [prep["fire0"], prep["fire1"]])
    x = maxpool_ceil_nhwc(x)
    x = fire_chain(x, [prep["fire2"], prep["fire3"]])
    x = maxpool_ceil_nhwc(x)
    x = fire_chain(x, [prep["fire4"], prep["fire5"], prep["fire6"], prep["fire7"]])
    # classifier: Dropout -> 1x1 conv -> ReLU -> AdaptiveAvgPool2d((1,1)) -> flatten
    wf, bf = prep["final"]
    n, h, wd, c = x.shape
    a = x.reshape(n * h * wd, c)
    logits_map = matmul_bias_act(a, wf, bf, apply_relu=True,
                                 out_dtype=jnp.float32)  # (N*H*W, classes)
    return logits_map.reshape(n, h * wd, -1).mean(axis=1)  # (N, num_classes)


if __name__ == "__main__":
    key = jax.random.PRNGKey(0)
    pkey, xkey = jax.random.split(key)
    in_channels, num_classes, dropout = 3, 10, 0.5
    params = init_params(pkey, in_channels, num_classes)
    prep = prepare_params(params)
    x = jax.random.normal(xkey, (2, in_channels, 25, 25), jnp.float32)
    out = jax.jit(squeezenet_forward)(prep, x)
    jax.block_until_ready(out)
    assert out.shape == (2, num_classes)
    assert bool(jnp.all(jnp.isfinite(out)))
    print("KERNEL_OK")
</pallas_src>

<mosaic_0001>
module attributes {stable_mosaic.version = 11 : i64} {
  func.func @_matmul_bias_act_kernel(%arg0: i32, %arg1: memref<144x27xbf16, #tpu.memory_space<vmem>>, %arg2: memref<27x64xbf16, #tpu.memory_space<vmem>>, %arg3: memref<1x64xf32, #tpu.memory_space<vmem>>, %arg4: memref<144x64xbf16, #tpu.memory_space<vmem>>) attributes {dimension_semantics = [#tpu.dimension_semantics<parallel>], iteration_bounds = array<i64: 2>, scalar_prefetch = 0 : i64, scratch_operands = 0 : i64, tpu.core_type = #tpu.core_type<tc>, window_params = [{transform_indices = @transform_0, window_bounds = array<i64: 144, 27>}, {pipeline_mode = #tpu.pipeline_mode<synchronous>, transform_indices = @transform_1, window_bounds = array<i64: 27, 64>}, {pipeline_mode = #tpu.pipeline_mode<synchronous>, transform_indices = @transform_2, window_bounds = array<i64: 1, 64>}, {transform_indices = @transform_3, window_bounds = array<i64: 144, 64>}]} {
    %c0 = arith.constant 0 : index
    %c0_0 = arith.constant 0 : index
    %0 = vector.load %arg1[%c0, %c0_0] : memref<144x27xbf16, #tpu.memory_space<vmem>>, vector<144x27xbf16>
    %c0_1 = arith.constant 0 : index
    %c0_2 = arith.constant 0 : index
    %1 = vector.load %arg2[%c0_1, %c0_2] : memref<27x64xbf16, #tpu.memory_space<vmem>>, vector<27x64xbf16>
    %cst = arith.constant dense<0.000000e+00> : vector<144x64xf32>
    %2 = tpu.matmul %0, %1, %cst {dimension_numbers = #tpu.dot_dimension_numbers<[1], [0], [0], [1], [0, 0, 1, 1], [], []>} : vector<144x27xbf16>, vector<27x64xbf16>, vector<144x64xf32> -> vector<144x64xf32>
    %c0_3 = arith.constant 0 : index
    %c0_4 = arith.constant 0 : index
    %3 = vector.load %arg3[%c0_3, %c0_4] : memref<1x64xf32, #tpu.memory_space<vmem>>, vector<1x64xf32>
    %4 = vector.broadcast %3 : vector<1x64xf32> to vector<144x64xf32>
    %5 = arith.addf %2, %4 : vector<144x64xf32>
    %cst_5 = arith.constant 0.000000e+00 : f32
    %6 = vector.broadcast %cst_5 : f32 to vector<144x64xf32>
    %7 = arith.maximumf %5, %6 : vector<144x64xf32>
    %8 = arith.truncf %7 : vector<144x64xf32> to vector<144x64xbf16>
    %c0_6 = arith.constant 0 : index
    %c0_7 = arith.constant 0 : index
    %9 = vector.load %arg4[%c0_6, %c0_7] : memref<144x64xbf16, #tpu.memory_space<vmem>>, vector<144x64xbf16>
    tpu.vector_store %arg4[%c0_6, %c0_7], %8 {strides = array<i32>} : memref<144x64xbf16, #tpu.memory_space<vmem>>, vector<144x64xbf16>,
    return
  }
  func.func @transform_0(%arg0: i32) -> (i32, i32) {
    %c0_i32 = arith.constant 0 : i32
    %c0_i32_0 = arith.constant 0 : i32
    return %arg0, %c0_i32 : i32, i32
  }
  func.func @transform_1(%arg0: i32) -> (i32, i32) {
    %c0_i32 = arith.constant 0 : i32
    %c0_i32_0 = arith.constant 0 : i32
    %c0_i32_1 = arith.constant 0 : i32
    return %c0_i32, %c0_i32_0 : i32, i32
  }
  func.func @transform_2(%arg0: i32) -> (i32, i32) {
    %c0_i32 = arith.constant 0 : i32
    %c0_i32_0 = arith.constant 0 : i32
    %c0_i32_1 = arith.constant 0 : i32
    return %c0_i32, %c0_i32_0 : i32, i32
  }
  func.func @transform_3(%arg0: i32) -> (i32, i32) {
    %c0_i32 = arith.constant 0 : i32
    %c0_i32_0 = arith.constant 0 : i32
    return %arg0, %c0_i32 : i32, i32
  }
}

module attributes {stable_mosaic.version = 11 : i64} {
  func.func @_fire_chain_kernel(%arg0: i32, %arg1: memref<1x36x64xbf16, #tpu.memory_space<vmem>>, %arg2: memref<64x16xbf16, #tpu.memory_space<vmem>>, %arg3: memref<1x16xf32, #tpu.memory_space<vmem>>, %arg4: memref<144x128xbf16, #tpu.memory_space<vmem>>, %arg5: memref<1x128xf32, #tpu.memory_space<vmem>>, %arg6: memref<128x16xbf16, #tpu.memory_space<vmem>>, %arg7: memref<1x16xf32, #tpu.memory_space<vmem>>, %arg8: memref<144x128xbf16, #tpu.memory_space<vmem>>, %arg9: memref<1x128xf32, #tpu.memory_space<vmem>>, %arg10: memref<1x36x128xbf16, #tpu.memory_space<vmem>>, %arg11: memref<64x16xbf16, #tpu.memory_space<vmem>>, %arg12: memref<64x16xbf16, #tpu.memory_space<vmem>>, %arg13: memref<36x144xbf16, #tpu.memory_space<vmem>>, %arg14: memref<36x144xbf16, #tpu.memory_space<vmem>>) attributes {dimension_semantics = [#tpu.dimension_semantics<parallel>], iteration_bounds = array<i64: 2>, scalar_prefetch = 0 : i64, scratch_operands = 4 : i64, tpu.core_type = #tpu.core_type<tc>, window_params = [{transform_indices = @transform_0, window_bounds = array<i64: 1, 36, 64>}, {pipeline_mode = #tpu.pipeline_mode<synchronous>, transform_indices = @transform_1, window_bounds = array<i64: 64, 16>}, {pipeline_mode = #tpu.pipeline_mode<synchronous>, transform_indices = @transform_2, window_bounds = array<i64: 1, 16>}, {pipeline_mode = #tpu.pipeline_mode<synchronous>, transform_indices = @transform_3, window_bounds = array<i64: 144, 128>}, {pipeline_mode = #tpu.pipeline_mode<synchronous>, transform_indices = @transform_4, window_bounds = array<i64: 1, 128>}, {pipeline_mode = #tpu.pipeline_mode<synchronous>, transform_indices = @transform_5, window_bounds = array<i64: 128, 16>}, {pipeline_mode = #tpu.pipeline_mode<synchronous>, transform_indices = @transform_6, window_bounds = array<i64: 1, 16>}, {pipeline_mode = #tpu.pipeline_mode<synchronous>, transform_indices = @transform_7, window_bounds = array<i64: 144, 128>}, {pipeline_mode = #tpu.pipeline_mode<synchronous>, transform_indices = @transform_8, window_bounds = array<i64: 1, 128>}, {transform_indices = @transform_9, window_bounds = array<i64: 1, 36, 128>}]} {
    %c0 = arith.constant 0 : index
    %c0_0 = arith.constant 0 : index
    %c0_1 = arith.constant 0 : index
    %0 = vector.load %arg1[%c0, %c0_0, %c0_1] : memref<1x36x64xbf16, #tpu.memory_space<vmem>>, vector<1x36x64xbf16>
    %1 = vector.shape_cast %0 : vector<1x36x64xbf16> to vector<36x64xbf16>
    %c0_2 = arith.constant 0 : index
    %c0_3 = arith.constant 0 : index
    %2 = vector.load %arg2[%c0_2, %c0_3] : memref<64x16xbf16, #tpu.memory_space<vmem>>, vector<64x16xbf16>
    %cst = arith.constant dense<0.000000e+00> : vector<36x16xf32>
    %3 = tpu.matmul %1, %2, %cst {dimension_numbers = #tpu.dot_dimension_numbers<[1], [0], [0], [1], [0, 0, 1, 1], [], []>} : vector<36x64xbf16>, vector<64x16xbf16>, vector<36x16xf32> -> vector<36x16xf32>
    %c0_4 = arith.constant 0 : index
    %c0_5 = arith.constant 0 : index
    %4 = vector.load %arg3[%c0_4, %c0_5] : memref<1x16xf32, #tpu.memory_space<vmem>>, vector<1x16xf32>
    %5 = vector.broadcast %4 : vector<1x16xf32> to vector<36x16xf32>
    %6 = arith.addf %3, %5 : vector<36x16xf32>
    %cst_6 = arith.constant 0.000000e+00 : f32
    %7 = vector.broadcast %cst_6 : f32 to vector<36x16xf32>
    %8 = arith.maximumf %6, %7 : vector<36x16xf32>
    %9 = arith.truncf %8 : vector<36x16xf32> to vector<36x16xbf16>
    %cst_7 = arith.constant 0.000000e+00 : bf16
    %10 = vector.broadcast %cst_7 : bf16 to vector<64x16xbf16>
    %c0_8 = arith.constant 0 : index
    %c0_9 = arith.constant 0 : index
    %11 = vector.load %arg11[%c0_8, %c0_9] : memref<64x16xbf16, #tpu.memory_space<vmem>>, vector<64x16xbf16>
    tpu.vector_store %arg11[%c0_8, %c0_9], %10 {strides = array<i32>} : memref<64x16xbf16, #tpu.memory_space<vmem>>, vector<64x16xbf16>,
    %12 = vector.extract_strided_slice %9 {offsets = [0, 0], sizes = [6, 16], strides = [1, 1]} : vector<36x16xbf16> to vector<6x16xbf16>
    %c9 = arith.constant 9 : index
    %c0_10 = arith.constant 0 : index
    %13 = vector.load %arg11[%c9, %c0_10] : memref<64x16xbf16, #tpu.memory_space<vmem>>, vector<6x16xbf16>
    tpu.vector_store %arg11[%c9, %c0_10], %12 {strides = array<i32>} : memref<64x16xbf16, #tpu.memory_space<vmem>>, vector<6x16xbf16>,
    %14 = vector.extract_strided_slice %9 {offsets = [6, 0], sizes = [6, 16], strides = [1, 1]} : vector<36x16xbf16> to vector<6x16xbf16>
    %c17 = arith.constant 17 : index
    %c0_11 = arith.constant 0 : index
    %15 = vector.load %arg11[%c17, %c0_11] : memref<64x16xbf16, #tpu.memory_space<vmem>>, vector<6x16xbf16>
    tpu.vector_store %arg11[%c17, %c0_11], %14 {strides = array<i32>} : memref<64x16xbf16, #tpu.memory_space<vmem>>, vector<6x16xbf16>,
    %16 = vector.extract_strided_slice %9 {offsets = [12, 0], sizes = [6, 16], strides = [1, 1]} : vector<36x16xbf16> to vector<6x16xbf16>
    %c25 = arith.constant 25 : index
    %c0_12 = arith.constant 0 : index
    %17 = vector.load %arg11[%c25, %c0_12] : memref<64x16xbf16, #tpu.memory_space<vmem>>, vector<6x16xbf16>
    tpu.vector_store %arg11[%c25, %c0_12], %16 {strides = array<i32>} : memref<64x16xbf16, #tpu.memory_space<vmem>>, vector<6x16xbf16>,
    %18 = vector.extract_strided_slice %9 {offsets = [18, 0], sizes = [6, 16], strides = [1, 1]} : vector<36x16xbf16> to vector<6x16xbf16>
    %c33 = arith.constant 33 : index
    %c0_13 = arith.constant 0 : index
    %19 = vector.load %arg11[%c33, %c0_13] : memref<64x16xbf16, #tpu.memory_space<vmem>>, vector<6x16xbf16>
    tpu.vector_store %arg11[%c33, %c0_13], %18 {strides = array<i32>} : memref<64x16xbf16, #tpu.memory_space<vmem>>, vector<6x16xbf16>,
    %20 = vector.extract_strided_slice %9 {offsets = [24, 0], sizes = [6, 16], strides = [1, 1]} : vector<36x16xbf16> to vector<6x16xbf16>
    %c41 = arith.constant 41 : index
    %c0_14 = arith.constant 0 : index
    %21 = vector.load %arg11[%c41, %c0_14] : memref<64x16xbf16, #tpu.memory_space<vmem>>, vector<6x16xbf16>
    tpu.vector_store %arg11[%c41, %c0_14], %20 {strides = array<i32>} : memref<64x16xbf16, #tpu.memory_space<vmem>>, vector<6x16xbf16>,
    %22 = vector.extract_strided_slice %9 {offsets = [30, 0], sizes = [6, 16], strides = [1, 1]} : vector<36x16xbf16> to vector<6x16xbf16>
    %c49 = arith.constant 49 : index
    %c0_15 = arith.constant 0 : index
    %23 = vector.load %arg11[%c49, %c0_15] : memref<64x16xbf16, #tpu.memory_space<vmem>>, vector<6x16xbf16>
    tpu.vector_store %arg11[%c49, %c0_15], %22 {strides = array<i32>} : memref<64x16xbf16, #tpu.memory_space<vmem>>, vector<6x16xbf16>,
    %c0_16 = arith.constant 0 : index
    %c0_17 = arith.constant 0 : index
    %24 = vector.load %arg11[%c0_16, %c0_17] : memref<64x16xbf16, #tpu.memory_space<vmem>>, vector<6x16xbf16>
    %c0_18 = arith.constant 0 : index
    %c0_19 = arith.constant 0 : index
    %25 = vector.load %arg13[%c0_18, %c0_19] : memref<36x144xbf16, #tpu.memory_space<vmem>>, vector<6x16xbf16>
    tpu.vector_store %arg13[%c0_18, %c0_19], %24 {strides = array<i32>} : memref<36x144xbf16, #tpu.memory_space<vmem>>, vector<6x16xbf16>,
    %c8 = arith.constant 8 : index
    %c0_20 = arith.constant 0 : index
    %26 = vector.load %arg11[%c8, %c0_20] : memref<64x16xbf16, #tpu.memory_space<vmem>>, vector<6x16xbf16>
    %c6 = arith.constant 6 : index
    %c0_21 = arith.constant 0 : index
    %27 = vector.load %arg13[%c6, %c0_21] : memref<36x144xbf16, #tpu.memory_space<vmem>>, vector<6x16xbf16>
    tpu.vector_store %arg13[%c6, %c0_21], %26 {strides = array<i32>} : memref<36x144xbf16, #tpu.memory_space<vmem>>, vector<6x16xbf16>,
    %c16 = arith.constant 16 : index
    %c0_22 = arith.constant 0 : index
    %28 = vector.load %arg11[%c16, %c0_22] : memref<64x16xbf16, #tpu.memory_space<vmem>>, vector<6x16xbf16>
    %c12 = arith.constant 12 : index
    %c0_23 = arith.constant 0 : index
    %29 = vector.load %arg13[%c12, %c0_23] : memref<36x144xbf16, #tpu.memory_space<vmem>>, vector<6x16xbf16>
    tpu.vector_store %arg13[%c12, %c0_23], %28 {strides = array<i32>} : memref<36x144xbf16, #tpu.memory_space<vmem>>, vector<6x16xbf16>,
    %c24 = arith.constant 24 : index
    %c0_24 = arith.constant 0 : index
    %30 = vector.load %arg11[%c24, %c0_24] : memref<64x16xbf16, #tpu.memory_space<vmem>>, vector<6x16xbf16>
    %c18 = arith.constant 18 : index
    %c0_25 = arith.constant 0 : index
    %31 = vector.load %arg13[%c18, %c0_25] : memref<36x144xbf16, #tpu.memory_space<vmem>>, vector<6x16xbf16>
    tpu.vector_store %arg13[%c18, %c0_25], %30 {strides = array<i32>} : memref<36x144xbf16, #tpu.memory_space<vmem>>, vector<6x16xbf16>,
    %c32 = arith.constant 32 : index
    %c0_26 = arith.constant 0 : index
    %32 = vector.load %arg11[%c32, %c0_26] : memref<64x16xbf16, #tpu.memory_space<vmem>>, vector<6x16xbf16>
    %c24_27 = arith.constant 24 : index
    %c0_28 = arith.constant 0 : index
    %33 = vector.load %arg13[%c24_27, %c0_28] : memref<36x144xbf16, #tpu.memory_space<vmem>>, vector<6x16xbf16>
    tpu.vector_store %arg13[%c24_27, %c0_28], %32 {strides = array<i32>} : memref<36x144xbf16, #tpu.memory_space<vmem>>, vector<6x16xbf16>,
    %c40 = arith.constant 40 : index
    %c0_29 = arith.constant 0 : index
    %34 = vector.load %arg11[%c40, %c0_29] : memref<64x16xbf16, #tpu.memory_space<vmem>>, vector<6x16xbf16>
    %c30 = arith.constant 30 : index
    %c0_30 = arith.constant 0 : index
    %35 = vector.load %arg13[%c30, %c0_30] : memref<36x144xbf16, #tpu.memory_space<vmem>>, vector<6x16xbf16>
    tpu.vector_store %arg13[%c30, %c0_30], %34 {strides = array<i32>} : memref<36x144xbf16, #tpu.memory_space<vmem>>, vector<6x16xbf16>,
    %c1 = arith.constant 1 : index
    %c0_31 = arith.constant 0 : index
    %36 = vector.load %arg11[%c1, %c0_31] : memref<64x16xbf16, #tpu.memory_space<vmem>>, vector<6x16xbf16>
    %c0_32 = arith.constant 0 : index
    %c16_33 = arith.constant 16 : index
    %37 = vector.load %arg13[%c0_32, %c16_33] : memref<36x144xbf16, #tpu.memory_space<vmem>>, vector<6x16xbf16>
    tpu.vector_store %arg13[%c0_32, %c16_33], %36 {strides = array<i32>} : memref<36x144xbf16, #tpu.memory_space<vmem>>, vector<6x16xbf16>,
    %c9_34 = arith.constant 9 : index
    %c0_35 = arith.constant 0 : index
    %38 = vector.load %arg11[%c9_34, %c0_35] : memref<64x16xbf16, #tpu.memory_space<vmem>>, vector<6x16xbf16>
    %c6_36 = arith.constant 6 : index
    %c16_37 = arith.constant 16 : index
    %39 = vector.load %arg13[%c6_36, %c16_37] : memref<36x144xbf16, #tpu.memory_space<vmem>>, vector<6x16xbf16>
    tpu.vector_store %arg13[%c6_36, %c16_37], %38 {strides = array<i32>} : memref<36x144xbf16, #tpu.memory_space<vmem>>, vector<6x16xbf16>,
    %c17_38 = arith.constant 17 : index
    %c0_39 = arith.constant 0 : index
    %40 = vector.load %arg11[%c17_38, %c0_39] : memref<64x16xbf16, #tpu.memory_space<vmem>>, vector<6x16xbf16>
    %c12_40 = arith.constant 12 : index
    %c16_41 = arith.constant 16 : index
    %41 = vector.load %arg13[%c12_40, %c16_41] : memref<36x144xbf16, #tpu.memory_space<vmem>>, vector<6x16xbf16>
    tpu.vector_store %arg13[%c12_40, %c16_41], %40 {strides = array<i32>} : memref<36x144xbf16, #tpu.memory_space<vmem>>, vector<6x16xbf16>,
    %c25_42 = arith.constant 25 : index
    %c0_43 = arith.constant 0 : index
    %42 = vector.load %arg11[%c25_42, %c0_43] : memref<64x16xbf16, #tpu.memory_space<vmem>>, vector<6x16xbf16>
    %c18_44 = arith.constant 18 : index
    %c16_45 = arith.constant 16 : index
    %43 = vector.load %arg13[%c18_44, %c16_45] : memref<36x144xbf16, #tpu.memory_space<vmem>>, vector<6x16xbf16>
    tpu.vector_store %arg13[%c18_44, %c16_45], %42 {strides = array<i32>} : memref<36x144xbf16, #tpu.memory_space<vmem>>, vector<6x16xbf16>,
    %c33_46 = arith.constant 33 : index
    %c0_47 = arith.constant 0 : index
    %44 = vector.load %arg11[%c33_46, %c0_47] : memref<64x16xbf16, #tpu.memory_space<vmem>>, vector<6x16xbf16>
    %c24_48 = arith.constant 24 : index
    %c16_49 = arith.constant 16 : index
    %45 = vector.load %arg13[%c24_48, %c16_49] : memref<36x144xbf16, #tpu.memory_space<vmem>>, vector<6x16xbf16>
    tpu.vector_store %arg13[%c24_48, %c16_49], %44 {strides = array<i32>} : memref<36x144xbf16, #tpu.memory_space<vmem>>, vector<6x16xbf16>,
    %c41_50 = arith.constant 41 : index
    %c0_51 = arith.constant 0 : index
    %46 = vector.load %arg11[%c41_50, %c0_51] : memref<64x16xbf16, #tpu.memory_space<vmem>>, vector<6x16xbf16>
    %c30_52 = arith.constant 30 : index
    %c16_53 = arith.constant 16 : index
    %47 = vector.load %arg13[%c30_52, %c16_53] : memref<36x144xbf16, #tpu.memory_space<vmem>>, vector<6x16xbf16>
    tpu.vector_store %arg13[%c30_52, %c16_53], %46 {strides = array<i32>} : memref<36x144xbf16, #tpu.memory_space<vmem>>, vector<6x16xbf16>,
    %c2 = arith.constant 2 : index
    %c0_54 = arith.constant 0 : index
    %48 = vector.load %arg11[%c2, %c0_54] : memref<64x16xbf16, #tpu.memory_space<vmem>>, vector<6x16xbf16>
    %c0_55 = arith.constant 0 : index
    %c32_56 = arith.constant 32 : index
    %49 = vector.load %arg13[%c0_55, %c32_56] : memref<36x144xbf16, #tpu.memory_space<vmem>>, vector<6x16xbf16>
    tpu.vector_store %arg13[%c0_55, %c32_56], %48 {strides = array<i32>} : memref<36x144xbf16, #tpu.memory_space<vmem>>, vector<6x16xbf16>,
    %c10 = arith.constant 10 : index
    %c0_57 = arith.constant 0 : index
    %50 = vector.load %arg11[%c10, %c0_57] : memref<64x16xbf16, #tpu.memory_space<vmem>>, vector<6x16xbf16>
    %c6_58 = arith.constant 6 : index
    %c32_59 = arith.constant 32 : index
    %51 = vector.load %arg13[%c6_58, %c32_59] : memref<36x144xbf16, #tpu.memory_space<vmem>>, vector<6x16xbf16>
    tpu.vector_store %arg13[%c6_58, %c32_59], %50 {strides = array<i32>} : memref<36x144xbf16, #tpu.memory_space<vmem>>, vector<6x16xbf16>,
    %c18_60 = arith.constant 18 : index
    %c0_61 = arith.constant 0 : index
    %52 = vector.load %arg11[%c18_60, %c0_61] : memref<64x16xbf16, #tpu.memory_space<vmem>>, vector<6x16xbf16>
    %c12_62 = arith.constant 12 : index
    %c32_63 = arith.constant 32 : index
    %53 = vector.load %arg13[%c12_62, %c32_63] : memref<36x144xbf16, #tpu.memory_space<vmem>>, vector<6x16xbf16>
    tpu.vector_store %arg13[%c12_62, %c32_63], %52 {strides = array<i32>} : memref<36x144xbf16, #tpu.memory_space<vmem>>, vector<6x16xbf16>,
    %c26 = arith.constant 26 : index
    %c0_64 = arith.constant 0 : index
    %54 = vector.load %arg11[%c26, %c0_64] : memref<64x16xbf16, #tpu.memory_space<vmem>>, vector<6x16xbf16>
    %c18_65 = arith.constant 18 : index
    %c32_66 = arith.constant 32 : index
    %55 = vector.load %arg13[%c18_65, %c32_66] : memref<36x144xbf16, #tpu.memory_space<vmem>>, vector<6x16xbf16>
    tpu.vector_store %arg13[%c18_65, %c32_66], %54 {strides = array<i32>} : memref<36x144xbf16, #tpu.memory_space<vmem>>, vector<6x16xbf16>,
    %c34 = arith.constant 34 : index
    %c0_67 = arith.constant 0 : index
    %56 = vector.load %arg11[%c34, %c0_67] : memref<64x16xbf16, #tpu.memory_space<vmem>>, vector<6x16xbf16>
    %c24_68 = arith.constant 24 : index
    %c32_69 = arith.constant 32 : index
    %57 = vector.load %arg13[%c24_68, %c32_69] : memref<36x144xbf16, #tpu.memory_space<vmem>>, vector<6x16xbf16>
    tpu.vector_store %arg13[%c24_68, %c32_69], %56 {strides = array<i32>} : memref<36x144xbf16, #tpu.memory_space<vmem>>, vector<6x16xbf16>,
    %c42 = arith.constant 42 : index
    %c0_70 = arith.constant 0 : index
    %58 = vector.load %arg11[%c42, %c0_70] : memref<64x16xbf16, #tpu.memory_space<vmem>>, vector<6x16xbf16>
    %c30_71 = arith.constant 30 : index
    %c32_72 = arith.constant 32 : index
    %59 = vector.load %arg13[%c30_71, %c32_72] : memref<36x144xbf16, #tpu.memory_space<vmem>>, vector<6x16xbf16>
    tpu.vector_store %arg13[%c30_71, %c32_72], %58 {strides = array<i32>} : memref<36x144xbf16, #tpu.memory_space<vmem>>, vector<6x16xbf16>,
    %c8_73 = arith.constant 8 : index
    %c0_74 = arith.constant 0 : index
    %60 = vector.load %arg11[%c8_73, %c0_74] : memref<64x16xbf16, #tpu.memory_space<vmem>>, vector<6x16xbf16>
    %c0_75 = arith.constant 0 : index
    %c48 = arith.constant 48 : index
    %61 = vector.load %arg13[%c0_75, %c48] : memref<36x144xbf16, #tpu.memory_space<vmem>>, vector<6x16xbf16>
    tpu.vector_store %arg13[%c0_75, %c48], %60 {strides = array<i32>} : memref<36x144xbf16, #tpu.memory_space<vmem>>, vector<6x16xbf16>,
    %c16_76 = arith.constant 16 : index
    %c0_77 = arith.constant 0 : index
    %62 = vector.load %arg11[%c16_76, %c0_77] : memref<64x16xbf16, #tpu.memory_space<vmem>>, vector<6x16xbf16>
    %c6_78 = arith.constant 6 : index
    %c48_79 = arith.constant 48 : index
    %63 = vector.load %arg13[%c6_78, %c48_79] : memref<36x144xbf16, #tpu.memory_space<vmem>>, vector<6x16xbf16>
    tpu.vector_store %arg13[%c6_78, %c48_79], %62 {strides = array<i32>} : memref<36x144xbf16, #tpu.memory_space<vmem>>, vector<6x16xbf16>,
    %c24_80 = arith.constant 24 : index
    %c0_81 = arith.constant 0 : index
    %64 = vector.load %arg11[%c24_80, %c0_81] : memref<64x16xbf16, #tpu.memory_space<vmem>>, vector<6x16xbf16>
    %c12_82 = arith.constant 12 : index
    %c48_83 = arith.constant 48 : index
    %65 = vector.load %arg13[%c12_82, %c48_83] : memref<36x144xbf16, #tpu.memory_space<vmem>>, vector<6x16xbf16>
    tpu.vector_store %arg13[%c12_82, %c48_83], %64 {strides = array<i32>} : memref<36x144xbf16, #tpu.memory_space<vmem>>, vector<6x16xbf16>,
    %c32_84 = arith.constant 32 : index
    %c0_85 = arith.constant 0 : index
    %66 = vector.load %arg11[%c32_84, %c0_85] : memref<64x16xbf16, #tpu.memory_space<vmem>>, vector<6x16xbf16>
    %c18_86 = arith.constant 18 : index
    %c48_87 = arith.constant 48 : index
    %67 = vector.load %arg13[%c18_86, %c48_87] : memref<36x144xbf16, #tpu.memory_space<vmem>>, vector<6x16xbf16>
    tpu.vector_store %arg13[%c18_86, %c48_87], %66 {strides = array<i32>} : memref<36x144xbf16, #tpu.memory_space<vmem>>, vector<6x16xbf16>,
    %c40_88 = arith.constant 40 : index
    %c0_89 = arith.constant 0 : index
    %68 = vector.load %arg11[%c40_88, %c0_89] : memref<64x16xbf16, #tpu.memory_space<vmem>>, vector<6x16xbf16>
    %c24_90 = arith.constant 24 : index
    %c48_91 = arith.constant 48 : index
    %69 = vector.load %arg13[%c24_90, %c48_91] : memref<36x144xbf16, #tpu.memory_space<vmem>>, vector<6x16xbf16>
    tpu.vector_store %arg13[%c24_90, %c48_91], %68 {strides = array<i32>} : memref<36x144xbf16, #tpu.memory_space<vmem>>, vector<6x16xbf16>,
    %c48_92 = arith.constant 48 : index
    %c0_93 = arith.constant 0 : index
    %70 = vector.load %arg11[%c48_92, %c0_93] : memref<64x16xbf16, #tpu.memory_space<vmem>>, vector<6x16xbf16>
    %c30_94 = arith.constant 30 : index
    %c48_95 = arith.constant 48 : index
    %71 = vector.load %arg13[%c30_94, %c48_95] : memref<36x144xbf16, #tpu.memory_space<vmem>>, vector<6x16xbf16>
    tpu.vector_store %arg13[%c30_94, %c48_95], %70 {strides = array<i32>} : memref<36x144xbf16, #tpu.memory_space<vmem>>, vector<6x16xbf16>,
    %c9_96 = arith.constant 9 : index
    %c0_97 = arith.constant 0 : index
    %72 = vector.load %arg11[%c9_96, %c0_97] : memref<64x16xbf16, #tpu.memory_space<vmem>>, vector<6x16xbf16>
    %c0_98 = arith.constant 0 : index
    %c64 = arith.constant 64 : index
    %73 = vector.load %arg13[%c0_98, %c64] : memref<36x144xbf16, #tpu.memory_space<vmem>>, vector<6x16xbf16>
    tpu.vector_store %arg13[%c0_98, %c64], %72 {strides = array<i32>} : memref<36x144xbf16, #tpu.memory_space<vmem>>, vector<6x16xbf16>,
    %c17_99 = arith.constant 17 : index
    %c0_100 = arith.constant 0 : index
    %74 = vector.load %arg11[%c17_99, %c0_100] : memref<64x16xbf16, #tpu.memory_space<vmem>>, vector<6x16xbf16>
    %c6_101 = arith.constant 6 : index
    %c64_102 = arith.constant 64 : index
    %75 = vector.load %arg13[%c6_101, %c64_102] : memref<36x144xbf16, #tpu.memory_space<vmem>>, vector<6x16xbf16>
    tpu.vector_store %arg13[%c6_101, %c64_102], %74 {strides = array<i32>} : memref<36x144xbf16, #tpu.memory_space<vmem>>, vector<6x16xbf16>,
    %c25_103 = arith.constant 25 : index
    %c0_104 = arith.constant 0 : index
    %76 = vector.load %arg11[%c25_103, %c0_104] : memref<64x16xbf16, #tpu.memory_space<vmem>>, vector<6x16xbf16>
    %c12_105 = arith.constant 12 : index
    %c64_106 = arith.constant 64 : index
    %77 = vector.load %arg13[%c12_105, %c64_106] : memref<36x144xbf16, #tpu.memory_space<vmem>>, vector<6x16xbf16>
    tpu.vector_store %arg13[%c12_105, %c64_106], %76 {strides = array<i32>} : memref<36x144xbf16, #tpu.memory_space<vmem>>, vector<6x16xbf16>,
    %c33_107 = arith.constant 33 : index
    %c0_108 = arith.constant 0 : index
    %78 = vector.load %arg11[%c33_107, %c0_108] : memref<64x16xbf16, #tpu.memory_space<vmem>>, vector<6x16xbf16>
    %c18_109 = arith.constant 18 : index
    %c64_110 = arith.constant 64 : index
    %79 = vector.load %arg13[%c18_109, %c64_110] : memref<36x144xbf16, #tpu.memory_space<vmem>>, vector<6x16xbf16>
    tpu.vector_store %arg13[%c18_109, %c64_110], %78 {strides = array<i32>} : memref<36x144xbf16, #tpu.memory_space<vmem>>, vector<6x16xbf16>,
    %c41_111 = arith.constant 41 : index
    %c0_112 = arith.constant 0 : index
    %80 = vector.load %arg11[%c41_111, %c0_112] : memref<64x16xbf16, #tpu.memory_space<vmem>>, vector<6x16xbf16>
    %c24_113 = arith.constant 24 : index
    %c64_114 = arith.constant 64 : index
    %81 = vector.load %arg13[%c24_113, %c64_114] : memref<36x144xbf16, #tpu.memory_space<vmem>>, vector<6x16xbf16>
    tpu.vector_store %arg13[%c24_113, %c64_114], %80 {strides = array<i32>} : memref<36x144xbf16, #tpu.memory_space<vmem>>, vector<6x16xbf16>,
    %c49_115 = arith.constant 49 : index
    %c0_116 = arith.constant 0 : index
    %82 = vector.load %arg11[%c49_115, %c0_116] : memref<64x16xbf16, #tpu.memory_space<vmem>>, vector<6x16xbf16>
    %c30_117 = arith.constant 30 : index
    %c64_118 = arith.constant 64 : index
    %83 = vector.load %arg13[%c30_117, %c64_118] : memref<36x144xbf16, #tpu.memory_space<vmem>>, vector<6x16xbf16>
    tpu.vector_store %arg13[%c30_117, %c64_118], %82 {strides = array<i32>} : memref<36x144xbf16, #tpu.memory_space<vmem>>, vector<6x16xbf16>,
    %c10_119 = arith.constant 10 : index
    %c0_120 = arith.constant 0 : index
    %84 = vector.load %arg11[%c10_119, %c0_120] : memref<64x16xbf16, #tpu.memory_space<vmem>>, vector<6x16xbf16>
    %c0_121 = arith.constant 0 : index
    %c80 = arith.constant 80 : index
    %85 = vector.load %arg13[%c0_121, %c80] : memref<36x144xbf16, #tpu.memory_space<vmem>>, vector<6x16xbf16>
    tpu.vector_store %arg13[%c0_121, %c80], %84 {strides = array<i32>} : memref<36x144xbf16, #tpu.memory_space<vmem>>, vector<6x16xbf16>,
    %c18_122 = arith.constant 18 : index
    %c0_123 = arith.constant 0 : index
    %86 = vector.load %arg11[%c18_122, %c0_123] : memref<64x16xbf16, #tpu.memory_space<vmem>>, vector<6x16xbf16>
    %c6_124 = arith.constant 6 : index
    %c80_125 = arith.constant 80 : index
    %87 = vector.load %arg13[%c6_124, %c80_125] : memref<36x144xbf16, #tpu.memory_space<vmem>>, vector<6x16xbf16>
    tpu.vector_store %arg13[%c6_124, %c80_125], %86 {strides = array<i32>} : memref<36x144xbf16, #tpu.memory_space<vmem>>, vector<6x16xbf16>,
    %c26_126 = arith.constant 26 : index
    %c0_127 = arith.constant 0 : index
    %88 = vector.load %arg11[%c26_126, %c0_127] : memref<64x16xbf16, #tpu.memory_space<vmem>>, vector<6x16xbf16>
    %c12_128 = arith.constant 12 : index
    %c80_129 = arith.constant 80 : index
    %89 = vector.load %arg13[%c12_128, %c80_129] : memref<36x144xbf16, #tpu.memory_space<vmem>>, vector<6x16xbf16>
    tpu.vector_store %arg13[%c12_128, %c80_129], %88 {strides = array<i32>} : memref<36x144xbf16, #tpu.memory_space<vmem>>, vector<6x16xbf16>,
    %c34_130 = arith.constant 34 : index
    %c0_131 = arith.constant 0 : index
    %90 = vector.load %arg11[%c34_130, %c0_131] : memref<64x16xbf16, #tpu.memory_space<vmem>>, vector<6x16xbf16>
    %c18_132 = arith.constant 18 : index
    %c80_133 = arith.constant 80 : index
    %91 = vector.load %arg13[%c18_132, %c80_133] : memref<36x144xbf16, #tpu.memory_space<vmem>>, vector<6x16xbf16>
    tpu.vector_store %arg13[%c18_132, %c80_133], %90 {strides = array<i32>} : memref<36x144xbf16, #tpu.memory_space<vmem>>, vector<6x16xbf16>,
    %c42_134 = arith.constant 42 : index
    %c0_135 = arith.constant 0 : index
    %92 = vector.load %arg11[%c42_134, %c0_135] : memref<64x16xbf16, #tpu.memory_space<vmem>>, vector<6x16xbf16>
    %c24_136 = arith.constant 24 : index
    %c80_137 = arith.constant 80 : index
    %93 = vector.load %arg13[%c24_136, %c80_137] : memref<36x144xbf16, #tpu.memory_space<vmem>>, vector<6x16xbf16>
    tpu.vector_store %arg13[%c24_136, %c80_137], %92 {strides = array<i32>} : memref<36x144xbf16, #tpu.memory_space<vmem>>, vector<6x16xbf16>,
    %c50 = arith.constant 50 : index
    %c0_138 = arith.constant 0 : index
    %94 = vector.load %arg11[%c50, %c0_138] : memref<64x16xbf16, #tpu.memory_space<vmem>>, vector<6x16xbf16>
    %c30_139 = arith.constant 30 : index
    %c80_140 = arith.constant 80 : index
    %95 = vector.load %arg13[%c30_139, %c80_140] : memref<36x144xbf16, #tpu.memory_space<vmem>>, vector<6x16xbf16>
    tpu.vector_store %arg13[%c30_139, %c80_140], %94 {strides = array<i32>} : memref<36x144xbf16, #tpu.memory_space<vmem>>, vector<6x16xbf16>,
    %c16_141 = arith.constant 16 : index
    %c0_142 = arith.constant 0 : index
    %96 = vector.load %arg11[%c16_141, %c0_142] : memref<64x16xbf16, #tpu.memory_space<vmem>>, vector<6x16xbf16>
    %c0_143 = arith.constant 0 : index
    %c96 = arith.constant 96 : index
    %97 = vector.load %arg13[%c0_143, %c96] : memref<36x144xbf16, #tpu.memory_space<vmem>>, vector<6x16xbf16>
    tpu.vector_store %arg13[%c0_143, %c96], %96 {strides = array<i32>} : memref<36x144xbf16, #tpu.memory_space<vmem>>, vector<6x16xbf16>,
    %c24_144 = arith.constant 24 : index
    %c0_145 = arith.constant 0 : index
    %98 = vector.load %arg11[%c24_144, %c0_145] : memref<64x16xbf16, #tpu.memory_space<vmem>>, vector<6x16xbf16>
    %c6_146 = arith.constant 6 : index
    %c96_147 = arith.constant 96 : index
    %99 = vector.load %arg13[%c6_146, %c96_147] : memref<36x144xbf16, #tpu.memory_space<vmem>>, vector<6x16xbf16>
    tpu.vector_store %arg13[%c6_146, %c96_147], %98 {strides = array<i32>} : memref<36x144xbf16, #tpu.memory_space<vmem>>, vector<6x16xbf16>,
    %c32_148 = arith.constant 32 : index
    %c0_149 = arith.constant 0 : index
    %100 = vector.load %arg11[%c32_148, %c0_149] : memref<64x16xbf16, #tpu.memory_space<vmem>>, vector<6x16xbf16>
    %c12_150 = arith.constant 12 : index
    %c96_151 = arith.constant 96 : index
    %101 = vector.load %arg13[%c12_150, %c96_151] : memref<36x144xbf16, #tpu.memory_space<vmem>>, vector<6x16xbf16>
    tpu.vector_store %arg13[%c12_150, %c96_151], %100 {strides = array<i32>} : memref<36x144xbf16, #tpu.memory_space<vmem>>, vector<6x16xbf16>,
    %c40_152 = arith.constant 40 : index
    %c0_153 = arith.constant 0 : index
    %102 = vector.load %arg11[%c40_152, %c0_153] : memref<64x16xbf16, #tpu.memory_space<vmem>>, vector<6x16xbf16>
    %c18_154 = arith.constant 18 : index
    %c96_155 = arith.constant 96 : index
    %103 = vector.load %arg13[%c18_154, %c96_155] : memref<36x144xbf16, #tpu.memory_space<vmem>>, vector<6x16xbf16>
    tpu.vector_store %arg13[%c18_154, %c96_155], %102 {strides = array<i32>} : memref<36x144xbf16, #tpu.memory_space<vmem>>, vector<6x16xbf16>,
    %c48_156 = arith.constant 48 : index
    %c0_157 = arith.constant 0 : index
    %104 = vector.load %arg11[%c48_156, %c0_157] : memref<64x16xbf16, #tpu.memory_space<vmem>>, vector<6x16xbf16>
    %c24_158 = arith.constant 24 : index
    %c96_159 = arith.constant 96 : index
    %105 = vector.load %arg13[%c24_158, %c96_159] : memref<36x144xbf16, #tpu.memory_space<vmem>>, vector<6x16xbf16>
    tpu.vector_store %arg13[%c24_158, %c96_159], %104 {strides = array<i32>} : memref<36x144xbf16, #tpu.memory_space<vmem>>, vector<6x16xbf16>,
    %c56 = arith.constant 56 : index
    %c0_160 = arith.constant 0 : index
    %106 = vector.load %arg11[%c56, %c0_160] : memref<64x16xbf16, #tpu.memory_space<vmem>>, vector<6x16xbf16>
    %c30_161 = arith.constant 30 : index
    %c96_162 = arith.constant 96 : index
    %107 = vector.load %arg13[%c30_161, %c96_162] : memref<36x144xbf16, #tpu.memory_space<vmem>>, vector<6x16xbf16>
    tpu.vector_store %arg13[%c30_161, %c96_162], %106 {strides = array<i32>} : memref<36x144xbf16, #tpu.memory_space<vmem>>, vector<6x16xbf16>,
    %c17_163 = arith.constant 17 : index
    %c0_164 = arith.constant 0 : index
    %108 = vector.load %arg11[%c17_163, %c0_164] : memref<64x16xbf16, #tpu.memory_space<vmem>>, vector<6x16xbf16>
    %c0_165 = arith.constant 0 : index
    %c112 = arith.constant 112 : index
    %109 = vector.load %arg13[%c0_165, %c112] : memref<36x144xbf16, #tpu.memory_space<vmem>>, vector<6x16xbf16>
    tpu.vector_store %arg13[%c0_165, %c112], %108 {strides = array<i32>} : memref<36x144xbf16, #tpu.memory_space<vmem>>, vector<6x16xbf16>,
    %c25_166 = arith.constant 25 : index
    %c0_167 = arith.constant 0 : index
    %110 = vector.load %arg11[%c25_166, %c0_167] : memref<64x16xbf16, #tpu.memory_space<vmem>>, vector<6x16xbf16>
    %c6_168 = arith.constant 6 : index
    %c112_169 = arith.constant 112 : index
    %111 = vector.load %arg13[%c6_168, %c112_169] : memref<36x144xbf16, #tpu.memory_space<vmem>>, vector<6x16xbf16>
    tpu.vector_store %arg13[%c6_168, %c112_169], %110 {strides = array<i32>} : memref<36x144xbf16, #tpu.memory_space<vmem>>, vector<6x16xbf16>,
    %c33_170 = arith.constant 33 : index
    %c0_171 = arith.constant 0 : index
    %112 = vector.load %arg11[%c33_170, %c0_171] : memref<64x16xbf16, #tpu.memory_space<vmem>>, vector<6x16xbf16>
    %c12_172 = arith.constant 12 : index
    %c112_173 = arith.constant 112 : index
    %113 = vector.load %arg13[%c12_172, %c112_173] : memref<36x144xbf16, #tpu.memory_space<vmem>>, vector<6x16xbf16>
    tpu.vector_store %arg13[%c12_172, %c112_173], %112 {strides = array<i32>} : memref<36x144xbf16, #tpu.memory_space<vmem>>, vector<6x16xbf16>,
    %c41_174 = arith.constant 41 : index
    %c0_175 = arith.constant 0 : index
    %114 = vector.load %arg11[%c41_174, %c0_175] : memref<64x16xbf16, #tpu.memory_space<vmem>>, vector<6x16xbf16>
    %c18_176 = arith.constant 18 : index
    %c112_177 = arith.constant 112 : index
    %115 = vector.load %arg13[%c18_176, %c112_177] : memref<36x144xbf16, #tpu.memory_space<vmem>>, vector<6x16xbf16>
    tpu.vector_store %arg13[%c18_176, %c112_177], %114 {strides = array<i32>} : memref<36x144xbf16, #tpu.memory_space<vmem>>, vector<6x16xbf16>,
    %c49_178 = arith.constant 49 : index
    %c0_179 = arith.constant 0 : index
    %116 = vector.load %arg11[%c49_178, %c0_179] : memref<64x16xbf16, #tpu.memory_space<vmem>>, vector<6x16xbf16>
    %c24_180 = arith.constant 24 : index
    %c112_181 = arith.constant 112 : index
    %117 = vector.load %arg13[%c24_180, %c112_181] : memref<36x144xbf16, #tpu.memory_space<vmem>>, vector<6x16xbf16>
    tpu.vector_store %arg13[%c24_180, %c112_181], %116 {strides = array<i32>} : memref<36x144xbf16, #tpu.memory_space<vmem>>, vector<6x16xbf16>,
    %c57 = arith.constant 57 : index
    %c0_182 = arith.constant 0 : index
    %118 = vector.load %arg11[%c57, %c0_182] : memref<64x16xbf16, #tpu.memory_space<vmem>>, vector<6x16xbf16>
    %c30_183 = arith.constant 30 : index
    %c112_184 = arith.constant 112 : index
    %119 = vector.load %arg13[%c30_183, %c112_184] : memref<36x144xbf16, #tpu.memory_space<vmem>>, vector<6x16xbf16>
    tpu.vector_store %arg13[%c30_183, %c112_184], %118 {strides = array<i32>} : memref<36x144xbf16, #tpu.memory_space<vmem>>, vector<6x16xbf16>,
    %c18_185 = arith.constant 18 : index
    %c0_186 = arith.constant 0 : index
    %120 = vector.load %arg11[%c18_185, %c0_186] : memref<64x16xbf16, #tpu.memory_space<vmem>>, vector<6x16xbf16>
    %c0_187 = arith.constant 0 : index
    %c128 = arith.constant 128 : index
    %121 = vector.load %arg13[%c0_187, %c128] : memref<36x144xbf16, #tpu.memory_space<vmem>>, vector<6x16xbf16>
    tpu.vector_store %arg13[%c0_187, %c128], %120 {strides = array<i32>} : memref<36x144xbf16, #tpu.memory_space<vmem>>, vector<6x16xbf16>,
    %c26_188 = arith.constant 26 : index
    %c0_189 = arith.constant 0 : index
    %122 = vector.load %arg11[%c26_188, %c0_189] : memref<64x16xbf16, #tpu.memory_space<vmem>>, vector<6x16xbf16>
    %c6_190 = arith.constant 6 : index
    %c128_191 = arith.constant 128 : index
    %123 = vector.load %arg13[%c6_190, %c128_191] : memref<36x144xbf16, #tpu.memory_space<vmem>>, vector<6x16xbf16>
    tpu.vector_store %arg13[%c6_190, %c128_191], %122 {strides = array<i32>} : memref<36x144xbf16, #tpu.memory_space<vmem>>, vector<6x16xbf16>,
    %c34_192 = arith.constant 34 : index
    %c0_193 = arith.constant 0 : index
    %124 = vector.load %arg11[%c34_192, %c0_193] : memref<64x16xbf16, #tpu.memory_space<vmem>>, vector<6x16xbf16>
    %c12_194 = arith.constant 12 : index
    %c128_195 = arith.constant 128 : index
    %125 = vector.load %arg13[%c12_194, %c128_195] : memref<36x144xbf16, #tpu.memory_space<vmem>>, vector<6x16xbf16>
    tpu.vector_store %arg13[%c12_194, %c128_195], %124 {strides = array<i32>} : memref<36x144xbf16, #tpu.memory_space<vmem>>, vector<6x16xbf16>,
    %c42_196 = arith.constant 42 : index
    %c0_197 = arith.constant 0 : index
    %126 = vector.load %arg11[%c42_196, %c0_197] : memref<64x16xbf16, #tpu.memory_space<vmem>>, vector<6x16xbf16>
    %c18_198 = arith.constant 18 : index
    %c128_199 = arith.constant 128 : index
    %127 = vector.load %arg13[%c18_198, %c128_199] : memref<36x144xbf16, #tpu.memory_space<vmem>>, vector<6x16xbf16>
    tpu.vector_store %arg13[%c18_198, %c128_199], %126 {strides = array<i32>} : memref<36x144xbf16, #tpu.memory_space<vmem>>, vector<6x16xbf16>,
    %c50_200 = arith.constant 50 : index
    %c0_201 = arith.constant 0 : index
    %128 = vector.load %arg11[%c50_200, %c0_201] : memref<64x16xbf16, #tpu.memory_space<vmem>>, vector<6x16xbf16>
    %c24_202 = arith.constant 24 : index
    %c128_203 = arith.constant 128 : index
    %129 = vector.load %arg13[%c24_202, %c128_203] : memref<36x144xbf16, #tpu.memory_space<vmem>>, vector<6x16xbf16>
    tpu.vector_store %arg13[%c24_202, %c128_203], %128 {strides = array<i32>} : memref<36x144xbf16, #tpu.memory_space<vmem>>, vector<6x16xbf16>,
    %c58 = arith.constant 58 : index
    %c0_204 = arith.constant 0 : index
    %130 = vector.load %arg11[%c58, %c0_204] : memref<64x16xbf16, #tpu.memory_space<vmem>>, vector<6x16xbf16>
    %c30_205 = arith.constant 30 : index
    %c128_206 = arith.constant 128 : index
    %131 = vector.load %arg13[%c30_205, %c128_206] : memref<36x144xbf16, #tpu.memory_space<vmem>>, vector<6x16xbf16>
    tpu.vector_store %arg13[%c30_205, %c128_206], %130 {strides = array<i32>} : memref<36x144xbf16, #tpu.memory_space<vmem>>, vector<6x16xbf16>,
    %c0_207 = arith.constant 0 : index
    %c0_208 = arith.constant 0 : index
    %132 = vector.load %arg13[%c0_207, %c0_208] : memref<36x144xbf16, #tpu.memory_space<vmem>>, vector<36x144xbf16>
    %c0_209 = arith.constant 0 : index
    %c0_210 = arith.constant 0 : index
    %133 = vector.load %arg4[%c0_209, %c0_210] : memref<144x128xbf16, #tpu.memory_space<vmem>>, vector<144x128xbf16>
    %cst_211 = arith.constant dense<0.000000e+00> : vector<36x128xf32>
    %134 = tpu.matmul %132, %133, %cst_211 {dimension_numbers = #tpu.dot_dimension_numbers<[1], [0], [0], [1], [0, 0, 1, 1], [], []>} : vector<36x144xbf16>, vector<144x128xbf16>, vector<36x128xf32> -> vector<36x128xf32>
    %c0_212 = arith.constant 0 : index
    %c0_213 = arith.constant 0 : index
    %135 = vector.load %arg5[%c0_212, %c0_213] : memref<1x128xf32, #tpu.memory_space<vmem>>, vector<1x128xf32>
    %136 = vector.broadcast %135 : vector<1x128xf32> to vector<36x128xf32>
    %137 = arith.addf %134, %136 : vector<36x128xf32>
    %cst_214 = arith.constant 0.000000e+00 : f32
    %138 = vector.broadcast %cst_214 : f32 to vector<36x128xf32>
    %139 = arith.maximumf %137, %138 : vector<36x128xf32>
    %140 = arith.truncf %139 : vector<36x128xf32> to vector<36x128xbf16>
    %c0_215 = arith.constant 0 : index
    %c0_216 = arith.constant 0 : index
    %141 = vector.load %arg6[%c0_215, %c0_216] : memref<128x16xbf16, #tpu.memory_space<vmem>>, vector<128x16xbf16>
    %cst_217 = arith.constant dense<0.000000e+00> : vector<36x16xf32>
    %142 = tpu.matmul %140, %141, %cst_217 {dimension_numbers = #tpu.dot_dimension_numbers<[1], [0], [0], [1], [0, 0, 1, 1], [], []>} : vector<36x128xbf16>, vector<128x16xbf16>, vector<36x16xf32> -> vector<36x16xf32>
    %c0_218 = arith.constant 0 : index
    %c0_219 = arith.constant 0 : index
    %143 = vector.load %arg7[%c0_218, %c0_219] : memref<1x16xf32, #tpu.memory_space<vmem>>, vector<1x16xf32>
    %144 = vector.broadcast %143 : vector<1x16xf32> to vector<36x16xf32>
    %145 = arith.addf %142, %144 : vector<36x16xf32>
    %cst_220 = arith.constant 0.000000e+00 : f32
    %146 = vector.broadcast %cst_220 : f32 to vector<36x16xf32>
    %147 = arith.maximumf %145, %146 : vector<36x16xf32>
    %148 = arith.truncf %147 : vector<36x16xf32> to vector<36x16xbf16>
    %cst_221 = arith.constant 0.000000e+00 : bf16
    %149 = vector.broadcast %cst_221 : bf16 to vector<64x16xbf16>
    %c0_222 = arith.constant 0 : index
    %c0_223 = arith.constant 0 : index
    %150 = vector.load %arg12[%c0_222, %c0_223] : memref<64x16xbf16, #tpu.memory_space<vmem>>, vector<64x16xbf16>
    tpu.vector_store %arg12[%c0_222, %c0_223], %149 {strides = array<i32>} : memref<64x16xbf16, #tpu.memory_space<vmem>>, vector<64x16xbf16>,
    %151 = vector.extract_strided_slice %148 {offsets = [0, 0], sizes = [6, 16], strides = [1, 1]} : vector<36x16xbf16> to vector<6x16xbf16>
    %c9_224 = arith.constant 9 : index
    %c0_225 = arith.constant 0 : index
    %152 = vector.load %arg12[%c9_224, %c0_225] : memref<64x16xbf16, #tpu.memory_space<vmem>>, vector<6x16xbf16>
    tpu.vector_store %arg12[%c9_224, %c0_225], %151 {strides = array<i32>} : memref<64x16xbf16, #tpu.memory_space<vmem>>, vector<6x16xbf16>,
    %153 = vector.extract_strided_slice %148 {offsets = [6, 0], sizes = [6, 16], strides = [1, 1]} : vector<36x16xbf16> to vector<6x16xbf16>
    %c17_226 = arith.constant 17 : index
    %c0_227 = arith.constant 0 : index
    %154 = vector.load %arg12[%c17_226, %c0_227] : memref<64x16xbf16, #tpu.memory_space<vmem>>, vector<6x16xbf16>
    tpu.vector_store %arg12[%c17_226, %c0_227], %153 {strides = array<i32>} : memref<64x16xbf16, #tpu.memory_space<vmem>>, vector<6x16xbf16>,
    %155 = vector.extract_strided_slice %148 {offsets = [12, 0], sizes = [6, 16], strides = [1, 1]} : vector<36x16xbf16> to vector<6x16xbf16>
    %c25_228 = arith.constant 25 : index
    %c0_229 = arith.constant 0 : index
    %156 = vector.load %arg12[%c25_228, %c0_229] : memref<64x16xbf16, #tpu.memory_space<vmem>>, vector<6x16xbf16>
    tpu.vector_store %arg12[%c25_228, %c0_229], %155 {strides = array<i32>} : memref<64x16xbf16, #tpu.memory_space<vmem>>, vector<6x16xbf16>,
    %157 = vector.extract_strided_slice %148 {offsets = [18, 0], sizes = [6, 16], strides = [1, 1]} : vector<36x16xbf16> to vector<6x16xbf16>
    %c33_230 = arith.constant 33 : index
    %c0_231 = arith.constant 0 : index
    %158 = vector.load %arg12[%c33_230, %c0_231] : memref<64x16xbf16, #tpu.memory_space<vmem>>, vector<6x16xbf16>
    tpu.vector_store %arg12[%c33_230, %c0_231], %157 {strides = array<i32>} : memref<64x16xbf16, #tpu.memory_space<vmem>>, vector<6x16xbf16>,
    %159 = vector.extract_strided_slice %148 {offsets = [24, 0], sizes = [6, 16], strides = [1, 1]} : vector<36x16xbf16> to vector<6x16xbf16>
    %c41_232 = arith.constant 41 : index
    %c0_233 = arith.constant 0 : index
    %160 = vector.load %arg12[%c41_232, %c0_233] : memref<64x16xbf16, #tpu.memory_space<vmem>>, vector<6x16xbf16>
    tpu.vector_store %arg12[%c41_232, %c0_233], %159 {strides = array<i32>} : memref<64x16xbf16, #tpu.memory_space<vmem>>, vector<6x16xbf16>,
    %161 = vector.extract_strided_slice %148 {offsets = [30, 0], sizes = [6, 16], strides = [1, 1]} : vector<36x16xbf16> to vector<6x16xbf16>
    %c49_234 = arith.constant 49 : index
    %c0_235 = arith.constant 0 : index
    %162 = vector.load %arg12[%c49_234, %c0_235] : memref<64x16xbf16, #tpu.memory_space<vmem>>, vector<6x16xbf16>
    tpu.vector_store %arg12[%c49_234, %c0_235], %161 {strides = array<i32>} : memref<64x16xbf16, #tpu.memory_space<vmem>>, vector<6x16xbf16>,
    %c0_236 = arith.constant 0 : index
    %c0_237 = arith.constant 0 : index
    %163 = vector.load %arg12[%c0_236, %c0_237] : memref<64x16xbf16, #tpu.memory_space<vmem>>, vector<6x16xbf16>
    %c0_238 = arith.constant 0 : index
    %c0_239 = arith.constant 0 : index
    %164 = vector.load %arg14[%c0_238, %c0_239] : memref<36x144xbf16, #tpu.memory_space<vmem>>, vector<6x16xbf16>
    tpu.vector_store %arg14[%c0_238, %c0_239], %163 {strides = array<i32>} : memref<36x144xbf16, #tpu.memory_space<vmem>>, vector<6x16xbf16>,
    %c8_240 = arith.constant 8 : index
    %c0_241 = arith.constant 0 : index
    %165 = vector.load %arg12[%c8_240, %c0_241] : memref<64x16xbf16, #tpu.memory_space<vmem>>, vector<6x16xbf16>
    %c6_242 = arith.constant 6 : index
    %c0_243 = arith.constant 0 : index
    %166 = vector.load %arg14[%c6_242, %c0_243] : memref<36x144xbf16, #tpu.memory_space<vmem>>, vector<6x16xbf16>
    tpu.vector_store %arg14[%c6_242, %c0_243], %165 {strides = array<i32>} : memref<36x144xbf16, #tpu.memory_space<vmem>>, vector<6x16xbf16>,
    %c16_244 = arith.constant 16 : index
    %c0_245 = arith.constant 0 : index
    %167 = vector.load %arg12[%c16_244, %c0_245] : memref<64x16xbf16, #tpu.memory_space<vmem>>, vector<6x16xbf16>
    %c12_246 = arith.constant 12 : index
    %c0_247 = arith.constant 0 : index
    %168 = vector.load %arg14[%c12_246, %c0_247] : memref<36x144xbf16, #tpu.memory_space<vmem>>, vector<6x16xbf16>
    tpu.vector_store %arg14[%c12_246, %c0_247], %167 {strides = array<i32>} : memref<36x144xbf16, #tpu.memory_space<vmem>>, vector<6x16xbf16>,
    %c24_248 = arith.constant 24 : index
    %c0_249 = arith.constant 0 : index
    %169 = vector.load %arg12[%c24_248, %c0_249] : memref<64x16xbf16, #tpu.memory_space<vmem>>, vector<6x16xbf16>
    %c18_250 = arith.constant 18 : index
    %c0_251 = arith.constant 0 : index
    %170 = vector.load %arg14[%c18_250, %c0_251] : memref<36x144xbf16, #tpu.memory_space<vmem>>, vector<6x16xbf16>
    tpu.vector_store %arg14[%c18_250, %c0_251], %169 {strides = array<i32>} : memref<36x144xbf16, #tpu.memory_space<vmem>>, vector<6x16xbf16>,
    %c32_252 = arith.constant 32 : index
    %c0_253 = arith.constant 0 : index
    %171 = vector.load %arg12[%c32_252, %c0_253] : memref<64x16xbf16, #tpu.memory_space<vmem>>, vector<6x16xbf16>
    %c24_254 = arith.constant 24 : index
    %c0_255 = arith.constant 0 : index
    %172 = vector.load %arg14[%c24_254, %c0_255] : memref<36x144xbf16, #tpu.memory_space<vmem>>, vector<6x16xbf16>
    tpu.vector_store %arg14[%c24_254, %c0_255], %171 {strides = array<i32>} : memref<36x144xbf16, #tpu.memory_space<vmem>>, vector<6x16xbf16>,
    %c40_256 = arith.constant 40 : index
    %c0_257 = arith.constant 0 : index
    %173 = vector.load %arg12[%c40_256, %c0_257] : memref<64x16xbf16, #tpu.memory_space<vmem>>, vector<6x16xbf16>
    %c30_258 = arith.constant 30 : index
    %c0_259 = arith.constant 0 : index
    %174 = vector.load %arg14[%c30_258, %c0_259] : memref<36x144xbf16, #tpu.memory_space<vmem>>, vector<6x16xbf16>
    tpu.vector_store %arg14[%c30_258, %c0_259], %173 {strides = array<i32>} : memref<36x144xbf16, #tpu.memory_space<vmem>>, vector<6x16xbf16>,
    %c1_260 = arith.constant 1 : index
    %c0_261 = arith.constant 0 : index
    %175 = vector.load %arg12[%c1_260, %c0_261] : memref<64x16xbf16, #tpu.memory_space<vmem>>, vector<6x16xbf16>
    %c0_262 = arith.constant 0 : index
    %c16_263 = arith.constant 16 : index
    %176 = vector.load %arg14[%c0_262, %c16_263] : memref<36x144xbf16, #tpu.memory_space<vmem>>, vector<6x16xbf16>
    tpu.vector_store %arg14[%c0_262, %c16_263], %175 {strides = array<i32>} : memref<36x144xbf16, #tpu.memory_space<vmem>>, vector<6x16xbf16>,
    %c9_264 = arith.constant 9 : index
    %c0_265 = arith.constant 0 : index
    %177 = vector.load %arg12[%c9_264, %c0_265] : memref<64x16xbf16, #tpu.memory_space<vmem>>, vector<6x16xbf16>
    %c6_266 = arith.constant 6 : index
    %c16_267 = arith.constant 16 : index
    %178 = vector.load %arg14[%c6_266, %c16_267] : memref<36x144xbf16, #tpu.memory_space<vmem>>, vector<6x16xbf16>
    tpu.vector_store %arg14[%c6_266, %c16_267], %177 {strides = array<i32>} : memref<36x144xbf16, #tpu.memory_space<vmem>>, vector<6x16xbf16>,
    %c17_268 = arith.constant 17 : index
    %c0_269 = arith.constant 0 : index
    %179 = vector.load %arg12[%c17_268, %c0_269] : memref<64x16xbf16, #tpu.memory_space<vmem>>, vector<6x16xbf16>
    %c12_270 = arith.constant 12 : index
    %c16_271 = arith.constant 16 : index
    %180 = vector.load %arg14[%c12_270, %c16_271] : memref<36x144xbf16, #tpu.memory_space<vmem>>, vector<6x16xbf16>
    tpu.vector_store %arg14[%c12_270, %c16_271], %179 {strides = array<i32>} : memref<36x144xbf16, #tpu.memory_space<vmem>>, vector<6x16xbf16>,
    %c25_272 = arith.constant 25 : index
    %c0_273 = arith.constant 0 : index
    %181 = vector.load %arg12[%c25_272, %c0_273] : memref<64x16xbf16, #tpu.memory_space<vmem>>, vector<6x16xbf16>
    %c18_274 = arith.constant 18 : index
    %c16_275 = arith.constant 16 : index
    %182 = vector.load %arg14[%c18_274, %c16_275] : memref<36x144xbf16, #tpu.memory_space<vmem>>, vector<6x16xbf16>
    tpu.vector_store %arg14[%c18_274, %c16_275], %181 {strides = array<i32>} : memref<36x144xbf16, #tpu.memory_space<vmem>>, vector<6x16xbf16>,
    %c33_276 = arith.constant 33 : index
    %c0_277 = arith.constant 0 : index
    %183 = vector.load %arg12[%c33_276, %c0_277] : memref<64x16xbf16, #tpu.memory_space<vmem>>, vector<6x16xbf16>
    %c24_278 = arith.constant 24 : index
    %c16_279 = arith.constant 16 : index
    %184 = vector.load %arg14[%c24_278, %c16_279] : memref<36x144xbf16, #tpu.memory_space<vmem>>, vector<6x16xbf16>
    tpu.vector_store %arg14[%c24_278, %c16_279], %183 {strides = array<i32>} : memref<36x144xbf16, #tpu.memory_space<vmem>>, vector<6x16xbf16>,
    %c41_280 = arith.constant 41 : index
    %c0_281 = arith.constant 0 : index
    %185 = vector.load %arg12[%c41_280, %c0_281] : memref<64x16xbf16, #tpu.memory_space<vmem>>, vector<6x16xbf16>
    %c30_282 = arith.constant 30 : index
    %c16_283 = arith.constant 16 : index
    %186 = vector.load %arg14[%c30_282, %c16_283] : memref<36x144xbf16, #tpu.memory_space<vmem>>, vector<6x16xbf16>
    tpu.vector_store %arg14[%c30_282, %c16_283], %185 {strides = array<i32>} : memref<36x144xbf16, #tpu.memory_space<vmem>>, vector<6x16xbf16>,
    %c2_284 = arith.constant 2 : index
    %c0_285 = arith.constant 0 : index
    %187 = vector.load %arg12[%c2_284, %c0_285] : memref<64x16xbf16, #tpu.memory_space<vmem>>, vector<6x16xbf16>
    %c0_286 = arith.constant 0 : index
    %c32_287 = arith.constant 32 : index
    %188 = vector.load %arg14[%c0_286, %c32_287] : memref<36x144xbf16, #tpu.memory_space<vmem>>, vector<6x16xbf16>
    tpu.vector_store %arg14[%c0_286, %c32_287], %187 {strides = array<i32>} : memref<36x144xbf16, #tpu.memory_space<vmem>>, vector<6x16xbf16>,
    %c10_288 = arith.constant 10 : index
    %c0_289 = arith.constant 0 : index
    %189 = vector.load %arg12[%c10_288, %c0_289] : memref<64x16xbf16, #tpu.memory_space<vmem>>, vector<6x16xbf16>
    %c6_290 = arith.constant 6 : index
    %c32_291 = arith.constant 32 : index
    %190 = vector.load %arg14[%c6_290, %c32_291] : memref<36x144xbf16, #tpu.memory_space<vmem>>, vector<6x16xbf16>
    tpu.vector_store %arg14[%c6_290, %c32_291], %189 {strides = array<i32>} : memref<36x144xbf16, #tpu.memory_space<vmem>>, vector<6x16xbf16>,
    %c18_292 = arith.constant 18 : index
    %c0_293 = arith.constant 0 : index
    %191 = vector.load %arg12[%c18_292, %c0_293] : memref<64x16xbf16, #tpu.memory_space<vmem>>, vector<6x16xbf16>
    %c12_294 = arith.constant 12 : index
    %c32_295 = arith.constant 32 : index
    %192 = vector.load %arg14[%c12_294, %c32_295] : memref<36x144xbf16, #tpu.memory_space<vmem>>, vector<6x16xbf16>
    tpu.vector_store %arg14[%c12_294, %c32_295], %191 {strides = array<i32>} : memref<36x144xbf16, #tpu.memory_space<vmem>>, vector<6x16xbf16>,
    %c26_296 = arith.constant 26 : index
    %c0_297 = arith.constant 0 : index
    %193 = vector.load %arg12[%c26_296, %c0_297] : memref<64x16xbf16, #tpu.memory_space<vmem>>, vector<6x16xbf16>
    %c18_298 = arith.constant 18 : index
    %c32_299 = arith.constant 32 : index
    %194 = vector.load %arg14[%c18_298, %c32_299] : memref<36x144xbf16, #tpu.memory_space<vmem>>, vector<6x16xbf16>
    tpu.vector_store %arg14[%c18_298, %c32_299], %193 {strides = array<i32>} : memref<36x144xbf16, #tpu.memory_space<vmem>>, vector<6x16xbf16>,
    %c34_300 = arith.constant 34 : index
    %c0_301 = arith.constant 0 : index
    %195 = vector.load %arg12[%c34_300, %c0_301] : memref<64x16xbf16, #tpu.memory_space<vmem>>, vector<6x16xbf16>
    %c24_302 = arith.constant 24 : index
    %c32_303 = arith.constant 32 : index
    %196 = vector.load %arg14[%c24_302, %c32_303] : memref<36x144xbf16, #tpu.memory_space<vmem>>, vector<6x16xbf16>
    tpu.vector_store %arg14[%c24_302, %c32_303], %195 {strides = array<i32>} : memref<36x144xbf16, #tpu.memory_space<vmem>>, vector<6x16xbf16>,
    %c42_304 = arith.constant 42 : index
    %c0_305 = arith.constant 0 : index
    %197 = vector.load %arg12[%c42_304, %c0_305] : memref<64x16xbf16, #tpu.memory_space<vmem>>, vector<6x16xbf16>
    %c30_306 = arith.constant 30 : index
    %c32_307 = arith.constant 32 : index
    %198 = vector.load %arg14[%c30_306, %c32_307] : memref<36x144xbf16, #tpu.memory_space<vmem>>, vector<6x16xbf16>
    tpu.vector_store %arg14[%c30_306, %c32_307], %197 {strides = array<i32>} : memref<36x144xbf16, #tpu.memory_space<vmem>>, vector<6x16xbf16>,
    %c8_308 = arith.constant 8 : index
    %c0_309 = arith.constant 0 : index
    %199 = vector.load %arg12[%c8_308, %c0_309] : memref<64x16xbf16, #tpu.memory_space<vmem>>, vector<6x16xbf16>
    %c0_310 = arith.constant 0 : index
    %c48_311 = arith.constant 48 : index
    %200 = vector.load %arg14[%c0_310, %c48_311] : memref<36x144xbf16, #tpu.memory_space<vmem>>, vector<6x16xbf16>
    tpu.vector_store %arg14[%c0_310, %c48_311], %199 {strides = array<i32>} : memref<36x144xbf16, #tpu.memory_space<vmem>>, vector<6x16xbf16>,
    %c16_312 = arith.constant 16 : index
    %c0_313 = arith.constant 0 : index
    %201 = vector.load %arg12[%c16_312, %c0_313] : memref<64x16xbf16, #tpu.memory_space<vmem>>, vector<6x16xbf16>
    %c6_314 = arith.constant 6 : index
    %c48_315 = arith.constant 48 : index
    %202 = vector.load %arg14[%c6_314, %c48_315] : memref<36x144xbf16, #tpu.memory_space<vmem>>, vector<6x16xbf16>
    tpu.vector_store %arg14[%c6_314, %c48_315], %201 {strides = array<i32>} : memref<36x144xbf16, #tpu.memory_space<vmem>>, vector<6x16xbf16>,
    %c24_316 = arith.constant 24 : index
    %c0_317 = arith.constant 0 : index
    %203 = vector.load %arg12[%c24_316, %c0_317] : memref<64x16xbf16, #tpu.memory_space<vmem>>, vector<6x16xbf16>
    %c12_318 = arith.constant 12 : index
    %c48_319 = arith.constant 48 : index
    %204 = vector.load %arg14[%c12_318, %c48_319] : memref<36x144xbf16, #tpu.memory_space<vmem>>, vector<6x16xbf16>
    tpu.vector_store %arg14[%c12_318, %c48_319], %203 {strides = array<i32>} : memref<36x144xbf16, #tpu.memory_space<vmem>>, vector<6x16xbf16>,
    %c32_320 = arith.constant 32 : index
    %c0_321 = arith.constant 0 : index
    %205 = vector.load %arg12[%c32_320, %c0_321] : memref<64x16xbf16, #tpu.memory_space<vmem>>, vector<6x16xbf16>
    %c18_322 = arith.constant 18 : index
    %c48_323 = arith.constant 48 : index
    %206 = vector.load %arg14[%c18_322, %c48_323] : memref<36x144xbf16, #tpu.memory_space<vmem>>, vector<6x16xbf16>
    tpu.vector_store %arg14[%c18_322, %c48_323], %205 {strides = array<i32>} : memref<36x144xbf16, #tpu.memory_space<vmem>>, vector<6x16xbf16>,
    %c40_324 = arith.constant 40 : index
    %c0_325 = arith.constant 0 : index
    %207 = vector.load %arg12[%c40_324, %c0_325] : memref<64x16xbf16, #tpu.memory_space<vmem>>, vector<6x16xbf16>
    %c24_326 = arith.constant 24 : index
    %c48_327 = arith.constant 48 : index
    %208 = vector.load %arg14[%c24_326, %c48_327] : memref<36x144xbf16, #tpu.memory_space<vmem>>, vector<6x16xbf16>
    tpu.vector_store %arg14[%c24_326, %c48_327], %207 {strides = array<i32>} : memref<36x144xbf16, #tpu.memory_space<vmem>>, vector<6x16xbf16>,
    %c48_328 = arith.constant 48 : index
    %c0_329 = arith.constant 0 : index
    %209 = vector.load %arg12[%c48_328, %c0_329] : memref<64x16xbf16, #tpu.memory_space<vmem>>, vector<6x16xbf16>
    %c30_330 = arith.constant 30 : index
    %c48_331 = arith.constant 48 : index
    %210 = vector.load %arg14[%c30_330, %c48_331] : memref<36x144xbf16, #tpu.memory_space<vmem>>, vector<6x16xbf16>
    tpu.vector_store %arg14[%c30_330, %c48_331], %209 {strides = array<i32>} : memref<36x144xbf16, #tpu.memory_space<vmem>>, vector<6x16xbf16>,
    %c9_332 = arith.constant 9 : index
    %c0_333 = arith.constant 0 : index
    %211 = vector.load %arg12[%c9_332, %c0_333] : memref<64x16xbf16, #tpu.memory_space<vmem>>, vector<6x16xbf16>
    %c0_334 = arith.constant 0 : index
    %c64_335 = arith.constant 64 : index
    %212 = vector.load %arg14[%c0_334, %c64_335] : memref<36x144xbf16, #tpu.memory_space<vmem>>, vector<6x16xbf16>
    tpu.vector_store %arg14[%c0_334, %c64_335], %211 {strides = array<i32>} : memref<36x144xbf16, #tpu.memory_space<vmem>>, vector<6x16xbf16>,
    %c17_336 = arith.constant 17 : index
    %c0_337 = arith.constant 0 : index
    %213 = vector.load %arg12[%c17_336, %c0_337] : memref<64x16xbf16, #tpu.memory_space<vmem>>, vector<6x16xbf16>
    %c6_338 = arith.constant 6 : index
    %c64_339 = arith.constant 64 : index
    %214 = vector.load %arg14[%c6_338, %c64_339] : memref<36x144xbf16, #tpu.memory_space<vmem>>, vector<6x16xbf16>
    tpu.vector_store %arg14[%c6_338, %c64_339], %213 {strides = array<i32>} : memref<36x144xbf16, #tpu.memory_space<vmem>>, vector<6x16xbf16>,
    %c25_340 = arith.constant 25 : index
    %c0_341 = arith.constant 0 : index
    %215 = vector.load %arg12[%c25_340, %c0_341] : memref<64x16xbf16, #tpu.memory_space<vmem>>, vector<6x16xbf16>
    %c12_342 = arith.constant 12 : index
    %c64_343 = arith.constant 64 : index
    %216 = vector.load %arg14[%c12_342, %c64_343] : memref<36x144xbf16, #tpu.memory_space<vmem>>, vector<6x16xbf16>
    tpu.vector_store %arg14[%c12_342, %c64_343], %215 {strides = array<i32>} : memref<36x144xbf16, #tpu.memory_space<vmem>>, vector<6x16xbf16>,
    %c33_344 = arith.constant 33 : index
    %c0_345 = arith.constant 0 : index
    %217 = vector.load %arg12[%c33_344, %c0_345] : memref<64x16xbf16, #tpu.memory_space<vmem>>, vector<6x16xbf16>
    %c18_346 = arith.constant 18 : index
    %c64_347 = arith.constant 64 : index
    %218 = vector.load %arg14[%c18_346, %c64_347] : memref<36x144xbf16, #tpu.memory_space<vmem>>, vector<6x16xbf16>
    tpu.vector_store %arg14[%c18_346, %c64_347], %217 {strides = array<i32>} : memref<36x144xbf16, #tpu.memory_space<vmem>>, vector<6x16xbf16>,
    %c41_348 = arith.constant 41 : index
    %c0_349 = arith.constant 0 : index
    %219 = vector.load %arg12[%c41_348, %c0_349] : memref<64x16xbf16, #tpu.memory_space<vmem>>, vector<6x16xbf16>
    %c24_350 = arith.constant 24 : index
    %c64_351 = arith.constant 64 : index
    %220 = vector.load %arg14[%c24_350, %c64_351] : memref<36x144xbf16, #tpu.memory_space<vmem>>, vector<6x16xbf16>
    tpu.vector_store %arg14[%c24_350, %c64_351], %219 {strides = array<i32>} : memref<36x144xbf16, #tpu.memory_space<vmem>>, vector<6x16xbf16>,
    %c49_352 = arith.constant 49 : index
    %c0_353 = arith.constant 0 : index
    %221 = vector.load %arg12[%c49_352, %c0_353] : memref<64x16xbf16, #tpu.memory_space<vmem>>, vector<6x16xbf16>
    %c30_354 = arith.constant 30 : index
    %c64_355 = arith.constant 64 : index
    %222 = vector.load %arg14[%c30_354, %c64_355] : memref<36x144xbf16, #tpu.memory_space<vmem>>, vector<6x16xbf16>
    tpu.vector_store %arg14[%c30_354, %c64_355], %221 {strides = array<i32>} : memref<36x144xbf16, #tpu.memory_space<vmem>>, vector<6x16xbf16>,
    %c10_356 = arith.constant 10 : index
    %c0_357 = arith.constant 0 : index
    %223 = vector.load %arg12[%c10_356, %c0_357] : memref<64x16xbf16, #tpu.memory_space<vmem>>, vector<6x16xbf16>
    %c0_358 = arith.constant 0 : index
    %c80_359 = arith.constant 80 : index
    %224 = vector.load %arg14[%c0_358, %c80_359] : memref<36x144xbf16, #tpu.memory_space<vmem>>, vector<6x16xbf16>
    tpu.vector_store %arg14[%c0_358, %c80_359], %223 {strides = array<i32>} : memref<36x144xbf16, #tpu.memory_space<vmem>>, vector<6x16xbf16>,
    %c18_360 = arith.constant 18 : index
    %c0_361 = arith.constant 0 : index
    %225 = vector.load %arg12[%c18_360, %c0_361] : memref<64x16xbf16, #tpu.memory_space<vmem>>, vector<6x16xbf16>
    %c6_362 = arith.constant 6 : index
    %c80_363 = arith.constant 80 : index
    %226 = vector.load %arg14[%c6_362, %c80_363] : memref<36x144xbf16, #tpu.memory_space<vmem>>, vector<6x16xbf16>
    tpu.vector_store %arg14[%c6_362, %c80_363], %225 {strides = array<i32>} : memref<36x144xbf16, #tpu.memory_space<vmem>>, vector<6x16xbf16>,
    %c26_364 = arith.constant 26 : index
    %c0_365 = arith.constant 0 : index
    %227 = vector.load %arg12[%c26_364, %c0_365] : memref<64x16xbf16, #tpu.memory_space<vmem>>, vector<6x16xbf16>
    %c12_366 = arith.constant 12 : index
    %c80_367 = arith.constant 80 : index
    %228 = vector.load %arg14[%c12_366, %c80_367] : memref<36x144xbf16, #tpu.memory_space<vmem>>, vector<6x16xbf16>
    tpu.vector_store %arg14[%c12_366, %c80_367], %227 {strides = array<i32>} : memref<36x144xbf16, #tpu.memory_space<vmem>>, vector<6x16xbf16>,
    %c34_368 = arith.constant 34 : index
    %c0_369 = arith.constant 0 : index
    %229 = vector.load %arg12[%c34_368, %c0_369] : memref<64x16xbf16, #tpu.memory_space<vmem>>, vector<6x16xbf16>
    %c18_370 = arith.constant 18 : index
    %c80_371 = arith.constant 80 : index
    %230 = vector.load %arg14[%c18_370, %c80_371] : memref<36x144xbf16, #tpu.memory_space<vmem>>, vector<6x16xbf16>
    tpu.vector_store %arg14[%c18_370, %c80_371], %229 {strides = array<i32>} : memref<36x144xbf16, #tpu.memory_space<vmem>>, vector<6x16xbf16>,
    %c42_372 = arith.constant 42 : index
    %c0_373 = arith.constant 0 : index
    %231 = vector.load %arg12[%c42_372, %c0_373] : memref<64x16xbf16, #tpu.memory_space<vmem>>, vector<6x16xbf16>
    %c24_374 = arith.constant 24 : index
    %c80_375 = arith.constant 80 : index
    %232 = vector.load %arg14[%c24_374, %c80_375] : memref<36x144xbf16, #tpu.memory_space<vmem>>, vector<6x16xbf16>
    tpu.vector_store %arg14[%c24_374, %c80_375], %231 {strides = array<i32>} : memref<36x144xbf16, #tpu.memory_space<vmem>>, vector<6x16xbf16>,
    %c50_376 = arith.constant 50 : index
    %c0_377 = arith.constant 0 : index
    %233 = vector.load %arg12[%c50_376, %c0_377] : memref<64x16xbf16, #tpu.memory_space<vmem>>, vector<6x16xbf16>
    %c30_378 = arith.constant 30 : index
    %c80_379 = arith.constant 80 : index
    %234 = vector.load %arg14[%c30_378, %c80_379] : memref<36x144xbf16, #tpu.memory_space<vmem>>, vector<6x16xbf16>
    tpu.vector_store %arg14[%c30_378, %c80_379], %233 {strides = array<i32>} : memref<36x144xbf16, #tpu.memory_space<vmem>>, vector<6x16xbf16>,
    %c16_380 = arith.constant 16 : index
    %c0_381 = arith.constant 0 : index
    %235 = vector.load %arg12[%c16_380, %c0_381] : memref<64x16xbf16, #tpu.memory_space<vmem>>, vector<6x16xbf16>
    %c0_382 = arith.constant 0 : index
    %c96_383 = arith.constant 96 : index
    %236 = vector.load %arg14[%c0_382, %c96_383] : memref<36x144xbf16, #tpu.memory_space<vmem>>, vector<6x16xbf16>
    tpu.vector_store %arg14[%c0_382, %c96_383], %235 {strides = array<i32>} : memref<36x144xbf16, #tpu.memory_space<vmem>>, vector<6x16xbf16>,
    %c24_384 = arith.constant 24 : index
    %c0_385 = arith.constant 0 : index
    %237 = vector.load %arg12[%c24_384, %c0_385] : memref<64x16xbf16, #tpu.memory_space<vmem>>, vector<6x16xbf16>
    %c6_386 = arith.constant 6 : index
    %c96_387 = arith.constant 96 : index
    %238 = vector.load %arg14[%c6_386, %c96_387] : memref<36x144xbf16, #tpu.memory_space<vmem>>, vector<6x16xbf16>
    tpu.vector_store %arg14[%c6_386, %c96_387], %237 {strides = array<i32>} : memref<36x144xbf16, #tpu.memory_space<vmem>>, vector<6x16xbf16>,
    %c32_388 = arith.constant 32 : index
    %c0_389 = arith.constant 0 : index
    %239 = vector.load %arg12[%c32_388, %c0_389] : memref<64x16xbf16, #tpu.memory_space<vmem>>, vector<6x16xbf16>
    %c12_390 = arith.constant 12 : index
    %c96_391 = arith.constant 96 : index
    %240 = vector.load %arg14[%c12_390, %c96_391] : memref<36x144xbf16, #tpu.memory_space<vmem>>, vector<6x16xbf16>
    tpu.vector_store %arg14[%c12_390, %c96_391], %239 {strides = array<i32>} : memref<36x144xbf16, #tpu.memory_space<vmem>>, vector<6x16xbf16>,
    %c40_392 = arith.constant 40 : index
    %c0_393 = arith.constant 0 : index
    %241 = vector.load %arg12[%c40_392, %c0_393] : memref<64x16xbf16, #tpu.memory_space<vmem>>, vector<6x16xbf16>
    %c18_394 = arith.constant 18 : index
    %c96_395 = arith.constant 96 : index
    %242 = vector.load %arg14[%c18_394, %c96_395] : memref<36x144xbf16, #tpu.memory_space<vmem>>, vector<6x16xbf16>
    tpu.vector_store %arg14[%c18_394, %c96_395], %241 {strides = array<i32>} : memref<36x144xbf16, #tpu.memory_space<vmem>>, vector<6x16xbf16>,
    %c48_396 = arith.constant 48 : index
    %c0_397 = arith.constant 0 : index
    %243 = vector.load %arg12[%c48_396, %c0_397] : memref<64x16xbf16, #tpu.memory_space<vmem>>, vector<6x16xbf16>
    %c24_398 = arith.constant 24 : index
    %c96_399 = arith.constant 96 : index
    %244 = vector.load %arg14[%c24_398, %c96_399] : memref<36x144xbf16, #tpu.memory_space<vmem>>, vector<6x16xbf16>
    tpu.vector_store %arg14[%c24_398, %c96_399], %243 {strides = array<i32>} : memref<36x144xbf16, #tpu.memory_space<vmem>>, vector<6x16xbf16>,
    %c56_400 = arith.constant 56 : index
    %c0_401 = arith.constant 0 : index
    %245 = vector.load %arg12[%c56_400, %c0_401] : memref<64x16xbf16, #tpu.memory_space<vmem>>, vector<6x16xbf16>
    %c30_402 = arith.constant 30 : index
    %c96_403 = arith.constant 96 : index
    %246 = vector.load %arg14[%c30_402, %c96_403] : memref<36x144xbf16, #tpu.memory_space<vmem>>, vector<6x16xbf16>
    tpu.vector_store %arg14[%c30_402, %c96_403], %245 {strides = array<i32>} : memref<36x144xbf16, #tpu.memory_space<vmem>>, vector<6x16xbf16>,
    %c17_404 = arith.constant 17 : index
    %c0_405 = arith.constant 0 : index
    %247 = vector.load %arg12[%c17_404, %c0_405] : memref<64x16xbf16, #tpu.memory_space<vmem>>, vector<6x16xbf16>
    %c0_406 = arith.constant 0 : index
    %c112_407 = arith.constant 112 : index
    %248 = vector.load %arg14[%c0_406, %c112_407] : memref<36x144xbf16, #tpu.memory_space<vmem>>, vector<6x16xbf16>
    tpu.vector_store %arg14[%c0_406, %c112_407], %247 {strides = array<i32>} : memref<36x144xbf16, #tpu.memory_space<vmem>>, vector<6x16xbf16>,
    %c25_408 = arith.constant 25 : index
    %c0_409 = arith.constant 0 : index
    %249 = vector.load %arg12[%c25_408, %c0_409] : memref<64x16xbf16, #tpu.memory_space<vmem>>, vector<6x16xbf16>
    %c6_410 = arith.constant 6 : index
    %c112_411 = arith.constant 112 : index
    %250 = vector.load %arg14[%c6_410, %c112_411] : memref<36x144xbf16, #tpu.memory_space<vmem>>, vector<6x16xbf16>
    tpu.vector_store %arg14[%c6_410, %c112_411], %249 {strides = array<i32>} : memref<36x144xbf16, #tpu.memory_space<vmem>>, vector<6x16xbf16>,
    %c33_412 = arith.constant 33 : index
    %c0_413 = arith.constant 0 : index
    %251 = vector.load %arg12[%c33_412, %c0_413] : memref<64x16xbf16, #tpu.memory_space<vmem>>, vector<6x16xbf16>
    %c12_414 = arith.constant 12 : index
    %c112_415 = arith.constant 112 : index
    %252 = vector.load %arg14[%c12_414, %c112_415] : memref<36x144xbf16, #tpu.memory_space<vmem>>, vector<6x16xbf16>
    tpu.vector_store %arg14[%c12_414, %c112_415], %251 {strides = array<i32>} : memref<36x144xbf16, #tpu.memory_space<vmem>>, vector<6x16xbf16>,
    %c41_416 = arith.constant 41 : index
    %c0_417 = arith.constant 0 : index
    %253 = vector.load %arg12[%c41_416, %c0_417] : memref<64x16xbf16, #tpu.memory_space<vmem>>, vector<6x16xbf16>
    %c18_418 = arith.constant 18 : index
    %c112_419 = arith.constant 112 : index
    %254 = vector.load %arg14[%c18_418, %c112_419] : memref<36x144xbf16, #tpu.memory_space<vmem>>, vector<6x16xbf16>
    tpu.vector_store %arg14[%c18_418, %c112_419], %253 {strides = array<i32>} : memref<36x144xbf16, #tpu.memory_space<vmem>>, vector<6x16xbf16>,
    %c49_420 = arith.constant 49 : index
    %c0_421 = arith.constant 0 : index
    %255 = vector.load %arg12[%c49_420, %c0_421] : memref<64x16xbf16, #tpu.memory_space<vmem>>, vector<6x16xbf16>
    %c24_422 = arith.constant 24 : index
    %c112_423 = arith.constant 112 : index
    %256 = vector.load %arg14[%c24_422, %c112_423] : memref<36x144xbf16, #tpu.memory_space<vmem>>, vector<6x16xbf16>
    tpu.vector_store %arg14[%c24_422, %c112_423], %255 {strides = array<i32>} : memref<36x144xbf16, #tpu.memory_space<vmem>>, vector<6x16xbf16>,
    %c57_424 = arith.constant 57 : index
    %c0_425 = arith.constant 0 : index
    %257 = vector.load %arg12[%c57_424, %c0_425] : memref<64x16xbf16, #tpu.memory_space<vmem>>, vector<6x16xbf16>
    %c30_426 = arith.constant 30 : index
    %c112_427 = arith.constant 112 : index
    %258 = vector.load %arg14[%c30_426, %c112_427] : memref<36x144xbf16, #tpu.memory_space<vmem>>, vector<6x16xbf16>
    tpu.vector_store %arg14[%c30_426, %c112_427], %257 {strides = array<i32>} : memref<36x144xbf16, #tpu.memory_space<vmem>>, vector<6x16xbf16>,
    %c18_428 = arith.constant 18 : index
    %c0_429 = arith.constant 0 : index
    %259 = vector.load %arg12[%c18_428, %c0_429] : memref<64x16xbf16, #tpu.memory_space<vmem>>, vector<6x16xbf16>
    %c0_430 = arith.constant 0 : index
    %c128_431 = arith.constant 128 : index
    %260 = vector.load %arg14[%c0_430, %c128_431] : memref<36x144xbf16, #tpu.memory_space<vmem>>, vector<6x16xbf16>
    tpu.vector_store %arg14[%c0_430, %c128_431], %259 {strides = array<i32>} : memref<36x144xbf16, #tpu.memory_space<vmem>>, vector<6x16xbf16>,
    %c26_432 = arith.constant 26 : index
    %c0_433 = arith.constant 0 : index
    %261 = vector.load %arg12[%c26_432, %c0_433] : memref<64x16xbf16, #tpu.memory_space<vmem>>, vector<6x16xbf16>
    %c6_434 = arith.constant 6 : index
    %c128_435 = arith.constant 128 : index
    %262 = vector.load %arg14[%c6_434, %c128_435] : memref<36x144xbf16, #tpu.memory_space<vmem>>, vector<6x16xbf16>
    tpu.vector_store %arg14[%c6_434, %c128_435], %261 {strides = array<i32>} : memref<36x144xbf16, #tpu.memory_space<vmem>>, vector<6x16xbf16>,
    %c34_436 = arith.constant 34 : index
    %c0_437 = arith.constant 0 : index
    %263 = vector.load %arg12[%c34_436, %c0_437] : memref<64x16xbf16, #tpu.memory_space<vmem>>, vector<6x16xbf16>
    %c12_438 = arith.constant 12 : index
    %c128_439 = arith.constant 128 : index
    %264 = vector.load %arg14[%c12_438, %c128_439] : memref<36x144xbf16, #tpu.memory_space<vmem>>, vector<6x16xbf16>
    tpu.vector_store %arg14[%c12_438, %c128_439], %263 {strides = array<i32>} : memref<36x144xbf16, #tpu.memory_space<vmem>>, vector<6x16xbf16>,
    %c42_440 = arith.constant 42 : index
    %c0_441 = arith.constant 0 : index
    %265 = vector.load %arg12[%c42_440, %c0_441] : memref<64x16xbf16, #tpu.memory_space<vmem>>, vector<6x16xbf16>
    %c18_442 = arith.constant 18 : index
    %c128_443 = arith.constant 128 : index
    %266 = vector.load %arg14[%c18_442, %c128_443] : memref<36x144xbf16, #tpu.memory_space<vmem>>, vector<6x16xbf16>
    tpu.vector_store %arg14[%c18_442, %c128_443], %265 {strides = array<i32>} : memref<36x144xbf16, #tpu.memory_space<vmem>>, vector<6x16xbf16>,
    %c50_444 = arith.constant 50 : index
    %c0_445 = arith.constant 0 : index
    %267 = vector.load %arg12[%c50_444, %c0_445] : memref<64x16xbf16, #tpu.memory_space<vmem>>, vector<6x16xbf16>
    %c24_446 = arith.constant 24 : index
    %c128_447 = arith.constant 128 : index
    %268 = vector.load %arg14[%c24_446, %c128_447] : memref<36x144xbf16, #tpu.memory_space<vmem>>, vector<6x16xbf16>
    tpu.vector_store %arg14[%c24_446, %c128_447], %267 {strides = array<i32>} : memref<36x144xbf16, #tpu.memory_space<vmem>>, vector<6x16xbf16>,
    %c58_448 = arith.constant 58 : index
    %c0_449 = arith.constant 0 : index
    %269 = vector.load %arg12[%c58_448, %c0_449] : memref<64x16xbf16, #tpu.memory_space<vmem>>, vector<6x16xbf16>
    %c30_450 = arith.constant 30 : index
    %c128_451 = arith.constant 128 : index
    %270 = vector.load %arg14[%c30_450, %c128_451] : memref<36x144xbf16, #tpu.memory_space<vmem>>, vector<6x16xbf16>
    tpu.vector_store %arg14[%c30_450, %c128_451], %269 {strides = array<i32>} : memref<36x144xbf16, #tpu.memory_space<vmem>>, vector<6x16xbf16>,
    %c0_452 = arith.constant 0 : index
    %c0_453 = arith.constant 0 : index
    %271 = vector.load %arg14[%c0_452, %c0_453] : memref<36x144xbf16, #tpu.memory_space<vmem>>, vector<36x144xbf16>
    %c0_454 = arith.constant 0 : index
    %c0_455 = arith.constant 0 : index
    %272 = vector.load %arg8[%c0_454, %c0_455] : memref<144x128xbf16, #tpu.memory_space<vmem>>, vector<144x128xbf16>
    %cst_456 = arith.constant dense<0.000000e+00> : vector<36x128xf32>
    %273 = tpu.matmul %271, %272, %cst_456 {dimension_numbers = #tpu.dot_dimension_numbers<[1], [0], [0], [1], [0, 0, 1, 1], [], []>} : vector<36x144xbf16>, vector<144x128xbf16>, vector<36x128xf32> -> vector<36x128xf32>
    %c0_457 = arith.constant 0 : index
    %c0_458 = arith.constant 0 : index
    %274 = vector.load %arg9[%c0_457, %c0_458] : memref<1x128xf32, #tpu.memory_space<vmem>>, vector<1x128xf32>
    %275 = vector.broadcast %274 : vector<1x128xf32> to vector<36x128xf32>
    %276 = arith.addf %273, %275 : vector<36x128xf32>
    %cst_459 = arith.constant 0.000000e+00 : f32
    %277 = vector.broadcast %cst_459 : f32 to vector<36x128xf32>
    %278 = arith.maximumf %276, %277 : vector<36x128xf32>
    %279 = arith.truncf %278 : vector<36x128xf32> to vector<36x128xbf16>
    %c0_460 = arith.constant 0 : index
    %c0_461 = arith.constant 0 : index
    %c0_462 = arith.constant 0 : index
    %280 = vector.load %arg10[%c0_460, %c0_461, %c0_462] : memref<1x36x128xbf16, #tpu.memory_space<vmem>>, vector<1x36x128xbf16>
    %281 = vector.shape_cast %280 : vector<1x36x128xbf16> to vector<36x128xbf16>
    %282 = vector.shape_cast %279 : vector<36x128xbf16> to vector<1x36x128xbf16>
    tpu.vector_store %arg10[%c0_460, %c0_461, %c0_462], %282 {strides = array<i32>} : memref<1x36x128xbf16, #tpu.memory_space<vmem>>, vector<1x36x128xbf16>,
    return
  }
  func.func @transform_0(%arg0: i32) -> (i32, i32, i32) {
    %c0_i32 = arith.constant 0 : i32
    %c0_i32_0 = arith.constant 0 : i32
    %c0_i32_1 = arith.constant 0 : i32
    return %arg0, %c0_i32, %c0_i32_0 : i32, i32, i32
  }
  func.func @transform_1(%arg0: i32) -> (i32, i32) {
    %c0_i32 = arith.constant 0 : i32
    %c0_i32_0 = arith.constant 0 : i32
    %c0_i32_1 = arith.constant 0 : i32
    return %c0_i32, %c0_i32_0 : i32, i32
  }
  func.func @transform_2(%arg0: i32) -> (i32, i32) {
    %c0_i32 = arith.constant 0 : i32
    %c0_i32_0 = arith.constant 0 : i32
    %c0_i32_1 = arith.constant 0 : i32
    return %c0_i32, %c0_i32_0 : i32, i32
  }
  func.func @transform_3(%arg0: i32) -> (i32, i32) {
    %c0_i32 = arith.constant 0 : i32
    %c0_i32_0 = arith.constant 0 : i32
    %c0_i32_1 = arith.constant 0 : i32
    return %c0_i32, %c0_i32_0 : i32, i32
  }
  func.func @transform_4(%arg0: i32) -> (i32, i32) {
    %c0_i32 = arith.constant 0 : i32
    %c0_i32_0 = arith.constant 0 : i32
    %c0_i32_1 = arith.constant 0 : i32
    return %c0_i32, %c0_i32_0 : i32, i32
  }
  func.func @transform_5(%arg0: i32) -> (i32, i32) {
    %c0_i32 = arith.constant 0 : i32
    %c0_i32_0 = arith.constant 0 : i32
    %c0_i32_1 = arith.constant 0 : i32
    return %c0_i32, %c0_i32_0 : i32, i32
  }
  func.func @transform_6(%arg0: i32) -> (i32, i32) {
    %c0_i32 = arith.constant 0 : i32
    %c0_i32_0 = arith.constant 0 : i32
    %c0_i32_1 = arith.constant 0 : i32
    return %c0_i32, %c0_i32_0 : i32, i32
  }
  func.func @transform_7(%arg0: i32) -> (i32, i32) {
    %c0_i32 = arith.constant 0 : i32
    %c0_i32_0 = arith.constant 0 : i32
    %c0_i32_1 = arith.constant 0 : i32
    return %c0_i32, %c0_i32_0 : i32, i32
  }
  func.func @transform_8(%arg0: i32) -> (i32, i32) {
    %c0_i32 = arith.constant 0 : i32
    %c0_i32_0 = arith.constant 0 : i32
    %c0_i32_1 = arith.constant 0 : i32
    return %c0_i32, %c0_i32_0 : i32, i32
  }
  func.func @transform_9(%arg0: i32) -> (i32, i32, i32) {
    %c0_i32 = arith.constant 0 : i32
    %c0_i32_0 = arith.constant 0 : i32
    %c0_i32_1 = arith.constant 0 : i32
    return %arg0, %c0_i32, %c0_i32_0 : i32, i32, i32
  }
}

module attributes {stable_mosaic.version = 11 : i64} {
  func.func @_fire_chain_kernel(%arg0: i32, %arg1: memref<1x9x128xbf16, #tpu.memory_space<vmem>>, %arg2: memref<128x32xbf16, #tpu.memory_space<vmem>>, %arg3: memref<1x32xf32, #tpu.memory_space<vmem>>, %arg4: memref<288x256xbf16, #tpu.memory_space<vmem>>, %arg5: memref<1x256xf32, #tpu.memory_space<vmem>>, %arg6: memref<256x32xbf16, #tpu.memory_space<vmem>>, %arg7: memref<1x32xf32, #tpu.memory_space<vmem>>, %arg8: memref<288x256xbf16, #tpu.memory_space<vmem>>, %arg9: memref<1x256xf32, #tpu.memory_space<vmem>>, %arg10: memref<1x9x256xbf16, #tpu.memory_space<vmem>>, %arg11: memref<25x32xbf16, #tpu.memory_space<vmem>>, %arg12: memref<25x32xbf16, #tpu.memory_space<vmem>>, %arg13: memref<9x288xbf16, #tpu.memory_space<vmem>>, %arg14: memref<9x288xbf16, #tpu.memory_space<vmem>>) attributes {dimension_semantics = [#tpu.dimension_semantics<parallel>], iteration_bounds = array<i64: 2>, scalar_prefetch = 0 : i64, scratch_operands = 4 : i64, tpu.core_type = #tpu.core_type<tc>, window_params = [{transform_indices = @transform_0, window_bounds = array<i64: 1, 9, 128>}, {pipeline_mode = #tpu.pipeline_mode<synchronous>, transform_indices = @transform_1, window_bounds = array<i64: 128, 32>}, {pipeline_mode = #tpu.pipeline_mode<synchronous>, transform_indices = @transform_2, window_bounds = array<i64: 1, 32>}, {pipeline_mode = #tpu.pipeline_mode<synchronous>, transform_indices = @transform_3, window_bounds = array<i64: 288, 256>}, {pipeline_mode = #tpu.pipeline_mode<synchronous>, transform_indices = @transform_4, window_bounds = array<i64: 1, 256>}, {pipeline_mode = #tpu.pipeline_mode<synchronous>, transform_indices = @transform_5, window_bounds = array<i64: 256, 32>}, {pipeline_mode = #tpu.pipeline_mode<synchronous>, transform_indices = @transform_6, window_bounds = array<i64: 1, 32>}, {pipeline_mode = #tpu.pipeline_mode<synchronous>, transform_indices = @transform_7, window_bounds = array<i64: 288, 256>}, {pipeline_mode = #tpu.pipeline_mode<synchronous>, transform_indices = @transform_8, window_bounds = array<i64: 1, 256>}, {transform_indices = @transform_9, window_bounds = array<i64: 1, 9, 256>}]} {
    %c0 = arith.constant 0 : index
    %c0_0 = arith.constant 0 : index
    %c0_1 = arith.constant 0 : index
    %0 = vector.load %arg1[%c0, %c0_0, %c0_1] : memref<1x9x128xbf16, #tpu.memory_space<vmem>>, vector<1x9x128xbf16>
    %1 = vector.shape_cast %0 : vector<1x9x128xbf16> to vector<9x128xbf16>
    %c0_2 = arith.constant 0 : index
    %c0_3 = arith.constant 0 : index
    %2 = vector.load %arg2[%c0_2, %c0_3] : memref<128x32xbf16, #tpu.memory_space<vmem>>, vector<128x32xbf16>
    %cst = arith.constant dense<0.000000e+00> : vector<9x32xf32>
    %3 = tpu.matmul %1, %2, %cst {dimension_numbers = #tpu.dot_dimension_numbers<[1], [0], [0], [1], [0, 0, 1, 1], [], []>} : vector<9x128xbf16>, vector<128x32xbf16>, vector<9x32xf32> -> vector<9x32xf32>
    %c0_4 = arith.constant 0 : index
    %c0_5 = arith.constant 0 : index
    %4 = vector.load %arg3[%c0_4, %c0_5] : memref<1x32xf32, #tpu.memory_space<vmem>>, vector<1x32xf32>
    %5 = vector.broadcast %4 : vector<1x32xf32> to vector<9x32xf32>
    %6 = arith.addf %3, %5 : vector<9x32xf32>
    %cst_6 = arith.constant 0.000000e+00 : f32
    %7 = vector.broadcast %cst_6 : f32 to vector<9x32xf32>
    %8 = arith.maximumf %6, %7 : vector<9x32xf32>
    %9 = arith.truncf %8 : vector<9x32xf32> to vector<9x32xbf16>
    %cst_7 = arith.constant 0.000000e+00 : bf16
    %10 = vector.broadcast %cst_7 : bf16 to vector<25x32xbf16>
    %c0_8 = arith.constant 0 : index
    %c0_9 = arith.constant 0 : index
    %11 = vector.load %arg11[%c0_8, %c0_9] : memref<25x32xbf16, #tpu.memory_space<vmem>>, vector<25x32xbf16>
    tpu.vector_store %arg11[%c0_8, %c0_9], %10 {strides = array<i32>} : memref<25x32xbf16, #tpu.memory_space<vmem>>, vector<25x32xbf16>,
    %12 = vector.extract_strided_slice %9 {offsets = [0, 0], sizes = [3, 32], strides = [1, 1]} : vector<9x32xbf16> to vector<3x32xbf16>
    %c6 = arith.constant 6 : index
    %c0_10 = arith.constant 0 : index
    %13 = vector.load %arg11[%c6, %c0_10] : memref<25x32xbf16, #tpu.memory_space<vmem>>, vector<3x32xbf16>
    tpu.vector_store %arg11[%c6, %c0_10], %12 {strides = array<i32>} : memref<25x32xbf16, #tpu.memory_space<vmem>>, vector<3x32xbf16>,
    %14 = vector.extract_strided_slice %9 {offsets = [3, 0], sizes = [3, 32], strides = [1, 1]} : vector<9x32xbf16> to vector<3x32xbf16>
    %c11 = arith.constant 11 : index
    %c0_11 = arith.constant 0 : index
    %15 = vector.load %arg11[%c11, %c0_11] : memref<25x32xbf16, #tpu.memory_space<vmem>>, vector<3x32xbf16>
    tpu.vector_store %arg11[%c11, %c0_11], %14 {strides = array<i32>} : memref<25x32xbf16, #tpu.memory_space<vmem>>, vector<3x32xbf16>,
    %16 = vector.extract_strided_slice %9 {offsets = [6, 0], sizes = [3, 32], strides = [1, 1]} : vector<9x32xbf16> to vector<3x32xbf16>
    %c16 = arith.constant 16 : index
    %c0_12 = arith.constant 0 : index
    %17 = vector.load %arg11[%c16, %c0_12] : memref<25x32xbf16, #tpu.memory_space<vmem>>, vector<3x32xbf16>
    tpu.vector_store %arg11[%c16, %c0_12], %16 {strides = array<i32>} : memref<25x32xbf16, #tpu.memory_space<vmem>>, vector<3x32xbf16>,
    %c0_13 = arith.constant 0 : index
    %c0_14 = arith.constant 0 : index
    %18 = vector.load %arg11[%c0_13, %c0_14] : memref<25x32xbf16, #tpu.memory_space<vmem>>, vector<3x32xbf16>
    %c0_15 = arith.constant 0 : index
    %c0_16 = arith.constant 0 : index
    %19 = vector.load %arg13[%c0_15, %c0_16] : memref<9x288xbf16, #tpu.memory_space<vmem>>, vector<3x32xbf16>
    tpu.vector_store %arg13[%c0_15, %c0_16], %18 {strides = array<i32>} : memref<9x288xbf16, #tpu.memory_space<vmem>>, vector<3x32xbf16>,
    %c5 = arith.constant 5 : index
    %c0_17 = arith.constant 0 : index
    %20 = vector.load %arg11[%c5, %c0_17] : memref<25x32xbf16, #tpu.memory_space<vmem>>, vector<3x32xbf16>
    %c3 = arith.constant 3 : index
    %c0_18 = arith.constant 0 : index
    %21 = vector.load %arg13[%c3, %c0_18] : memref<9x288xbf16, #tpu.memory_space<vmem>>, vector<3x32xbf16>
    tpu.vector_store %arg13[%c3, %c0_18], %20 {strides = array<i32>} : memref<9x288xbf16, #tpu.memory_space<vmem>>, vector<3x32xbf16>,
    %c10 = arith.constant 10 : index
    %c0_19 = arith.constant 0 : index
    %22 = vector.load %arg11[%c10, %c0_19] : memref<25x32xbf16, #tpu.memory_space<vmem>>, vector<3x32xbf16>
    %c6_20 = arith.constant 6 : index
    %c0_21 = arith.constant 0 : index
    %23 = vector.load %arg13[%c6_20, %c0_21] : memref<9x288xbf16, #tpu.memory_space<vmem>>, vector<3x32xbf16>
    tpu.vector_store %arg13[%c6_20, %c0_21], %22 {strides = array<i32>} : memref<9x288xbf16, #tpu.memory_space<vmem>>, vector<3x32xbf16>,
    %c1 = arith.constant 1 : index
    %c0_22 = arith.constant 0 : index
    %24 = vector.load %arg11[%c1, %c0_22] : memref<25x32xbf16, #tpu.memory_space<vmem>>, vector<3x32xbf16>
    %c0_23 = arith.constant 0 : index
    %c32 = arith.constant 32 : index
    %25 = vector.load %arg13[%c0_23, %c32] : memref<9x288xbf16, #tpu.memory_space<vmem>>, vector<3x32xbf16>
    tpu.vector_store %arg13[%c0_23, %c32], %24 {strides = array<i32>} : memref<9x288xbf16, #tpu.memory_space<vmem>>, vector<3x32xbf16>,
    %c6_24 = arith.constant 6 : index
    %c0_25 = arith.constant 0 : index
    %26 = vector.load %arg11[%c6_24, %c0_25] : memref<25x32xbf16, #tpu.memory_space<vmem>>, vector<3x32xbf16>
    %c3_26 = arith.constant 3 : index
    %c32_27 = arith.constant 32 : index
    %27 = vector.load %arg13[%c3_26, %c32_27] : memref<9x288xbf16, #tpu.memory_space<vmem>>, vector<3x32xbf16>
    tpu.vector_store %arg13[%c3_26, %c32_27], %26 {strides = array<i32>} : memref<9x288xbf16, #tpu.memory_space<vmem>>, vector<3x32xbf16>,
    %c11_28 = arith.constant 11 : index
    %c0_29 = arith.constant 0 : index
    %28 = vector.load %arg11[%c11_28, %c0_29] : memref<25x32xbf16, #tpu.memory_space<vmem>>, vector<3x32xbf16>
    %c6_30 = arith.constant 6 : index
    %c32_31 = arith.constant 32 : index
    %29 = vector.load %arg13[%c6_30, %c32_31] : memref<9x288xbf16, #tpu.memory_space<vmem>>, vector<3x32xbf16>
    tpu.vector_store %arg13[%c6_30, %c32_31], %28 {strides = array<i32>} : memref<9x288xbf16, #tpu.memory_space<vmem>>, vector<3x32xbf16>,
    %c2 = arith.constant 2 : index
    %c0_32 = arith.constant 0 : index
    %30 = vector.load %arg11[%c2, %c0_32] : memref<25x32xbf16, #tpu.memory_space<vmem>>, vector<3x32xbf16>
    %c0_33 = arith.constant 0 : index
    %c64 = arith.constant 64 : index
    %31 = vector.load %arg13[%c0_33, %c64] : memref<9x288xbf16, #tpu.memory_space<vmem>>, vector<3x32xbf16>
    tpu.vector_store %arg13[%c0_33, %c64], %30 {strides = array<i32>} : memref<9x288xbf16, #tpu.memory_space<vmem>>, vector<3x32xbf16>,
    %c7 = arith.constant 7 : index
    %c0_34 = arith.constant 0 : index
    %32 = vector.load %arg11[%c7, %c0_34] : memref<25x32xbf16, #tpu.memory_space<vmem>>, vector<3x32xbf16>
    %c3_35 = arith.constant 3 : index
    %c64_36 = arith.constant 64 : index
    %33 = vector.load %arg13[%c3_35, %c64_36] : memref<9x288xbf16, #tpu.memory_space<vmem>>, vector<3x32xbf16>
    tpu.vector_store %arg13[%c3_35, %c64_36], %32 {strides = array<i32>} : memref<9x288xbf16, #tpu.memory_space<vmem>>, vector<3x32xbf16>,
    %c12 = arith.constant 12 : index
    %c0_37 = arith.constant 0 : index
    %34 = vector.load %arg11[%c12, %c0_37] : memref<25x32xbf16, #tpu.memory_space<vmem>>, vector<3x32xbf16>
    %c6_38 = arith.constant 6 : index
    %c64_39 = arith.constant 64 : index
    %35 = vector.load %arg13[%c6_38, %c64_39] : memref<9x288xbf16, #tpu.memory_space<vmem>>, vector<3x32xbf16>
    tpu.vector_store %arg13[%c6_38, %c64_39], %34 {strides = array<i32>} : memref<9x288xbf16, #tpu.memory_space<vmem>>, vector<3x32xbf16>,
    %c5_40 = arith.constant 5 : index
    %c0_41 = arith.constant 0 : index
    %36 = vector.load %arg11[%c5_40, %c0_41] : memref<25x32xbf16, #tpu.memory_space<vmem>>, vector<3x32xbf16>
    %c0_42 = arith.constant 0 : index
    %c96 = arith.constant 96 : index
    %37 = vector.load %arg13[%c0_42, %c96] : memref<9x288xbf16, #tpu.memory_space<vmem>>, vector<3x32xbf16>
    tpu.vector_store %arg13[%c0_42, %c96], %36 {strides = array<i32>} : memref<9x288xbf16, #tpu.memory_space<vmem>>, vector<3x32xbf16>,
    %c10_43 = arith.constant 10 : index
    %c0_44 = arith.constant 0 : index
    %38 = vector.load %arg11[%c10_43, %c0_44] : memref<25x32xbf16, #tpu.memory_space<vmem>>, vector<3x32xbf16>
    %c3_45 = arith.constant 3 : index
    %c96_46 = arith.constant 96 : index
    %39 = vector.load %arg13[%c3_45, %c96_46] : memref<9x288xbf16, #tpu.memory_space<vmem>>, vector<3x32xbf16>
    tpu.vector_store %arg13[%c3_45, %c96_46], %38 {strides = array<i32>} : memref<9x288xbf16, #tpu.memory_space<vmem>>, vector<3x32xbf16>,
    %c15 = arith.constant 15 : index
    %c0_47 = arith.constant 0 : index
    %40 = vector.load %arg11[%c15, %c0_47] : memref<25x32xbf16, #tpu.memory_space<vmem>>, vector<3x32xbf16>
    %c6_48 = arith.constant 6 : index
    %c96_49 = arith.constant 96 : index
    %41 = vector.load %arg13[%c6_48, %c96_49] : memref<9x288xbf16, #tpu.memory_space<vmem>>, vector<3x32xbf16>
    tpu.vector_store %arg13[%c6_48, %c96_49], %40 {strides = array<i32>} : memref<9x288xbf16, #tpu.memory_space<vmem>>, vector<3x32xbf16>,
    %c6_50 = arith.constant 6 : index
    %c0_51 = arith.constant 0 : index
    %42 = vector.load %arg11[%c6_50, %c0_51] : memref<25x32xbf16, #tpu.memory_space<vmem>>, vector<3x32xbf16>
    %c0_52 = arith.constant 0 : index
    %c128 = arith.constant 128 : index
    %43 = vector.load %arg13[%c0_52, %c128] : memref<9x288xbf16, #tpu.memory_space<vmem>>, vector<3x32xbf16>
    tpu.vector_store %arg13[%c0_52, %c128], %42 {strides = array<i32>} : memref<9x288xbf16, #tpu.memory_space<vmem>>, vector<3x32xbf16>,
    %c11_53 = arith.constant 11 : index
    %c0_54 = arith.constant 0 : index
    %44 = vector.load %arg11[%c11_53, %c0_54] : memref<25x32xbf16, #tpu.memory_space<vmem>>, vector<3x32xbf16>
    %c3_55 = arith.constant 3 : index
    %c128_56 = arith.constant 128 : index
    %45 = vector.load %arg13[%c3_55, %c128_56] : memref<9x288xbf16, #tpu.memory_space<vmem>>, vector<3x32xbf16>
    tpu.vector_store %arg13[%c3_55, %c128_56], %44 {strides = array<i32>} : memref<9x288xbf16, #tpu.memory_space<vmem>>, vector<3x32xbf16>,
    %c16_57 = arith.constant 16 : index
    %c0_58 = arith.constant 0 : index
    %46 = vector.load %arg11[%c16_57, %c0_58] : memref<25x32xbf16, #tpu.memory_space<vmem>>, vector<3x32xbf16>
    %c6_59 = arith.constant 6 : index
    %c128_60 = arith.constant 128 : index
    %47 = vector.load %arg13[%c6_59, %c128_60] : memref<9x288xbf16, #tpu.memory_space<vmem>>, vector<3x32xbf16>
    tpu.vector_store %arg13[%c6_59, %c128_60], %46 {strides = array<i32>} : memref<9x288xbf16, #tpu.memory_space<vmem>>, vector<3x32xbf16>,
    %c7_61 = arith.constant 7 : index
    %c0_62 = arith.constant 0 : index
    %48 = vector.load %arg11[%c7_61, %c0_62] : memref<25x32xbf16, #tpu.memory_space<vmem>>, vector<3x32xbf16>
    %c0_63 = arith.constant 0 : index
    %c160 = arith.constant 160 : index
    %49 = vector.load %arg13[%c0_63, %c160] : memref<9x288xbf16, #tpu.memory_space<vmem>>, vector<3x32xbf16>
    tpu.vector_store %arg13[%c0_63, %c160], %48 {strides = array<i32>} : memref<9x288xbf16, #tpu.memory_space<vmem>>, vector<3x32xbf16>,
    %c12_64 = arith.constant 12 : index
    %c0_65 = arith.constant 0 : index
    %50 = vector.load %arg11[%c12_64, %c0_65] : memref<25x32xbf16, #tpu.memory_space<vmem>>, vector<3x32xbf16>
    %c3_66 = arith.constant 3 : index
    %c160_67 = arith.constant 160 : index
    %51 = vector.load %arg13[%c3_66, %c160_67] : memref<9x288xbf16, #tpu.memory_space<vmem>>, vector<3x32xbf16>
    tpu.vector_store %arg13[%c3_66, %c160_67], %50 {strides = array<i32>} : memref<9x288xbf16, #tpu.memory_space<vmem>>, vector<3x32xbf16>,
    %c17 = arith.constant 17 : index
    %c0_68 = arith.constant 0 : index
    %52 = vector.load %arg11[%c17, %c0_68] : memref<25x32xbf16, #tpu.memory_space<vmem>>, vector<3x32xbf16>
    %c6_69 = arith.constant 6 : index
    %c160_70 = arith.constant 160 : index
    %53 = vector.load %arg13[%c6_69, %c160_70] : memref<9x288xbf16, #tpu.memory_space<vmem>>, vector<3x32xbf16>
    tpu.vector_store %arg13[%c6_69, %c160_70], %52 {strides = array<i32>} : memref<9x288xbf16, #tpu.memory_space<vmem>>, vector<3x32xbf16>,
    %c10_71 = arith.constant 10 : index
    %c0_72 = arith.constant 0 : index
    %54 = vector.load %arg11[%c10_71, %c0_72] : memref<25x32xbf16, #tpu.memory_space<vmem>>, vector<3x32xbf16>
    %c0_73 = arith.constant 0 : index
    %c192 = arith.constant 192 : index
    %55 = vector.load %arg13[%c0_73, %c192] : memref<9x288xbf16, #tpu.memory_space<vmem>>, vector<3x32xbf16>
    tpu.vector_store %arg13[%c0_73, %c192], %54 {strides = array<i32>} : memref<9x288xbf16, #tpu.memory_space<vmem>>, vector<3x32xbf16>,
    %c15_74 = arith.constant 15 : index
    %c0_75 = arith.constant 0 : index
    %56 = vector.load %arg11[%c15_74, %c0_75] : memref<25x32xbf16, #tpu.memory_space<vmem>>, vector<3x32xbf16>
    %c3_76 = arith.constant 3 : index
    %c192_77 = arith.constant 192 : index
    %57 = vector.load %arg13[%c3_76, %c192_77] : memref<9x288xbf16, #tpu.memory_space<vmem>>, vector<3x32xbf16>
    tpu.vector_store %arg13[%c3_76, %c192_77], %56 {strides = array<i32>} : memref<9x288xbf16, #tpu.memory_space<vmem>>, vector<3x32xbf16>,
    %c20 = arith.constant 20 : index
    %c0_78 = arith.constant 0 : index
    %58 = vector.load %arg11[%c20, %c0_78] : memref<25x32xbf16, #tpu.memory_space<vmem>>, vector<3x32xbf16>
    %c6_79 = arith.constant 6 : index
    %c192_80 = arith.constant 192 : index
    %59 = vector.load %arg13[%c6_79, %c192_80] : memref<9x288xbf16, #tpu.memory_space<vmem>>, vector<3x32xbf16>
    tpu.vector_store %arg13[%c6_79, %c192_80], %58 {strides = array<i32>} : memref<9x288xbf16, #tpu.memory_space<vmem>>, vector<3x32xbf16>,
    %c11_81 = arith.constant 11 : index
    %c0_82 = arith.constant 0 : index
    %60 = vector.load %arg11[%c11_81, %c0_82] : memref<25x32xbf16, #tpu.memory_space<vmem>>, vector<3x32xbf16>
    %c0_83 = arith.constant 0 : index
    %c224 = arith.constant 224 : index
    %61 = vector.load %arg13[%c0_83, %c224] : memref<9x288xbf16, #tpu.memory_space<vmem>>, vector<3x32xbf16>
    tpu.vector_store %arg13[%c0_83, %c224], %60 {strides = array<i32>} : memref<9x288xbf16, #tpu.memory_space<vmem>>, vector<3x32xbf16>,
    %c16_84 = arith.constant 16 : index
    %c0_85 = arith.constant 0 : index
    %62 = vector.load %arg11[%c16_84, %c0_85] : memref<25x32xbf16, #tpu.memory_space<vmem>>, vector<3x32xbf16>
    %c3_86 = arith.constant 3 : index
    %c224_87 = arith.constant 224 : index
    %63 = vector.load %arg13[%c3_86, %c224_87] : memref<9x288xbf16, #tpu.memory_space<vmem>>, vector<3x32xbf16>
    tpu.vector_store %arg13[%c3_86, %c224_87], %62 {strides = array<i32>} : memref<9x288xbf16, #tpu.memory_space<vmem>>, vector<3x32xbf16>,
    %c21 = arith.constant 21 : index
    %c0_88 = arith.constant 0 : index
    %64 = vector.load %arg11[%c21, %c0_88] : memref<25x32xbf16, #tpu.memory_space<vmem>>, vector<3x32xbf16>
    %c6_89 = arith.constant 6 : index
    %c224_90 = arith.constant 224 : index
    %65 = vector.load %arg13[%c6_89, %c224_90] : memref<9x288xbf16, #tpu.memory_space<vmem>>, vector<3x32xbf16>
    tpu.vector_store %arg13[%c6_89, %c224_90], %64 {strides = array<i32>} : memref<9x288xbf16, #tpu.memory_space<vmem>>, vector<3x32xbf16>,
    %c12_91 = arith.constant 12 : index
    %c0_92 = arith.constant 0 : index
    %66 = vector.load %arg11[%c12_91, %c0_92] : memref<25x32xbf16, #tpu.memory_space<vmem>>, vector<3x32xbf16>
    %c0_93 = arith.constant 0 : index
    %c256 = arith.constant 256 : index
    %67 = vector.load %arg13[%c0_93, %c256] : memref<9x288xbf16, #tpu.memory_space<vmem>>, vector<3x32xbf16>
    tpu.vector_store %arg13[%c0_93, %c256], %66 {strides = array<i32>} : memref<9x288xbf16, #tpu.memory_space<vmem>>, vector<3x32xbf16>,
    %c17_94 = arith.constant 17 : index
    %c0_95 = arith.constant 0 : index
    %68 = vector.load %arg11[%c17_94, %c0_95] : memref<25x32xbf16, #tpu.memory_space<vmem>>, vector<3x32xbf16>
    %c3_96 = arith.constant 3 : index
    %c256_97 = arith.constant 256 : index
    %69 = vector.load %arg13[%c3_96, %c256_97] : memref<9x288xbf16, #tpu.memory_space<vmem>>, vector<3x32xbf16>
    tpu.vector_store %arg13[%c3_96, %c256_97], %68 {strides = array<i32>} : memref<9x288xbf16, #tpu.memory_space<vmem>>, vector<3x32xbf16>,
    %c22 = arith.constant 22 : index
    %c0_98 = arith.constant 0 : index
    %70 = vector.load %arg11[%c22, %c0_98] : memref<25x32xbf16, #tpu.memory_space<vmem>>, vector<3x32xbf16>
    %c6_99 = arith.constant 6 : index
    %c256_100 = arith.constant 256 : index
    %71 = vector.load %arg13[%c6_99, %c256_100] : memref<9x288xbf16, #tpu.memory_space<vmem>>, vector<3x32xbf16>
    tpu.vector_store %arg13[%c6_99, %c256_100], %70 {strides = array<i32>} : memref<9x288xbf16, #tpu.memory_space<vmem>>, vector<3x32xbf16>,
    %c0_101 = arith.constant 0 : index
    %c0_102 = arith.constant 0 : index
    %72 = vector.load %arg13[%c0_101, %c0_102] : memref<9x288xbf16, #tpu.memory_space<vmem>>, vector<9x288xbf16>
    %c0_103 = arith.constant 0 : index
    %c0_104 = arith.constant 0 : index
    %73 = vector.load %arg4[%c0_103, %c0_104] : memref<288x256xbf16, #tpu.memory_space<vmem>>, vector<288x256xbf16>
    %cst_105 = arith.constant dense<0.000000e+00> : vector<9x256xf32>
    %74 = tpu.matmul %72, %73, %cst_105 {dimension_numbers = #tpu.dot_dimension_numbers<[1], [0], [0], [1], [0, 0, 1, 1], [], []>} : vector<9x288xbf16>, vector<288x256xbf16>, vector<9x256xf32> -> vector<9x256xf32>
    %c0_106 = arith.constant 0 : index
    %c0_107 = arith.constant 0 : index
    %75 = vector.load %arg5[%c0_106, %c0_107] : memref<1x256xf32, #tpu.memory_space<vmem>>, vector<1x256xf32>
    %76 = vector.broadcast %75 : vector<1x256xf32> to vector<9x256xf32>
    %77 = arith.addf %74, %76 : vector<9x256xf32>
    %cst_108 = arith.constant 0.000000e+00 : f32
    %78 = vector.broadcast %cst_108 : f32 to vector<9x256xf32>
    %79 = arith.maximumf %77, %78 : vector<9x256xf32>
    %80 = arith.truncf %79 : vector<9x256xf32> to vector<9x256xbf16>
    %c0_109 = arith.constant 0 : index
    %c0_110 = arith.constant 0 : index
    %81 = vector.load %arg6[%c0_109, %c0_110] : memref<256x32xbf16, #tpu.memory_space<vmem>>, vector<256x32xbf16>
    %cst_111 = arith.constant dense<0.000000e+00> : vector<9x32xf32>
    %82 = tpu.matmul %80, %81, %cst_111 {dimension_numbers = #tpu.dot_dimension_numbers<[1], [0], [0], [1], [0, 0, 1, 1], [], []>} : vector<9x256xbf16>, vector<256x32xbf16>, vector<9x32xf32> -> vector<9x32xf32>
    %c0_112 = arith.constant 0 : index
    %c0_113 = arith.constant 0 : index
    %83 = vector.load %arg7[%c0_112, %c0_113] : memref<1x32xf32, #tpu.memory_space<vmem>>, vector<1x32xf32>
    %84 = vector.broadcast %83 : vector<1x32xf32> to vector<9x32xf32>
    %85 = arith.addf %82, %84 : vector<9x32xf32>
    %cst_114 = arith.constant 0.000000e+00 : f32
    %86 = vector.broadcast %cst_114 : f32 to vector<9x32xf32>
    %87 = arith.maximumf %85, %86 : vector<9x32xf32>
    %88 = arith.truncf %87 : vector<9x32xf32> to vector<9x32xbf16>
    %cst_115 = arith.constant 0.000000e+00 : bf16
    %89 = vector.broadcast %cst_115 : bf16 to vector<25x32xbf16>
    %c0_116 = arith.constant 0 : index
    %c0_117 = arith.constant 0 : index
    %90 = vector.load %arg12[%c0_116, %c0_117] : memref<25x32xbf16, #tpu.memory_space<vmem>>, vector<25x32xbf16>
    tpu.vector_store %arg12[%c0_116, %c0_117], %89 {strides = array<i32>} : memref<25x32xbf16, #tpu.memory_space<vmem>>, vector<25x32xbf16>,
    %91 = vector.extract_strided_slice %88 {offsets = [0, 0], sizes = [3, 32], strides = [1, 1]} : vector<9x32xbf16> to vector<3x32xbf16>
    %c6_118 = arith.constant 6 : index
    %c0_119 = arith.constant 0 : index
    %92 = vector.load %arg12[%c6_118, %c0_119] : memref<25x32xbf16, #tpu.memory_space<vmem>>, vector<3x32xbf16>
    tpu.vector_store %arg12[%c6_118, %c0_119], %91 {strides = array<i32>} : memref<25x32xbf16, #tpu.memory_space<vmem>>, vector<3x32xbf16>,
    %93 = vector.extract_strided_slice %88 {offsets = [3, 0], sizes = [3, 32], strides = [1, 1]} : vector<9x32xbf16> to vector<3x32xbf16>
    %c11_120 = arith.constant 11 : index
    %c0_121 = arith.constant 0 : index
    %94 = vector.load %arg12[%c11_120, %c0_121] : memref<25x32xbf16, #tpu.memory_space<vmem>>, vector<3x32xbf16>
    tpu.vector_store %arg12[%c11_120, %c0_121], %93 {strides = array<i32>} : memref<25x32xbf16, #tpu.memory_space<vmem>>, vector<3x32xbf16>,
    %95 = vector.extract_strided_slice %88 {offsets = [6, 0], sizes = [3, 32], strides = [1, 1]} : vector<9x32xbf16> to vector<3x32xbf16>
    %c16_122 = arith.constant 16 : index
    %c0_123 = arith.constant 0 : index
    %96 = vector.load %arg12[%c16_122, %c0_123] : memref<25x32xbf16, #tpu.memory_space<vmem>>, vector<3x32xbf16>
    tpu.vector_store %arg12[%c16_122, %c0_123], %95 {strides = array<i32>} : memref<25x32xbf16, #tpu.memory_space<vmem>>, vector<3x32xbf16>,
    %c0_124 = arith.constant 0 : index
    %c0_125 = arith.constant 0 : index
    %97 = vector.load %arg12[%c0_124, %c0_125] : memref<25x32xbf16, #tpu.memory_space<vmem>>, vector<3x32xbf16>
    %c0_126 = arith.constant 0 : index
    %c0_127 = arith.constant 0 : index
    %98 = vector.load %arg14[%c0_126, %c0_127] : memref<9x288xbf16, #tpu.memory_space<vmem>>, vector<3x32xbf16>
    tpu.vector_store %arg14[%c0_126, %c0_127], %97 {strides = array<i32>} : memref<9x288xbf16, #tpu.memory_space<vmem>>, vector<3x32xbf16>,
    %c5_128 = arith.constant 5 : index
    %c0_129 = arith.constant 0 : index
    %99 = vector.load %arg12[%c5_128, %c0_129] : memref<25x32xbf16, #tpu.memory_space<vmem>>, vector<3x32xbf16>
    %c3_130 = arith.constant 3 : index
    %c0_131 = arith.constant 0 : index
    %100 = vector.load %arg14[%c3_130, %c0_131] : memref<9x288xbf16, #tpu.memory_space<vmem>>, vector<3x32xbf16>
    tpu.vector_store %arg14[%c3_130, %c0_131], %99 {strides = array<i32>} : memref<9x288xbf16, #tpu.memory_space<vmem>>, vector<3x32xbf16>,
    %c10_132 = arith.constant 10 : index
    %c0_133 = arith.constant 0 : index
    %101 = vector.load %arg12[%c10_132, %c0_133] : memref<25x32xbf16, #tpu.memory_space<vmem>>, vector<3x32xbf16>
    %c6_134 = arith.constant 6 : index
    %c0_135 = arith.constant 0 : index
    %102 = vector.load %arg14[%c6_134, %c0_135] : memref<9x288xbf16, #tpu.memory_space<vmem>>, vector<3x32xbf16>
    tpu.vector_store %arg14[%c6_134, %c0_135], %101 {strides = array<i32>} : memref<9x288xbf16, #tpu.memory_space<vmem>>, vector<3x32xbf16>,
    %c1_136 = arith.constant 1 : index
    %c0_137 = arith.constant 0 : index
    %103 = vector.load %arg12[%c1_136, %c0_137] : memref<25x32xbf16, #tpu.memory_space<vmem>>, vector<3x32xbf16>
    %c0_138 = arith.constant 0 : index
    %c32_139 = arith.constant 32 : index
    %104 = vector.load %arg14[%c0_138, %c32_139] : memref<9x288xbf16, #tpu.memory_space<vmem>>, vector<3x32xbf16>
    tpu.vector_store %arg14[%c0_138, %c32_139], %103 {strides = array<i32>} : memref<9x288xbf16, #tpu.memory_space<vmem>>, vector<3x32xbf16>,
    %c6_140 = arith.constant 6 : index
    %c0_141 = arith.constant 0 : index
    %105 = vector.load %arg12[%c6_140, %c0_141] : memref<25x32xbf16, #tpu.memory_space<vmem>>, vector<3x32xbf16>
    %c3_142 = arith.constant 3 : index
    %c32_143 = arith.constant 32 : index
    %106 = vector.load %arg14[%c3_142, %c32_143] : memref<9x288xbf16, #tpu.memory_space<vmem>>, vector<3x32xbf16>
    tpu.vector_store %arg14[%c3_142, %c32_143], %105 {strides = array<i32>} : memref<9x288xbf16, #tpu.memory_space<vmem>>, vector<3x32xbf16>,
    %c11_144 = arith.constant 11 : index
    %c0_145 = arith.constant 0 : index
    %107 = vector.load %arg12[%c11_144, %c0_145] : memref<25x32xbf16, #tpu.memory_space<vmem>>, vector<3x32xbf16>
    %c6_146 = arith.constant 6 : index
    %c32_147 = arith.constant 32 : index
    %108 = vector.load %arg14[%c6_146, %c32_147] : memref<9x288xbf16, #tpu.memory_space<vmem>>, vector<3x32xbf16>
    tpu.vector_store %arg14[%c6_146, %c32_147], %107 {strides = array<i32>} : memref<9x288xbf16, #tpu.memory_space<vmem>>, vector<3x32xbf16>,
    %c2_148 = arith.constant 2 : index
    %c0_149 = arith.constant 0 : index
    %109 = vector.load %arg12[%c2_148, %c0_149] : memref<25x32xbf16, #tpu.memory_space<vmem>>, vector<3x32xbf16>
    %c0_150 = arith.constant 0 : index
    %c64_151 = arith.constant 64 : index
    %110 = vector.load %arg14[%c0_150, %c64_151] : memref<9x288xbf16, #tpu.memory_space<vmem>>, vector<3x32xbf16>
    tpu.vector_store %arg14[%c0_150, %c64_151], %109 {strides = array<i32>} : memref<9x288xbf16, #tpu.memory_space<vmem>>, vector<3x32xbf16>,
    %c7_152 = arith.constant 7 : index
    %c0_153 = arith.constant 0 : index
    %111 = vector.load %arg12[%c7_152, %c0_153] : memref<25x32xbf16, #tpu.memory_space<vmem>>, vector<3x32xbf16>
    %c3_154 = arith.constant 3 : index
    %c64_155 = arith.constant 64 : index
    %112 = vector.load %arg14[%c3_154, %c64_155] : memref<9x288xbf16, #tpu.memory_space<vmem>>, vector<3x32xbf16>
    tpu.vector_store %arg14[%c3_154, %c64_155], %111 {strides = array<i32>} : memref<9x288xbf16, #tpu.memory_space<vmem>>, vector<3x32xbf16>,
    %c12_156 = arith.constant 12 : index
    %c0_157 = arith.constant 0 : index
    %113 = vector.load %arg12[%c12_156, %c0_157] : memref<25x32xbf16, #tpu.memory_space<vmem>>, vector<3x32xbf16>
    %c6_158 = arith.constant 6 : index
    %c64_159 = arith.constant 64 : index
    %114 = vector.load %arg14[%c6_158, %c64_159] : memref<9x288xbf16, #tpu.memory_space<vmem>>, vector<3x32xbf16>
    tpu.vector_store %arg14[%c6_158, %c64_159], %113 {strides = array<i32>} : memref<9x288xbf16, #tpu.memory_space<vmem>>, vector<3x32xbf16>,
    %c5_160 = arith.constant 5 : index
    %c0_161 = arith.constant 0 : index
    %115 = vector.load %arg12[%c5_160, %c0_161] : memref<25x32xbf16, #tpu.memory_space<vmem>>, vector<3x32xbf16>
    %c0_162 = arith.constant 0 : index
    %c96_163 = arith.constant 96 : index
    %116 = vector.load %arg14[%c0_162, %c96_163] : memref<9x288xbf16, #tpu.memory_space<vmem>>, vector<3x32xbf16>
    tpu.vector_store %arg14[%c0_162, %c96_163], %115 {strides = array<i32>} : memref<9x288xbf16, #tpu.memory_space<vmem>>, vector<3x32xbf16>,
    %c10_164 = arith.constant 10 : index
    %c0_165 = arith.constant 0 : index
    %117 = vector.load %arg12[%c10_164, %c0_165] : memref<25x32xbf16, #tpu.memory_space<vmem>>, vector<3x32xbf16>
    %c3_166 = arith.constant 3 : index
    %c96_167 = arith.constant 96 : index
    %118 = vector.load %arg14[%c3_166, %c96_167] : memref<9x288xbf16, #tpu.memory_space<vmem>>, vector<3x32xbf16>
    tpu.vector_store %arg14[%c3_166, %c96_167], %117 {strides = array<i32>} : memref<9x288xbf16, #tpu.memory_space<vmem>>, vector<3x32xbf16>,
    %c15_168 = arith.constant 15 : index
    %c0_169 = arith.constant 0 : index
    %119 = vector.load %arg12[%c15_168, %c0_169] : memref<25x32xbf16, #tpu.memory_space<vmem>>, vector<3x32xbf16>
    %c6_170 = arith.constant 6 : index
    %c96_171 = arith.constant 96 : index
    %120 = vector.load %arg14[%c6_170, %c96_171] : memref<9x288xbf16, #tpu.memory_space<vmem>>, vector<3x32xbf16>
    tpu.vector_store %arg14[%c6_170, %c96_171], %119 {strides = array<i32>} : memref<9x288xbf16, #tpu.memory_space<vmem>>, vector<3x32xbf16>,
    %c6_172 = arith.constant 6 : index
    %c0_173 = arith.constant 0 : index
    %121 = vector.load %arg12[%c6_172, %c0_173] : memref<25x32xbf16, #tpu.memory_space<vmem>>, vector<3x32xbf16>
    %c0_174 = arith.constant 0 : index
    %c128_175 = arith.constant 128 : index
    %122 = vector.load %arg14[%c0_174, %c128_175] : memref<9x288xbf16, #tpu.memory_space<vmem>>, vector<3x32xbf16>
    tpu.vector_store %arg14[%c0_174, %c128_175], %121 {strides = array<i32>} : memref<9x288xbf16, #tpu.memory_space<vmem>>, vector<3x32xbf16>,
    %c11_176 = arith.constant 11 : index
    %c0_177 = arith.constant 0 : index
    %123 = vector.load %arg12[%c11_176, %c0_177] : memref<25x32xbf16, #tpu.memory_space<vmem>>, vector<3x32xbf16>
    %c3_178 = arith.constant 3 : index
    %c128_179 = arith.constant 128 : index
    %124 = vector.load %arg14[%c3_178, %c128_179] : memref<9x288xbf16, #tpu.memory_space<vmem>>, vector<3x32xbf16>
    tpu.vector_store %arg14[%c3_178, %c128_179], %123 {strides = array<i32>} : memref<9x288xbf16, #tpu.memory_space<vmem>>, vector<3x32xbf16>,
    %c16_180 = arith.constant 16 : index
    %c0_181 = arith.constant 0 : index
    %125 = vector.load %arg12[%c16_180, %c0_181] : memref<25x32xbf16, #tpu.memory_space<vmem>>, vector<3x32xbf16>
    %c6_182 = arith.constant 6 : index
    %c128_183 = arith.constant 128 : index
    %126 = vector.load %arg14[%c6_182, %c128_183] : memref<9x288xbf16, #tpu.memory_space<vmem>>, vector<3x32xbf16>
    tpu.vector_store %arg14[%c6_182, %c128_183], %125 {strides = array<i32>} : memref<9x288xbf16, #tpu.memory_space<vmem>>, vector<3x32xbf16>,
    %c7_184 = arith.constant 7 : index
    %c0_185 = arith.constant 0 : index
    %127 = vector.load %arg12[%c7_184, %c0_185] : memref<25x32xbf16, #tpu.memory_space<vmem>>, vector<3x32xbf16>
    %c0_186 = arith.constant 0 : index
    %c160_187 = arith.constant 160 : index
    %128 = vector.load %arg14[%c0_186, %c160_187] : memref<9x288xbf16, #tpu.memory_space<vmem>>, vector<3x32xbf16>
    tpu.vector_store %arg14[%c0_186, %c160_187], %127 {strides = array<i32>} : memref<9x288xbf16, #tpu.memory_space<vmem>>, vector<3x32xbf16>,
    %c12_188 = arith.constant 12 : index
    %c0_189 = arith.constant 0 : index
    %129 = vector.load %arg12[%c12_188, %c0_189] : memref<25x32xbf16, #tpu.memory_space<vmem>>, vector<3x32xbf16>
    %c3_190 = arith.constant 3 : index
    %c160_191 = arith.constant 160 : index
    %130 = vector.load %arg14[%c3_190, %c160_191] : memref<9x288xbf16, #tpu.memory_space<vmem>>, vector<3x32xbf16>
    tpu.vector_store %arg14[%c3_190, %c160_191], %129 {strides = array<i32>} : memref<9x288xbf16, #tpu.memory_space<vmem>>, vector<3x32xbf16>,
    %c17_192 = arith.constant 17 : index
    %c0_193 = arith.constant 0 : index
    %131 = vector.load %arg12[%c17_192, %c0_193] : memref<25x32xbf16, #tpu.memory_space<vmem>>, vector<3x32xbf16>
    %c6_194 = arith.constant 6 : index
    %c160_195 = arith.constant 160 : index
    %132 = vector.load %arg14[%c6_194, %c160_195] : memref<9x288xbf16, #tpu.memory_space<vmem>>, vector<3x32xbf16>
    tpu.vector_store %arg14[%c6_194, %c160_195], %131 {strides = array<i32>} : memref<9x288xbf16, #tpu.memory_space<vmem>>, vector<3x32xbf16>,
    %c10_196 = arith.constant 10 : index
    %c0_197 = arith.constant 0 : index
    %133 = vector.load %arg12[%c10_196, %c0_197] : memref<25x32xbf16, #tpu.memory_space<vmem>>, vector<3x32xbf16>
    %c0_198 = arith.constant 0 : index
    %c192_199 = arith.constant 192 : index
    %134 = vector.load %arg14[%c0_198, %c192_199] : memref<9x288xbf16, #tpu.memory_space<vmem>>, vector<3x32xbf16>
    tpu.vector_store %arg14[%c0_198, %c192_199], %133 {strides = array<i32>} : memref<9x288xbf16, #tpu.memory_space<vmem>>, vector<3x32xbf16>,
    %c15_200 = arith.constant 15 : index
    %c0_201 = arith.constant 0 : index
    %135 = vector.load %arg12[%c15_200, %c0_201] : memref<25x32xbf16, #tpu.memory_space<vmem>>, vector<3x32xbf16>
    %c3_202 = arith.constant 3 : index
    %c192_203 = arith.constant 192 : index
    %136 = vector.load %arg14[%c3_202, %c192_203] : memref<9x288xbf16, #tpu.memory_space<vmem>>, vector<3x32xbf16>
    tpu.vector_store %arg14[%c3_202, %c192_203], %135 {strides = array<i32>} : memref<9x288xbf16, #tpu.memory_space<vmem>>, vector<3x32xbf16>,
    %c20_204 = arith.constant 20 : index
    %c0_205 = arith.constant 0 : index
    %137 = vector.load %arg12[%c20_204, %c0_205] : memref<25x32xbf16, #tpu.memory_space<vmem>>, vector<3x32xbf16>
    %c6_206 = arith.constant 6 : index
    %c192_207 = arith.constant 192 : index
    %138 = vector.load %arg14[%c6_206, %c192_207] : memref<9x288xbf16, #tpu.memory_space<vmem>>, vector<3x32xbf16>
    tpu.vector_store %arg14[%c6_206, %c192_207], %137 {strides = array<i32>} : memref<9x288xbf16, #tpu.memory_space<vmem>>, vector<3x32xbf16>,
    %c11_208 = arith.constant 11 : index
    %c0_209 = arith.constant 0 : index
    %139 = vector.load %arg12[%c11_208, %c0_209] : memref<25x32xbf16, #tpu.memory_space<vmem>>, vector<3x32xbf16>
    %c0_210 = arith.constant 0 : index
    %c224_211 = arith.constant 224 : index
    %140 = vector.load %arg14[%c0_210, %c224_211] : memref<9x288xbf16, #tpu.memory_space<vmem>>, vector<3x32xbf16>
    tpu.vector_store %arg14[%c0_210, %c224_211], %139 {strides = array<i32>} : memref<9x288xbf16, #tpu.memory_space<vmem>>, vector<3x32xbf16>,
    %c16_212 = arith.constant 16 : index
    %c0_213 = arith.constant 0 : index
    %141 = vector.load %arg12[%c16_212, %c0_213] : memref<25x32xbf16, #tpu.memory_space<vmem>>, vector<3x32xbf16>
    %c3_214 = arith.constant 3 : index
    %c224_215 = arith.constant 224 : index
    %142 = vector.load %arg14[%c3_214, %c224_215] : memref<9x288xbf16, #tpu.memory_space<vmem>>, vector<3x32xbf16>
    tpu.vector_store %arg14[%c3_214, %c224_215], %141 {strides = array<i32>} : memref<9x288xbf16, #tpu.memory_space<vmem>>, vector<3x32xbf16>,
    %c21_216 = arith.constant 21 : index
    %c0_217 = arith.constant 0 : index
    %143 = vector.load %arg12[%c21_216, %c0_217] : memref<25x32xbf16, #tpu.memory_space<vmem>>, vector<3x32xbf16>
    %c6_218 = arith.constant 6 : index
    %c224_219 = arith.constant 224 : index
    %144 = vector.load %arg14[%c6_218, %c224_219] : memref<9x288xbf16, #tpu.memory_space<vmem>>, vector<3x32xbf16>
    tpu.vector_store %arg14[%c6_218, %c224_219], %143 {strides = array<i32>} : memref<9x288xbf16, #tpu.memory_space<vmem>>, vector<3x32xbf16>,
    %c12_220 = arith.constant 12 : index
    %c0_221 = arith.constant 0 : index
    %145 = vector.load %arg12[%c12_220, %c0_221] : memref<25x32xbf16, #tpu.memory_space<vmem>>, vector<3x32xbf16>
    %c0_222 = arith.constant 0 : index
    %c256_223 = arith.constant 256 : index
    %146 = vector.load %arg14[%c0_222, %c256_223] : memref<9x288xbf16, #tpu.memory_space<vmem>>, vector<3x32xbf16>
    tpu.vector_store %arg14[%c0_222, %c256_223], %145 {strides = array<i32>} : memref<9x288xbf16, #tpu.memory_space<vmem>>, vector<3x32xbf16>,
    %c17_224 = arith.constant 17 : index
    %c0_225 = arith.constant 0 : index
    %147 = vector.load %arg12[%c17_224, %c0_225] : memref<25x32xbf16, #tpu.memory_space<vmem>>, vector<3x32xbf16>
    %c3_226 = arith.constant 3 : index
    %c256_227 = arith.constant 256 : index
    %148 = vector.load %arg14[%c3_226, %c256_227] : memref<9x288xbf16, #tpu.memory_space<vmem>>, vector<3x32xbf16>
    tpu.vector_store %arg14[%c3_226, %c256_227], %147 {strides = array<i32>} : memref<9x288xbf16, #tpu.memory_space<vmem>>, vector<3x32xbf16>,
    %c22_228 = arith.constant 22 : index
    %c0_229 = arith.constant 0 : index
    %149 = vector.load %arg12[%c22_228, %c0_229] : memref<25x32xbf16, #tpu.memory_space<vmem>>, vector<3x32xbf16>
    %c6_230 = arith.constant 6 : index
    %c256_231 = arith.constant 256 : index
    %150 = vector.load %arg14[%c6_230, %c256_231] : memref<9x288xbf16, #tpu.memory_space<vmem>>, vector<3x32xbf16>
    tpu.vector_store %arg14[%c6_230, %c256_231], %149 {strides = array<i32>} : memref<9x288xbf16, #tpu.memory_space<vmem>>, vector<3x32xbf16>,
    %c0_232 = arith.constant 0 : index
    %c0_233 = arith.constant 0 : index
    %151 = vector.load %arg14[%c0_232, %c0_233] : memref<9x288xbf16, #tpu.memory_space<vmem>>, vector<9x288xbf16>
    %c0_234 = arith.constant 0 : index
    %c0_235 = arith.constant 0 : index
    %152 = vector.load %arg8[%c0_234, %c0_235] : memref<288x256xbf16, #tpu.memory_space<vmem>>, vector<288x256xbf16>
    %cst_236 = arith.constant dense<0.000000e+00> : vector<9x256xf32>
    %153 = tpu.matmul %151, %152, %cst_236 {dimension_numbers = #tpu.dot_dimension_numbers<[1], [0], [0], [1], [0, 0, 1, 1], [], []>} : vector<9x288xbf16>, vector<288x256xbf16>, vector<9x256xf32> -> vector<9x256xf32>
    %c0_237 = arith.constant 0 : index
    %c0_238 = arith.constant 0 : index
    %154 = vector.load %arg9[%c0_237, %c0_238] : memref<1x256xf32, #tpu.memory_space<vmem>>, vector<1x256xf32>
    %155 = vector.broadcast %154 : vector<1x256xf32> to vector<9x256xf32>
    %156 = arith.addf %153, %155 : vector<9x256xf32>
    %cst_239 = arith.constant 0.000000e+00 : f32
    %157 = vector.broadcast %cst_239 : f32 to vector<9x256xf32>
    %158 = arith.maximumf %156, %157 : vector<9x256xf32>
    %159 = arith.truncf %158 : vector<9x256xf32> to vector<9x256xbf16>
    %c0_240 = arith.constant 0 : index
    %c0_241 = arith.constant 0 : index
    %c0_242 = arith.constant 0 : index
    %160 = vector.load %arg10[%c0_240, %c0_241, %c0_242] : memref<1x9x256xbf16, #tpu.memory_space<vmem>>, vector<1x9x256xbf16>
    %161 = vector.shape_cast %160 : vector<1x9x256xbf16> to vector<9x256xbf16>
    %162 = vector.shape_cast %159 : vector<9x256xbf16> to vector<1x9x256xbf16>
    tpu.vector_store %arg10[%c0_240, %c0_241, %c0_242], %162 {strides = array<i32>} : memref<1x9x256xbf16, #tpu.memory_space<vmem>>, vector<1x9x256xbf16>,
    return
  }
  func.func @transform_0(%arg0: i32) -> (i32, i32, i32) {
    %c0_i32 = arith.constant 0 : i32
    %c0_i32_0 = arith.constant 0 : i32
    %c0_i32_1 = arith.constant 0 : i32
    return %arg0, %c0_i32, %c0_i32_0 : i32, i32, i32
  }
  func.func @transform_1(%arg0: i32) -> (i32, i32) {
    %c0_i32 = arith.constant 0 : i32
    %c0_i32_0 = arith.constant 0 : i32
    %c0_i32_1 = arith.constant 0 : i32
    return %c0_i32, %c0_i32_0 : i32, i32
  }
  func.func @transform_2(%arg0: i32) -> (i32, i32) {
    %c0_i32 = arith.constant 0 : i32
    %c0_i32_0 = arith.constant 0 : i32
    %c0_i32_1 = arith.constant 0 : i32
    return %c0_i32, %c0_i32_0 : i32, i32
  }
  func.func @transform_3(%arg0: i32) -> (i32, i32) {
    %c0_i32 = arith.constant 0 : i32
    %c0_i32_0 = arith.constant 0 : i32
    %c0_i32_1 = arith.constant 0 : i32
    return %c0_i32, %c0_i32_0 : i32, i32
  }
  func.func @transform_4(%arg0: i32) -> (i32, i32) {
    %c0_i32 = arith.constant 0 : i32
    %c0_i32_0 = arith.constant 0 : i32
    %c0_i32_1 = arith.constant 0 : i32
    return %c0_i32, %c0_i32_0 : i32, i32
  }
  func.func @transform_5(%arg0: i32) -> (i32, i32) {
    %c0_i32 = arith.constant 0 : i32
    %c0_i32_0 = arith.constant 0 : i32
    %c0_i32_1 = arith.constant 0 : i32
    return %c0_i32, %c0_i32_0 : i32, i32
  }
  func.func @transform_6(%arg0: i32) -> (i32, i32) {
    %c0_i32 = arith.constant 0 : i32
    %c0_i32_0 = arith.constant 0 : i32
    %c0_i32_1 = arith.constant 0 : i32
    return %c0_i32, %c0_i32_0 : i32, i32
  }
  func.func @transform_7(%arg0: i32) -> (i32, i32) {
    %c0_i32 = arith.constant 0 : i32
    %c0_i32_0 = arith.constant 0 : i32
    %c0_i32_1 = arith.constant 0 : i32
    return %c0_i32, %c0_i32_0 : i32, i32
  }
  func.func @transform_8(%arg0: i32) -> (i32, i32) {
    %c0_i32 = arith.constant 0 : i32
    %c0_i32_0 = arith.constant 0 : i32
    %c0_i32_1 = arith.constant 0 : i32
    return %c0_i32, %c0_i32_0 : i32, i32
  }
  func.func @transform_9(%arg0: i32) -> (i32, i32, i32) {
    %c0_i32 = arith.constant 0 : i32
    %c0_i32_0 = arith.constant 0 : i32
    %c0_i32_1 = arith.constant 0 : i32
    return %arg0, %c0_i32, %c0_i32_0 : i32, i32, i32
  }
}

module attributes {stable_mosaic.version = 11 : i64} {
  func.func @_fire_chain_kernel(%arg0: i32, %arg1: memref<1x1x256xbf16, #tpu.memory_space<vmem>>, %arg2: memref<256x48xbf16, #tpu.memory_space<vmem>>, %arg3: memref<1x48xf32, #tpu.memory_space<vmem>>, %arg4: memref<432x384xbf16, #tpu.memory_space<vmem>>, %arg5: memref<1x384xf32, #tpu.memory_space<vmem>>, %arg6: memref<384x48xbf16, #tpu.memory_space<vmem>>, %arg7: memref<1x48xf32, #tpu.memory_space<vmem>>, %arg8: memref<432x384xbf16, #tpu.memory_space<vmem>>, %arg9: memref<1x384xf32, #tpu.memory_space<vmem>>, %arg10: memref<384x64xbf16, #tpu.memory_space<vmem>>, %arg11: memref<1x64xf32, #tpu.memory_space<vmem>>, %arg12: memref<576x512xbf16, #tpu.memory_space<vmem>>, %arg13: memref<1x512xf32, #tpu.memory_space<vmem>>, %arg14: memref<512x64xbf16, #tpu.memory_space<vmem>>, %arg15: memref<1x64xf32, #tpu.memory_space<vmem>>, %arg16: memref<576x512xbf16, #tpu.memory_space<vmem>>, %arg17: memref<1x512xf32, #tpu.memory_space<vmem>>, %arg18: memref<1x1x512xbf16, #tpu.memory_space<vmem>>, %arg19: memref<9x48xbf16, #tpu.memory_space<vmem>>, %arg20: memref<9x48xbf16, #tpu.memory_space<vmem>>, %arg21: memref<9x64xbf16, #tpu.memory_space<vmem>>, %arg22: memref<9x64xbf16, #tpu.memory_space<vmem>>, %arg23: memref<1x432xbf16, #tpu.memory_space<vmem>>, %arg24: memref<1x432xbf16, #tpu.memory_space<vmem>>, %arg25: memref<1x576xbf16, #tpu.memory_space<vmem>>, %arg26: memref<1x576xbf16, #tpu.memory_space<vmem>>) attributes {dimension_semantics = [#tpu.dimension_semantics<parallel>], iteration_bounds = array<i64: 2>, scalar_prefetch = 0 : i64, scratch_operands = 8 : i64, tpu.core_type = #tpu.core_type<tc>, window_params = [{transform_indices = @transform_0, window_bounds = array<i64: 1, 1, 256>}, {pipeline_mode = #tpu.pipeline_mode<synchronous>, transform_indices = @transform_1, window_bounds = array<i64: 256, 48>}, {pipeline_mode = #tpu.pipeline_mode<synchronous>, transform_indices = @transform_2, window_bounds = array<i64: 1, 48>}, {pipeline_mode = #tpu.pipeline_mode<synchronous>, transform_indices = @transform_3, window_bounds = array<i64: 432, 384>}, {pipeline_mode = #tpu.pipeline_mode<synchronous>, transform_indices = @transform_4, window_bounds = array<i64: 1, 384>}, {pipeline_mode = #tpu.pipeline_mode<synchronous>, transform_indices = @transform_5, window_bounds = array<i64: 384, 48>}, {pipeline_mode = #tpu.pipeline_mode<synchronous>, transform_indices = @transform_6, window_bounds = array<i64: 1, 48>}, {pipeline_mode = #tpu.pipeline_mode<synchronous>, transform_indices = @transform_7, window_bounds = array<i64: 432, 384>}, {pipeline_mode = #tpu.pipeline_mode<synchronous>, transform_indices = @transform_8, window_bounds = array<i64: 1, 384>}, {pipeline_mode = #tpu.pipeline_mode<synchronous>, transform_indices = @transform_9, window_bounds = array<i64: 384, 64>}, {pipeline_mode = #tpu.pipeline_mode<synchronous>, transform_indices = @transform_10, window_bounds = array<i64: 1, 64>}, {pipeline_mode = #tpu.pipeline_mode<synchronous>, transform_indices = @transform_11, window_bounds = array<i64: 576, 512>}, {pipeline_mode = #tpu.pipeline_mode<synchronous>, transform_indices = @transform_12, window_bounds = array<i64: 1, 512>}, {pipeline_mode = #tpu.pipeline_mode<synchronous>, transform_indices = @transform_13, window_bounds = array<i64: 512, 64>}, {pipeline_mode = #tpu.pipeline_mode<synchronous>, transform_indices = @transform_14, window_bounds = array<i64: 1, 64>}, {pipeline_mode = #tpu.pipeline_mode<synchronous>, transform_indices = @transform_15, window_bounds = array<i64: 576, 512>}, {pipeline_mode = #tpu.pipeline_mode<synchronous>, transform_indices = @transform_16, window_bounds = array<i64: 1, 512>}, {transform_indices = @transform_17, window_bounds = array<i64: 1, 1, 512>}]} {
    %c0 = arith.constant 0 : index
    %c0_0 = arith.constant 0 : index
    %c0_1 = arith.constant 0 : index
    %0 = vector.load %arg1[%c0, %c0_0, %c0_1] : memref<1x1x256xbf16, #tpu.memory_space<vmem>>, vector<1x1x256xbf16>
    %1 = vector.shape_cast %0 : vector<1x1x256xbf16> to vector<1x256xbf16>
    %c0_2 = arith.constant 0 : index
    %c0_3 = arith.constant 0 : index
    %2 = vector.load %arg2[%c0_2, %c0_3] : memref<256x48xbf16, #tpu.memory_space<vmem>>, vector<256x48xbf16>
    %cst = arith.constant dense<0.000000e+00> : vector<1x48xf32>
    %3 = tpu.matmul %1, %2, %cst {dimension_numbers = #tpu.dot_dimension_numbers<[1], [0], [0], [1], [0, 0, 1, 1], [], []>} : vector<1x256xbf16>, vector<256x48xbf16>, vector<1x48xf32> -> vector<1x48xf32>
    %c0_4 = arith.constant 0 : index
    %c0_5 = arith.constant 0 : index
    %4 = vector.load %arg3[%c0_4, %c0_5] : memref<1x48xf32, #tpu.memory_space<vmem>>, vector<1x48xf32>
    %5 = arith.addf %3, %4 : vector<1x48xf32>
    %cst_6 = arith.constant 0.000000e+00 : f32
    %6 = vector.broadcast %cst_6 : f32 to vector<1x48xf32>
    %7 = arith.maximumf %5, %6 : vector<1x48xf32>
    %8 = arith.truncf %7 : vector<1x48xf32> to vector<1x48xbf16>
    %cst_7 = arith.constant 0.000000e+00 : bf16
    %9 = vector.broadcast %cst_7 : bf16 to vector<9x48xbf16>
    %c0_8 = arith.constant 0 : index
    %c0_9 = arith.constant 0 : index
    %10 = vector.load %arg19[%c0_8, %c0_9] : memref<9x48xbf16, #tpu.memory_space<vmem>>, vector<9x48xbf16>
    tpu.vector_store %arg19[%c0_8, %c0_9], %9 {strides = array<i32>} : memref<9x48xbf16, #tpu.memory_space<vmem>>, vector<9x48xbf16>,
    %c4 = arith.constant 4 : index
    %c0_10 = arith.constant 0 : index
    %11 = vector.load %arg19[%c4, %c0_10] : memref<9x48xbf16, #tpu.memory_space<vmem>>, vector<1x48xbf16>
    tpu.vector_store %arg19[%c4, %c0_10], %8 {strides = array<i32>} : memref<9x48xbf16, #tpu.memory_space<vmem>>, vector<1x48xbf16>,
    %c0_11 = arith.constant 0 : index
    %c0_12 = arith.constant 0 : index
    %12 = vector.load %arg19[%c0_11, %c0_12] : memref<9x48xbf16, #tpu.memory_space<vmem>>, vector<1x48xbf16>
    %c0_13 = arith.constant 0 : index
    %c0_14 = arith.constant 0 : index
    %13 = vector.load %arg23[%c0_13, %c0_14] : memref<1x432xbf16, #tpu.memory_space<vmem>>, vector<1x48xbf16>
    tpu.vector_store %arg23[%c0_13, %c0_14], %12 {strides = array<i32>} : memref<1x432xbf16, #tpu.memory_space<vmem>>, vector<1x48xbf16>,
    %c1 = arith.constant 1 : index
    %c0_15 = arith.constant 0 : index
    %14 = vector.load %arg19[%c1, %c0_15] : memref<9x48xbf16, #tpu.memory_space<vmem>>, vector<1x48xbf16>
    %c0_16 = arith.constant 0 : index
    %c48 = arith.constant 48 : index
    %15 = vector.load %arg23[%c0_16, %c48] : memref<1x432xbf16, #tpu.memory_space<vmem>>, vector<1x48xbf16>
    tpu.vector_store %arg23[%c0_16, %c48], %14 {strides = array<i32>} : memref<1x432xbf16, #tpu.memory_space<vmem>>, vector<1x48xbf16>,
    %c2 = arith.constant 2 : index
    %c0_17 = arith.constant 0 : index
    %16 = vector.load %arg19[%c2, %c0_17] : memref<9x48xbf16, #tpu.memory_space<vmem>>, vector<1x48xbf16>
    %c0_18 = arith.constant 0 : index
    %c96 = arith.constant 96 : index
    %17 = vector.load %arg23[%c0_18, %c96] : memref<1x432xbf16, #tpu.memory_space<vmem>>, vector<1x48xbf16>
    tpu.vector_store %arg23[%c0_18, %c96], %16 {strides = array<i32>} : memref<1x432xbf16, #tpu.memory_space<vmem>>, vector<1x48xbf16>,
    %c3 = arith.constant 3 : index
    %c0_19 = arith.constant 0 : index
    %18 = vector.load %arg19[%c3, %c0_19] : memref<9x48xbf16, #tpu.memory_space<vmem>>, vector<1x48xbf16>
    %c0_20 = arith.constant 0 : index
    %c144 = arith.constant 144 : index
    %19 = vector.load %arg23[%c0_20, %c144] : memref<1x432xbf16, #tpu.memory_space<vmem>>, vector<1x48xbf16>
    tpu.vector_store %arg23[%c0_20, %c144], %18 {strides = array<i32>} : memref<1x432xbf16, #tpu.memory_space<vmem>>, vector<1x48xbf16>,
    %c4_21 = arith.constant 4 : index
    %c0_22 = arith.constant 0 : index
    %20 = vector.load %arg19[%c4_21, %c0_22] : memref<9x48xbf16, #tpu.memory_space<vmem>>, vector<1x48xbf16>
    %c0_23 = arith.constant 0 : index
    %c192 = arith.constant 192 : index
    %21 = vector.load %arg23[%c0_23, %c192] : memref<1x432xbf16, #tpu.memory_space<vmem>>, vector<1x48xbf16>
    tpu.vector_store %arg23[%c0_23, %c192], %20 {strides = array<i32>} : memref<1x432xbf16, #tpu.memory_space<vmem>>, vector<1x48xbf16>,
    %c5 = arith.constant 5 : index
    %c0_24 = arith.constant 0 : index
    %22 = vector.load %arg19[%c5, %c0_24] : memref<9x48xbf16, #tpu.memory_space<vmem>>, vector<1x48xbf16>
    %c0_25 = arith.constant 0 : index
    %c240 = arith.constant 240 : index
    %23 = vector.load %arg23[%c0_25, %c240] : memref<1x432xbf16, #tpu.memory_space<vmem>>, vector<1x48xbf16>
    tpu.vector_store %arg23[%c0_25, %c240], %22 {strides = array<i32>} : memref<1x432xbf16, #tpu.memory_space<vmem>>, vector<1x48xbf16>,
    %c6 = arith.constant 6 : index
    %c0_26 = arith.constant 0 : index
    %24 = vector.load %arg19[%c6, %c0_26] : memref<9x48xbf16, #tpu.memory_space<vmem>>, vector<1x48xbf16>
    %c0_27 = arith.constant 0 : index
    %c288 = arith.constant 288 : index
    %25 = vector.load %arg23[%c0_27, %c288] : memref<1x432xbf16, #tpu.memory_space<vmem>>, vector<1x48xbf16>
    tpu.vector_store %arg23[%c0_27, %c288], %24 {strides = array<i32>} : memref<1x432xbf16, #tpu.memory_space<vmem>>, vector<1x48xbf16>,
    %c7 = arith.constant 7 : index
    %c0_28 = arith.constant 0 : index
    %26 = vector.load %arg19[%c7, %c0_28] : memref<9x48xbf16, #tpu.memory_space<vmem>>, vector<1x48xbf16>
    %c0_29 = arith.constant 0 : index
    %c336 = arith.constant 336 : index
    %27 = vector.load %arg23[%c0_29, %c336] : memref<1x432xbf16, #tpu.memory_space<vmem>>, vector<1x48xbf16>
    tpu.vector_store %arg23[%c0_29, %c336], %26 {strides = array<i32>} : memref<1x432xbf16, #tpu.memory_space<vmem>>, vector<1x48xbf16>,
    %c8 = arith.constant 8 : index
    %c0_30 = arith.constant 0 : index
    %28 = vector.load %arg19[%c8, %c0_30] : memref<9x48xbf16, #tpu.memory_space<vmem>>, vector<1x48xbf16>
    %c0_31 = arith.constant 0 : index
    %c384 = arith.constant 384 : index
    %29 = vector.load %arg23[%c0_31, %c384] : memref<1x432xbf16, #tpu.memory_space<vmem>>, vector<1x48xbf16>
    tpu.vector_store %arg23[%c0_31, %c384], %28 {strides = array<i32>} : memref<1x432xbf16, #tpu.memory_space<vmem>>, vector<1x48xbf16>,
    %c0_32 = arith.constant 0 : index
    %c0_33 = arith.constant 0 : index
    %30 = vector.load %arg23[%c0_32, %c0_33] : memref<1x432xbf16, #tpu.memory_space<vmem>>, vector<1x432xbf16>
    %c0_34 = arith.constant 0 : index
    %c0_35 = arith.constant 0 : index
    %31 = vector.load %arg4[%c0_34, %c0_35] : memref<432x384xbf16, #tpu.memory_space<vmem>>, vector<432x384xbf16>
    %cst_36 = arith.constant dense<0.000000e+00> : vector<1x384xf32>
    %32 = tpu.matmul %30, %31, %cst_36 {dimension_numbers = #tpu.dot_dimension_numbers<[1], [0], [0], [1], [0, 0, 1, 1], [], []>} : vector<1x432xbf16>, vector<432x384xbf16>, vector<1x384xf32> -> vector<1x384xf32>
    %c0_37 = arith.constant 0 : index
    %c0_38 = arith.constant 0 : index
    %33 = vector.load %arg5[%c0_37, %c0_38] : memref<1x384xf32, #tpu.memory_space<vmem>>, vector<1x384xf32>
    %34 = arith.addf %32, %33 : vector<1x384xf32>
    %cst_39 = arith.constant 0.000000e+00 : f32
    %35 = vector.broadcast %cst_39 : f32 to vector<1x384xf32>
    %36 = arith.maximumf %34, %35 : vector<1x384xf32>
    %37 = arith.truncf %36 : vector<1x384xf32> to vector<1x384xbf16>
    %c0_40 = arith.constant 0 : index
    %c0_41 = arith.constant 0 : index
    %38 = vector.load %arg6[%c0_40, %c0_41] : memref<384x48xbf16, #tpu.memory_space<vmem>>, vector<384x48xbf16>
    %cst_42 = arith.constant dense<0.000000e+00> : vector<1x48xf32>
    %39 = tpu.matmul %37, %38, %cst_42 {dimension_numbers = #tpu.dot_dimension_numbers<[1], [0], [0], [1], [0, 0, 1, 1], [], []>} : vector<1x384xbf16>, vector<384x48xbf16>, vector<1x48xf32> -> vector<1x48xf32>
    %c0_43 = arith.constant 0 : index
    %c0_44 = arith.constant 0 : index
    %40 = vector.load %arg7[%c0_43, %c0_44] : memref<1x48xf32, #tpu.memory_space<vmem>>, vector<1x48xf32>
    %41 = arith.addf %39, %40 : vector<1x48xf32>
    %cst_45 = arith.constant 0.000000e+00 : f32
    %42 = vector.broadcast %cst_45 : f32 to vector<1x48xf32>
    %43 = arith.maximumf %41, %42 : vector<1x48xf32>
    %44 = arith.truncf %43 : vector<1x48xf32> to vector<1x48xbf16>
    %cst_46 = arith.constant 0.000000e+00 : bf16
    %45 = vector.broadcast %cst_46 : bf16 to vector<9x48xbf16>
    %c0_47 = arith.constant 0 : index
    %c0_48 = arith.constant 0 : index
    %46 = vector.load %arg20[%c0_47, %c0_48] : memref<9x48xbf16, #tpu.memory_space<vmem>>, vector<9x48xbf16>
    tpu.vector_store %arg20[%c0_47, %c0_48], %45 {strides = array<i32>} : memref<9x48xbf16, #tpu.memory_space<vmem>>, vector<9x48xbf16>,
    %c4_49 = arith.constant 4 : index
    %c0_50 = arith.constant 0 : index
    %47 = vector.load %arg20[%c4_49, %c0_50] : memref<9x48xbf16, #tpu.memory_space<vmem>>, vector<1x48xbf16>
    tpu.vector_store %arg20[%c4_49, %c0_50], %44 {strides = array<i32>} : memref<9x48xbf16, #tpu.memory_space<vmem>>, vector<1x48xbf16>,
    %c0_51 = arith.constant 0 : index
    %c0_52 = arith.constant 0 : index
    %48 = vector.load %arg20[%c0_51, %c0_52] : memref<9x48xbf16, #tpu.memory_space<vmem>>, vector<1x48xbf16>
    %c0_53 = arith.constant 0 : index
    %c0_54 = arith.constant 0 : index
    %49 = vector.load %arg24[%c0_53, %c0_54] : memref<1x432xbf16, #tpu.memory_space<vmem>>, vector<1x48xbf16>
    tpu.vector_store %arg24[%c0_53, %c0_54], %48 {strides = array<i32>} : memref<1x432xbf16, #tpu.memory_space<vmem>>, vector<1x48xbf16>,
    %c1_55 = arith.constant 1 : index
    %c0_56 = arith.constant 0 : index
    %50 = vector.load %arg20[%c1_55, %c0_56] : memref<9x48xbf16, #tpu.memory_space<vmem>>, vector<1x48xbf16>
    %c0_57 = arith.constant 0 : index
    %c48_58 = arith.constant 48 : index
    %51 = vector.load %arg24[%c0_57, %c48_58] : memref<1x432xbf16, #tpu.memory_space<vmem>>, vector<1x48xbf16>
    tpu.vector_store %arg24[%c0_57, %c48_58], %50 {strides = array<i32>} : memref<1x432xbf16, #tpu.memory_space<vmem>>, vector<1x48xbf16>,
    %c2_59 = arith.constant 2 : index
    %c0_60 = arith.constant 0 : index
    %52 = vector.load %arg20[%c2_59, %c0_60] : memref<9x48xbf16, #tpu.memory_space<vmem>>, vector<1x48xbf16>
    %c0_61 = arith.constant 0 : index
    %c96_62 = arith.constant 96 : index
    %53 = vector.load %arg24[%c0_61, %c96_62] : memref<1x432xbf16, #tpu.memory_space<vmem>>, vector<1x48xbf16>
    tpu.vector_store %arg24[%c0_61, %c96_62], %52 {strides = array<i32>} : memref<1x432xbf16, #tpu.memory_space<vmem>>, vector<1x48xbf16>,
    %c3_63 = arith.constant 3 : index
    %c0_64 = arith.constant 0 : index
    %54 = vector.load %arg20[%c3_63, %c0_64] : memref<9x48xbf16, #tpu.memory_space<vmem>>, vector<1x48xbf16>
    %c0_65 = arith.constant 0 : index
    %c144_66 = arith.constant 144 : index
    %55 = vector.load %arg24[%c0_65, %c144_66] : memref<1x432xbf16, #tpu.memory_space<vmem>>, vector<1x48xbf16>
    tpu.vector_store %arg24[%c0_65, %c144_66], %54 {strides = array<i32>} : memref<1x432xbf16, #tpu.memory_space<vmem>>, vector<1x48xbf16>,
    %c4_67 = arith.constant 4 : index
    %c0_68 = arith.constant 0 : index
    %56 = vector.load %arg20[%c4_67, %c0_68] : memref<9x48xbf16, #tpu.memory_space<vmem>>, vector<1x48xbf16>
    %c0_69 = arith.constant 0 : index
    %c192_70 = arith.constant 192 : index
    %57 = vector.load %arg24[%c0_69, %c192_70] : memref<1x432xbf16, #tpu.memory_space<vmem>>, vector<1x48xbf16>
    tpu.vector_store %arg24[%c0_69, %c192_70], %56 {strides = array<i32>} : memref<1x432xbf16, #tpu.memory_space<vmem>>, vector<1x48xbf16>,
    %c5_71 = arith.constant 5 : index
    %c0_72 = arith.constant 0 : index
    %58 = vector.load %arg20[%c5_71, %c0_72] : memref<9x48xbf16, #tpu.memory_space<vmem>>, vector<1x48xbf16>
    %c0_73 = arith.constant 0 : index
    %c240_74 = arith.constant 240 : index
    %59 = vector.load %arg24[%c0_73, %c240_74] : memref<1x432xbf16, #tpu.memory_space<vmem>>, vector<1x48xbf16>
    tpu.vector_store %arg24[%c0_73, %c240_74], %58 {strides = array<i32>} : memref<1x432xbf16, #tpu.memory_space<vmem>>, vector<1x48xbf16>,
    %c6_75 = arith.constant 6 : index
    %c0_76 = arith.constant 0 : index
    %60 = vector.load %arg20[%c6_75, %c0_76] : memref<9x48xbf16, #tpu.memory_space<vmem>>, vector<1x48xbf16>
    %c0_77 = arith.constant 0 : index
    %c288_78 = arith.constant 288 : index
    %61 = vector.load %arg24[%c0_77, %c288_78] : memref<1x432xbf16, #tpu.memory_space<vmem>>, vector<1x48xbf16>
    tpu.vector_store %arg24[%c0_77, %c288_78], %60 {strides = array<i32>} : memref<1x432xbf16, #tpu.memory_space<vmem>>, vector<1x48xbf16>,
    %c7_79 = arith.constant 7 : index
    %c0_80 = arith.constant 0 : index
    %62 = vector.load %arg20[%c7_79, %c0_80] : memref<9x48xbf16, #tpu.memory_space<vmem>>, vector<1x48xbf16>
    %c0_81 = arith.constant 0 : index
    %c336_82 = arith.constant 336 : index
    %63 = vector.load %arg24[%c0_81, %c336_82] : memref<1x432xbf16, #tpu.memory_space<vmem>>, vector<1x48xbf16>
    tpu.vector_store %arg24[%c0_81, %c336_82], %62 {strides = array<i32>} : memref<1x432xbf16, #tpu.memory_space<vmem>>, vector<1x48xbf16>,
    %c8_83 = arith.constant 8 : index
    %c0_84 = arith.constant 0 : index
    %64 = vector.load %arg20[%c8_83, %c0_84] : memref<9x48xbf16, #tpu.memory_space<vmem>>, vector<1x48xbf16>
    %c0_85 = arith.constant 0 : index
    %c384_86 = arith.constant 384 : index
    %65 = vector.load %arg24[%c0_85, %c384_86] : memref<1x432xbf16, #tpu.memory_space<vmem>>, vector<1x48xbf16>
    tpu.vector_store %arg24[%c0_85, %c384_86], %64 {strides = array<i32>} : memref<1x432xbf16, #tpu.memory_space<vmem>>, vector<1x48xbf16>,
    %c0_87 = arith.constant 0 : index
    %c0_88 = arith.constant 0 : index
    %66 = vector.load %arg24[%c0_87, %c0_88] : memref<1x432xbf16, #tpu.memory_space<vmem>>, vector<1x432xbf16>
    %c0_89 = arith.constant 0 : index
    %c0_90 = arith.constant 0 : index
    %67 = vector.load %arg8[%c0_89, %c0_90] : memref<432x384xbf16, #tpu.memory_space<vmem>>, vector<432x384xbf16>
    %cst_91 = arith.constant dense<0.000000e+00> : vector<1x384xf32>
    %68 = tpu.matmul %66, %67, %cst_91 {dimension_numbers = #tpu.dot_dimension_numbers<[1], [0], [0], [1], [0, 0, 1, 1], [], []>} : vector<1x432xbf16>, vector<432x384xbf16>, vector<1x384xf32> -> vector<1x384xf32>
    %c0_92 = arith.constant 0 : index
    %c0_93 = arith.constant 0 : index
    %69 = vector.load %arg9[%c0_92, %c0_93] : memref<1x384xf32, #tpu.memory_space<vmem>>, vector<1x384xf32>
    %70 = arith.addf %68, %69 : vector<1x384xf32>
    %cst_94 = arith.constant 0.000000e+00 : f32
    %71 = vector.broadcast %cst_94 : f32 to vector<1x384xf32>
    %72 = arith.maximumf %70, %71 : vector<1x384xf32>
    %73 = arith.truncf %72 : vector<1x384xf32> to vector<1x384xbf16>
    %c0_95 = arith.constant 0 : index
    %c0_96 = arith.constant 0 : index
    %74 = vector.load %arg10[%c0_95, %c0_96] : memref<384x64xbf16, #tpu.memory_space<vmem>>, vector<384x64xbf16>
    %cst_97 = arith.constant dense<0.000000e+00> : vector<1x64xf32>
    %75 = tpu.matmul %73, %74, %cst_97 {dimension_numbers = #tpu.dot_dimension_numbers<[1], [0], [0], [1], [0, 0, 1, 1], [], []>} : vector<1x384xbf16>, vector<384x64xbf16>, vector<1x64xf32> -> vector<1x64xf32>
    %c0_98 = arith.constant 0 : index
    %c0_99 = arith.constant 0 : index
    %76 = vector.load %arg11[%c0_98, %c0_99] : memref<1x64xf32, #tpu.memory_space<vmem>>, vector<1x64xf32>
    %77 = arith.addf %75, %76 : vector<1x64xf32>
    %cst_100 = arith.constant 0.000000e+00 : f32
    %78 = vector.broadcast %cst_100 : f32 to vector<1x64xf32>
    %79 = arith.maximumf %77, %78 : vector<1x64xf32>
    %80 = arith.truncf %79 : vector<1x64xf32> to vector<1x64xbf16>
    %cst_101 = arith.constant 0.000000e+00 : bf16
    %81 = vector.broadcast %cst_101 : bf16 to vector<9x64xbf16>
    %c0_102 = arith.constant 0 : index
    %c0_103 = arith.constant 0 : index
    %82 = vector.load %arg21[%c0_102, %c0_103] : memref<9x64xbf16, #tpu.memory_space<vmem>>, vector<9x64xbf16>
    tpu.vector_store %arg21[%c0_102, %c0_103], %81 {strides = array<i32>} : memref<9x64xbf16, #tpu.memory_space<vmem>>, vector<9x64xbf16>,
    %c4_104 = arith.constant 4 : index
    %c0_105 = arith.constant 0 : index
    %83 = vector.load %arg21[%c4_104, %c0_105] : memref<9x64xbf16, #tpu.memory_space<vmem>>, vector<1x64xbf16>
    tpu.vector_store %arg21[%c4_104, %c0_105], %80 {strides = array<i32>} : memref<9x64xbf16, #tpu.memory_space<vmem>>, vector<1x64xbf16>,
    %c0_106 = arith.constant 0 : index
    %c0_107 = arith.constant 0 : index
    %84 = vector.load %arg21[%c0_106, %c0_107] : memref<9x64xbf16, #tpu.memory_space<vmem>>, vector<1x64xbf16>
    %c0_108 = arith.constant 0 : index
    %c0_109 = arith.constant 0 : index
    %85 = vector.load %arg25[%c0_108, %c0_109] : memref<1x576xbf16, #tpu.memory_space<vmem>>, vector<1x64xbf16>
    tpu.vector_store %arg25[%c0_108, %c0_109], %84 {strides = array<i32>} : memref<1x576xbf16, #tpu.memory_space<vmem>>, vector<1x64xbf16>,
    %c1_110 = arith.constant 1 : index
    %c0_111 = arith.constant 0 : index
    %86 = vector.load %arg21[%c1_110, %c0_111] : memref<9x64xbf16, #tpu.memory_space<vmem>>, vector<1x64xbf16>
    %c0_112 = arith.constant 0 : index
    %c64 = arith.constant 64 : index
    %87 = vector.load %arg25[%c0_112, %c64] : memref<1x576xbf16, #tpu.memory_space<vmem>>, vector<1x64xbf16>
    tpu.vector_store %arg25[%c0_112, %c64], %86 {strides = array<i32>} : memref<1x576xbf16, #tpu.memory_space<vmem>>, vector<1x64xbf16>,
    %c2_113 = arith.constant 2 : index
    %c0_114 = arith.constant 0 : index
    %88 = vector.load %arg21[%c2_113, %c0_114] : memref<9x64xbf16, #tpu.memory_space<vmem>>, vector<1x64xbf16>
    %c0_115 = arith.constant 0 : index
    %c128 = arith.constant 128 : index
    %89 = vector.load %arg25[%c0_115, %c128] : memref<1x576xbf16, #tpu.memory_space<vmem>>, vector<1x64xbf16>
    tpu.vector_store %arg25[%c0_115, %c128], %88 {strides = array<i32>} : memref<1x576xbf16, #tpu.memory_space<vmem>>, vector<1x64xbf16>,
    %c3_116 = arith.constant 3 : index
    %c0_117 = arith.constant 0 : index
    %90 = vector.load %arg21[%c3_116, %c0_117] : memref<9x64xbf16, #tpu.memory_space<vmem>>, vector<1x64xbf16>
    %c0_118 = arith.constant 0 : index
    %c192_119 = arith.constant 192 : index
    %91 = vector.load %arg25[%c0_118, %c192_119] : memref<1x576xbf16, #tpu.memory_space<vmem>>, vector<1x64xbf16>
    tpu.vector_store %arg25[%c0_118, %c192_119], %90 {strides = array<i32>} : memref<1x576xbf16, #tpu.memory_space<vmem>>, vector<1x64xbf16>,
    %c4_120 = arith.constant 4 : index
    %c0_121 = arith.constant 0 : index
    %92 = vector.load %arg21[%c4_120, %c0_121] : memref<9x64xbf16, #tpu.memory_space<vmem>>, vector<1x64xbf16>
    %c0_122 = arith.constant 0 : index
    %c256 = arith.constant 256 : index
    %93 = vector.load %arg25[%c0_122, %c256] : memref<1x576xbf16, #tpu.memory_space<vmem>>, vector<1x64xbf16>
    tpu.vector_store %arg25[%c0_122, %c256], %92 {strides = array<i32>} : memref<1x576xbf16, #tpu.memory_space<vmem>>, vector<1x64xbf16>,
    %c5_123 = arith.constant 5 : index
    %c0_124 = arith.constant 0 : index
    %94 = vector.load %arg21[%c5_123, %c0_124] : memref<9x64xbf16, #tpu.memory_space<vmem>>, vector<1x64xbf16>
    %c0_125 = arith.constant 0 : index
    %c320 = arith.constant 320 : index
    %95 = vector.load %arg25[%c0_125, %c320] : memref<1x576xbf16, #tpu.memory_space<vmem>>, vector<1x64xbf16>
    tpu.vector_store %arg25[%c0_125, %c320], %94 {strides = array<i32>} : memref<1x576xbf16, #tpu.memory_space<vmem>>, vector<1x64xbf16>,
    %c6_126 = arith.constant 6 : index
    %c0_127 = arith.constant 0 : index
    %96 = vector.load %arg21[%c6_126, %c0_127] : memref<9x64xbf16, #tpu.memory_space<vmem>>, vector<1x64xbf16>
    %c0_128 = arith.constant 0 : index
    %c384_129 = arith.constant 384 : index
    %97 = vector.load %arg25[%c0_128, %c384_129] : memref<1x576xbf16, #tpu.memory_space<vmem>>, vector<1x64xbf16>
    tpu.vector_store %arg25[%c0_128, %c384_129], %96 {strides = array<i32>} : memref<1x576xbf16, #tpu.memory_space<vmem>>, vector<1x64xbf16>,
    %c7_130 = arith.constant 7 : index
    %c0_131 = arith.constant 0 : index
    %98 = vector.load %arg21[%c7_130, %c0_131] : memref<9x64xbf16, #tpu.memory_space<vmem>>, vector<1x64xbf16>
    %c0_132 = arith.constant 0 : index
    %c448 = arith.constant 448 : index
    %99 = vector.load %arg25[%c0_132, %c448] : memref<1x576xbf16, #tpu.memory_space<vmem>>, vector<1x64xbf16>
    tpu.vector_store %arg25[%c0_132, %c448], %98 {strides = array<i32>} : memref<1x576xbf16, #tpu.memory_space<vmem>>, vector<1x64xbf16>,
    %c8_133 = arith.constant 8 : index
    %c0_134 = arith.constant 0 : index
    %100 = vector.load %arg21[%c8_133, %c0_134] : memref<9x64xbf16, #tpu.memory_space<vmem>>, vector<1x64xbf16>
    %c0_135 = arith.constant 0 : index
    %c512 = arith.constant 512 : index
    %101 = vector.load %arg25[%c0_135, %c512] : memref<1x576xbf16, #tpu.memory_space<vmem>>, vector<1x64xbf16>
    tpu.vector_store %arg25[%c0_135, %c512], %100 {strides = array<i32>} : memref<1x576xbf16, #tpu.memory_space<vmem>>, vector<1x64xbf16>,
    %c0_136 = arith.constant 0 : index
    %c0_137 = arith.constant 0 : index
    %102 = vector.load %arg25[%c0_136, %c0_137] : memref<1x576xbf16, #tpu.memory_space<vmem>>, vector<1x576xbf16>
    %c0_138 = arith.constant 0 : index
    %c0_139 = arith.constant 0 : index
    %103 = vector.load %arg12[%c0_138, %c0_139] : memref<576x512xbf16, #tpu.memory_space<vmem>>, vector<576x512xbf16>
    %cst_140 = arith.constant dense<0.000000e+00> : vector<1x512xf32>
    %104 = tpu.matmul %102, %103, %cst_140 {dimension_numbers = #tpu.dot_dimension_numbers<[1], [0], [0], [1], [0, 0, 1, 1], [], []>} : vector<1x576xbf16>, vector<576x512xbf16>, vector<1x512xf32> -> vector<1x512xf32>
    %c0_141 = arith.constant 0 : index
    %c0_142 = arith.constant 0 : index
    %105 = vector.load %arg13[%c0_141, %c0_142] : memref<1x512xf32, #tpu.memory_space<vmem>>, vector<1x512xf32>
    %106 = arith.addf %104, %105 : vector<1x512xf32>
    %cst_143 = arith.constant 0.000000e+00 : f32
    %107 = vector.broadcast %cst_143 : f32 to vector<1x512xf32>
    %108 = arith.maximumf %106, %107 : vector<1x512xf32>
    %109 = arith.truncf %108 : vector<1x512xf32> to vector<1x512xbf16>
    %c0_144 = arith.constant 0 : index
    %c0_145 = arith.constant 0 : index
    %110 = vector.load %arg14[%c0_144, %c0_145] : memref<512x64xbf16, #tpu.memory_space<vmem>>, vector<512x64xbf16>
    %cst_146 = arith.constant dense<0.000000e+00> : vector<1x64xf32>
    %111 = tpu.matmul %109, %110, %cst_146 {dimension_numbers = #tpu.dot_dimension_numbers<[1], [0], [0], [1], [0, 0, 1, 1], [], []>} : vector<1x512xbf16>, vector<512x64xbf16>, vector<1x64xf32> -> vector<1x64xf32>
    %c0_147 = arith.constant 0 : index
    %c0_148 = arith.constant 0 : index
    %112 = vector.load %arg15[%c0_147, %c0_148] : memref<1x64xf32, #tpu.memory_space<vmem>>, vector<1x64xf32>
    %113 = arith.addf %111, %112 : vector<1x64xf32>
    %cst_149 = arith.constant 0.000000e+00 : f32
    %114 = vector.broadcast %cst_149 : f32 to vector<1x64xf32>
    %115 = arith.maximumf %113, %114 : vector<1x64xf32>
    %116 = arith.truncf %115 : vector<1x64xf32> to vector<1x64xbf16>
    %cst_150 = arith.constant 0.000000e+00 : bf16
    %117 = vector.broadcast %cst_150 : bf16 to vector<9x64xbf16>
    %c0_151 = arith.constant 0 : index
    %c0_152 = arith.constant 0 : index
    %118 = vector.load %arg22[%c0_151, %c0_152] : memref<9x64xbf16, #tpu.memory_space<vmem>>, vector<9x64xbf16>
    tpu.vector_store %arg22[%c0_151, %c0_152], %117 {strides = array<i32>} : memref<9x64xbf16, #tpu.memory_space<vmem>>, vector<9x64xbf16>,
    %c4_153 = arith.constant 4 : index
    %c0_154 = arith.constant 0 : index
    %119 = vector.load %arg22[%c4_153, %c0_154] : memref<9x64xbf16, #tpu.memory_space<vmem>>, vector<1x64xbf16>
    tpu.vector_store %arg22[%c4_153, %c0_154], %116 {strides = array<i32>} : memref<9x64xbf16, #tpu.memory_space<vmem>>, vector<1x64xbf16>,
    %c0_155 = arith.constant 0 : index
    %c0_156 = arith.constant 0 : index
    %120 = vector.load %arg22[%c0_155, %c0_156] : memref<9x64xbf16, #tpu.memory_space<vmem>>, vector<1x64xbf16>
    %c0_157 = arith.constant 0 : index
    %c0_158 = arith.constant 0 : index
    %121 = vector.load %arg26[%c0_157, %c0_158] : memref<1x576xbf16, #tpu.memory_space<vmem>>, vector<1x64xbf16>
    tpu.vector_store %arg26[%c0_157, %c0_158], %120 {strides = array<i32>} : memref<1x576xbf16, #tpu.memory_space<vmem>>, vector<1x64xbf16>,
    %c1_159 = arith.constant 1 : index
    %c0_160 = arith.constant 0 : index
    %122 = vector.load %arg22[%c1_159, %c0_160] : memref<9x64xbf16, #tpu.memory_space<vmem>>, vector<1x64xbf16>
    %c0_161 = arith.constant 0 : index
    %c64_162 = arith.constant 64 : index
    %123 = vector.load %arg26[%c0_161, %c64_162] : memref<1x576xbf16, #tpu.memory_space<vmem>>, vector<1x64xbf16>
    tpu.vector_store %arg26[%c0_161, %c64_162], %122 {strides = array<i32>} : memref<1x576xbf16, #tpu.memory_space<vmem>>, vector<1x64xbf16>,
    %c2_163 = arith.constant 2 : index
    %c0_164 = arith.constant 0 : index
    %124 = vector.load %arg22[%c2_163, %c0_164] : memref<9x64xbf16, #tpu.memory_space<vmem>>, vector<1x64xbf16>
    %c0_165 = arith.constant 0 : index
    %c128_166 = arith.constant 128 : index
    %125 = vector.load %arg26[%c0_165, %c128_166] : memref<1x576xbf16, #tpu.memory_space<vmem>>, vector<1x64xbf16>
    tpu.vector_store %arg26[%c0_165, %c128_166], %124 {strides = array<i32>} : memref<1x576xbf16, #tpu.memory_space<vmem>>, vector<1x64xbf16>,
    %c3_167 = arith.constant 3 : index
    %c0_168 = arith.constant 0 : index
    %126 = vector.load %arg22[%c3_167, %c0_168] : memref<9x64xbf16, #tpu.memory_space<vmem>>, vector<1x64xbf16>
    %c0_169 = arith.constant 0 : index
    %c192_170 = arith.constant 192 : index
    %127 = vector.load %arg26[%c0_169, %c192_170] : memref<1x576xbf16, #tpu.memory_space<vmem>>, vector<1x64xbf16>
    tpu.vector_store %arg26[%c0_169, %c192_170], %126 {strides = array<i32>} : memref<1x576xbf16, #tpu.memory_space<vmem>>, vector<1x64xbf16>,
    %c4_171 = arith.constant 4 : index
    %c0_172 = arith.constant 0 : index
    %128 = vector.load %arg22[%c4_171, %c0_172] : memref<9x64xbf16, #tpu.memory_space<vmem>>, vector<1x64xbf16>
    %c0_173 = arith.constant 0 : index
    %c256_174 = arith.constant 256 : index
    %129 = vector.load %arg26[%c0_173, %c256_174] : memref<1x576xbf16, #tpu.memory_space<vmem>>, vector<1x64xbf16>
    tpu.vector_store %arg26[%c0_173, %c256_174], %128 {strides = array<i32>} : memref<1x576xbf16, #tpu.memory_space<vmem>>, vector<1x64xbf16>,
    %c5_175 = arith.constant 5 : index
    %c0_176 = arith.constant 0 : index
    %130 = vector.load %arg22[%c5_175, %c0_176] : memref<9x64xbf16, #tpu.memory_space<vmem>>, vector<1x64xbf16>
    %c0_177 = arith.constant 0 : index
    %c320_178 = arith.constant 320 : index
    %131 = vector.load %arg26[%c0_177, %c320_178] : memref<1x576xbf16, #tpu.memory_space<vmem>>, vector<1x64xbf16>
    tpu.vector_store %arg26[%c0_177, %c320_178], %130 {strides = array<i32>} : memref<1x576xbf16, #tpu.memory_space<vmem>>, vector<1x64xbf16>,
    %c6_179 = arith.constant 6 : index
    %c0_180 = arith.constant 0 : index
    %132 = vector.load %arg22[%c6_179, %c0_180] : memref<9x64xbf16, #tpu.memory_space<vmem>>, vector<1x64xbf16>
    %c0_181 = arith.constant 0 : index
    %c384_182 = arith.constant 384 : index
    %133 = vector.load %arg26[%c0_181, %c384_182] : memref<1x576xbf16, #tpu.memory_space<vmem>>, vector<1x64xbf16>
    tpu.vector_store %arg26[%c0_181, %c384_182], %132 {strides = array<i32>} : memref<1x576xbf16, #tpu.memory_space<vmem>>, vector<1x64xbf16>,
    %c7_183 = arith.constant 7 : index
    %c0_184 = arith.constant 0 : index
    %134 = vector.load %arg22[%c7_183, %c0_184] : memref<9x64xbf16, #tpu.memory_space<vmem>>, vector<1x64xbf16>
    %c0_185 = arith.constant 0 : index
    %c448_186 = arith.constant 448 : index
    %135 = vector.load %arg26[%c0_185, %c448_186] : memref<1x576xbf16, #tpu.memory_space<vmem>>, vector<1x64xbf16>
    tpu.vector_store %arg26[%c0_185, %c448_186], %134 {strides = array<i32>} : memref<1x576xbf16, #tpu.memory_space<vmem>>, vector<1x64xbf16>,
    %c8_187 = arith.constant 8 : index
    %c0_188 = arith.constant 0 : index
    %136 = vector.load %arg22[%c8_187, %c0_188] : memref<9x64xbf16, #tpu.memory_space<vmem>>, vector<1x64xbf16>
    %c0_189 = arith.constant 0 : index
    %c512_190 = arith.constant 512 : index
    %137 = vector.load %arg26[%c0_189, %c512_190] : memref<1x576xbf16, #tpu.memory_space<vmem>>, vector<1x64xbf16>
    tpu.vector_store %arg26[%c0_189, %c512_190], %136 {strides = array<i32>} : memref<1x576xbf16, #tpu.memory_space<vmem>>, vector<1x64xbf16>,
    %c0_191 = arith.constant 0 : index
    %c0_192 = arith.constant 0 : index
    %138 = vector.load %arg26[%c0_191, %c0_192] : memref<1x576xbf16, #tpu.memory_space<vmem>>, vector<1x576xbf16>
    %c0_193 = arith.constant 0 : index
    %c0_194 = arith.constant 0 : index
    %139 = vector.load %arg16[%c0_193, %c0_194] : memref<576x512xbf16, #tpu.memory_space<vmem>>, vector<576x512xbf16>
    %cst_195 = arith.constant dense<0.000000e+00> : vector<1x512xf32>
    %140 = tpu.matmul %138, %139, %cst_195 {dimension_numbers = #tpu.dot_dimension_numbers<[1], [0], [0], [1], [0, 0, 1, 1], [], []>} : vector<1x576xbf16>, vector<576x512xbf16>, vector<1x512xf32> -> vector<1x512xf32>
    %c0_196 = arith.constant 0 : index
    %c0_197 = arith.constant 0 : index
    %141 = vector.load %arg17[%c0_196, %c0_197] : memref<1x512xf32, #tpu.memory_space<vmem>>, vector<1x512xf32>
    %142 = arith.addf %140, %141 : vector<1x512xf32>
    %cst_198 = arith.constant 0.000000e+00 : f32
    %143 = vector.broadcast %cst_198 : f32 to vector<1x512xf32>
    %144 = arith.maximumf %142, %143 : vector<1x512xf32>
    %145 = arith.truncf %144 : vector<1x512xf32> to vector<1x512xbf16>
    %c0_199 = arith.constant 0 : index
    %c0_200 = arith.constant 0 : index
    %c0_201 = arith.constant 0 : index
    %146 = vector.load %arg18[%c0_199, %c0_200, %c0_201] : memref<1x1x512xbf16, #tpu.memory_space<vmem>>, vector<1x1x512xbf16>
    %147 = vector.shape_cast %146 : vector<1x1x512xbf16> to vector<1x512xbf16>
    %148 = vector.shape_cast %145 : vector<1x512xbf16> to vector<1x1x512xbf16>
    tpu.vector_store %arg18[%c0_199, %c0_200, %c0_201], %148 {strides = array<i32>} : memref<1x1x512xbf16, #tpu.memory_space<vmem>>, vector<1x1x512xbf16>,
    return
  }
  func.func @transform_0(%arg0: i32) -> (i32, i32, i32) {
    %c0_i32 = arith.constant 0 : i32
    %c0_i32_0 = arith.constant 0 : i32
    %c0_i32_1 = arith.constant 0 : i32
    return %arg0, %c0_i32, %c0_i32_0 : i32, i32, i32
  }
  func.func @transform_1(%arg0: i32) -> (i32, i32) {
    %c0_i32 = arith.constant 0 : i32
    %c0_i32_0 = arith.constant 0 : i32
    %c0_i32_1 = arith.constant 0 : i32
    return %c0_i32, %c0_i32_0 : i32, i32
  }
  func.func @transform_2(%arg0: i32) -> (i32, i32) {
    %c0_i32 = arith.constant 0 : i32
    %c0_i32_0 = arith.constant 0 : i32
    %c0_i32_1 = arith.constant 0 : i32
    return %c0_i32, %c0_i32_0 : i32, i32
  }
  func.func @transform_3(%arg0: i32) -> (i32, i32) {
    %c0_i32 = arith.constant 0 : i32
    %c0_i32_0 = arith.constant 0 : i32
    %c0_i32_1 = arith.constant 0 : i32
    return %c0_i32, %c0_i32_0 : i32, i32
  }
  func.func @transform_4(%arg0: i32) -> (i32, i32) {
    %c0_i32 = arith.constant 0 : i32
    %c0_i32_0 = arith.constant 0 : i32
    %c0_i32_1 = arith.constant 0 : i32
    return %c0_i32, %c0_i32_0 : i32, i32
  }
  func.func @transform_5(%arg0: i32) -> (i32, i32) {
    %c0_i32 = arith.constant 0 : i32
    %c0_i32_0 = arith.constant 0 : i32
    %c0_i32_1 = arith.constant 0 : i32
    return %c0_i32, %c0_i32_0 : i32, i32
  }
  func.func @transform_6(%arg0: i32) -> (i32, i32) {
    %c0_i32 = arith.constant 0 : i32
    %c0_i32_0 = arith.constant 0 : i32
    %c0_i32_1 = arith.constant 0 : i32
    return %c0_i32, %c0_i32_0 : i32, i32
  }
  func.func @transform_7(%arg0: i32) -> (i32, i32) {
    %c0_i32 = arith.constant 0 : i32
    %c0_i32_0 = arith.constant 0 : i32
    %c0_i32_1 = arith.constant 0 : i32
    return %c0_i32, %c0_i32_0 : i32, i32
  }
  func.func @transform_8(%arg0: i32) -> (i32, i32) {
    %c0_i32 = arith.constant 0 : i32
    %c0_i32_0 = arith.constant 0 : i32
    %c0_i32_1 = arith.constant 0 : i32
    return %c0_i32, %c0_i32_0 : i32, i32
  }
  func.func @transform_9(%arg0: i32) -> (i32, i32) {
    %c0_i32 = arith.constant 0 : i32
    %c0_i32_0 = arith.constant 0 : i32
    %c0_i32_1 = arith.constant 0 : i32
    return %c0_i32, %c0_i32_0 : i32, i32
  }
  func.func @transform_10(%arg0: i32) -> (i32, i32) {
    %c0_i32 = arith.constant 0 : i32
    %c0_i32_0 = arith.constant 0 : i32
    %c0_i32_1 = arith.constant 0 : i32
    return %c0_i32, %c0_i32_0 : i32, i32
  }
  func.func @transform_11(%arg0: i32) -> (i32, i32) {
    %c0_i32 = arith.constant 0 : i32
    %c0_i32_0 = arith.constant 0 : i32
    %c0_i32_1 = arith.constant 0 : i32
    return %c0_i32, %c0_i32_0 : i32, i32
  }
  func.func @transform_12(%arg0: i32) -> (i32, i32) {
    %c0_i32 = arith.constant 0 : i32
    %c0_i32_0 = arith.constant 0 : i32
    %c0_i32_1 = arith.constant 0 : i32
    return %c0_i32, %c0_i32_0 : i32, i32
  }
  func.func @transform_13(%arg0: i32) -> (i32, i32) {
    %c0_i32 = arith.constant 0 : i32
    %c0_i32_0 = arith.constant 0 : i32
    %c0_i32_1 = arith.constant 0 : i32
    return %c0_i32, %c0_i32_0 : i32, i32
  }
  func.func @transform_14(%arg0: i32) -> (i32, i32) {
    %c0_i32 = arith.constant 0 : i32
    %c0_i32_0 = arith.constant 0 : i32
    %c0_i32_1 = arith.constant 0 : i32
    return %c0_i32, %c0_i32_0 : i32, i32
  }
  func.func @transform_15(%arg0: i32) -> (i32, i32) {
    %c0_i32 = arith.constant 0 : i32
    %c0_i32_0 = arith.constant 0 : i32
    %c0_i32_1 = arith.constant 0 : i32
    return %c0_i32, %c0_i32_0 : i32, i32
  }
  func.func @transform_16(%arg0: i32) -> (i32, i32) {
    %c0_i32 = arith.constant 0 : i32
    %c0_i32_0 = arith.constant 0 : i32
    %c0_i32_1 = arith.constant 0 : i32
    return %c0_i32, %c0_i32_0 : i32, i32
  }
  func.func @transform_17(%arg0: i32) -> (i32, i32, i32) {
    %c0_i32 = arith.constant 0 : i32
    %c0_i32_0 = arith.constant 0 : i32
    %c0_i32_1 = arith.constant 0 : i32
    return %arg0, %c0_i32, %c0_i32_0 : i32, i32, i32
  }
}

module attributes {stable_mosaic.version = 11 : i64} {
  func.func @_matmul_bias_act_kernel(%arg0: i32, %arg1: memref<2x512xbf16, #tpu.memory_space<vmem>>, %arg2: memref<512x10xbf16, #tpu.memory_space<vmem>>, %arg3: memref<1x10xf32, #tpu.memory_space<vmem>>, %arg4: memref<2x10xf32, #tpu.memory_space<vmem>>) attributes {dimension_semantics = [#tpu.dimension_semantics<parallel>], iteration_bounds = array<i64: 1>, scalar_prefetch = 0 : i64, scratch_operands = 0 : i64, tpu.core_type = #tpu.core_type<tc>, window_params = [{transform_indices = @transform_0, window_bounds = array<i64: 2, 512>}, {pipeline_mode = #tpu.pipeline_mode<synchronous>, transform_indices = @transform_1, window_bounds = array<i64: 512, 10>}, {pipeline_mode = #tpu.pipeline_mode<synchronous>, transform_indices = @transform_2, window_bounds = array<i64: 1, 10>}, {transform_indices = @transform_3, window_bounds = array<i64: 2, 10>}]} {
    %c0 = arith.constant 0 : index
    %c0_0 = arith.constant 0 : index
    %0 = vector.load %arg1[%c0, %c0_0] : memref<2x512xbf16, #tpu.memory_space<vmem>>, vector<2x512xbf16>
    %c0_1 = arith.constant 0 : index
    %c0_2 = arith.constant 0 : index
    %1 = vector.load %arg2[%c0_1, %c0_2] : memref<512x10xbf16, #tpu.memory_space<vmem>>, vector<512x10xbf16>
    %cst = arith.constant dense<0.000000e+00> : vector<2x10xf32>
    %2 = tpu.matmul %0, %1, %cst {dimension_numbers = #tpu.dot_dimension_numbers<[1], [0], [0], [1], [0, 0, 1, 1], [], []>} : vector<2x512xbf16>, vector<512x10xbf16>, vector<2x10xf32> -> vector<2x10xf32>
    %c0_3 = arith.constant 0 : index
    %c0_4 = arith.constant 0 : index
    %3 = vector.load %arg3[%c0_3, %c0_4] : memref<1x10xf32, #tpu.memory_space<vmem>>, vector<1x10xf32>
    %4 = vector.broadcast %3 : vector<1x10xf32> to vector<2x10xf32>
    %5 = arith.addf %2, %4 : vector<2x10xf32>
    %cst_5 = arith.constant 0.000000e+00 : f32
    %6 = vector.broadcast %cst_5 : f32 to vector<2x10xf32>
    %7 = arith.maximumf %5, %6 : vector<2x10xf32>
    %c0_6 = arith.constant 0 : index
    %c0_7 = arith.constant 0 : index
    %8 = vector.load %arg4[%c0_6, %c0_7] : memref<2x10xf32, #tpu.memory_space<vmem>>, vector<2x10xf32>
    tpu.vector_store %arg4[%c0_6, %c0_7], %7 {strides = array<i32>} : memref<2x10xf32, #tpu.memory_space<vmem>>, vector<2x10xf32>,
    return
  }
  func.func @transform_0(%arg0: i32) -> (i32, i32) {
    %c0_i32 = arith.constant 0 : i32
    %c0_i32_0 = arith.constant 0 : i32
    return %arg0, %c0_i32 : i32, i32
  }
  func.func @transform_1(%arg0: i32) -> (i32, i32) {
    %c0_i32 = arith.constant 0 : i32
    %c0_i32_0 = arith.constant 0 : i32
    %c0_i32_1 = arith.constant 0 : i32
    return %c0_i32, %c0_i32_0 : i32, i32
  }
  func.func @transform_2(%arg0: i32) -> (i32, i32) {
    %c0_i32 = arith.constant 0 : i32
    %c0_i32_0 = arith.constant 0 : i32
    %c0_i32_1 = arith.constant 0 : i32
    return %c0_i32, %c0_i32_0 : i32, i32
  }
  func.func @transform_3(%arg0: i32) -> (i32, i32) {
    %c0_i32 = arith.constant 0 : i32
    %c0_i32_0 = arith.constant 0 : i32
    return %arg0, %c0_i32 : i32, i32
  }
}

</mosaic_0001>

<bundles_post_ra>
// kernel: squeezenet_forward.5
= control target key start
LH: loop header
LB: loop body
LE: loop exit
PB: predicated region body
PF: predicated region fallthrough
CT: control target
= control target key end

     0   :  { %s739_s12 = smov 0   ;;  %s848_s0 = inlined_call_operand.vmem [shape: bf16[288,27], index: 0, kind: input, shape index: {}]   ;;  %s849_s1 = inlined_call_operand.vmem [shape: bf16[27,64], index: 1, kind: input, shape index: {}]   ;;  %s850_s2 = inlined_call_operand.vmem [shape: f32[1,64], index: 2, kind: input, shape index: {}]   ;;  %s851_s3 = inlined_call_operand.vmem [shape: bf16[288,64], index: 3, kind: output, shape index: {}]  }
   0x1 LB: > { %s565_s13 = sadd.s32 4294967295, %s714_s12   ;;  %p569_p0 = scmp.ge.s32.totalorder %s714_s12, 1  ;;  %s714_s12 = sphi %s739_s12, %s13_s12  }
   0x2   : > { %p138_p1 = scmp.lt.s32.totalorder %s714_s12, 3 }
   0x4   : > { %p139_p2 = pnand %p569_p0, %p138_p1 }
   0x5   : > { %s162_s16 = smul.u32 (!%p139_p2), 18, %s565_s13 }
   0x6   : > { %142 = sbr.rel (%p139_p2) target bundleno = 259 (0x103), region = 32 }
   0x7   : > { %p163_p3 = scmp.lt.s32.totalorder (!%p139_p2), %s162_s16, 35 }
   0xb   : > { %vm288_vm0 = vcmask 1044480   ;;  %v716_v0 = vmov 0.0   ;;  %v697_v1 = vld [vmem:[%s849_s1 + $0x8] sm:$0x3f]   ;;  %vm289_vm1 = vcmask 1045504   ;;  %v717_v2 = vmov 65535  }
   0xc   : > { %642 = vmatprep.subr.bf16.mxu0 %v716_v0  ;;  %682 = vmatprep.subr.bf16.mxu1 %v716_v0  ;;  %v290_v3 = vsel %vm288_vm0, 4294967295, %v717_v2  ;;  %vm718_vm2 = vmmov 0   ;;  %v698_v6 = vld [vmem:[%s849_s1] sm:$0xff]   ;;  %s853_s16 = smov (!%p163_p3, %s162_s16), 35  ;;  %vm260_vm3 = vcmask 220160   ;;  %vm490_vm4 = vcmask 519168  }
   0xd   : > { %v291_v4 = vsel %vm289_vm1, %v290_v3, 0  ;;  %646 = vmatprep.mubr.msk.bf16.mxu0 %vm718_vm2, %v716_v0  ;;  %666 = vmatprep.mubr.msk.bf16.mxu1 %vm718_vm2, %v716_v0  ;;  %s570_s19 = sshll.u32 %s853_s16, 2  ;;  %v782_v16 = vld [vmem:[%s850_s2] ss:$0 sm:$0xff] }
   0xe   : > { %v293_v5 = vand.u32 %v697_v1, %v291_v4  ;;  %s166_s22 = scalar_lea.vmem %s848_s0, %s570_s19  ;;  %s791_s27 = scalar_lea.vmem %s851_s3, %s570_s19 }
   0xf   : > { %v699_v7 = vld [vmem:[%s166_s22] sm:$0xff]   ;;  %v700_v8 = vld [vmem:[%s166_s22 + $0x28] sm:$0xff]   ;;  %v702_v10 = vld [vmem:[%s166_s22 + $0x30] sm:$0xff]  }
  0x10   : > { %643 = vmatpush3.bf16.msra.mxu0 %v293_v5  ;;  %684 = vmatpush3.bf16.msra.mxu1 %v293_v5  ;;  %v701_v9 = vld [vmem:[%s166_s22 + $0x8] sm:$0xff]   ;;  %v703_v11 = vld [vmem:[%s166_s22 + $0x10] sm:$0xff]   ;;  %v704_v12 = vld [vmem:[%s166_s22 + $0x38] sm:$0xff]  }
  0x11   : > { %644 = vmatprep.subr.bf16.mxu0 %v716_v0  ;;  %683 = vmatprep.subr.bf16.mxu1 %v716_v0  ;;  %v705_v13 = vld [vmem:[%s166_s22 + $0x18] sm:$0xff]   ;;  %v706_v14 = vld [vmem:[%s166_s22 + $0x40] sm:$0xff]  }
  0x12   : > { %v707_v15 = vld [vmem:[%s166_s22 + $0x20] sm:$0xff]  }
  0x14   : > { %645 = vmatpush3.bf16.msra.mxu0 %v698_v6  ;;  %685 = vmatpush3.bf16.msra.mxu1 %v698_v6 }
  0x17   : > { %647 = vmatmul.mubr.msk.bf16.vlgmr.msra.gmra.mxu0 %vm260_vm3, %v699_v7  ;;  %667 = vmatmul.mubr.msk.bf16.vlgmr.msra.gmra.mxu1 %vm260_vm3, %v700_v8 }
  0x18   : > { %650 = vmatprep.mubr.msk.bf16.mxu0 %vm718_vm2, %v716_v0  ;;  %670 = vmatprep.mubr.msk.bf16.mxu1 %vm718_vm2, %v716_v0 }
  0x1f   : > { %651 = vmatmul.mubr.msk.bf16.gmra.mxu0 %vm260_vm3, %v701_v9  ;;  %671 = vmatmul.mubr.msk.bf16.gmra.mxu1 %vm260_vm3, %v702_v10 }
  0x20   : > { %654 = vmatprep.mubr.msk.bf16.mxu0 %vm718_vm2, %v716_v0  ;;  %674 = vmatprep.mubr.msk.bf16.mxu1 %vm718_vm2, %v716_v0 }
  0x27   : > { %655 = vmatmul.mubr.msk.bf16.gmra.mxu0 %vm260_vm3, %v703_v11  ;;  %675 = vmatmul.mubr.msk.bf16.gmra.mxu1 %vm260_vm3, %v704_v12 }
  0x28   : > { %658 = vmatprep.mubr.msk.bf16.mxu0 %vm718_vm2, %v716_v0  ;;  %678 = vmatprep.mubr.msk.bf16.mxu1 %vm718_vm2, %v716_v0 }
  0x2f   : > { %659 = vmatmul.mubr.msk.bf16.gmra.mxu0 %vm260_vm3, %v705_v13  ;;  %679 = vmatmul.mubr.msk.bf16.gmra.mxu1 %vm260_vm3, %v706_v14 }
  0x30   : > { %662 = vmatprep.mubr.msk.bf16.mxu0 %vm718_vm2, %v716_v0 }
  0x37   : > { %663 = vmatmul.mubr.msk.bf16.gmra.mxu0 %vm260_vm3, %v707_v15 }
  0xd7   : > { %v329_v17 = vpop.f32.mrf.mxu0  ;;  %v369_v18 = vpop.f32.mrf.mxu1 }
  0xd8   : > { %v330_v19 = vadd.f32 %v782_v16, %v329_v17  ;;  %v370_v20 = vadd.f32 %v782_v16, %v369_v18 }
  0xd9   : > { %v648_v21 = vpop.f32.mrf.mxu0  ;;  %v668_v22 = vpop.f32.mrf.mxu1 }
  0xda   : > { %v400_v23 = vmax.f32 %v330_v19, 0.0  ;;  %v410_v24 = vmax.f32 %v370_v20, 0.0 }
  0xdb   : > { %v332_v25 = vpop.f32.mrf.mxu0  ;;  %v372_v26 = vpop.f32.mrf.mxu1 }
  0xdc   : > { %v613_v27 = vpack.c.bf16 %v400_v23, %v400_v23  ;;  %v623_v28 = vpack.c.bf16 %v410_v24, %v410_v24  ;;  %v333_v29 = vadd.f32 %v782_v16, %v332_v25  ;;  %v373_v30 = vadd.f32 %v782_v16, %v372_v26 }
  0xdd   : > { %v649_v31 = vpop.f32.mrf.mxu0  ;;  %v669_v32 = vpop.f32.mrf.mxu1 }
  0xde   : > { %491 = vst.msk [vmem:[%s791_s27] sm:$0xf] %vm490_vm4, %v613_v27  ;;  %501 = vst.msk [vmem:[%s791_s27 + $0x28] sm:$0xf] %vm490_vm4, %v623_v28  ;;  %v401_v33 = vmax.f32 %v333_v29, 0.0  ;;  %v411_v34 = vmax.f32 %v373_v30, 0.0 }
  0xdf   : > { %v337_v35 = vpop.f32.mrf.mxu0  ;;  %v377_v36 = vpop.f32.mrf.mxu1 }
  0xe0   : > { %v614_v37 = vpack.c.bf16 %v401_v33, %v401_v33  ;;  %v624_v38 = vpack.c.bf16 %v411_v34, %v411_v34  ;;  %v338_v39 = vadd.f32 %v782_v16, %v337_v35  ;;  %v378_v40 = vadd.f32 %v782_v16, %v377_v36 }
  0xe1   : > { %v652_v41 = vpop.f32.mrf.mxu0  ;;  %v672_v42 = vpop.f32.mrf.mxu1 }
  0xe2   : > { %492 = vst.msk [vmem:[%s791_s27 + $0x4] sm:$0xf] %vm490_vm4, %v614_v37  ;;  %502 = vst.msk [vmem:[%s791_s27 + $0x2c] sm:$0xf] %vm490_vm4, %v624_v38  ;;  %v402_v43 = vmax.f32 %v338_v39, 0.0  ;;  %v412_v44 = vmax.f32 %v378_v40, 0.0 }
  0xe3   : > { %v340_v45 = vpop.f32.mrf.mxu0  ;;  %v380_v46 = vpop.f32.mrf.mxu1 }
  0xe4   : > { %v615_v47 = vpack.c.bf16 %v402_v43, %v402_v43  ;;  %v625_v48 = vpack.c.bf16 %v412_v44, %v412_v44  ;;  %v341_v49 = vadd.f32 %v782_v16, %v340_v45  ;;  %v381_v50 = vadd.f32 %v782_v16, %v380_v46 }
  0xe5   : > { %v653_v51 = vpop.f32.mrf.mxu0  ;;  %v673_v52 = vpop.f32.mrf.mxu1 }
  0xe6   : > { %493 = vst.msk [vmem:[%s791_s27 + $0x8] sm:$0xf] %vm490_vm4, %v615_v47  ;;  %503 = vst.msk [vmem:[%s791_s27 + $0x30] sm:$0xf] %vm490_vm4, %v625_v48  ;;  %v403_v53 = vmax.f32 %v341_v49, 0.0  ;;  %v413_v54 = vmax.f32 %v381_v50, 0.0 }
  0xe7   : > { %v345_v55 = vpop.f32.mrf.mxu0  ;;  %v385_v56 = vpop.f32.mrf.mxu1 }
  0xe8   : > { %v616_v57 = vpack.c.bf16 %v403_v53, %v403_v53  ;;  %v626_v58 = vpack.c.bf16 %v413_v54, %v413_v54  ;;  %v346_v59 = vadd.f32 %v782_v16, %v345_v55  ;;  %v386_v60 = vadd.f32 %v782_v16, %v385_v56 }
  0xe9   : > { %v656_v61 = vpop.f32.mrf.mxu0  ;;  %v676_v62 = vpop.f32.mrf.mxu1 }
  0xea   : > { %494 = vst.msk [vmem:[%s791_s27 + $0xc] sm:$0xf] %vm490_vm4, %v616_v57  ;;  %504 = vst.msk [vmem:[%s791_s27 + $0x34] sm:$0xf] %vm490_vm4, %v626_v58  ;;  %v404_v63 = vmax.f32 %v346_v59, 0.0  ;;  %v414_v0 = vmax.f32 %v386_v60, 0.0 }
  0xeb   : > { %v348_v1 = vpop.f32.mrf.mxu0  ;;  %v388_v2 = vpop.f32.mrf.mxu1 }
  0xec   : > { %v617_v3 = vpack.c.bf16 %v404_v63, %v404_v63  ;;  %v627_v4 = vpack.c.bf16 %v414_v0, %v414_v0  ;;  %v349_v5 = vadd.f32 %v782_v16, %v348_v1  ;;  %v389_v6 = vadd.f32 %v782_v16, %v388_v2 }
  0xed   : > { %v657_v7 = vpop.f32.mrf.mxu0  ;;  %v677_v8 = vpop.f32.mrf.mxu1 }
  0xee   : > { %495 = vst.msk [vmem:[%s791_s27 + $0x10] sm:$0xf] %vm490_vm4, %v617_v3  ;;  %505 = vst.msk [vmem:[%s791_s27 + $0x38] sm:$0xf] %vm490_vm4, %v627_v4  ;;  %v405_v9 = vmax.f32 %v349_v5, 0.0  ;;  %v415_v10 = vmax.f32 %v389_v6, 0.0 }
  0xef   : > { %v353_v11 = vpop.f32.mrf.mxu0  ;;  %v393_v12 = vpop.f32.mrf.mxu1 }
  0xf0   : > { %v618_v13 = vpack.c.bf16 %v405_v9, %v405_v9  ;;  %v628_v14 = vpack.c.bf16 %v415_v10, %v415_v10  ;;  %v354_v15 = vadd.f32 %v782_v16, %v353_v11  ;;  %v394_v17 = vadd.f32 %v782_v16, %v393_v12 }
  0xf1   : > { %v660_v18 = vpop.f32.mrf.mxu0  ;;  %v680_v19 = vpop.f32.mrf.mxu1 }
  0xf2   : > { %496 = vst.msk [vmem:[%s791_s27 + $0x14] sm:$0xf] %vm490_vm4, %v618_v13  ;;  %506 = vst.msk [vmem:[%s791_s27 + $0x3c] sm:$0xf] %vm490_vm4, %v628_v14  ;;  %v406_v20 = vmax.f32 %v354_v15, 0.0  ;;  %v416_v21 = vmax.f32 %v394_v17, 0.0 }
  0xf3   : > { %v356_v22 = vpop.f32.mrf.mxu0  ;;  %v396_v23 = vpop.f32.mrf.mxu1 }
  0xf4   : > { %v619_v24 = vpack.c.bf16 %v406_v20, %v406_v20  ;;  %v629_v25 = vpack.c.bf16 %v416_v21, %v416_v21  ;;  %v357_v26 = vadd.f32 %v782_v16, %v356_v22  ;;  %v397_v27 = vadd.f32 %v782_v16, %v396_v23 }
  0xf5   : > { %v661_v28 = vpop.f32.mrf.mxu0  ;;  %v681_v29 = vpop.f32.mrf.mxu1 }
  0xf6   : > { %497 = vst.msk [vmem:[%s791_s27 + $0x18] sm:$0xf] %vm490_vm4, %v619_v24  ;;  %507 = vst.msk [vmem:[%s791_s27 + $0x40] sm:$0xf] %vm490_vm4, %v629_v25  ;;  %v407_v30 = vmax.f32 %v357_v26, 0.0  ;;  %v417_v31 = vmax.f32 %v397_v27, 0.0 }
  0xf7   : > { %v361_v32 = vpop.f32.mrf.mxu0 }
  0xf8   : > { %v620_v33 = vpack.c.bf16 %v407_v30, %v407_v30  ;;  %v630_v34 = vpack.c.bf16 %v417_v31, %v417_v31  ;;  %v362_v35 = vadd.f32 %v782_v16, %v361_v32 }
  0xf9   : > { %v664_v36 = vpop.f32.mrf.mxu0 }
  0xfa   : > { %498 = vst.msk [vmem:[%s791_s27 + $0x1c] sm:$0xf] %vm490_vm4, %v620_v33  ;;  %508 = vst.msk [vmem:[%s791_s27 + $0x44] sm:$0xf] %vm490_vm4, %v630_v34  ;;  %v408_v37 = vmax.f32 %v362_v35, 0.0 }
  0xfb   : > { %v364_v38 = vpop.f32.mrf.mxu0 }
  0xfc   : > { %v621_v39 = vpack.c.bf16 %v408_v37, %v408_v37  ;;  %v365_v40 = vadd.f32 %v782_v16, %v364_v38 }
  0xfd   : > { %v665_v41 = vpop.f32.mrf.mxu0 }
  0xfe   : > { %499 = vst.msk [vmem:[%s791_s27 + $0x20] sm:$0xf] %vm490_vm4, %v621_v39  ;;  %v409_v42 = vmax.f32 %v365_v40, 0.0 }
 0x100   : > { %v622_v43 = vpack.c.bf16 %v409_v42, %v409_v42 }
 0x102   : > { %500 = vst.msk [vmem:[%s791_s27 + $0x24] sm:$0xf] %vm490_vm4, %v622_v43 }
 0x103 PF: > { %s13_s12 = sadd.s32 1, %s714_s12  }
 0x104   : > { %p10_p4 = scmp.ge.s32.totalorder %s13_s12, 4  }
 0x106   :  { %12 = sbr.rel (!%p10_p4) target bundleno = 1 (0x1), region = 62 }

// kernel: squeezenet_forward.7
= control target key start
LH: loop header
LB: loop body
LE: loop exit
PB: predicated region body
PF: predicated region fallthrough
CT: control target
= control target key end

     0   :  { %s2655_s30 = smov 0   ;;  %s3379_s0 = inlined_call_operand.vmem [shape: bf16[2,9,128], index: 0, kind: input, shape index: {}]   ;;  %s3380_s1 = inlined_call_operand.vmem [shape: bf16[128,32], index: 1, kind: input, shape index: {}]   ;;  %s3381_s2 = inlined_call_operand.vmem [shape: f32[1,32], index: 2, kind: input, shape index: {}]   ;;  %s3382_s3 = inlined_call_operand.vmem [shape: bf16[288,256], index: 3, kind: input, shape index: {}]   ;;  %s3383_s4 = inlined_call_operand.vmem [shape: f32[1,256], index: 4, kind: input, shape index: {}]   ;;  %s3384_s5 = inlined_call_operand.vmem [shape: bf16[256,32], index: 5, kind: input, shape index: {}]   ;;  %s3385_s6 = inlined_call_operand.vmem [shape: f32[1,32], index: 6, kind: input, shape index: {}]   ;;  %s3386_s7 = inlined_call_operand.vmem [shape: bf16[288,256], index: 7, kind: input, shape index: {}]   ;;  %s3387_s8 = inlined_call_operand.vmem [shape: f32[1,256], index: 8, kind: input, shape index: {}]   ;;  %s3388_s9 = inlined_call_operand.vmem [shape: bf16[2,9,256], index: 9, kind: output, shape index: {}]  }
   0x1 LB: > { %s2232_s10 = sadd.s32 4294967295, %s2597_s30   ;;  %p2236_p0 = scmp.ge.s32.totalorder %s2597_s30, 1  ;;  %s2597_s30 = sphi %s2655_s30, %s19_s30  }
   0x2   : > { %p287_p1 = scmp.lt.s32.totalorder %s2597_s30, 3 }
   0x4   : > { %p288_p2 = pnand %p2236_p0, %p287_p1 }
   0x5   : > { %p323_p3 = scmp.lt.s32.totalorder (!%p288_p2), %s2232_s10, 1  ;;  %s2602_s29 = smov (!%p288_p2), 32  }
   0x6   : > { %291 = sbr.rel (%p288_p2) target bundleno = 1246 (0x4de), region = 56  ;;  %s2603_s13 = smov (!%p288_p2), 64  }
   0x7   : > { %s2604_s15 = smov (!%p288_p2), 96  }
   0xb   : > { %v2451_v0 = vld [vmem:[%s3380_s1 + $0x38] sm:$0xff]   ;;  %v2599_v1 = vmov 0.0   ;;  %v2452_v2 = vld [vmem:[%s3380_s1 + $0x30] sm:$0xff]   ;;  %vm2600_vm0 = vmmov 0   ;;  %vm457_vm1 = vcmask 257024   ;;  %s3465_s10 = smov (!%p323_p3, %s2232_s10), 1 }
   0xc   : > { %2417 = vmatprep.subr.bf16.mxu0 %v2599_v1  ;;  %2433 = vmatprep.mubr.msk.bf16.mxu0 %vm2600_vm0, %v2599_v1  ;;  %v2453_v3 = vld [vmem:[%s3380_s1 + $0x28] sm:$0xff]   ;;  %s2378_s17 = sshll.u32 %s3465_s10, 3  ;;  %v2601_v4 = vmov 0   ;;  %v2454_v5 = vld [vmem:[%s3380_s1 + $0x20] sm:$0xff]   ;;  %v2455_v6 = vld [vmem:[%s3380_s1 + $0x18] sm:$0xff]   ;;  %vm461_vm2 = vcmask 253952  }
   0xd   : > { %2418 = vmatpush3.bf16.msra.mxu0 %v2451_v0  ;;  %458 = vst.msk [vmem:[#allocation2] sm:$0xf] %vm457_vm1, %v2601_v4  ;;  %459 = vst.msk [vmem:[#allocation2 + $0x4] sm:$0xf] %vm457_vm1, %v2601_v4  ;;  %s327_s20 = scalar_lea.vmem %s3379_s0, %s2378_s17  ;;  %v2456_v10 = vld [vmem:[%s3380_s1 + $0x10] sm:$0xff]   ;;  %v2457_v14 = vld [vmem:[%s3380_s1 + $0x8] sm:$0xff]  }
   0xe   : > { %2419 = vmatprep.subr.bf16.mxu0 %v2599_v1  ;;  %460 = vst.msk [vmem:[#allocation2 + $0x8] sm:$0xf] %vm457_vm1, %v2601_v4  ;;  %1421 = vst.msk [vmem:[#allocation3] sm:$0xf] %vm457_vm1, %v2601_v4  ;;  %v2458_v16 = vld [vmem:[%s3380_s1] sm:$0xff]   ;;  %vm495_vm5 = vcmask 254976  }
   0xf   : > { %1422 = vst.msk [vmem:[#allocation3 + $0x4] sm:$0xf] %vm457_vm1, %v2601_v4  ;;  %1423 = vst.msk [vmem:[#allocation3 + $0x8] sm:$0xf] %vm457_vm1, %v2601_v4  ;;  %v2459_v17 = vld [vmem:[%s327_s20] sm:$0x1f]  }
  0x10   : > { %vm3395_vm3 = vsmask.f32 256  ;;  %v464_v18 = vld [vmem:[#allocation2 + $0xc] sm:$0x1]  ;;  %vm3394_vm6 = vsmask.f32 1280 }
  0x11   : > { %2420 = vmatpush3.bf16.msra.mxu0 %v2452_v2  ;;  %vm2702_vm4 = vmand %vm461_vm2, %vm3395_vm3  ;;  %v502_v22 = vld [vmem:[#allocation4] sm:$0x3]  ;;  %v1424_v24 = vld [vmem:[#allocation3 + $0xc] sm:$0x1]  ;;  %vm3392_vm8 = vcmask 257027   ;;  %vm479_vm9 = vcmask 256001  }
  0x12   : > { %2421 = vmatprep.subr.bf16.mxu0 %v2599_v1  ;;  %v465_v20 = vsel %vm2702_vm4, 0, %v464_v18  ;;  %vm2709_vm7 = vmand %vm495_vm5, %vm3394_vm6  ;;  %v1425_v26 = vsel %vm2702_vm4, 0, %v1424_v24  ;;  %v2460_v27 = vld [vmem:[%s3382_s3 + $0x110] ss:$8 sps:$4 sm:$0xff]   ;;  %v2462_v28 = vld [vmem:[%s3382_s3 + $0x114] ss:$8 sps:$4 sm:$0xff]  }
  0x13   : > { %466 = vst [vmem:[#allocation2 + $0xc] sm:$0x1] %v465_v20  ;;  %1426 = vst [vmem:[#allocation3 + $0xc] sm:$0x1] %v1425_v26  ;;  %v2463_v29 = vld [vmem:[%s3382_s3 + $0x100] ss:$8 sps:$4 sm:$0xff]  }
  0x14   : > { %v523_v7 = vld [vmem:[#allocation2] sm:$0x3]  ;;  %v2465_v30 = vld [vmem:[%s3382_s3 + $0x104] ss:$8 sps:$4 sm:$0xff]   ;;  %v896_v32 = vld [vmem:[#allocation4 + $0x14] sm:$0x1] }
  0x15   : > { %2422 = vmatpush3.bf16.msra.mxu0 %v2453_v3  ;;  %v525_v8 = vshrl.u32 %v523_v7, 16  ;;  %v528_v9 = vshll.u32 %v523_v7, 16  ;;  %v501_v23 = vld [vmem:[#allocation2] sm:$0x3]  ;;  %v893_v33 = vld [vmem:[#allocation2 + $0x8] sm:$0x8] }
  0x16   : > { %2423 = vmatprep.subr.bf16.mxu0 %v2599_v1  ;;  %v503_v25 = vsel %vm2709_vm7, %v501_v23, %v502_v22  ;;  %895 = vst.msk [vmem:[#allocation4 + $0x8] sm:$0x8] %vm3392_vm8, %v893_v33  ;;  %v2467_v35 = vld [vmem:[%s3382_s3 + $0x74] ss:$8 sps:$4 sm:$0xff]   ;;  %v2469_v36 = vld [vmem:[%s3382_s3 + $0x70] ss:$8 sps:$4 sm:$0xff]  }
  0x17   : > { %v527_v11 = vrot.slane %v525_v8, 4  ;;  %v530_v12 = vrot.slane %v528_v9, 5  ;;  %504 = vst [vmem:[#allocation4] sm:$0x3] %v503_v25  ;;  %v2470_v37 = vld [vmem:[%s3382_s3 + $0x64] ss:$8 sps:$4 sm:$0xff]   ;;  %1150 = vmatprep.subr.bf16.mxu1 %v2467_v35 }
  0x18   : > { %1151 = vmatpush1.bf16.msra.mxu1 %v2469_v36  ;;  %v2472_v38 = vld [vmem:[%s3382_s3 + $0x60] ss:$8 sps:$4 sm:$0xff]   ;;  %vm3393_vm10 = vsmask.f32 7942  ;;  %vm3390_vm11 = vcmask 1040384   ;;  %vm3389_vm12 = vcmask 1044484  }
  0x19   : > { %2424 = vmatpush3.bf16.msra.mxu0 %v2454_v5  ;;  %v531_v13 = vor.u32 %v530_v12, %v527_v11  ;;  %1152 = vmatprep.subr.bf16.mxu1 %v2470_v37  ;;  %v2241_v39 = vld [vmem:[%s3381_s2] ss:$0 sm:$0xff]  ;;  %v476_v50 = vld [vmem:[#allocation2 + $0x4] sm:$0x1]  ;;  %vm2748_vm13 = vmand %vm479_vm9, %vm3393_vm10  ;;  %vm543_vm15 = vsmask.f32 2304 }
  0x1a   : > { %2425 = vmatprep.subr.bf16.mxu0 %v2599_v1  ;;  %v894_v31 = vld [vmem:[#allocation2 + $0xc] sm:$0x1]  ;;  %v482_v52 = vld [vmem:[#allocation2 + $0x4] sm:$0x6]  ;;  %vm2755_vm14 = vmor %vm3390_vm11, %vm3389_vm12  ;;  %vm544_vm0 = vsmask.f32 6416 }
  0x1b   : > { %v532_v15 = vrot.slane %v531_v13, 4  ;;  %v897_v34 = vsel %vm2702_vm4, %v894_v31, %v896_v32  ;;  %v498_v61 = vld [vmem:[#allocation2 + $0x8] sm:$0x3]  ;;  %v714_v8 = vld [vmem:[#allocation4 + $0x4] sm:$0x3]  ;;  %vm536_vm1 = vcmask 517376   ;;  %vm2775_vm5 = vmor %vm543_vm15, %vm544_vm0 }
  0x1c   : > { %898 = vst [vmem:[#allocation4 + $0x14] sm:$0x1] %v897_v34  ;;  %1153 = vmatpush1.bf16.msra.mxu1 %v2472_v38  ;;  %vm733_vm2 = vsmask.f32 4368  ;;  %vm2789_vm15 = vmand %vm536_vm1, %vm3394_vm6  ;;  %vm607_vm0 = vcmask 1041408   ;;  %vm608_vm1 = vcmask 1045508  }
  0x1d   : > { %2426 = vmatpush3.bf16.msra.mxu0 %v2455_v6  ;;  %533 = vrot.lane.b32.xlu0 %v532_v15, %s2602_s29  ;;  %vm2783_vm9 = vmor %vm3395_vm3, %vm733_vm2  ;;  %vm676_vm12 = vsmask.f32 7440  ;;  %v2563_v51 = vld [vmem:[%s3386_s7 + $0x4] ss:$8 sps:$4 sm:$0xff]   ;;  %s2379_s18 = sshll.u32 %s3465_s10, 4 }
  0x1e   : > { %2427 = vmatprep.subr.bf16.mxu0 %v2599_v1  ;;  %v510_v0 = vld [vmem:[#allocation4] sm:$0x6]  ;;  %vm2817_vm2 = vmor %vm607_vm0, %vm608_vm1  ;;  %vm3391_vm0 = vcmask 261120   ;;  %vm675_vm1 = vsmask.f32 3328  ;;  %s332_s21 = scalar_lea.vmem %s3388_s9, %s2379_s18 }
  0x1f   : > { %vm2921_vm11 = vmor %vm675_vm1, %vm676_vm12  ;;  %vm563_vm12 = vcmask 518401  }
  0x20   : > { %vm2992_vm1 = vmand %vm563_vm12, %vm3393_vm10 }
  0x21   : > { %2428 = vmatpush3.bf16.msra.mxu0 %v2456_v10 }
  0x22   : > { %2429 = vmatprep.subr.bf16.mxu0 %v2599_v1 }
  0x25   : > { %2430 = vmatpush3.bf16.msra.mxu0 %v2457_v14 }
  0x26   : > { %2431 = vmatprep.subr.bf16.mxu0 %v2599_v1 }
  0x29   : > { %2432 = vmatpush3.bf16.msra.mxu0 %v2458_v16 }
  0x2a   : > { %1205 = vmatprep.subr.bf16.mxu0 %v2462_v28 }
  0x2c   : > { %2434 = vmatmul.mubr.bf16.vlgmr.msra.gmra.mxu0 %v2459_v17 }
  0x2d   : > { %1225 = vmatprep.mubr.bf16.mxu0 %v2601_v4  ;;  %1206 = vmatpush1.bf16.msra.mxu0 %v2460_v27 }
  0x2e   : > { %1207 = vmatprep.subr.bf16.mxu0 %v2465_v30  ;;  %v883_v30 = vld [vmem:[#allocation4 + $0x8] sm:$0x3] }
  0x31   : > { %1208 = vmatpush1.bf16.msra.mxu0 %v2463_v29 }
  0xec   : > { %v447_v40 = vpop.f32.mrf.mxu0 }
  0xed   : > { %v448_v41 = vadd.f32 %v2241_v39, %v447_v40 }
  0xee   : > { %v2435_v42 = vpop.f32.mrf.mxu0 }
  0xef   : > { %v454_v43 = vmax.f32 %v448_v41, 0.0  ;;  %v591_v41 = vld [vmem:[#allocation2] sm:$0x6] }
  0xf0   : > { %v450_v44 = vpop.f32.mrf.mxu0 }
  0xf1   : > { %v2380_v45 = vpack.c.bf16 %v454_v43, %v454_v43  ;;  %v451_v46 = vadd.f32 %v2241_v39, %v450_v44 }
  0xf2   : > { %v2436_v47 = vpop.f32.mrf.mxu0 }
  0xf3   : > { %v470_v48 = vrot.slane %v2380_v45, 5  ;;  %v455_v49 = vmax.f32 %v451_v46, 0.0  ;;  %v2253_v58 = vrot.slane %v2380_v45, 11 }
  0xf5   : > { %v471_v53 = vrot.slane %v470_v48, 4  ;;  %475 = vst.msk [vmem:[#allocation2] sm:$0x8] %vm3392_vm8, %v470_v48  ;;  %v456_v54 = vpack.c.bf16 %v455_v49, %v454_v43  ;;  %v2381_v55 = vpack.c.bf16 %v455_v49, %v455_v49  ;;  %v534_v43 = vpop.permute.xlu0 %533 }
  0xf7   : > { %v477_v57 = vsel %vm2702_vm4, %v471_v53, %v476_v50  ;;  %v483_v59 = vsel %vm2748_vm13, %v456_v54, %v482_v52  ;;  %v492_v60 = vrot.slane %v2381_v55, 7  ;;  %v2798_v50 = vld [vmem:[#allocation2 + $0x4] sm:$0x8]  ;;  %v2255_v54 = vrot.slane %v591_v41, 9  ;;  %v2479_v41 = vld [vmem:[%s3382_s3 + $0x34] ss:$8 sps:$4 sm:$0xff]  }
  0xf8   : > { %478 = vst [vmem:[#allocation2 + $0x4] sm:$0x1] %v477_v57  ;;  %484 = vst [vmem:[#allocation2 + $0x4] sm:$0x6] %v483_v59 }
  0xf9   : > { %v493_v62 = vsel %vm2755_vm14, %v2253_v58, %v492_v60 }
  0xfa   : > { %v499_v63 = vsel %vm2709_vm7, %v493_v62, %v498_v61 }
  0xfb   : > { %500 = vst [vmem:[#allocation2 + $0x8] sm:$0x3] %v499_v63 }
  0xfc   : > { %v541_v1 = vld [vmem:[#allocation2] sm:$0x8] }
  0xfd   : > { %v505_v2 = vld [vmem:[#allocation2] sm:$0xc]  ;;  %v547_v5 = vshrl.u32 %v541_v1, 16  ;;  %v550_v6 = vshll.u32 %v541_v1, 16 }
  0xfe   : > { %v705_v3 = vld [vmem:[#allocation2] sm:$0x8]  ;;  %v2254_v7 = vrot.slane %v505_v2, 9 }
  0xff   : > { %v731_v9 = vld [vmem:[#allocation2] sm:$0x8]  ;;  %v706_v10 = vld [vmem:[#allocation2 + $0x4] sm:$0x1]  ;;  %v878_v11 = vld [vmem:[#allocation2 + $0x4] sm:$0xc] }
 0x100   : > { %v542_v12 = vld [vmem:[#allocation2 + $0x4] sm:$0x1]  ;;  %v511_v13 = vsel %vm2748_vm13, %v2254_v7, %v510_v0  ;;  %v2259_v14 = vrot.slane %v705_v3, 11  ;;  %v711_v15 = vrot.slane %v706_v10, 7  ;;  %v549_v16 = vrot.slane %v547_v5, 5 }
 0x101   : > { %v552_v17 = vrot.slane %v550_v6, 6  ;;  %512 = vst [vmem:[#allocation4] sm:$0x6] %v511_v13  ;;  %v732_v18 = vld [vmem:[#allocation2 + $0x4] sm:$0x1]  ;;  %v2263_v20 = vrot.slane %v878_v11, 10 }
 0x102   : > { %v556_v22 = vshll.u32 %v542_v12, 16  ;;  %v736_v23 = vshrl.u32 %v731_v9, 16  ;;  %v741_v24 = vshrl.u32 %v732_v18, 16  ;;  %v754_v25 = vld [vmem:[#allocation2 + $0x4] sm:$0xc]  ;;  %v712_v26 = vsel %vm2755_vm14, %v2259_v14, %v711_v15 }
 0x103   : > { %v553_v27 = vor.u32 %v552_v17, %v549_v16  ;;  %v756_v28 = vshrl.u32 %v754_v25, 16  ;;  %v759_v29 = vshll.u32 %v754_v25, 16  ;;  %v715_v31 = vsel %vm2709_vm7, %v712_v26, %v714_v8  ;;  %v2779_v36 = vld [vmem:[#allocation2 + $0x4] sm:$0x6]  ;;  %v603_v55 = vld [vmem:[#allocation2] sm:$0x8] }
 0x104   : > { %v558_v33 = vrot.slane %v556_v22, 6  ;;  %v743_v34 = vrot.slane %v741_v24, 7  ;;  %v744_v35 = vshll.u32 %v732_v18, 16  ;;  %716 = vst [vmem:[#allocation4 + $0x4] sm:$0x3] %v715_v31  ;;  %v2260_v44 = vrot.slane %v736_v23, 11 }
 0x105   : > { %v554_v37 = vrot.slane %v553_v27, 4  ;;  %v758_v39 = vrot.slane %v756_v28, 4  ;;  %v761_v40 = vrot.slane %v759_v29, 5  ;;  %v570_v46 = vshrl.u32 %v2779_v36, 16  ;;  %v886_v57 = vld [vmem:[#allocation2 + $0x8] sm:$0x3] }
 0x106   : > { %v746_v45 = vor.u32 %v744_v35, %v743_v34  ;;  %v884_v49 = vsel %vm2709_vm7, %v2263_v20, %v883_v30  ;;  %v790_v59 = vld [vmem:[#allocation2 + $0x4] sm:$0x6]  ;;  %v639_v60 = vld [vmem:[#allocation2] sm:$0xc]  ;;  %v604_v63 = vld [vmem:[#allocation2 + $0x4] sm:$0x1] }
 0x107   : > { %v559_v47 = vsel %vm2775_vm5, %v554_v37, %v558_v33  ;;  %v762_v48 = vor.u32 %v761_v40, %v758_v39  ;;  %885 = vst [vmem:[#allocation4 + $0x8] sm:$0x3] %v884_v49  ;;  %v2806_v62 = vrot.slane %v570_v46, 6  ;;  %v2808_v0 = vld [vmem:[#allocation2 + $0x4] sm:$0xc]  ;;  %v888_v1 = vrot.slane %v886_v57, 7 }
 0x108   : > { %560 = vrot.lane.b32.xlu1 %v559_v47, %s2602_s29  ;;  %v538_v52 = vld [vmem:[#allocation4] sm:$0x3]  ;;  %v747_v53 = vsel %vm2783_vm9, %v2260_v44, %v746_v45  ;;  %v2261_v2 = vrot.slane %v790_v59, 9  ;;  %v2262_v3 = vrot.slane %v2798_v50, 10  ;;  %v2256_v5 = vrot.slane %v603_v55, 10 }
 0x109   : > { %v539_v58 = vsel %vm2789_vm15, %v534_v43, %v538_v52  ;;  %748 = vrot.lane.b32.xlu0 %v747_v53, %s2602_s29  ;;  %v763_v61 = vrot.slane %v762_v48, 4  ;;  %v612_v6 = vrot.slane %v604_v63, 6  ;;  %v624_v7 = vrot.slane %v2808_v0, 7  ;;  %v2814_v8 = vld [vmem:[#allocation2 + $0x8] sm:$0xc] }
 0x10a   : > { %540 = vst [vmem:[#allocation4] sm:$0x3] %v539_v58  ;;  %v641_v9 = vshrl.u32 %v639_v60, 16  ;;  %v577_v10 = vrot.slane %v2806_v62, 4  ;;  %v3422_v11 = vmov 0  ;;  %v644_v12 = vshll.u32 %v639_v60, 16 }
 0x10b   : > { %v3423_v11 = vsel %vm2817_vm2, 4294967295, %v3422_v11  ;;  %v828_v13 = vld [vmem:[#allocation2 + $0x4] sm:$0x6]  ;;  %v2473_v14 = vld [vmem:[%s3382_s3 + $0x54] ss:$8 sps:$4 sm:$0xff]   ;;  %v613_v24 = vsel %vm2817_vm2, %v2256_v5, %v612_v6  ;;  %v816_v25 = vrot.slane %v2814_v8, 7 }
 0x10c   : > { %764 = vrot.lane.b32.xlu1 %v763_v61, %s2602_s29  ;;  %v718_v16 = vld [vmem:[#allocation4 + $0x4] sm:$0x6]  ;;  %v2475_v17 = vld [vmem:[%s3382_s3 + $0x50] ss:$8 sps:$4 sm:$0xff]   ;;  %v801_v20 = vld [vmem:[#allocation2 + $0x8] sm:$0x1]  ;;  %1154 = vmatprep.subr.bf16.mxu1 %v2473_v14 }
 0x10d   : > { %595 = vrot.lane.b32.xlu0 %v2255_v54, %s2603_s13  ;;  %v2830_v22 = vld [vmem:[#allocation2 + $0x8] sm:$0x3]  ;;  %v2476_v23 = vld [vmem:[%s3382_s3 + $0x44] ss:$8 sps:$4 sm:$0xff]   ;;  %v643_v26 = vrot.slane %v641_v9, 6  ;;  %1155 = vmatpush1.bf16.msra.mxu1 %v2475_v17  ;;  %v646_v29 = vrot.slane %v644_v12, 7 }
 0x10e   : > { %v890_v15 = vld [vmem:[#allocation4 + $0x8] sm:$0x6]  ;;  %v717_v27 = vld [vmem:[#allocation2 + $0x4] sm:$0x6]  ;;  %v830_v30 = vshrl.u32 %v828_v13, 16  ;;  %v833_v31 = vshll.u32 %v828_v13, 16  ;;  %1156 = vmatprep.subr.bf16.mxu1 %v2476_v23 }
 0x10f   : > { %v891_v18 = vsel %vm2748_vm13, %v888_v1, %v890_v15  ;;  %v2478_v28 = vld [vmem:[%s3382_s3 + $0x40] ss:$8 sps:$4 sm:$0xff]   ;;  %v719_v33 = vsel %vm2748_vm13, %v717_v27, %v718_v16  ;;  %v513_v34 = vld [vmem:[#allocation2 + $0x4] sm:$0x6]  ;;  %v625_v35 = vrot.slane %v624_v7, 4  ;;  %v806_v37 = vrot.slane %v801_v20, 6 }
 0x110   : > { %794 = vrot.lane.b32.xlu1 %v2261_v2, %s2603_s13  ;;  %892 = vst [vmem:[#allocation4 + $0x8] sm:$0x6] %v891_v18  ;;  %v772_v39 = vshrl.u32 %v2830_v22, 16  ;;  %720 = vst [vmem:[#allocation4 + $0x4] sm:$0x6] %v719_v33  ;;  %v515_v40 = vrot.slane %v513_v34, 6  ;;  %v647_v48 = vor.u32 %v646_v29, %v643_v26 }
 0x111   : > { %580 = vrot.lane.b32.xlu0 %v577_v10, %s2602_s29  ;;  %v520_v43 = vld [vmem:[#allocation4 + $0xc] sm:$0x1]  ;;  %v817_v44 = vrot.slane %v816_v25, 4  ;;  %1157 = vmatpush1.bf16.msra.mxu1 %v2478_v28  ;;  %v2481_v46 = vld [vmem:[%s3382_s3 + $0x30] ss:$8 sps:$4 sm:$0xff]   ;;  %v832_v49 = vrot.slane %v830_v30, 5  ;;  %v807_v54 = vsel %vm2817_vm2, %v2262_v3, %v806_v37 }
 0x112   : > { %v516_v45 = vrot.slane %v515_v40, 4  ;;  %519 = vst.msk [vmem:[#allocation4] sm:$0x8] %vm3392_vm8, %v515_v40  ;;  %v721_v47 = vld [vmem:[#allocation2 + $0x8] sm:$0x3]  ;;  %v835_v50 = vrot.slane %v833_v31, 6  ;;  %1158 = vmatprep.subr.bf16.mxu1 %v2479_v41 }
 0x113   : > { %v2482_v52 = vld [vmem:[%s3382_s3 + $0x24] ss:$8 sps:$4 sm:$0xff]   ;;  %v723_v53 = vrot.slane %v721_v47, 5  ;;  %v2863_v55 = vrot.slane %v772_v39, 5  ;;  %v573_v57 = vshll.u32 %v2779_v36, 16  ;;  %v648_v36 = vrot.slane %v647_v48, 4 }
 0x114   : > { %614 = vrot.lane.b32.xlu1 %v613_v24, %s2603_s13  ;;  %v657_v58 = vld [vmem:[#allocation2 + $0x4] sm:$0x6]  ;;  %v521_v59 = vsel %vm2702_vm4, %v516_v45, %v520_v43  ;;  %v728_v60 = vld [vmem:[#allocation4 + $0x10] sm:$0x1]  ;;  %v2484_v63 = vld [vmem:[%s3382_s3 + $0x20] ss:$8 sps:$4 sm:$0xff]   ;;  %v836_v2 = vor.u32 %v835_v50, %v832_v49 }
 0x115   : > { %628 = vrot.lane.b32.xlu0 %v625_v35, %s2603_s13  ;;  %522 = vst [vmem:[#allocation4 + $0xc] sm:$0x1] %v521_v59  ;;  %727 = vst.msk [vmem:[#allocation4 + $0x4] sm:$0x8] %vm3392_vm8, %v723_v53  ;;  %1159 = vmatpush1.bf16.msra.mxu1 %v2481_v46  ;;  %v724_v1 = vrot.slane %v723_v53, 4  ;;  %v659_v3 = vshrl.u32 %v657_v58, 16 }
 0x116   : > { %1160 = vmatprep.subr.bf16.mxu1 %v2482_v52  ;;  %v2485_v5 = vld [vmem:[%s3382_s3 + $0x14] ss:$8 sps:$4 sm:$0xff]   ;;  %v779_v6 = vrot.slane %v2863_v55, 4  ;;  %v575_v9 = vrot.slane %v573_v57, 7  ;;  %v859_v12 = vld [vmem:[#allocation2 + $0x8] sm:$0xc] }
 0x117   : > { %v2466_v61 = vld [vmem:[#allocation4 + $0x8] ss:$12 sps:$4 sm:$0x1f]   ;;  %v729_v10 = vsel %vm2702_vm4, %v724_v1, %v728_v60  ;;  %v2487_v13 = vld [vmem:[%s3382_s3 + $0x10] ss:$8 sps:$4 sm:$0xff]   ;;  %v837_v14 = vrot.slane %v836_v2, 4 }
 0x118   : > { %808 = vrot.lane.b32.xlu1 %v807_v54, %s2603_s13  ;;  %2303 = vmatmul.mubr.msk.bf16.vlgmr.msra.gmra.mxu0 %vm3391_vm0, %v2466_v61  ;;  %730 = vst [vmem:[#allocation4 + $0x10] sm:$0x1] %v729_v10  ;;  %v661_v15 = vrot.slane %v659_v3, 7  ;;  %v2488_v16 = vld [vmem:[%s3382_s3 + $0x4] ss:$8 sps:$4 sm:$0xff]   ;;  %v576_v17 = vor.u32 %v575_v9, %v2806_v62  ;;  %v662_v18 = vshll.u32 %v657_v58, 16 }
 0x119   : > { %820 = vrot.lane.b32.xlu0 %v817_v44, %s2603_s13  ;;  %1161 = vmatpush1.bf16.msra.mxu1 %v2484_v63  ;;  %v861_v20 = vshrl.u32 %v859_v12, 16  ;;  %v844_v23 = vld [vmem:[#allocation2 + $0x8] sm:$0x3]  ;;  %v2491_v27 = vld [vmem:[%s3382_s3 + $0xf4] ss:$8 sps:$4 sm:$0xff]   ;;  %v775_v33 = vshll.u32 %v2830_v22, 16 }
 0x11a   : > { %1162 = vmatprep.subr.bf16.mxu1 %v2485_v5  ;;  %v2490_v24 = vld [vmem:[%s3382_s3] ss:$8 sps:$4 sm:$0xff]   ;;  %v664_v26 = vor.u32 %v662_v18, %v661_v15  ;;  %v846_v28 = vshrl.u32 %v844_v23, 16  ;;  %v849_v62 = vshll.u32 %v844_v23, 16  ;;  %v2493_v31 = vld [vmem:[%s3382_s3 + $0xf0] ss:$8 sps:$4 sm:$0xff]  }
 0x11b   : > { %v674_v29 = vld [vmem:[#allocation2 + $0x8] sm:$0x1]  ;;  %v863_v30 = vrot.slane %v861_v20, 7  ;;  %v2494_v34 = vld [vmem:[%s3382_s3 + $0xe4] ss:$8 sps:$4 sm:$0xff]   ;;  %v777_v41 = vrot.slane %v775_v33, 6 }
 0x11c   : > { %649 = vrot.lane.b32.xlu1 %v648_v36, %s2604_s15  ;;  %v688_v35 = vshrl.u32 %v674_v29, 16  ;;  %v848_v37 = vrot.slane %v846_v28, 6  ;;  %v851_v39 = vrot.slane %v849_v62, 7  ;;  %v684_v0 = vshll.u32 %v674_v29, 16  ;;  %v673_v40 = vld [vmem:[#allocation2 + $0x4] sm:$0x8] }
 0x11d   : > { %782 = vrot.lane.b32.xlu0 %v779_v6, %s2602_s29  ;;  %1163 = vmatpush1.bf16.msra.mxu1 %v2487_v13  ;;  %v2496_v22 = vld [vmem:[%s3382_s3 + $0xe0] ss:$8 sps:$4 sm:$0xff]   ;;  %v2497_v43 = vld [vmem:[%s3382_s3 + $0xd4] ss:$8 sps:$4 sm:$0xff]   ;;  %v864_v45 = vshll.u32 %v859_v12, 16  ;;  %v3424_v46 = vmov 0  ;;  %v778_v48 = vor.u32 %v777_v41, %v2863_v55 }
 0x11e   : > { %1164 = vmatprep.subr.bf16.mxu1 %v2488_v16  ;;  %v852_v8 = vor.u32 %v851_v39, %v848_v37  ;;  %v686_v44 = vrot.slane %v684_v0, 5  ;;  %v3425_v46 = vsel %vm2921_vm11, 4294967295, %v3424_v46  ;;  %v2499_v47 = vld [vmem:[%s3382_s3 + $0xd0] ss:$8 sps:$4 sm:$0xff]   ;;  %v2500_v49 = vld [vmem:[%s3382_s3 + $0xc4] ss:$8 sps:$4 sm:$0xff]  }
 0x11f   : > { %v866_v52 = vor.u32 %v864_v45, %v863_v30  ;;  %v2502_v53 = vld [vmem:[%s3382_s3 + $0xc0] ss:$8 sps:$4 sm:$0xff]   ;;  %v2503_v54 = vld [vmem:[%s3382_s3 + $0xb4] ss:$8 sps:$4 sm:$0xff]   ;;  %v2505_v55 = vld [vmem:[%s3382_s3 + $0xb0] ss:$8 sps:$4 sm:$0xff]  }
 0x120   : > { %838 = vrot.lane.b32.xlu1 %v837_v14, %s2604_s15  ;;  %v923_v57 = vld [vmem:[%s3382_s3 + $0xa0] sm:$0xff]  ;;  %v924_v58 = vld [vmem:[%s3382_s3 + $0xa8] sm:$0xff]  ;;  %v2508_v61 = vld [vmem:[%s3382_s3 + $0x94] ss:$8 sps:$4 sm:$0xff]   ;;  %v3426_v14 = vmov 0  ;;  %vm598_vm0 = vcmask 779776  }
 0x121   : > { %578 = vrot.lane.b32.xlu0 %v576_v17, %s2602_s29  ;;  %1165 = vmatpush1.bf16.msra.mxu1 %v2490_v24  ;;  %v2506_v59 = vld [vmem:[%s3382_s3 + $0xa4] ss:$8 sps:$4 sm:$0xff]   ;;  %v2287_v60 = vcombine.low %v923_v57, %v924_v58  ;;  %v2510_v63 = vld [vmem:[%s3382_s3 + $0x90] ss:$8 sps:$4 sm:$0xff]   ;;  %v2513_v36 = vld [vmem:[%s3382_s3 + $0x80] ss:$8 sps:$4 sm:$0xff]  }
 0x122   : > { %1166 = vmatprep.subr.bf16.mxu1 %v2491_v27  ;;  %v2511_v1 = vld [vmem:[%s3382_s3 + $0x84] ss:$8 sps:$4 sm:$0xff]   ;;  %v2517_v2 = vld [vmem:[%s3384_s5 + $0x78] sm:$0xff]   ;;  %v2519_v5 = vld [vmem:[%s3384_s5 + $0x70] sm:$0xff]   ;;  %v3427_v14 = vsel %vm2992_vm1, 4294967295, %v3426_v14  ;;  %vm586_vm8 = vcmask 516352  }
 0x123   : > { %v2518_v3 = vld [vmem:[%s3384_s5 + $0x38] sm:$0xff]   ;;  %2395 = vmatprep.subr.bf16.mxu0 %v2517_v2  ;;  %v2520_v6 = vld [vmem:[%s3384_s5 + $0x30] sm:$0xff]   ;;  %v2521_v9 = vld [vmem:[%s3384_s5 + $0x68] sm:$0xff]   ;;  %v3428_v27 = vmov 0  ;;  %v3430_v28 = vmov 0 }
 0x124   : > { %665 = vrot.lane.b32.xlu1 %v664_v26, %s2604_s15  ;;  %2396 = vmatpush3.bf16.msra.mxu0 %v2518_v3  ;;  %v2522_v10 = vld [vmem:[%s3384_s5 + $0x28] sm:$0xff]   ;;  %v2523_v12 = vld [vmem:[%s3384_s5 + $0x60] sm:$0xff]   ;;  %vm3001_vm12 = vmand %vm598_vm0, %vm3394_vm6  ;;  %vm634_vm0 = vcmask 778752   ;;  %vm3432_vm6 = vsmask.f32 7942 }
 0x125   : > { %626 = vrot.lane.b32.xlu0 %v624_v7, %s2603_s13  ;;  %v867_v7 = vrot.slane %v863_v30, 4  ;;  %1167 = vmatpush2.bf16.msra.mxu1 %v2493_v31  ;;  %v2524_v13 = vld [vmem:[%s3384_s5 + $0x20] sm:$0xff]   ;;  %v3429_v27 = vsel %vm3001_vm12, 4294967295, %v3428_v27  ;;  %vm3006_vm10 = vmand %vm586_vm8, %vm3395_vm3  ;;  %v588_v31 = vld [vmem:[#allocation4 + $0xc] sm:$0x1]  ;;  %vm617_vm8 = vcmask 780801  }
 0x126   : > { %1168 = vmatprep.subr.bf16.mxu1 %v2494_v34  ;;  %2397 = vmatprep.subr.bf16.mxu0 %v2519_v5  ;;  %v565_v15 = vld [vmem:[#allocation4] sm:$0x6]  ;;  %v751_v20 = vld [vmem:[#allocation4 + $0x4] sm:$0x3]  ;;  %v3431_v28 = vsel %vm3006_vm10, 4294967295, %v3430_v28  ;;  %vm3017_vm3 = vmand %vm617_vm8, %vm3432_vm6  ;;  %vm652_vm6 = vcmask 1042176  }
 0x127   : > { %vm3438_vm8 = vsmask.f32 1280 }
 0x128   : > { %818 = vrot.lane.b32.xlu1 %v816_v25, %s2603_s13  ;;  %v679_v25 = vshrl.u32 %v673_v40, 16  ;;  %2398 = vmatpush3.bf16.msra.mxu0 %v2520_v6 }
 0x129   : > { %694 = vrot.lane.b32.xlu0 %v688_v35, %s2604_s15  ;;  %1169 = vmatpush2.bf16.msra.mxu1 %v2496_v22 }
 0x12a   : > { %1170 = vmatprep.subr.bf16.mxu1 %v2497_v43  ;;  %v687_v50 = vsel %vm2921_vm11, %v679_v25, %v686_v44  ;;  %2399 = vmatprep.subr.bf16.mxu0 %v2521_v9  ;;  %vm3435_vm11 = vsmask.f32 256 }
 0x12b   : > { %vm3022_vm2 = vmand %vm634_vm0, %vm3435_vm11  ;;  %vm3403_vm11 = vcmask 519427  }
 0x12c   : > { %870 = vrot.lane.b32.xlu1 %v867_v7, %s2604_s15  ;;  %2400 = vmatpush3.bf16.msra.mxu0 %v2522_v10  ;;  %v3433_v7 = vmov 0  ;;  %vm3035_vm0 = vmand %vm652_vm6, %vm3438_vm8  ;;  %vm668_vm6 = vcmask 1043201   ;;  %vm3441_vm8 = vsmask.f32 256 }
 0x12d   : > { %853 = vrot.lane.b32.xlu0 %v852_v8, %s2604_s15  ;;  %1171 = vmatpush2.bf16.msra.mxu1 %v2499_v47  ;;  %v3434_v7 = vsel %vm3017_vm3, 4294967295, %v3433_v7 }
 0x12e   : > { %1172 = vmatprep.subr.bf16.mxu1 %v2500_v49  ;;  %2401 = vmatprep.subr.bf16.mxu0 %v2523_v12  ;;  %v787_v49 = vld [vmem:[#allocation4 + $0x10] sm:$0x1] }
 0x130   : > { %780 = vrot.lane.b32.xlu1 %v778_v48, %s2602_s29  ;;  %2402 = vmatpush3.bf16.msra.mxu0 %v2524_v13 }
 0x131   : > { %692 = vrot.lane.b32.xlu0 %v687_v50, %s2604_s15  ;;  %1173 = vmatpush2.bf16.msra.mxu1 %v2502_v53 }
 0x132   : > { %1174 = vmatprep.subr.bf16.mxu1 %v2503_v54 }
 0x134   : > { %868 = vrot.lane.b32.xlu1 %v866_v52, %s2604_s15 }
 0x135   : > { %1175 = vmatpush2.bf16.msra.mxu1 %v2505_v55 }
 0x136   : > { %1176 = vmatprep.subr.bf16.mxu1 %v2506_v59 }
 0x139   : > { %1177 = vmatpush2.bf16.msra.mxu1 %v2287_v60 }
 0x13a   : > { %1178 = vmatprep.subr.bf16.mxu1 %v2508_v61 }
 0x13d   : > { %1179 = vmatpush2.bf16.msra.mxu1 %v2510_v63 }
 0x13e   : > { %1180 = vmatprep.subr.bf16.mxu1 %v2511_v1 }
 0x141   : > { %1181 = vmatpush2.bf16.msra.mxu1 %v2513_v36 }
 0x17a   : > { %v561_v16 = vpop.permute.xlu1 %560 }
 0x17b   : > { %v566_v17 = vsel %vm2992_vm1, %v561_v16, %v565_v15  ;;  %v749_v18 = vpop.permute.xlu0 %748 }
 0x17c   : > { %567 = vst [vmem:[#allocation4] sm:$0x6] %v566_v17  ;;  %v752_v23 = vsel %vm2789_vm15, %v749_v18, %v751_v20 }
 0x17d   : > { %753 = vst [vmem:[#allocation4 + $0x4] sm:$0x3] %v752_v23 }
 0x17e   : > { %v765_v24 = vpop.permute.xlu1 %764 }
 0x17f   : > { %v596_v26 = vpop.permute.xlu0 %595 }
 0x182   : > { %v795_v62 = vpop.permute.xlu1 %794 }
 0x183   : > { %v600_v29 = vld [vmem:[#allocation4] sm:$0x3]  ;;  %v581_v30 = vpop.permute.xlu0 %580 }
 0x184   : > { %v767_v33 = vld [vmem:[#allocation4 + $0x4] sm:$0x6]  ;;  %v601_v34 = vsel %vm3001_vm12, %v596_v26, %v600_v29  ;;  %v589_v35 = vsel %vm3006_vm10, %v581_v30, %v588_v31 }
 0x185   : > { %v768_v37 = vsel %vm2992_vm1, %v765_v24, %v767_v33  ;;  %602 = vst [vmem:[#allocation4] sm:$0x3] %v601_v34  ;;  %590 = vst [vmem:[#allocation4 + $0xc] sm:$0x1] %v589_v35  ;;  %vm700_vm1 = vcmask 1041152   ;;  %v2525_v34 = vld [vmem:[%s3384_s5 + $0x58] sm:$0xff]  }
 0x186   : > { %769 = vst [vmem:[#allocation4 + $0x4] sm:$0x6] %v768_v37  ;;  %v615_v39 = vpop.permute.xlu1 %614  ;;  %v2526_v35 = vld [vmem:[%s3384_s5 + $0x18] sm:$0xff]   ;;  %2403 = vmatprep.subr.bf16.mxu0 %v2525_v34  ;;  %v2527_v37 = vld [vmem:[%s3384_s5 + $0x50] sm:$0xff]  }
 0x187   : > { %v629_v0 = vpop.permute.xlu0 %628  ;;  %2404 = vmatpush3.bf16.msra.mxu0 %v2526_v35  ;;  %v2533_v35 = vld [vmem:[%s3386_s7 + $0x110] ss:$8 sps:$4 sm:$0xff]  }
 0x188   : > { %2405 = vmatprep.subr.bf16.mxu0 %v2527_v37  ;;  %v2535_v37 = vld [vmem:[%s3386_s7 + $0x114] ss:$8 sps:$4 sm:$0xff]  }
 0x18a   : > { %v809_v22 = vpop.permute.xlu1 %808 }
 0x18b   : > { %v821_v41 = vpop.permute.xlu0 %820 }
 0x18c   : > { %v619_v43 = vld [vmem:[#allocation4] sm:$0x6]  ;;  %v636_v8 = vld [vmem:[#allocation4 + $0xc] sm:$0x1] }
 0x18d   : > { %v797_v25 = vld [vmem:[#allocation4 + $0x4] sm:$0x3]  ;;  %v620_v44 = vsel %vm3017_vm3, %v615_v39, %v619_v43  ;;  %v637_v45 = vsel %vm3022_vm2, %v629_v0, %v636_v8  ;;  %v2528_v39 = vld [vmem:[%s3384_s5 + $0x10] sm:$0xff]   ;;  %v2529_v0 = vld [vmem:[%s3384_s5 + $0x48] sm:$0xff]  }
 0x18e   : > { %v798_v47 = vsel %vm3001_vm12, %v795_v62, %v797_v25  ;;  %621 = vst [vmem:[#allocation4] sm:$0x6] %v620_v44  ;;  %638 = vst [vmem:[#allocation4 + $0xc] sm:$0x1] %v637_v45  ;;  %v650_v48 = vpop.permute.xlu1 %649  ;;  %vm632_vm12 = vcmask 781827   ;;  %2406 = vmatpush3.bf16.msra.mxu0 %v2528_v39  ;;  %v2532_v44 = vld [vmem:[%s3384_s5] sm:$0xff]  }
 0x18f   : > { %799 = vst [vmem:[#allocation4 + $0x4] sm:$0x3] %v798_v47  ;;  %v783_v50 = vpop.permute.xlu0 %782  ;;  %2407 = vmatprep.subr.bf16.mxu0 %v2529_v0  ;;  %v1473_v43 = vld [vmem:[#allocation3] sm:$0x3]  ;;  %v2538_v39 = vld [vmem:[%s3386_s7 + $0x104] ss:$8 sps:$4 sm:$0xff]  }
 0x190   : > { %v788_v52 = vsel %vm3006_vm10, %v783_v50, %v787_v49  ;;  %v1475_v8 = vshrl.u32 %v1473_v43, 16  ;;  %v1478_v25 = vshll.u32 %v1473_v43, 16  ;;  %v941_v50 = vlaneseq  ;;  %v1811_v0 = vld [vmem:[#allocation3 + $0x8] sm:$0x8] }
 0x191   : > { %789 = vst [vmem:[#allocation4 + $0x10] sm:$0x1] %v788_v52 }
 0x192   : > { %v839_v53 = vpop.permute.xlu1 %838  ;;  %v1477_v45 = vrot.slane %v1475_v8, 4  ;;  %v1480_v47 = vrot.slane %v1478_v25, 5  ;;  %v3096_v52 = vshrl.u32 %v941_v50, 7  ;;  %v2540_v8 = vld [vmem:[%s3386_s7 + $0x70] ss:$8 sps:$4 sm:$0xff]  }
 0x193   : > { %v579_v55 = vpop.permute.xlu0 %578  ;;  %v2542_v25 = vld [vmem:[%s3386_s7 + $0x74] ss:$8 sps:$4 sm:$0xff]  }
 0x194   : > { %585 = vst.msk [vmem:[#allocation4] sm:$0x8] %vm3403_vm11, %v579_v55  ;;  %vm3048_vm11 = vmand %vm700_vm1, %vm3441_vm8  ;;  %vm3447_vm1 = vcmask 519427   ;;  %2067 = vmatprep.subr.bf16.mxu1 %v2542_v25 }
 0x195   : > { %v654_v57 = vld [vmem:[#allocation4] sm:$0x3]  ;;  %v702_v6 = vld [vmem:[#allocation4 + $0xc] sm:$0x1] }
 0x196   : > { %v811_v58 = vld [vmem:[#allocation4 + $0x4] sm:$0x6]  ;;  %v655_v59 = vsel %vm3035_vm0, %v650_v48, %v654_v57  ;;  %v666_v60 = vpop.permute.xlu1 %665  ;;  %v1481_v48 = vor.u32 %v1480_v47, %v1477_v45  ;;  %v943_v57 = vsub.s32 0, %v3096_v52  ;;  %v2543_v45 = vld [vmem:[%s3386_s7 + $0x60] ss:$8 sps:$4 sm:$0xff]  }
 0x197   : > { %v812_v61 = vsel %vm3017_vm3, %v809_v22, %v811_v58  ;;  %656 = vst [vmem:[#allocation4] sm:$0x3] %v655_v59  ;;  %v627_v63 = vpop.permute.xlu0 %626  ;;  %vm3444_vm3 = vsmask.f32 7942  ;;  %v2530_v22 = vld [vmem:[%s3384_s5 + $0x8] sm:$0xff]  }
 0x198   : > { %813 = vst [vmem:[#allocation4 + $0x4] sm:$0x6] %v812_v61  ;;  %v825_v1 = vld [vmem:[#allocation4 + $0x10] sm:$0x1]  ;;  %633 = vst.msk [vmem:[#allocation4] sm:$0x8] %vm632_vm12, %v627_v63  ;;  %2408 = vmatpush3.bf16.msra.mxu0 %v2530_v22 }
 0x199   : > { %v826_v36 = vsel %vm3022_vm2, %v821_v41, %v825_v1  ;;  %vm3053_vm10 = vmand %vm668_vm6, %vm3444_vm3  ;;  %vm698_vm3 = vcmask 1044227   ;;  %v2531_v41 = vld [vmem:[%s3384_s5 + $0x40] sm:$0xff]   ;;  %v1482_v49 = vrot.slane %v1481_v48, 4  ;;  %v1812_v22 = vld [vmem:[#allocation3 + $0xc] sm:$0x1]  ;;  %vm3448_vm6 = vcmask 257027  }
 0x19a   : > { %827 = vst [vmem:[#allocation4 + $0x10] sm:$0x1] %v826_v36  ;;  %v819_v3 = vpop.permute.xlu1 %818  ;;  %2409 = vmatprep.subr.bf16.mxu0 %v2531_v41  ;;  %v939_v58 = vld [vmem:[%s3383_s4] sm:$0x3]  ;;  %v1814_v41 = vld [vmem:[#allocation5 + $0x14] sm:$0x1]  ;;  %vm3449_vm8 = vmmov %vm3448_vm6 }
 0x19b   : > { %v695_v5 = vpop.permute.xlu0 %694  ;;  %1483 = vrot.lane.b32.xlu0 %v1482_v49, %s2602_s29  ;;  %v944_v61 = vrot.slane %v939_v58, %v943_v57  ;;  %1813 = vst.msk [vmem:[#allocation5 + $0x8] sm:$0x8] %vm3448_vm6, %v1811_v0  ;;  %v1815_v43 = vsel %vm2702_vm4, %v1812_v22, %v1814_v41  ;;  %v2304_v48 = vld [vmem:[%s3385_s6] ss:$0 sm:$0xff] }
 0x19c   : > { %v703_v10 = vsel %vm3048_vm11, %v695_v5, %v702_v6  ;;  %2410 = vmatpush3.bf16.msra.mxu0 %v2532_v44  ;;  %1816 = vst [vmem:[#allocation5 + $0x14] sm:$0x1] %v1815_v43  ;;  %v2545_v44 = vld [vmem:[%s3386_s7 + $0x64] ss:$8 sps:$4 sm:$0xff]  }
 0x19d   : > { %704 = vst [vmem:[#allocation4 + $0xc] sm:$0x1] %v703_v10  ;;  %2122 = vmatprep.subr.bf16.mxu0 %v2535_v37 }
 0x19e   : > { %v670_v12 = vld [vmem:[#allocation4] sm:$0x6]  ;;  %v871_v13 = vpop.permute.xlu1 %870 }
 0x19f   : > { %v841_v15 = vld [vmem:[#allocation4 + $0x4] sm:$0x3]  ;;  %v671_v16 = vsel %vm3053_vm10, %v666_v60, %v670_v12  ;;  %v854_v17 = vpop.permute.xlu0 %853 }
 0x1a0   : > { %v842_v18 = vsel %vm3035_vm0, %v839_v53, %v841_v15  ;;  %672 = vst [vmem:[#allocation4] sm:$0x6] %v671_v16  ;;  %v947_v53 = vsub.s32 1, %v3096_v52 }
 0x1a1   : > { %843 = vst [vmem:[#allocation4 + $0x4] sm:$0x3] %v842_v18  ;;  %v875_v20 = vld [vmem:[#allocation4 + $0x10] sm:$0x1] }
 0x1a2   : > { %v876_v23 = vsel %vm3048_vm11, %v871_v13, %v875_v20  ;;  %v781_v24 = vpop.permute.xlu1 %780  ;;  %v948_v59 = vrot.slane %v939_v58, %v947_v53 }
 0x1a3   : > { %877 = vst [vmem:[#allocation4 + $0x10] sm:$0x1] %v876_v23  ;;  %786 = vst.msk [vmem:[#allocation4 + $0x4] sm:$0x8] %vm3447_vm1, %v781_v24  ;;  %v693_v26 = vpop.permute.xlu0 %692  ;;  %vm3456_vm1 = vnez %v3431_v28 }
 0x1a4   : > { %824 = vst.msk [vmem:[#allocation4 + $0x4] sm:$0x8] %vm632_vm12, %v819_v3 }
 0x1a5   : > { %699 = vst.msk [vmem:[#allocation4] sm:$0x8] %vm698_vm3, %v693_v26 }
 0x1a6   : > { %v869_v62 = vpop.permute.xlu1 %868 }
 0x1a7   : > { %874 = vst.msk [vmem:[#allocation4 + $0x4] sm:$0x8] %vm698_vm3, %v869_v62 }
 0x1a8   : > { %v856_v29 = vld [vmem:[#allocation4 + $0x4] sm:$0x6] }
 0x1a9   : > { %v857_v30 = vsel %vm3053_vm10, %v854_v17, %v856_v29 }
 0x1aa   : > { %858 = vst [vmem:[#allocation4 + $0x4] sm:$0x6] %v857_v30 }
 0x1ac   : > { %v2514_v31 = vld [vmem:[#allocation4] ss:$12 sps:$4 sm:$0x1f]  }
 0x1b1   : > { %v2516_v33 = vld [vmem:[#allocation4 + $0x4] ss:$12 sps:$4 sm:$0x1f]  }
 0x1b2   : > { %1182 = vmatprep.mubr.bf16.mxu1 %v2516_v33  ;;  %v1452_v33 = vld [vmem:[#allocation5] sm:$0x3] }
 0x1b3   : > { %1183 = vmatmul.mubr.bf16.vlgmr.msra.gmra.mxu1 %v2514_v31  ;;  %v1451_v31 = vld [vmem:[#allocation3] sm:$0x3] }
 0x1b4   : > { %v1453_v34 = vsel %vm2709_vm7, %v1451_v31, %v1452_v33  ;;  %2068 = vmatpush1.bf16.msra.mxu1 %v2540_v8  ;;  %v1801_v8 = vld [vmem:[#allocation5 + $0x8] sm:$0x3] }
 0x1b5   : > { %1454 = vst [vmem:[#allocation5] sm:$0x3] %v1453_v34  ;;  %2069 = vmatprep.subr.bf16.mxu1 %v2545_v44 }
 0x1b8   : > { %2070 = vmatpush1.bf16.msra.mxu1 %v2543_v45 }
 0x1d8   : > { %v1227_v55 = vpop.f32.mrf.mxu0 }
 0x1da   : > { %v1229_v60 = vpop.f32.mrf.mxu0 }
 0x1dc   : > { %v1231_v3 = vpop.f32.mrf.mxu0 }
 0x1de   : > { %v1233_v17 = vpop.f32.mrf.mxu0 }
 0x273   : > { %v1184_v63 = vpop.f32.mrf.mxu1 }
 0x274   : > { %v1185_v5 = vadd.f32 %v1184_v63, %v944_v61 }
 0x275   : > { %v1186_v1 = vpop.f32.mrf.mxu1 }
 0x276   : > { %v1187_v36 = vadd.f32 %v1186_v1, %v948_v59  ;;  %v1228_v18 = vadd.f32 %v1227_v55, %v1185_v5  ;;  %v1435_v5 = vld [vmem:[#allocation3 + $0x4] sm:$0x1] }
 0x277   : > { %v1188_v6 = vpop.f32.mrf.mxu1 }
 0x278   : > { %v1189_v10 = vadd.f32 %v1188_v6, %v944_v61  ;;  %v1230_v13 = vadd.f32 %v1229_v60, %v1187_v36  ;;  %v1236_v62 = vmax.f32 %v1228_v18, 0.0  ;;  %v1438_v6 = vld [vmem:[#allocation3 + $0x4] sm:$0x6] }
 0x279   : > { %v1190_v12 = vpop.f32.mrf.mxu1 }
 0x27a   : > { %v1232_v15 = vadd.f32 %v1231_v3, %v1189_v10  ;;  %v1191_v16 = vadd.f32 %v1190_v12, %v948_v59  ;;  %v1237_v24 = vmax.f32 %v1230_v13, 0.0 }
 0x27c   : > { %v1234_v20 = vadd.f32 %v1233_v17, %v1191_v16  ;;  %v1238_v23 = vmax.f32 %v1232_v15, 0.0 }
 0x27e   : > { %v1239_v26 = vmax.f32 %v1234_v20, 0.0  ;;  %v1240_v30 = vpack.c.bf16 %v1238_v23, %v1236_v62  ;;  %v1448_v20 = vld [vmem:[#allocation3 + $0x8] sm:$0x3] }
 0x27f   : > { %v1460_v62 = vld [vmem:[#allocation5] sm:$0x6] }
 0x280   : > { %v1241_v29 = vpack.c.bf16 %v1239_v26, %v1237_v24 }
 0x282   : > { %1409 = vmatprep.mubr.bf16.mxu0 %v1241_v29 }
 0x283   : > { %1410 = vmatmul.mubr.bf16.vlgmr.msra.gmra.mxu0 %v1240_v30 }
 0x284   : > { %2142 = vmatprep.mubr.bf16.mxu0 %v2601_v4  ;;  %2123 = vmatpush1.bf16.msra.mxu0 %v2533_v35  ;;  %v2536_v4 = vld [vmem:[%s3386_s7 + $0x100] ss:$8 sps:$4 sm:$0xff]  }
 0x285   : > { %2124 = vmatprep.subr.bf16.mxu0 %v2538_v39 }
 0x288   : > { %2125 = vmatpush1.bf16.msra.mxu0 %v2536_v4 }
 0x343   : > { %v2411_v47 = vpop.f32.mrf.mxu0 }
 0x345   : > { %v2412_v49 = vpop.f32.mrf.mxu0 }
 0x346   : > { %v2413_v50 = vadd.f32 %v2412_v49, %v2411_v47 }
 0x347   : > { %v2414_v55 = vpop.f32.mrf.mxu0 }
 0x348   : > { %v1412_v58 = vadd.f32 %v2413_v50, %v2304_v48 }
 0x349   : > { %v2415_v59 = vpop.f32.mrf.mxu0 }
 0x34a   : > { %v1418_v60 = vmax.f32 %v1412_v58, 0.0  ;;  %v2416_v61 = vadd.f32 %v2415_v59, %v2414_v55 }
 0x34c   : > { %v2382_v63 = vpack.c.bf16 %v1418_v60, %v1418_v60  ;;  %v1415_v1 = vadd.f32 %v2416_v61, %v2304_v48  ;;  %v1531_v61 = vld [vmem:[#allocation3] sm:$0x6] }
 0x34e   : > { %v1430_v36 = vrot.slane %v2382_v63, 5  ;;  %v1419_v3 = vmax.f32 %v1415_v1, 0.0  ;;  %v2323_v16 = vrot.slane %v2382_v63, 11 }
 0x350   : > { %v1431_v10 = vrot.slane %v1430_v36, 4  ;;  %1434 = vst.msk [vmem:[#allocation3] sm:$0x8] %vm3449_vm8, %v1430_v36  ;;  %v1420_v12 = vpack.c.bf16 %v1419_v3, %v1418_v60  ;;  %v2383_v13 = vpack.c.bf16 %v1419_v3, %v1419_v3  ;;  %vm3459_vm8 = vcmask 519427  }
 0x352   : > { %v1436_v15 = vsel %vm2702_vm4, %v1431_v10, %v1435_v5  ;;  %v1439_v17 = vsel %vm2748_vm13, %v1420_v12, %v1438_v6  ;;  %v1445_v18 = vrot.slane %v2383_v13, 7  ;;  %v1484_v6 = vpop.permute.xlu0 %1483  ;;  %v2325_v13 = vrot.slane %v1531_v61, 9 }
 0x353   : > { %1437 = vst [vmem:[#allocation3 + $0x4] sm:$0x1] %v1436_v15  ;;  %1440 = vst [vmem:[#allocation3 + $0x4] sm:$0x6] %v1439_v17 }
 0x354   : > { %v1446_v23 = vsel %vm2755_vm14, %v2323_v16, %v1445_v18  ;;  %v3159_v16 = vld [vmem:[#allocation3 + $0x4] sm:$0x8] }
 0x355   : > { %v1449_v24 = vsel %vm2709_vm7, %v1446_v23, %v1448_v20 }
 0x356   : > { %1450 = vst [vmem:[#allocation3 + $0x8] sm:$0x3] %v1449_v24  ;;  %v3168_v24 = vld [vmem:[#allocation3 + $0x8] sm:$0xc] }
 0x357   : > { %v1489_v26 = vld [vmem:[#allocation3] sm:$0x8] }
 0x358   : > { %v1455_v29 = vld [vmem:[#allocation3] sm:$0xc]  ;;  %v1492_v30 = vshrl.u32 %v1489_v26, 16  ;;  %v1495_v31 = vshll.u32 %v1489_v26, 16 }
 0x359   : > { %v2324_v33 = vrot.slane %v1455_v29, 9  ;;  %v1651_v34 = vld [vmem:[#allocation3] sm:$0x8]  ;;  %v2332_v29 = vrot.slane %v3159_v16, 10  ;;  %v2555_v16 = vld [vmem:[%s3386_s7 + $0x20] ss:$8 sps:$4 sm:$0xff]  }
 0x35a   : > { %v1796_v35 = vld [vmem:[#allocation3 + $0x4] sm:$0xc]  ;;  %v1490_v37 = vld [vmem:[#allocation3 + $0x4] sm:$0x1]  ;;  %v1494_v4 = vrot.slane %v1492_v30, 5  ;;  %v1497_v39 = vrot.slane %v1495_v31, 6 }
 0x35b   : > { %v1461_v0 = vsel %vm2748_vm13, %v2324_v33, %v1460_v62  ;;  %v2333_v22 = vrot.slane %v1796_v35, 10  ;;  %v1501_v41 = vshll.u32 %v1490_v37, 16  ;;  %v1652_v43 = vld [vmem:[#allocation3 + $0x4] sm:$0x1]  ;;  %v1654_v44 = vshrl.u32 %v1651_v34, 16 }
 0x35c   : > { %1462 = vst [vmem:[#allocation5] sm:$0x6] %v1461_v0  ;;  %v1498_v25 = vor.u32 %v1497_v39, %v1494_v4  ;;  %v1659_v45 = vshrl.u32 %v1652_v43, 16  ;;  %v1672_v47 = vld [vmem:[#allocation3 + $0x4] sm:$0xc]  ;;  %v1662_v60 = vshll.u32 %v1652_v43, 16 }
 0x35d   : > { %v3151_v48 = vld [vmem:[#allocation3 + $0x4] sm:$0x6]  ;;  %v1503_v49 = vrot.slane %v1501_v41, 6  ;;  %v1674_v50 = vshrl.u32 %v1672_v47, 16  ;;  %v1677_v55 = vshll.u32 %v1672_v47, 16  ;;  %v1802_v63 = vsel %vm2709_vm7, %v2333_v22, %v1801_v8 }
 0x35e   : > { %v1499_v58 = vrot.slane %v1498_v25, 4  ;;  %v1661_v59 = vrot.slane %v1659_v45, 7  ;;  %v1513_v3 = vshrl.u32 %v3151_v48, 16  ;;  %1803 = vst [vmem:[#allocation5 + $0x8] sm:$0x3] %v1802_v63  ;;  %v2330_v10 = vrot.slane %v1654_v44, 11 }
 0x35f   : > { %v1676_v1 = vrot.slane %v1674_v50, 4  ;;  %v1679_v36 = vrot.slane %v1677_v55, 5  ;;  %v1804_v17 = vld [vmem:[#allocation3 + $0x8] sm:$0x3]  ;;  %v1569_v26 = vld [vmem:[#allocation3] sm:$0xc] }
 0x360   : > { %v1504_v5 = vsel %vm2775_vm5, %v1499_v58, %v1503_v49  ;;  %v1664_v12 = vor.u32 %v1662_v60, %v1661_v59  ;;  %v3166_v32 = vrot.slane %v1513_v3, 6  ;;  %v3170_v62 = vld [vmem:[#allocation3 + $0x4] sm:$0xc]  ;;  %v1806_v30 = vrot.slane %v1804_v17, 7  ;;  %v1625_v33 = vld [vmem:[#allocation3] sm:$0x8] }
 0x361   : > { %1505 = vrot.lane.b32.xlu0 %v1504_v5, %s2602_s29  ;;  %v1680_v15 = vor.u32 %v1679_v36, %v1676_v1  ;;  %v1708_v31 = vld [vmem:[#allocation3 + $0x4] sm:$0x6]  ;;  %v1542_v34 = vld [vmem:[#allocation3 + $0x4] sm:$0x1]  ;;  %v1734_v37 = vrot.slane %v3168_v24, 7  ;;  %v1571_v4 = vshrl.u32 %v1569_v26, 16  ;;  %vm3450_vm5 = vnez %v3423_v11 }
 0x362   : > { %v1665_v20 = vsel %vm2783_vm9, %v2330_v10, %v1664_v12  ;;  %v1520_v39 = vrot.slane %v3166_v32, 4  ;;  %v1557_v0 = vrot.slane %v3170_v62, 7  ;;  %v3180_v41 = vld [vmem:[#allocation3 + $0x8] sm:$0x3]  ;;  %v1626_v43 = vld [vmem:[#allocation3 + $0x4] sm:$0x1]  ;;  %vm3453_vm9 = vmmov %vm3448_vm6 }
 0x363   : > { %v1486_v18 = vld [vmem:[#allocation5] sm:$0x3]  ;;  %1666 = vrot.lane.b32.xlu1 %v1665_v20, %s2602_s29  ;;  %v1681_v38 = vrot.slane %v1680_v15, 4  ;;  %v2331_v8 = vrot.slane %v1708_v31, 9  ;;  %v1541_v25 = vld [vmem:[#allocation3] sm:$0x8] }
 0x364   : > { %v1487_v23 = vsel %vm2789_vm15, %v1484_v6, %v1486_v18  ;;  %v1574_v44 = vshll.u32 %v1569_v26, 16  ;;  %v1634_v45 = vld [vmem:[#allocation5 + $0x4] sm:$0x3]  ;;  %v1719_v47 = vld [vmem:[#allocation3 + $0x8] sm:$0x1]  ;;  %v1547_v55 = vrot.slane %v1542_v34, 6 }
 0x365   : > { %1488 = vst [vmem:[#allocation5] sm:$0x3] %v1487_v23  ;;  %1535 = vrot.lane.b32.xlu0 %v2325_v13, %s2603_s13  ;;  %v1808_v35 = vld [vmem:[#allocation5 + $0x8] sm:$0x6]  ;;  %v2546_v49 = vld [vmem:[%s3386_s7 + $0x50] ss:$8 sps:$4 sm:$0xff]  }
 0x366   : > { %v1809_v22 = vsel %vm2748_vm13, %v1806_v30, %v1808_v35  ;;  %v2548_v50 = vld [vmem:[%s3386_s7 + $0x54] ss:$8 sps:$4 sm:$0xff]   ;;  %v1690_v58 = vshrl.u32 %v3180_v41, 16  ;;  %v2329_v60 = vrot.slane %v1625_v33, 11  ;;  %v1631_v61 = vrot.slane %v1626_v43, 7 }
 0x367   : > { %1682 = vrot.lane.b32.xlu1 %v1681_v38, %s2602_s29  ;;  %1810 = vst [vmem:[#allocation5 + $0x8] sm:$0x6] %v1809_v22  ;;  %v1746_v59 = vld [vmem:[#allocation3 + $0x4] sm:$0x6]  ;;  %v1558_v63 = vrot.slane %v1557_v0, 4  ;;  %v2326_v1 = vrot.slane %v1541_v25, 10  ;;  %2071 = vmatprep.subr.bf16.mxu1 %v2548_v50 }
 0x368   : > { %v1735_v36 = vrot.slane %v1734_v37, 4  ;;  %v1573_v3 = vrot.slane %v1571_v4, 6  ;;  %v2551_v5 = vld [vmem:[%s3386_s7 + $0x44] ss:$8 sps:$4 sm:$0xff]   ;;  %v1724_v6 = vrot.slane %v1719_v47, 6  ;;  %v1576_v10 = vrot.slane %v1574_v44, 7  ;;  %2072 = vmatpush1.bf16.msra.mxu1 %v2546_v49 }
 0x369   : > { %1523 = vrot.lane.b32.xlu0 %v1520_v39, %s2602_s29  ;;  %v1632_v12 = vsel %vm2755_vm14, %v2329_v60, %v1631_v61  ;;  %v2549_v13 = vld [vmem:[%s3386_s7 + $0x40] ss:$8 sps:$4 sm:$0xff]   ;;  %v1463_v15 = vld [vmem:[#allocation3 + $0x4] sm:$0x6]  ;;  %v1748_v17 = vshrl.u32 %v1746_v59, 16  ;;  %v1751_v18 = vshll.u32 %v1746_v59, 16  ;;  %2073 = vmatprep.subr.bf16.mxu1 %v2551_v5  ;;  %v1548_v56 = vsel %vm3450_vm5, %v2326_v1, %v1547_v55 }
 0x36a   : > { %v1635_v20 = vsel %vm2709_vm7, %v1632_v12, %v1634_v45  ;;  %v1470_v23 = vld [vmem:[#allocation5 + $0xc] sm:$0x1]  ;;  %v1465_v26 = vrot.slane %v1463_v15, 6  ;;  %v3208_v30 = vrot.slane %v1690_v58, 5  ;;  %v1516_v38 = vshll.u32 %v3151_v48, 16  ;;  %vm3451_vm7 = vmmov %vm3448_vm6 }
 0x36b   : > { %1712 = vrot.lane.b32.xlu1 %v2331_v8, %s2603_s13  ;;  %1636 = vst [vmem:[#allocation5 + $0x4] sm:$0x3] %v1635_v20  ;;  %v2554_v31 = vld [vmem:[%s3386_s7 + $0x34] ss:$8 sps:$4 sm:$0xff]   ;;  %v1641_v33 = vld [vmem:[#allocation3 + $0x8] sm:$0x3]  ;;  %v1577_v35 = vor.u32 %v1576_v10, %v1573_v3  ;;  %v1725_v45 = vsel %vm3450_vm5, %v2332_v29, %v1724_v6  ;;  %vm3457_vm6 = vnez %v3429_v27 }
 0x36c   : > { %v1466_v34 = vrot.slane %v1465_v26, 4  ;;  %1469 = vst.msk [vmem:[#allocation5] sm:$0x8] %vm3451_vm7, %v1465_v26  ;;  %2074 = vmatpush1.bf16.msra.mxu1 %v2549_v13  ;;  %v2552_v4 = vld [vmem:[%s3386_s7 + $0x30] ss:$8 sps:$4 sm:$0xff]   ;;  %v1643_v39 = vrot.slane %v1641_v33, 5 }
 0x36d   : > { %1561 = vrot.lane.b32.xlu0 %v1558_v63, %s2603_s13  ;;  %v1648_v48 = vld [vmem:[#allocation5 + $0x10] sm:$0x1]  ;;  %vm3452_vm14 = vcmask 261120   ;;  %v1750_v22 = vrot.slane %v1748_v17, 5  ;;  %v1753_v43 = vrot.slane %v1751_v18, 6  ;;  %2075 = vmatprep.subr.bf16.mxu1 %v2554_v31  ;;  %v1697_v49 = vrot.slane %v3208_v30, 4 }
 0x36e   : > { %v2539_v21 = vld [vmem:[#allocation5 + $0x8] ss:$12 sps:$4 sm:$0x1f]   ;;  %v1585_v8 = vld [vmem:[#allocation3 + $0x4] sm:$0x6]  ;;  %v1471_v25 = vsel %vm2702_vm4, %v1466_v34, %v1470_v23  ;;  %v1644_v47 = vrot.slane %v1643_v39, 4 }
 0x36f   : > { %1549 = vrot.lane.b32.xlu1 %v1548_v56, %s2603_s13  ;;  %2373 = vmatmul.mubr.msk.bf16.vlgmr.msra.gmra.mxu0 %vm3452_vm14, %v2539_v21  ;;  %v2557_v44 = vld [vmem:[%s3386_s7 + $0x24] ss:$8 sps:$4 sm:$0xff]   ;;  %1472 = vst [vmem:[#allocation5 + $0xc] sm:$0x1] %v1471_v25  ;;  %1647 = vst.msk [vmem:[#allocation5 + $0x4] sm:$0x8] %vm3453_vm9, %v1643_v39  ;;  %v1754_v29 = vor.u32 %v1753_v43, %v1750_v22 }
 0x370   : > { %v1518_v50 = vrot.slane %v1516_v38, 7  ;;  %v1578_v55 = vrot.slane %v1577_v35, 4  ;;  %v1587_v58 = vshrl.u32 %v1585_v8, 16  ;;  %2076 = vmatpush1.bf16.msra.mxu1 %v2552_v4  ;;  %v1649_v11 = vsel %vm2702_vm4, %v1644_v47, %v1648_v48  ;;  %v1637_v59 = vld [vmem:[#allocation3 + $0x4] sm:$0x6] }
 0x371   : > { %1738 = vrot.lane.b32.xlu0 %v1735_v36, %s2603_s13  ;;  %2077 = vmatprep.subr.bf16.mxu1 %v2557_v44  ;;  %v2560_v61 = vld [vmem:[%s3386_s7 + $0x14] ss:$8 sps:$4 sm:$0xff]   ;;  %1650 = vst [vmem:[#allocation5 + $0x10] sm:$0x1] %v1649_v11  ;;  %v1762_v19 = vld [vmem:[#allocation3 + $0x8] sm:$0x3]  ;;  %vm3454_vm4 = vnez %v3425_v46 }
 0x372   : > { %v1638_v60 = vld [vmem:[#allocation5 + $0x4] sm:$0x6]  ;;  %v1519_v1 = vor.u32 %v1518_v50, %v3166_v32  ;;  %v1777_v36 = vld [vmem:[#allocation3 + $0x8] sm:$0xc]  ;;  %v1755_v5 = vrot.slane %v1754_v29, 4  ;;  %v1589_v6 = vrot.slane %v1587_v58, 7 }
 0x373   : > { %1726 = vrot.lane.b32.xlu1 %v1725_v45, %s2603_s13  ;;  %v1639_v63 = vsel %vm2748_vm13, %v1637_v59, %v1638_v60  ;;  %v2558_v3 = vld [vmem:[%s3386_s7 + $0x10] ss:$8 sps:$4 sm:$0xff]   ;;  %v1590_v32 = vshll.u32 %v1585_v8, 16  ;;  %v1764_v10 = vshrl.u32 %v1762_v19, 16  ;;  %v1767_v12 = vshll.u32 %v1762_v19, 16 }
 0x374   : > { %1640 = vst [vmem:[#allocation5 + $0x4] sm:$0x6] %v1639_v63  ;;  %2078 = vmatpush1.bf16.msra.mxu1 %v2555_v16  ;;  %v1779_v13 = vshrl.u32 %v1777_v36, 16  ;;  %v1600_v15 = vld [vmem:[#allocation3 + $0x8] sm:$0x1]  ;;  %v1782_v24 = vshll.u32 %v1777_v36, 16  ;;  %vm3455_vm13 = vnez %v3427_v14 }
 0x375   : > { %1700 = vrot.lane.b32.xlu0 %v1697_v49, %s2602_s29  ;;  %2079 = vmatprep.subr.bf16.mxu1 %v2560_v61  ;;  %v2561_v17 = vld [vmem:[%s3386_s7] ss:$8 sps:$4 sm:$0xff]   ;;  %v1592_v18 = vor.u32 %v1590_v32, %v1589_v6  ;;  %v2566_v20 = vld [vmem:[%s3386_s7 + $0xf4] ss:$8 sps:$4 sm:$0xff]   ;;  %v1611_v23 = vshrl.u32 %v1600_v15, 16  ;;  %v1766_v26 = vrot.slane %v1764_v10, 6 }
 0x376   : > { %v1769_v56 = vrot.slane %v1767_v12, 7  ;;  %v1781_v38 = vrot.slane %v1779_v13, 7  ;;  %v1607_v31 = vshll.u32 %v1600_v15, 16  ;;  %v2564_v33 = vld [vmem:[%s3386_s7 + $0xf0] ss:$8 sps:$4 sm:$0xff]  }
 0x377   : > { %1579 = vrot.lane.b32.xlu1 %v1578_v55, %s2604_s15  ;;  %v1599_v62 = vld [vmem:[#allocation3 + $0x4] sm:$0x8]  ;;  %v2569_v21 = vld [vmem:[%s3386_s7 + $0xe4] ss:$8 sps:$4 sm:$0xff]   ;;  %v2567_v48 = vld [vmem:[%s3386_s7 + $0xe0] ss:$8 sps:$4 sm:$0xff]  }
 0x378   : > { %2080 = vmatpush1.bf16.msra.mxu1 %v2558_v3  ;;  %v1770_v34 = vor.u32 %v1769_v56, %v1766_v26  ;;  %v1785_v35 = vrot.slane %v1781_v38, 4  ;;  %v1602_v4 = vshrl.u32 %v1599_v62, 16  ;;  %v1609_v39 = vrot.slane %v1607_v31, 5  ;;  %v2572_v22 = vld [vmem:[%s3386_s7 + $0xd4] ss:$8 sps:$4 sm:$0xff]  }
 0x379   : > { %1521 = vrot.lane.b32.xlu0 %v1519_v1, %s2602_s29  ;;  %2081 = vmatprep.subr.bf16.mxu1 %v2563_v51  ;;  %v2570_v43 = vld [vmem:[%s3386_s7 + $0xd0] ss:$8 sps:$4 sm:$0xff]   ;;  %v2575_v25 = vld [vmem:[%s3386_s7 + $0xc4] ss:$8 sps:$4 sm:$0xff]   ;;  %v1784_v44 = vor.u32 %v1782_v24, %v1781_v38  ;;  %v2573_v46 = vld [vmem:[%s3386_s7 + $0xc0] ss:$8 sps:$4 sm:$0xff]  }
 0x37a   : > { %v2578_v45 = vld [vmem:[%s3386_s7 + $0xb4] ss:$8 sps:$4 sm:$0xff]   ;;  %v2581_v47 = vld [vmem:[%s3386_s7 + $0xa4] ss:$8 sps:$4 sm:$0xff]   ;;  %v2579_v49 = vld [vmem:[%s3386_s7 + $0xa0] ss:$8 sps:$4 sm:$0xff]  }
 0x37b   : > { %1756 = vrot.lane.b32.xlu1 %v1755_v5, %s2604_s15  ;;  %v2584_v50 = vld [vmem:[%s3386_s7 + $0x94] ss:$8 sps:$4 sm:$0xff]   ;;  %v2582_v55 = vld [vmem:[%s3386_s7 + $0x90] ss:$8 sps:$4 sm:$0xff]   ;;  %v2587_v58 = vld [vmem:[%s3386_s7 + $0x84] ss:$8 sps:$4 sm:$0xff]  }
 0x37c   : > { %2082 = vmatpush1.bf16.msra.mxu1 %v2561_v17  ;;  %v2585_v16 = vld [vmem:[%s3386_s7 + $0x80] ss:$8 sps:$4 sm:$0xff]   ;;  %v1508_v11 = vld [vmem:[#allocation5] sm:$0x6]  ;;  %v1669_v61 = vld [vmem:[#allocation5 + $0x4] sm:$0x3] }
 0x37d   : > { %1559 = vrot.lane.b32.xlu0 %v1557_v0, %s2603_s13  ;;  %v1693_v0 = vshll.u32 %v3180_v41, 16  ;;  %2083 = vmatprep.subr.bf16.mxu1 %v2566_v20  ;;  %v1528_v3 = vld [vmem:[#allocation5 + $0xc] sm:$0x1]  ;;  %v1705_v38 = vld [vmem:[#allocation5 + $0x10] sm:$0x1] }
 0x37f   : > { %1593 = vrot.lane.b32.xlu1 %v1592_v18, %s2604_s15  ;;  %v1695_v41 = vrot.slane %v1693_v0, 6 }
 0x380   : > { %2084 = vmatpush2.bf16.msra.mxu1 %v2564_v33 }
 0x381   : > { %1617 = vrot.lane.b32.xlu0 %v1611_v23, %s2604_s15  ;;  %2085 = vmatprep.subr.bf16.mxu1 %v2569_v21  ;;  %v1696_v8 = vor.u32 %v1695_v41, %v3208_v30  ;;  %v2576_v30 = vld [vmem:[%s3386_s7 + $0xb0] ss:$8 sps:$4 sm:$0xff]  }
 0x383   : > { %1736 = vrot.lane.b32.xlu1 %v1734_v37, %s2603_s13  ;;  %v1610_v37 = vsel %vm3454_vm4, %v1602_v4, %v1609_v39 }
 0x384   : > { %2086 = vmatpush2.bf16.msra.mxu1 %v2567_v48 }
 0x385   : > { %1771 = vrot.lane.b32.xlu0 %v1770_v34, %s2604_s15  ;;  %2087 = vmatprep.subr.bf16.mxu1 %v2572_v22 }
 0x387   : > { %1788 = vrot.lane.b32.xlu1 %v1785_v35, %s2604_s15 }
 0x388   : > { %2088 = vmatpush2.bf16.msra.mxu1 %v2570_v43 }
 0x389   : > { %1615 = vrot.lane.b32.xlu0 %v1610_v37, %s2604_s15  ;;  %2089 = vmatprep.subr.bf16.mxu1 %v2575_v25 }
 0x38b   : > { %1698 = vrot.lane.b32.xlu1 %v1696_v8, %s2602_s29 }
 0x38c   : > { %2090 = vmatpush2.bf16.msra.mxu1 %v2573_v46 }
 0x38d   : > { %2091 = vmatprep.subr.bf16.mxu1 %v2578_v45 }
 0x38f   : > { %1786 = vrot.lane.b32.xlu1 %v1784_v44, %s2604_s15 }
 0x390   : > { %2092 = vmatpush2.bf16.msra.mxu1 %v2576_v30 }
 0x391   : > { %2093 = vmatprep.subr.bf16.mxu1 %v2581_v47 }
 0x394   : > { %2094 = vmatpush2.bf16.msra.mxu1 %v2579_v49 }
 0x395   : > { %2095 = vmatprep.subr.bf16.mxu1 %v2584_v50 }
 0x398   : > { %2096 = vmatpush2.bf16.msra.mxu1 %v2582_v55 }
 0x399   : > { %2097 = vmatprep.subr.bf16.mxu1 %v2587_v58 }
 0x39c   : > { %2098 = vmatpush2.bf16.msra.mxu1 %v2585_v16  ;;  %v1857_v16 = vld [vmem:[%s3387_s8] sm:$0x3] }
 0x3d3   : > { %v1506_v29 = vpop.permute.xlu0 %1505 }
 0x3d4   : > { %v1509_v59 = vsel %vm3455_vm13, %v1506_v29, %v1508_v11  ;;  %v1862_v29 = vrot.slane %v1857_v16, %v943_v57 }
 0x3d5   : > { %1510 = vst [vmem:[#allocation5] sm:$0x6] %v1509_v59  ;;  %v1667_v60 = vpop.permute.xlu1 %1666  ;;  %v1866_v59 = vrot.slane %v1857_v16, %v947_v53 }
 0x3d6   : > { %v1670_v63 = vsel %vm2789_vm15, %v1667_v60, %v1669_v61  ;;  %vm3458_vm15 = vnez %v3434_v7 }
 0x3d7   : > { %1671 = vst [vmem:[#allocation5 + $0x4] sm:$0x3] %v1670_v63  ;;  %v1536_v1 = vpop.permute.xlu0 %1535 }
 0x3d9   : > { %v1683_v19 = vpop.permute.xlu1 %1682 }
 0x3db   : > { %v1524_v36 = vpop.permute.xlu0 %1523 }
 0x3dc   : > { %v1538_v5 = vld [vmem:[#allocation5] sm:$0x3]  ;;  %v1529_v6 = vsel %vm3456_vm1, %v1524_v36, %v1528_v3 }
 0x3dd   : > { %v1539_v51 = vsel %vm3457_vm6, %v1536_v1, %v1538_v5  ;;  %1530 = vst [vmem:[#allocation5 + $0xc] sm:$0x1] %v1529_v6  ;;  %v1713_v32 = vpop.permute.xlu1 %1712 }
 0x3de   : > { %1540 = vst [vmem:[#allocation5] sm:$0x3] %v1539_v51  ;;  %v1685_v10 = vld [vmem:[#allocation5 + $0x4] sm:$0x6] }
 0x3df   : > { %v1686_v42 = vsel %vm3455_vm13, %v1683_v19, %v1685_v10  ;;  %v1562_v12 = vpop.permute.xlu0 %1561 }
 0x3e0   : > { %1687 = vst [vmem:[#allocation5 + $0x4] sm:$0x6] %v1686_v42 }
 0x3e1   : > { %v1550_v13 = vpop.permute.xlu1 %1549 }
 0x3e3   : > { %v1739_v15 = vpop.permute.xlu0 %1738 }
 0x3e4   : > { %v1566_v17 = vld [vmem:[#allocation5 + $0xc] sm:$0x1] }
 0x3e5   : > { %v1567_v18 = vsel %vm3022_vm2, %v1562_v12, %v1566_v17  ;;  %v1552_v20 = vld [vmem:[#allocation5] sm:$0x6]  ;;  %v1727_v23 = vpop.permute.xlu1 %1726  ;;  %v2174_v17 = vld [vmem:[%s332_s21 + $0x8] sm:$0x11] }
 0x3e6   : > { %1568 = vst [vmem:[#allocation5 + $0xc] sm:$0x1] %v1567_v18  ;;  %v1553_v26 = vsel %vm3458_vm15, %v1550_v13, %v1552_v20 }
 0x3e7   : > { %v1715_v56 = vld [vmem:[#allocation5 + $0x4] sm:$0x3]  ;;  %1554 = vst [vmem:[#allocation5] sm:$0x6] %v1553_v26  ;;  %v1701_v31 = vpop.permute.xlu0 %1700 }
 0x3e8   : > { %v1716_v14 = vsel %vm3457_vm6, %v1713_v32, %v1715_v56  ;;  %v1706_v33 = vsel %vm3456_vm1, %v1701_v31, %v1705_v38 }
 0x3e9   : > { %1717 = vst [vmem:[#allocation5 + $0x4] sm:$0x3] %v1716_v14  ;;  %1707 = vst [vmem:[#allocation5 + $0x10] sm:$0x1] %v1706_v33  ;;  %v1580_v62 = vpop.permute.xlu1 %1579 }
 0x3eb   : > { %v1522_v0 = vpop.permute.xlu0 %1521 }
 0x3ec   : > { %1527 = vst.msk [vmem:[#allocation5] sm:$0x8] %vm3459_vm8, %v1522_v0 }
 0x3ed   : > { %v1757_v21 = vpop.permute.xlu1 %1756  ;;  %v1622_v24 = vld [vmem:[#allocation5 + $0xc] sm:$0x1] }
 0x3ee   : > { %v1582_v34 = vld [vmem:[#allocation5] sm:$0x3] }
 0x3ef   : > { %v1583_v35 = vsel %vm3035_vm0, %v1580_v62, %v1582_v34  ;;  %v1560_v4 = vpop.permute.xlu0 %1559 }
 0x3f0   : > { %v1729_v39 = vld [vmem:[#allocation5 + $0x4] sm:$0x6]  ;;  %v1743_v48 = vld [vmem:[#allocation5 + $0x10] sm:$0x1]  ;;  %1584 = vst [vmem:[#allocation5] sm:$0x3] %v1583_v35 }
 0x3f1   : > { %1565 = vst.msk [vmem:[#allocation5] sm:$0x8] %vm632_vm12, %v1560_v4  ;;  %v1730_v27 = vsel %vm3458_vm15, %v1727_v23, %v1729_v39  ;;  %v1744_v28 = vsel %vm3022_vm2, %v1739_v15, %v1743_v48  ;;  %v1594_v41 = vpop.permute.xlu1 %1593  ;;  %vm3460_vm2 = vmmov %vm3459_vm8 }
 0x3f2   : > { %1731 = vst [vmem:[#allocation5 + $0x4] sm:$0x6] %v1730_v27  ;;  %1745 = vst [vmem:[#allocation5 + $0x10] sm:$0x1] %v1744_v28 }
 0x3f3   : > { %v1618_v22 = vpop.permute.xlu0 %1617 }
 0x3f4   : > { %v1623_v37 = vsel %vm3048_vm11, %v1618_v22, %v1622_v24 }
 0x3f5   : > { %1624 = vst [vmem:[#allocation5 + $0xc] sm:$0x1] %v1623_v37  ;;  %v1737_v43 = vpop.permute.xlu1 %1736 }
 0x3f7   : > { %v1596_v8 = vld [vmem:[#allocation5] sm:$0x6]  ;;  %v1772_v25 = vpop.permute.xlu0 %1771 }
 0x3f8   : > { %v1597_v44 = vsel %vm3053_vm10, %v1594_v41, %v1596_v8 }
 0x3f9   : > { %v1759_v7 = vld [vmem:[#allocation5 + $0x4] sm:$0x3]  ;;  %1598 = vst [vmem:[#allocation5] sm:$0x6] %v1597_v44  ;;  %v1789_v46 = vpop.permute.xlu1 %1788  ;;  %v1793_v40 = vld [vmem:[#allocation5 + $0x10] sm:$0x1] }
 0x3fa   : > { %v1760_v45 = vsel %vm3035_vm0, %v1757_v21, %v1759_v7  ;;  %v1794_v30 = vsel %vm3048_vm11, %v1789_v46, %v1793_v40  ;;  %vm3462_vm11 = vcmask 1040384  }
 0x3fb   : > { %1761 = vst [vmem:[#allocation5 + $0x4] sm:$0x3] %v1760_v45  ;;  %1795 = vst [vmem:[#allocation5 + $0x10] sm:$0x1] %v1794_v30  ;;  %v1616_v47 = vpop.permute.xlu0 %1615 }
 0x3fc   : > { %1621 = vst.msk [vmem:[#allocation5] sm:$0x8] %vm698_vm3, %v1616_v47 }
 0x3fd   : > { %v1699_v49 = vpop.permute.xlu1 %1698 }
 0x3fe   : > { %1704 = vst.msk [vmem:[#allocation5 + $0x4] sm:$0x8] %vm3460_vm2, %v1699_v49 }
 0x3ff   : > { %1742 = vst.msk [vmem:[#allocation5 + $0x4] sm:$0x8] %vm632_vm12, %v1737_v43  ;;  %vm3461_vm12 = vsmask.f32 256 }
 0x400   : > { %vm2170_vm0 = vmand %vm3462_vm11, %vm3461_vm12 }
 0x401   : > { %v1787_v50 = vpop.permute.xlu1 %1786 }
 0x402   : > { %v1774_v55 = vld [vmem:[#allocation5 + $0x4] sm:$0x6]  ;;  %1792 = vst.msk [vmem:[#allocation5 + $0x4] sm:$0x8] %vm698_vm3, %v1787_v50  ;;  %vm3463_vm3 = vcmask 1044484  }
 0x403   : > { %v1775_v54 = vsel %vm3053_vm10, %v1772_v25, %v1774_v55  ;;  %v2588_v2 = vld [vmem:[#allocation5] ss:$12 sps:$4 sm:$0x1f]   ;;  %vm2171_vm10 = vsmask.f32 4352 }
 0x404   : > { %1776 = vst [vmem:[#allocation5 + $0x4] sm:$0x6] %v1775_v54  ;;  %vm2172_vm5 = vmand %vm3463_vm3, %vm2171_vm10 }
 0x405   : > { %vm2173_vm7 = vmor %vm2172_vm5, %vm2170_vm0 }
 0x40b   : > { %v2590_v58 = vld [vmem:[#allocation5 + $0x4] ss:$12 sps:$4 sm:$0x1f]  }
 0x40c   : > { %2099 = vmatprep.mubr.bf16.mxu1 %v2590_v58 }
 0x40d   : > { %2100 = vmatmul.mubr.bf16.vlgmr.msra.gmra.mxu1 %v2588_v2 }
 0x42f   : > { %v2144_v11 = vpop.f32.mrf.mxu0 }
 0x431   : > { %v2146_v60 = vpop.f32.mrf.mxu0 }
 0x433   : > { %v2148_v36 = vpop.f32.mrf.mxu0 }
 0x435   : > { %v2150_v12 = vpop.f32.mrf.mxu0 }
 0x4cd   : > { %v2101_v9 = vpop.f32.mrf.mxu1 }
 0x4ce   : > { %v2102_v61 = vadd.f32 %v2101_v9, %v1862_v29 }
 0x4cf   : > { %v2103_v63 = vpop.f32.mrf.mxu1 }
 0x4d0   : > { %v2145_v1 = vadd.f32 %v2144_v11, %v2102_v61  ;;  %v2104_v19 = vadd.f32 %v2103_v63, %v1866_v59 }
 0x4d1   : > { %v2105_v3 = vpop.f32.mrf.mxu1 }
 0x4d2   : > { %v2147_v5 = vadd.f32 %v2146_v60, %v2104_v19  ;;  %v2106_v6 = vadd.f32 %v2105_v3, %v1862_v29  ;;  %v2153_v32 = vmax.f32 %v2145_v1, 0.0 }
 0x4d3   : > { %v2107_v51 = vpop.f32.mrf.mxu1 }
 0x4d4   : > { %v2154_v10 = vmax.f32 %v2147_v5, 0.0  ;;  %v2149_v42 = vadd.f32 %v2148_v36, %v2106_v6  ;;  %v2108_v57 = vadd.f32 %v2107_v51, %v1866_v59 }
 0x4d6   : > { %v2384_v52 = vpack.c.bf16 %v2154_v10, %v2153_v32  ;;  %v2151_v53 = vadd.f32 %v2150_v12, %v2108_v57  ;;  %v2155_v13 = vmax.f32 %v2149_v42, 0.0 }
 0x4d8   : > { %2169 = vst [vmem:[%s332_s21] sm:$0xff] %v2384_v52  ;;  %v2156_v15 = vmax.f32 %v2151_v53, 0.0 }
 0x4da   : > { %v2385_v18 = vpack.c.bf16 %v2156_v15, %v2155_v13 }
 0x4dc   : > { %v2175_v20 = vsel %vm2173_vm7, %v2385_v18, %v2174_v17 }
 0x4dd   : > { %2176 = vst [vmem:[%s332_s21 + $0x8] sm:$0x11] %v2175_v20 }
 0x4de PF: > { %s19_s30 = sadd.s32 1, %s2597_s30  }
 0x4df   : > { %p16_p4 = scmp.ge.s32.totalorder %s19_s30, 4  }
 0x4e1   :  { %18 = sbr.rel (!%p16_p4) target bundleno = 1 (0x1), region = 86 }

// kernel: squeezenet_forward.6
= control target key start
LH: loop header
LB: loop body
LE: loop exit
PB: predicated region body
PF: predicated region fallthrough
CT: control target
= control target key end

     0   :  { %s2783_s30 = smov 0   ;;  %s3417_s0 = inlined_call_operand.vmem [shape: bf16[2,36,64], index: 0, kind: input, shape index: {}]   ;;  %s3418_s1 = inlined_call_operand.vmem [shape: bf16[64,16], index: 1, kind: input, shape index: {}]   ;;  %s3419_s2 = inlined_call_operand.vmem [shape: f32[1,16], index: 2, kind: input, shape index: {}]   ;;  %s3420_s3 = inlined_call_operand.vmem [shape: bf16[144,128], index: 3, kind: input, shape index: {}]   ;;  %s3421_s4 = inlined_call_operand.vmem [shape: f32[1,128], index: 4, kind: input, shape index: {}]   ;;  %s3422_s5 = inlined_call_operand.vmem [shape: bf16[128,16], index: 5, kind: input, shape index: {}]   ;;  %s3423_s6 = inlined_call_operand.vmem [shape: f32[1,16], index: 6, kind: input, shape index: {}]   ;;  %s3424_s7 = inlined_call_operand.vmem [shape: bf16[144,128], index: 7, kind: input, shape index: {}]   ;;  %s3425_s8 = inlined_call_operand.vmem [shape: f32[1,128], index: 8, kind: input, shape index: {}]   ;;  %s3426_s9 = inlined_call_operand.vmem [shape: bf16[2,36,128], index: 9, kind: output, shape index: {}]  }
   0x1 LB: > { %s2461_s10 = sadd.s32 4294967295, %s2721_s30   ;;  %p2465_p0 = scmp.ge.s32.totalorder %s2721_s30, 1  ;;  %s2721_s30 = sphi %s2783_s30, %s19_s30  }
   0x2   : > { %p287_p1 = scmp.lt.s32.totalorder %s2721_s30, 3 }
   0x4   : > { %p288_p2 = pnand %p2465_p0, %p287_p1 }
   0x5   : > { %p323_p3 = scmp.lt.s32.totalorder (!%p288_p2), %s2461_s10, 1  ;;  %s2726_s23 = smov (!%p288_p2), 32  }
   0x6   : > { %291 = sbr.rel (%p288_p2) target bundleno = 1309 (0x51d), region = 56  ;;  %s2727_s24 = smov (!%p288_p2), 16  }
   0x7   : > { %s2728_s25 = smov (!%p288_p2), 96   ;;  %s2729_s28 = smov (!%p288_p2), 48  }
   0x8   : > { %s2730_s29 = smov (!%p288_p2), 80   ;;  %s2731_s11 = smov (!%p288_p2), 64  }
   0x9   : > { %s2732_s19 = smov (!%p288_p2), 112  }
   0xb   : > { %v2666_v0 = vld [vmem:[%s3418_s1 + $0x18] sm:$0xff]   ;;  %v2723_v1 = vmov 0.0   ;;  %v2667_v2 = vld [vmem:[%s3418_s1 + $0x10] sm:$0xff]   ;;  %vm3433_vm0 = vmmov 0   ;;  %s3567_s10 = smov (!%p323_p3, %s2461_s10), 1  ;;  %v2668_v3 = vld [vmem:[%s3418_s1 + $0x8] sm:$0xff]  }
   0xc   : > { %2599 = vmatprep.subr.bf16.mxu0 %v2723_v1  ;;  %2607 = vmatprep.mubr.msk.bf16.mxu0 %vm3433_vm0, %v2723_v1  ;;  %s2647_s17 = smul.u32 20, %s3567_s10  ;;  %v2669_v4 = vld [vmem:[%s3418_s1] sm:$0xff]   ;;  %vm391_vm1 = vcmask 523264   ;;  %vm465_vm2 = vcmask 125952   ;;  %v2725_v8 = vmov 0   ;;  %vm3432_vm3 = vcmask 124928  }
   0xd   : > { %2600 = vmatpush3.bf16.msra.mxu0 %v2666_v0  ;;  %467 = vst.msk [vmem:[#allocation2 + $0x4] sm:$0xf] %vm465_vm2, %v2725_v8  ;;  %466 = vst.msk [vmem:[#allocation2] sm:$0xf] %vm465_vm2, %v2725_v8  ;;  %1322 = vmatprep.subr.bf16.mxu1 %v2725_v8  ;;  %v2468_v20 = vld [vmem:[%s3419_s2] ss:$0 sm:$0xff] }
   0xe   : > { %2601 = vmatprep.subr.bf16.mxu0 %v2723_v1  ;;  %s327_s20 = scalar_lea.vmem %s3417_s0, %s2647_s17  ;;  %468 = vst.msk [vmem:[#allocation2 + $0x8] sm:$0xf] %vm465_vm2, %v2725_v8  ;;  %469 = vst.msk [vmem:[#allocation2 + $0xc] sm:$0xf] %vm465_vm2, %v2725_v8  ;;  %vm629_vm4 = vcmask 256128   ;;  %vm723_vm5 = vcmask 387328  }
   0xf   : > { %v2670_v5 = vld [vmem:[%s327_s20] sm:$0xff]   ;;  %v2671_v6 = vld [vmem:[%s327_s20 + $0x8] sm:$0xff]   ;;  %v2672_v7 = vld [vmem:[%s327_s20 + $0x10] ss:$0 sps:$4 sm:$0x33]   ;;  %vm3427_vm14 = vcmask 125953  }
  0x10   : > { %470 = vst.msk [vmem:[#allocation2 + $0x10] sm:$0xf] %vm465_vm2, %v2725_v8  ;;  %471 = vst.msk [vmem:[#allocation2 + $0x14] sm:$0xf] %vm465_vm2, %v2725_v8  ;;  %vm486_vm6 = vsmask.f32 3330 }
  0x11   : > { %2602 = vmatpush3.bf16.msra.mxu0 %v2667_v2  ;;  %472 = vst.msk [vmem:[#allocation2 + $0x18] sm:$0xf] %vm465_vm2, %v2725_v8  ;;  %473 = vst.msk [vmem:[#allocation2 + $0x1c] sm:$0xf] %vm465_vm2, %v2725_v8  ;;  %vm493_vm8 = vsmask.f32 1280 }
  0x12   : > { %2603 = vmatprep.subr.bf16.mxu0 %v2723_v1  ;;  %1521 = vst.msk [vmem:[#allocation3] sm:$0xf] %vm465_vm2, %v2725_v8  ;;  %1522 = vst.msk [vmem:[#allocation3 + $0x4] sm:$0xf] %vm465_vm2, %v2725_v8  ;;  %vm494_vm9 = vsmask.f32 5392 }
  0x13   : > { %1523 = vst.msk [vmem:[#allocation3 + $0x8] sm:$0xf] %vm465_vm2, %v2725_v8  ;;  %1524 = vst.msk [vmem:[#allocation3 + $0xc] sm:$0xf] %vm465_vm2, %v2725_v8  ;;  %vm516_vm11 = vsmask.f32 2304 }
  0x14   : > { %1525 = vst.msk [vmem:[#allocation3 + $0x10] sm:$0xf] %vm465_vm2, %v2725_v8  ;;  %1526 = vst.msk [vmem:[#allocation3 + $0x14] sm:$0xf] %vm465_vm2, %v2725_v8  ;;  %v616_v9 = vld [vmem:[#allocation2] sm:$0xf] }
  0x15   : > { %2604 = vmatpush3.bf16.msra.mxu0 %v2668_v3  ;;  %1527 = vst.msk [vmem:[#allocation3 + $0x18] sm:$0xf] %vm465_vm2, %v2725_v8  ;;  %1528 = vst.msk [vmem:[#allocation3 + $0x1c] sm:$0xf] %vm465_vm2, %v2725_v8  ;;  %v618_v10 = vshrl.u32 %v616_v9, 16  ;;  %v621_v11 = vshll.u32 %v616_v9, 16 }
  0x16   : > { %2605 = vmatprep.subr.bf16.mxu0 %v2723_v1  ;;  %v716_v12 = vld [vmem:[#allocation2] sm:$0xe]  ;;  %vm2872_vm7 = vmand %vm465_vm2, %vm486_vm6  ;;  %v488_v41 = vld [vmem:[#allocation2 + $0x4] sm:$0xf]  ;;  %vm517_vm12 = vsmask.f32 6416 }
  0x17   : > { %v2484_v13 = vrot.slane %v716_v12, 9  ;;  %v620_v14 = vrot.slane %v618_v10, 4  ;;  %v623_v15 = vrot.slane %v621_v11, 5  ;;  %v577_v24 = vld [vmem:[#allocation2] sm:$0x7]  ;;  %vm2878_vm10 = vmor %vm493_vm8, %vm494_vm9  ;;  %vm3431_vm15 = vcmask 125955  }
  0x18   : > { %v2859_v18 = vld [vmem:[#allocation2 + $0x1c] sm:$0x7]  ;;  %579 = vst.msk [vmem:[#allocation4] sm:$0x7] %vm3432_vm3, %v577_v24  ;;  %v510_v54 = vld [vmem:[#allocation2 + $0x8] sm:$0xf]  ;;  %vm2886_vm13 = vmor %vm516_vm11, %vm517_vm12 }
  0x19   : > { %2606 = vmatpush3.bf16.msra.mxu0 %v2669_v4  ;;  %720 = vrot.lane.b32.xlu0 %v2484_v13, %s2726_s23  ;;  %v624_v16 = vor.u32 %v623_v15, %v620_v14  ;;  %v1056_v19 = vrot.slane %v2859_v18, 5  ;;  %vm3429_vm2 = vcmask 125954   ;;  %vm3428_vm6 = vcmask 122880   ;;  %v2691_v18 = vld [vmem:[%s3422_s5 + $0x30] sm:$0xff]  }
  0x1a   : > { %2619 = vmatprep.subr.bf16.mxu0 %v2723_v1  ;;  %vm3459_vm8 = vcmask 518528   ;;  %vm647_vm9 = vcmask 257155   ;;  %vm3470_vm11 = vcmask 388355   ;;  %vm3454_vm12 = vcmask 519555  }
  0x1b   : > { %v625_v17 = vrot.slane %v624_v16, 4  ;;  %1058 = vrot.lane.b32.xlu1 %v1056_v19, %s2728_s25 }
  0x1c   : > { %2608 = vmatmul.mubr.msk.bf16.vlgmr.msra.gmra.mxu0 %vm391_vm1, %v2670_v5 }
  0x1d   : > { %2611 = vmatprep.mubr.msk.bf16.mxu0 %vm3433_vm0, %v2723_v1  ;;  %626 = vrot.lane.b32.xlu0 %v625_v17, %s2727_s24 }
  0x24   : > { %2612 = vmatmul.mubr.msk.bf16.gmra.mxu0 %vm391_vm1, %v2671_v6 }
  0x25   : > { %2615 = vmatprep.mubr.msk.bf16.mxu0 %vm3433_vm0, %v2723_v1 }
  0x2c   : > { %2616 = vmatmul.mubr.msk.bf16.gmra.mxu0 %vm391_vm1, %v2672_v7  ;;  %vm3430_vm1 = vcmask 123904  }
  0x2d   : > { %2635 = vmatprep.mubr.msk.bf16.mxu0 %vm3433_vm0, %v2723_v1  ;;  %vm3440_vm0 = vcmask 257154  }
  0x8b   : > { %v721_v21 = vpop.permute.xlu0 %720 }
  0x8f   : > { %v627_v28 = vpop.permute.xlu0 %626 }
  0x90   : > { %630 = vst.msk [vmem:[#allocation4] sm:$0x7] %vm629_vm4, %v627_v28 }
  0x91   : > { %724 = vst.msk [vmem:[#allocation4] sm:$0x7] %vm723_vm5, %v721_v21  ;;  %v533_v21 = vld [vmem:[#allocation2 + $0xc] sm:$0xf] }
  0xdc   : > { %v435_v22 = vpop.f32.mrf.mxu0 }
  0xdd   : > { %v436_v23 = vadd.f32 %v2468_v20, %v435_v22 }
  0xde   : > { %v2609_v25 = vpop.f32.mrf.mxu0 }
  0xdf   : > { %v457_v26 = vmax.f32 %v436_v23, 0.0 }
  0xe0   : > { %v438_v27 = vpop.f32.mrf.mxu0 }
  0xe1   : > { %v2555_v29 = vpack.c.bf16 %v457_v26, %v457_v26  ;;  %v439_v30 = vadd.f32 %v2468_v20, %v438_v27 }
  0xe2   : > { %v2610_v31 = vpop.f32.mrf.mxu0 }
  0xe3   : > { %v478_v32 = vshrl.u32 %v2555_v29, 16  ;;  %v481_v33 = vshll.u32 %v2555_v29, 16  ;;  %v458_v34 = vmax.f32 %v439_v30, 0.0  ;;  %v541_v29 = vld [vmem:[#allocation2 + $0x10] sm:$0xf] }
  0xe4   : > { %v443_v35 = vpop.f32.mrf.mxu0 }
  0xe5   : > { %v480_v36 = vrot.slane %v478_v32, 7  ;;  %v496_v37 = vrot.slane %v478_v32, 6  ;;  %v497_v38 = vrot.slane %v481_v33, 7  ;;  %v2556_v39 = vpack.c.bf16 %v458_v34, %v458_v34 }
  0xe6   : > { %v444_v42 = vadd.f32 %v2468_v20, %v443_v35  ;;  %v2613_v43 = vpop.f32.mrf.mxu0 }
  0xe7   : > { %v483_v44 = vor.u32 %v481_v33, %v480_v36  ;;  %v498_v45 = vor.u32 %v497_v38, %v496_v37  ;;  %v501_v46 = vshrl.u32 %v2556_v39, 16  ;;  %v504_v47 = vshll.u32 %v2556_v39, 16  ;;  %v554_v36 = vld [vmem:[#allocation2 + $0x14] sm:$0xf] }
  0xe8   : > { %v459_v48 = vmax.f32 %v444_v42, 0.0  ;;  %v446_v49 = vpop.f32.mrf.mxu0 }
  0xe9   : > { %v489_v50 = vsel %vm2872_vm7, %v483_v44, %v488_v41  ;;  %v503_v51 = vrot.slane %v501_v46, 6  ;;  %v506_v52 = vrot.slane %v504_v47, 7  ;;  %v519_v55 = vrot.slane %v501_v46, 5 }
  0xea   : > { %490 = vst [vmem:[#allocation2 + $0x4] sm:$0xf] %v489_v50  ;;  %v520_v56 = vrot.slane %v504_v47, 6  ;;  %v2557_v57 = vpack.c.bf16 %v459_v48, %v459_v48  ;;  %v447_v58 = vadd.f32 %v2468_v20, %v446_v49  ;;  %v2614_v59 = vpop.f32.mrf.mxu0  ;;  %v499_v60 = vrot.slane %v498_v45, 4 }
  0xeb   : > { %v507_v61 = vor.u32 %v506_v52, %v503_v51 }
  0xec   : > { %v521_v62 = vor.u32 %v520_v56, %v519_v55  ;;  %v524_v63 = vshrl.u32 %v2557_v57, 16  ;;  %v527_v0 = vshll.u32 %v2557_v57, 16  ;;  %v460_v2 = vmax.f32 %v447_v58, 0.0  ;;  %v451_v3 = vpop.f32.mrf.mxu0  ;;  %v574_v57 = vld [vmem:[#allocation2 + $0x18] sm:$0xf] }
  0xed   : > { %v508_v4 = vsel %vm2878_vm10, %v499_v60, %v507_v61  ;;  %v452_v5 = vadd.f32 %v2468_v20, %v451_v3 }
  0xee   : > { %v511_v6 = vsel %vm2872_vm7, %v508_v4, %v510_v54  ;;  %v526_v7 = vrot.slane %v524_v63, 5  ;;  %v529_v9 = vrot.slane %v527_v0, 6  ;;  %v2617_v10 = vpop.f32.mrf.mxu0  ;;  %v536_v12 = vrot.slane %v524_v63, 4 }
  0xef   : > { %512 = vst [vmem:[#allocation2 + $0x8] sm:$0xf] %v511_v6  ;;  %v537_v13 = vrot.slane %v527_v0, 5  ;;  %v2558_v14 = vpack.c.bf16 %v460_v2, %v460_v2  ;;  %v461_v15 = vmax.f32 %v452_v5, 0.0  ;;  %v522_v16 = vrot.slane %v521_v62, 4 }
  0xf0   : > { %v530_v17 = vor.u32 %v529_v9, %v526_v7  ;;  %v454_v22 = vpop.f32.mrf.mxu0 }
  0xf1   : > { %v538_v20 = vor.u32 %v537_v13, %v536_v12  ;;  %v547_v23 = vshrl.u32 %v2558_v14, 16  ;;  %v550_v24 = vshll.u32 %v2558_v14, 16  ;;  %v780_v25 = vld [vmem:[#allocation2 + $0x4] sm:$0x7]  ;;  %v2559_v27 = vpack.c.bf16 %v461_v15, %v461_v15 }
  0xf2   : > { %v725_v26 = vld [vmem:[#allocation2 + $0x4] sm:$0xe]  ;;  %v531_v28 = vsel %vm2886_vm13, %v522_v16, %v530_v17  ;;  %782 = vrot.lane.b32.xlu0 %v780_v25, %s2729_s28  ;;  %v2618_v32 = vpop.f32.mrf.mxu0 }
  0xf3   : > { %v727_v30 = vrot.slane %v725_v26, 6  ;;  %v941_v31 = vld [vmem:[#allocation2 + $0x4] sm:$0xe]  ;;  %v534_v33 = vsel %vm2872_vm7, %v531_v28, %v533_v21  ;;  %v539_v34 = vrot.slane %v538_v20, 4  ;;  %v549_v35 = vrot.slane %v547_v23, 7 }
  0xf4   : > { %v560_v37 = vrot.slane %v547_v23, 6  ;;  %535 = vst [vmem:[#allocation2 + $0xc] sm:$0xf] %v534_v33  ;;  %v561_v38 = vrot.slane %v550_v24, 7  ;;  %v565_v39 = vshrl.u32 %v2559_v27, 16  ;;  %v568_v41 = vshll.u32 %v2559_v27, 16 }
  0xf5   : > { %729 = vrot.lane.b32.xlu1 %v727_v30, %s2726_s23  ;;  %v2486_v42 = vrot.slane %v941_v31, 9  ;;  %v631_v43 = vld [vmem:[#allocation2 + $0x4] sm:$0xf]  ;;  %v542_v44 = vsel %vm2872_vm7, %v539_v34, %v541_v29  ;;  %v552_v45 = vor.u32 %v550_v24, %v549_v35  ;;  %v728_v58 = vrot.slane %v727_v30, 4 }
  0xf6   : > { %543 = vst [vmem:[#allocation2 + $0x10] sm:$0xf] %v542_v44  ;;  %v562_v46 = vor.u32 %v561_v38, %v560_v37  ;;  %v567_v47 = vrot.slane %v565_v39, 6  ;;  %v570_v48 = vrot.slane %v568_v41, 7  ;;  %v739_v49 = vld [vmem:[#allocation2 + $0x8] sm:$0xe] }
  0xf7   : > { %945 = vrot.lane.b32.xlu0 %v2486_v42, %s2730_s29  ;;  %v841_v50 = vld [vmem:[#allocation2 + $0x4] sm:$0xf]  ;;  %v555_v51 = vsel %vm2872_vm7, %v552_v45, %v554_v36  ;;  %v741_v52 = vrot.slane %v739_v49, 7  ;;  %v633_v54 = vshrl.u32 %v631_v43, 16  ;;  %v787_v59 = vld [vmem:[#allocation2 + $0x8] sm:$0x7] }
  0xf8   : > { %556 = vst [vmem:[#allocation2 + $0x14] sm:$0xf] %v555_v51  ;;  %v563_v55 = vrot.slane %v562_v46, 4  ;;  %v571_v56 = vor.u32 %v570_v48, %v567_v47  ;;  %v636_v60 = vshll.u32 %v631_v43, 16  ;;  %v843_v61 = vshrl.u32 %v841_v50, 16 }
  0xf9   : > { %743 = vrot.lane.b32.xlu1 %v741_v52, %s2726_s23  ;;  %v846_v62 = vshll.u32 %v841_v50, 16  ;;  %v789_v2 = vrot.slane %v787_v59, 5  ;;  %v635_v3 = vrot.slane %v633_v54, 5  ;;  %v950_v5 = vld [vmem:[#allocation2 + $0x8] sm:$0xe]  ;;  %v742_v31 = vrot.slane %v741_v52, 4 }
  0xfa   : > { %v572_v63 = vsel %vm2878_vm10, %v563_v55, %v571_v56  ;;  %v638_v4 = vrot.slane %v636_v60, 6  ;;  %v845_v6 = vrot.slane %v843_v61, 4  ;;  %v1005_v9 = vld [vmem:[#allocation2 + $0x8] sm:$0x7]  ;;  %v952_v10 = vrot.slane %v950_v5, 6  ;;  %v2673_v5 = vld [vmem:[%s3420_s3 + $0x38] sm:$0xff]  }
  0xfb   : > { %731 = vrot.lane.b32.xlu0 %v728_v58, %s2726_s23  ;;  %v575_v0 = vsel %vm2872_vm7, %v572_v63, %v574_v57  ;;  %v848_v7 = vrot.slane %v846_v62, 5  ;;  %v651_v16 = vld [vmem:[#allocation2 + $0x8] sm:$0xf]  ;;  %v753_v22 = vld [vmem:[#allocation2 + $0xc] sm:$0xe]  ;;  %v790_v20 = vrot.slane %v789_v2, 4  ;;  %1323 = vmatpush1.bf16.msra.mxu1 %v2673_v5 }
  0xfc   : > { %576 = vst [vmem:[#allocation2 + $0x18] sm:$0xf] %v575_v0  ;;  %v639_v12 = vor.u32 %v638_v4, %v635_v3  ;;  %v653_v17 = vshrl.u32 %v651_v16, 16  ;;  %v656_v21 = vshll.u32 %v651_v16, 16  ;;  %v953_v26 = vrot.slane %v952_v10, 4  ;;  %1324 = vmatprep.subr.bf16.mxu1 %v2725_v8 }
  0xfd   : > { %791 = vrot.lane.b32.xlu1 %v789_v2, %s2729_s28  ;;  %v849_v13 = vor.u32 %v848_v7, %v845_v6  ;;  %v978_v25 = vld [vmem:[#allocation2 + $0x10] sm:$0xe]  ;;  %v856_v27 = vld [vmem:[#allocation2 + $0x8] sm:$0xf]  ;;  %v2919_v32 = vld [vmem:[#allocation2 + $0xc] sm:$0x7] }
  0xfe   : > { %v640_v14 = vrot.slane %v639_v12, 4  ;;  %v655_v23 = vrot.slane %v653_v17, 6  ;;  %v658_v24 = vrot.slane %v656_v21, 7  ;;  %v858_v29 = vshrl.u32 %v856_v27, 16  ;;  %v760_v34 = vld [vmem:[#allocation2 + $0x10] sm:$0xe] }
  0xff   : > { %1007 = vrot.lane.b32.xlu0 %v1005_v9, %s2728_s25  ;;  %v850_v15 = vrot.slane %v849_v13, 4  ;;  %v861_v30 = vshll.u32 %v856_v27, 16  ;;  %v580_v35 = vld [vmem:[#allocation2 + $0x4] sm:$0x7]  ;;  %v1196_v36 = vld [vmem:[#allocation2 + $0x1c] sm:$0xe] }
 0x100   : > { %v2917_v28 = vor.u32 %v658_v24, %v655_v23  ;;  %v1188_v37 = vld [vmem:[#allocation2 + $0x14] sm:$0xe]  ;;  %v803_v38 = vrot.slane %v2919_v32, 6  ;;  %v860_v39 = vrot.slane %v858_v29, 5  ;;  %v2194_v43 = vld [vmem:[#allocation3 + $0x1c] sm:$0xe] }
 0x101   : > { %954 = vrot.lane.b32.xlu1 %v952_v10, %s2730_s29  ;;  %v863_v41 = vrot.slane %v861_v30, 6  ;;  %1189 = vst.msk [vmem:[#allocation4 + $0x14] sm:$0xe] %vm3427_vm14, %v1188_v37  ;;  %v2485_v44 = vrot.slane %v760_v34, 9  ;;  %v606_v45 = vld [vmem:[#allocation2 + $0x10] sm:$0x7] }
 0x102   : > { %v1066_v46 = vld [vmem:[#allocation2 + $0x8] sm:$0xf]  ;;  %v582_v47 = vrot.slane %v580_v35, 5  ;;  %607 = vst.msk [vmem:[#allocation4 + $0x18] sm:$0x7] %vm3432_vm3, %v606_v45  ;;  %v1198_v48 = vrot.slane %v1196_v36, 6 }
 0x103   : > { %641 = vrot.lane.b32.xlu0 %v639_v12, %s2727_s24  ;;  %v1190_v33 = vld [vmem:[#allocation2 + $0x18] sm:$0xe]  ;;  %v2196_v49 = vrot.slane %v2194_v43, 6  ;;  %v590_v50 = vld [vmem:[#allocation2 + $0x8] sm:$0x7]  ;;  %v864_v52 = vor.u32 %v863_v41, %v860_v39  ;;  %v1068_v57 = vshrl.u32 %v1066_v46, 16 }
 0x104   : > { %v2489_v42 = vrot.slane %v1190_v33, 9  ;;  %v1180_v51 = vld [vmem:[#allocation2 + $0x10] sm:$0xe]  ;;  %v2932_v54 = vld [vmem:[#allocation2 + $0xc] sm:$0xe]  ;;  %v583_v55 = vrot.slane %v582_v47, 4 }
 0x105   : > { %643 = vrot.lane.b32.xlu1 %v640_v14, %s2727_s24  ;;  %587 = vst.msk [vmem:[#allocation4] sm:$0x8] %vm3431_vm15, %v582_v47  ;;  %v1012_v56 = vld [vmem:[#allocation2 + $0xc] sm:$0x7]  ;;  %v1071_v58 = vshll.u32 %v1066_v46, 16  ;;  %v1199_v59 = vrot.slane %v1198_v48, 4 }
 0x106   : > { %1195 = vst.msk [vmem:[#allocation4 + $0x1c] sm:$0x7] %vm3432_vm3, %v2489_v42  ;;  %v2197_v60 = vrot.slane %v2196_v49, 4  ;;  %v823_v61 = vld [vmem:[#allocation2 + $0x14] sm:$0x7]  ;;  %v592_v62 = vrot.slane %v590_v50, 6 }
 0x107   : > { %851 = vrot.lane.b32.xlu0 %v850_v15, %s2731_s11  ;;  %1202 = vst.msk [vmem:[#allocation4 + $0x1c] sm:$0x8] %vm3431_vm15, %v1198_v48  ;;  %2200 = vst.msk [vmem:[#allocation5 + $0x1c] sm:$0x8] %vm3431_vm15, %v2196_v49  ;;  %v1182_v63 = vrot.slane %v1180_v51, 7  ;;  %v966_v0 = vrot.slane %v2932_v54, 7 }
 0x108   : > { %589 = vst.msk [vmem:[#allocation4 + $0x8] sm:$0x3] %vm3430_vm1, %v583_v55  ;;  %1203 = vst.msk [vmem:[#allocation4 + $0x24] sm:$0x3] %vm3430_vm1, %v1199_v59  ;;  %v600_v2 = vld [vmem:[#allocation2 + $0xc] sm:$0x7] }
 0x109   : > { %755 = vrot.lane.b32.xlu1 %v753_v22, %s2726_s23  ;;  %2201 = vst.msk [vmem:[#allocation5 + $0x24] sm:$0x3] %vm3430_vm1, %v2197_v60  ;;  %v608_v3 = vld [vmem:[#allocation2 + $0x14] sm:$0x7]  ;;  %v1014_v4 = vrot.slane %v1012_v56, 5  ;;  %v865_v9 = vrot.slane %v864_v52, 4 }
 0x10a   : > { %597 = vst.msk [vmem:[#allocation4 + $0x8] sm:$0xc] %vm3429_vm2, %v592_v62  ;;  %1186 = vst.msk [vmem:[#allocation4 + $0xc] sm:$0xc] %vm3429_vm2, %v1182_v63  ;;  %v1166_v6 = vld [vmem:[#allocation2 + $0x8] sm:$0xe] }
 0x10b   : > { %793 = vrot.lane.b32.xlu0 %v790_v20, %s2729_s28  ;;  %v1172_v7 = vld [vmem:[#allocation2 + $0xc] sm:$0xe]  ;;  %v1070_v10 = vrot.slane %v1068_v57, 4  ;;  %v1073_v12 = vrot.slane %v1071_v58, 5  ;;  %v593_v13 = vrot.slane %v592_v62, 4  ;;  %v1183_v14 = vrot.slane %v1182_v63, 4 }
 0x10c   : > { %v602_v15 = vrot.slane %v600_v2, 7  ;;  %v610_v16 = vrot.slane %v608_v3, 5  ;;  %v2488_v17 = vrot.slane %v1166_v6, 9  ;;  %v1174_v21 = vrot.slane %v1172_v7, 6  ;;  %v2674_v22 = vld [vmem:[%s3420_s3 + $0x30] sm:$0xff]   ;;  %v2675_v29 = vld [vmem:[%s3420_s3 + $0x28] sm:$0xff]  }
 0x10d   : > { %980 = vrot.lane.b32.xlu1 %v978_v25, %s2730_s29  ;;  %599 = vst.msk [vmem:[#allocation4 + $0x10] sm:$0x1] %vm3428_vm6, %v593_v13  ;;  %1187 = vst.msk [vmem:[#allocation4 + $0x14] sm:$0x1] %vm3428_vm6, %v1183_v14  ;;  %v1015_v23 = vrot.slane %v1014_v4, 4  ;;  %v1074_v25 = vor.u32 %v1073_v12, %v1070_v10  ;;  %1325 = vmatpush1.bf16.msra.mxu1 %v2674_v22  ;;  %v660_v34 = vrot.slane %v2917_v28, 4 }
 0x10e   : > { %605 = vst.msk [vmem:[#allocation4 + $0x10] sm:$0xe] %vm3427_vm14, %v602_v15  ;;  %v611_v20 = vrot.slane %v610_v16, 4  ;;  %v2960_v24 = vld [vmem:[#allocation2 + $0x10] sm:$0x7]  ;;  %1326 = vmatprep.subr.bf16.mxu1 %v2725_v8  ;;  %v2676_v37 = vld [vmem:[%s3420_s3 + $0x20] sm:$0xff]  }
 0x10f   : > { %956 = vrot.lane.b32.xlu0 %v953_v26, %s2730_s29  ;;  %614 = vst.msk [vmem:[#allocation4 + $0x18] sm:$0x8] %vm3431_vm15, %v610_v16  ;;  %v1175_v26 = vrot.slane %v1174_v21, 4  ;;  %1178 = vst.msk [vmem:[#allocation4 + $0x4] sm:$0x8] %vm3431_vm15, %v1174_v21  ;;  %v1028_v27 = vrot.slane %v2960_v24, 6 }
 0x110   : > { %1171 = vst.msk [vmem:[#allocation4 + $0x4] sm:$0x7] %vm3432_vm3, %v2488_v17  ;;  %v1075_v30 = vrot.slane %v1074_v25, 4  ;;  %v2977_v35 = vld [vmem:[#allocation2 + $0x14] sm:$0xe]  ;;  %v2677_v45 = vld [vmem:[%s3420_s3 + $0x18] sm:$0xff]  }
 0x111   : > { %661 = vrot.lane.b32.xlu1 %v2917_v28, %s2727_s24  ;;  %615 = vst.msk [vmem:[#allocation4 + $0x20] sm:$0x3] %vm3430_vm1, %v611_v20  ;;  %1179 = vst.msk [vmem:[#allocation4 + $0xc] sm:$0x3] %vm3430_vm1, %v1175_v26  ;;  %1327 = vmatpush1.bf16.msra.mxu1 %v2675_v29  ;;  %v876_v36 = vld [vmem:[#allocation2 + $0xc] sm:$0xf] }
 0x112   : > { %1328 = vmatprep.subr.bf16.mxu1 %v2725_v8  ;;  %v770_v39 = vrot.slane %v2977_v35, 6  ;;  %v1040_v41 = vld [vmem:[#allocation2 + $0x14] sm:$0x7]  ;;  %v878_v42 = vshrl.u32 %v876_v36, 16  ;;  %v881_v43 = vshll.u32 %v876_v36, 16  ;;  %v804_v28 = vrot.slane %v803_v38, 4 }
 0x113   : > { %745 = vrot.lane.b32.xlu0 %v742_v31, %s2726_s23  ;;  %v815_v31 = vld [vmem:[#allocation2 + $0x10] sm:$0x7]  ;;  %v1042_v46 = vrot.slane %v1040_v41, 7  ;;  %v967_v32 = vrot.slane %v966_v0, 4  ;;  %v985_v51 = vld [vmem:[#allocation2 + $0x14] sm:$0xe] }
 0x114   : > { %v817_v33 = vrot.slane %v815_v31, 7  ;;  %v880_v47 = vrot.slane %v878_v42, 6  ;;  %v883_v48 = vrot.slane %v881_v43, 7  ;;  %v2487_v59 = vrot.slane %v985_v51, 9  ;;  %v1101_v54 = vld [vmem:[#allocation2 + $0x10] sm:$0xf] }
 0x115   : > { %805 = vrot.lane.b32.xlu1 %v803_v38, %s2729_s28  ;;  %1329 = vmatpush1.bf16.msra.mxu1 %v2676_v37  ;;  %v671_v38 = vld [vmem:[#allocation2 + $0xc] sm:$0xf]  ;;  %v1103_v63 = vshrl.u32 %v1101_v54, 16  ;;  %v1029_v2 = vrot.slane %v1028_v27, 4  ;;  %v896_v3 = vld [vmem:[#allocation2 + $0x10] sm:$0xf] }
 0x116   : > { %1330 = vmatprep.subr.bf16.mxu1 %v2725_v8  ;;  %v884_v55 = vor.u32 %v883_v48, %v880_v47  ;;  %v673_v58 = vshrl.u32 %v671_v38, 16  ;;  %v2679_v60 = vld [vmem:[%s3420_s3 + $0x8] sm:$0xff]   ;;  %v684_v5 = vld [vmem:[#allocation2 + $0x10] sm:$0xf]  ;;  %v2680_v6 = vld [vmem:[%s3420_s3] sm:$0xff]   ;;  %v898_v12 = vshrl.u32 %v896_v3, 16 }
 0x117   : > { %764 = vrot.lane.b32.xlu0 %v2485_v44, %s2726_s23  ;;  %v1081_v44 = vld [vmem:[#allocation2 + $0xc] sm:$0xf]  ;;  %v698_v14 = vld [vmem:[#allocation2 + $0x14] sm:$0xf]  ;;  %v686_v15 = vshrl.u32 %v684_v5, 16  ;;  %v689_v16 = vshll.u32 %v684_v5, 16 }
 0x118   : > { %v1083_v49 = vshrl.u32 %v1081_v44, 16  ;;  %v1086_v50 = vshll.u32 %v1081_v44, 16  ;;  %v675_v62 = vrot.slane %v673_v58, 7  ;;  %v2681_v17 = vld [vmem:[%s3420_s3 + $0x40] sm:$0xff]   ;;  %v901_v21 = vshll.u32 %v896_v3, 16 }
 0x119   : > { %866 = vrot.lane.b32.xlu1 %v864_v52, %s2731_s11  ;;  %1331 = vmatpush1.bf16.msra.mxu1 %v2677_v45  ;;  %v2678_v52 = vld [vmem:[%s3420_s3 + $0x10] sm:$0xff]   ;;  %v900_v20 = vrot.slane %v898_v12, 7  ;;  %v703_v24 = vshll.u32 %v698_v14, 16  ;;  %v885_v25 = vrot.slane %v884_v55, 4  ;;  %v688_v26 = vrot.slane %v686_v15, 4 }
 0x11a   : > { %1332 = vmatprep.subr.bf16.mxu1 %v2725_v8  ;;  %v1085_v56 = vrot.slane %v1083_v49, 5  ;;  %v1088_v57 = vrot.slane %v1086_v50, 6  ;;  %v1121_v29 = vld [vmem:[#allocation2 + $0x14] sm:$0xf]  ;;  %v1048_v43 = vld [vmem:[#allocation2 + $0x18] sm:$0x7] }
 0x11b   : > { %825 = vrot.lane.b32.xlu0 %v823_v61, %s2729_s28  ;;  %v903_v31 = vor.u32 %v901_v21, %v900_v20  ;;  %v1123_v36 = vshrl.u32 %v1121_v29, 16  ;;  %v1126_v45 = vshll.u32 %v1121_v29, 16  ;;  %v1134_v49 = vld [vmem:[#allocation2 + $0x18] sm:$0xf]  ;;  %vm3435_vm14 = vcmask 255104  }
 0x11c   : > { %v1089_v61 = vor.u32 %v1088_v57, %v1085_v56  ;;  %v1139_v56 = vshll.u32 %v1134_v49, 16  ;;  %v1148_v57 = vld [vmem:[#allocation2 + $0x1c] sm:$0xf]  ;;  %vm3445_vm6 = vcmask 649728   ;;  %vm3436_vm2 = vcmask 386304  }
 0x11d   : > { %968 = vrot.lane.b32.xlu1 %v966_v0, %s2730_s29  ;;  %1333 = vmatpush1.bf16.msra.mxu1 %v2678_v52  ;;  %v1106_v0 = vshll.u32 %v1101_v54, 16  ;;  %v1125_v44 = vrot.slane %v1123_v36, 7  ;;  %v923_v52 = vld [vmem:[#allocation2 + $0x18] sm:$0xf]  ;;  %vm3438_vm1 = vcmask 780928   ;;  %vm3437_vm15 = vcmask 912128  }
 0x11e   : > { %1334 = vmatprep.subr.bf16.mxu1 %v2725_v8  ;;  %v1090_v13 = vrot.slane %v1089_v61, 4  ;;  %v928_v54 = vshll.u32 %v923_v52, 16  ;;  %v2694_v36 = vld [vmem:[%s3422_s5 + $0x18] sm:$0xff]   ;;  %vm3439_vm3 = vcmask 517504  }
 0x11f   : > { %868 = vrot.lane.b32.xlu0 %v865_v9, %s2731_s11  ;;  %v1105_v9 = vrot.slane %v1103_v63, 6  ;;  %v1108_v10 = vrot.slane %v1106_v0, 7  ;;  %v1128_v50 = vor.u32 %v1126_v45, %v1125_v44  ;;  %v1141_v63 = vrot.slane %v1139_v56, 5 }
 0x120   : > { %v1150_v0 = vshrl.u32 %v1148_v57, 16  ;;  %v930_v5 = vrot.slane %v928_v54, 6 }
 0x121   : > { %1016 = vrot.lane.b32.xlu1 %v1014_v4, %s2728_s25  ;;  %1335 = vmatpush1.bf16.msra.mxu1 %v2679_v60  ;;  %v676_v4 = vshll.u32 %v671_v38, 16  ;;  %v1109_v22 = vor.u32 %v1108_v10, %v1105_v9 }
 0x122   : > { %1336 = vmatprep.subr.bf16.mxu1 %v2725_v8  ;;  %v1152_v9 = vrot.slane %v1150_v0, 5 }
 0x123   : > { %1018 = vrot.lane.b32.xlu0 %v1015_v23, %s2728_s25  ;;  %v678_v7 = vor.u32 %v676_v4, %v675_v62  ;;  %v700_v23 = vshrl.u32 %v698_v14, 16  ;;  %v1110_v38 = vrot.slane %v1109_v22, 4 }
 0x125   : > { %1030 = vrot.lane.b32.xlu1 %v1028_v27, %s2728_s25  ;;  %1337 = vmatpush1.bf16.msra.mxu1 %v2680_v6  ;;  %v691_v27 = vrot.slane %v689_v16, 5  ;;  %v771_v16 = vrot.slane %v770_v39, 4 }
 0x126   : > { %1352 = vmatprep.subr.bf16.mxu1 %v2725_v8 }
 0x127   : > { %1076 = vrot.lane.b32.xlu0 %v1075_v30, %s2732_s19  ;;  %v909_v30 = vld [vmem:[#allocation2 + $0x14] sm:$0xf]  ;;  %v692_v37 = vor.u32 %v691_v27, %v688_v26  ;;  %v2692_v27 = vld [vmem:[%s3422_s5 + $0x28] sm:$0xff]  }
 0x128   : > { %v911_v41 = vshrl.u32 %v909_v30, 16  ;;  %v914_v42 = vshll.u32 %v909_v30, 16 }
 0x129   : > { %818 = vrot.lane.b32.xlu1 %v817_v33, %s2729_s28  ;;  %1353 = vmatpush2.bf16.msra.mxu1 %v2681_v17  ;;  %v702_v33 = vrot.slane %v700_v23, 5  ;;  %v3040_v17 = vpop.permute.xlu1 %1058 }
 0x12a   : > { %2319 = vmatprep.subr.bf16.mxu1 %v2725_v8  ;;  %v913_v47 = vrot.slane %v911_v41, 4  ;;  %v916_v48 = vrot.slane %v914_v42, 5 }
 0x12b   : > { %663 = vrot.lane.b32.xlu0 %v660_v34, %s2727_s24  ;;  %v705_v34 = vrot.slane %v703_v24, 6  ;;  %v1057_v24 = vrot.slane %v1056_v19, 4 }
 0x12c   : > { %v917_v51 = vor.u32 %v916_v48, %v913_v47 }
 0x12d   : > { %772 = vrot.lane.b32.xlu1 %v770_v39, %s2726_s23 }
 0x12e   : > { %v918_v60 = vrot.slane %v917_v51, 4 }
 0x12f   : > { %807 = vrot.lane.b32.xlu0 %v804_v28, %s2729_s28  ;;  %v706_v28 = vor.u32 %v705_v34, %v702_v33 }
 0x131   : > { %1043 = vrot.lane.b32.xlu1 %v1042_v46, %s2728_s25  ;;  %v693_v46 = vrot.slane %v692_v37, 4  ;;  %v707_v6 = vrot.slane %v706_v28, 4 }
 0x133   : > { %970 = vrot.lane.b32.xlu0 %v967_v32, %s2730_s29  ;;  %v829_v32 = vld [vmem:[#allocation2 + $0x18] sm:$0x7] }
 0x134   : > { %v831_v58 = vrot.slane %v829_v32, 5 }
 0x135   : > { %886 = vrot.lane.b32.xlu1 %v884_v55, %s2731_s11  ;;  %v1136_v55 = vshrl.u32 %v1134_v49, 16 }
 0x136   : > { %v832_v15 = vrot.slane %v831_v58, 4 }
 0x137   : > { %989 = vrot.lane.b32.xlu0 %v2487_v59, %s2730_s29  ;;  %v925_v59 = vshrl.u32 %v923_v52, 16  ;;  %v1138_v62 = vrot.slane %v1136_v55, 4 }
 0x139   : > { %1091 = vrot.lane.b32.xlu1 %v1089_v61, %s2732_s19  ;;  %v993_v61 = vld [vmem:[#allocation2 + $0x18] sm:$0xe]  ;;  %v927_v4 = vrot.slane %v925_v59, 5 }
 0x13a   : > { %v995_v3 = vrot.slane %v993_v61, 6 }
 0x13b   : > { %1032 = vrot.lane.b32.xlu0 %v1029_v2, %s2728_s25  ;;  %v1153_v2 = vshll.u32 %v1148_v57, 16  ;;  %v931_v12 = vor.u32 %v930_v5, %v927_v4 }
 0x13c   : > { %v996_v21 = vrot.slane %v995_v3, 4 }
 0x13d   : > { %679 = vrot.lane.b32.xlu1 %v678_v7, %s2727_s24  ;;  %v1142_v7 = vor.u32 %v1141_v63, %v1138_v62  ;;  %v1155_v10 = vrot.slane %v1153_v2, 6  ;;  %v932_v20 = vrot.slane %v931_v12, 4 }
 0x13f   : > { %1093 = vrot.lane.b32.xlu0 %v1090_v13, %s2732_s19  ;;  %v1143_v13 = vrot.slane %v1142_v7, 4  ;;  %v1156_v14 = vor.u32 %v1155_v10, %v1152_v9 }
 0x141   : > { %1111 = vrot.lane.b32.xlu1 %v1109_v22, %s2732_s19  ;;  %v1157_v22 = vrot.slane %v1156_v14, 4 }
 0x143   : > { %888 = vrot.lane.b32.xlu0 %v885_v25, %s2731_s11  ;;  %v2690_v25 = vld [vmem:[%s3422_s5 + $0x38] sm:$0xff]  }
 0x144   : > { %2620 = vmatpush3.bf16.msra.mxu0 %v2690_v25 }
 0x145   : > { %904 = vrot.lane.b32.xlu1 %v903_v31, %s2731_s11  ;;  %2621 = vmatprep.subr.bf16.mxu0 %v2723_v1  ;;  %v2693_v31 = vld [vmem:[%s3422_s5 + $0x20] sm:$0xff]  }
 0x147   : > { %1050 = vrot.lane.b32.xlu0 %v1048_v43, %s2728_s25 }
 0x148   : > { %2622 = vmatpush3.bf16.msra.mxu0 %v2691_v18 }
 0x149   : > { %708 = vrot.lane.b32.xlu1 %v706_v28, %s2727_s24  ;;  %2623 = vmatprep.subr.bf16.mxu0 %v2723_v1 }
 0x14b   : > { %694 = vrot.lane.b32.xlu0 %v693_v46, %s2727_s24 }
 0x14c   : > { %2624 = vmatpush3.bf16.msra.mxu0 %v2692_v27  ;;  %v2685_v27 = vld [vmem:[#allocation4 + $0x14] ss:$8 sps:$4 sm:$0xff]  }
 0x14d   : > { %1129 = vrot.lane.b32.xlu1 %v1128_v50, %s2732_s19  ;;  %2625 = vmatprep.subr.bf16.mxu0 %v2723_v1 }
 0x14f   : > { %1113 = vrot.lane.b32.xlu0 %v1110_v38, %s2732_s19 }
 0x150   : > { %2626 = vmatpush3.bf16.msra.mxu0 %v2693_v31 }
 0x151   : > { %833 = vrot.lane.b32.xlu1 %v831_v58, %s2729_s28  ;;  %2627 = vmatprep.subr.bf16.mxu0 %v2723_v1 }
 0x153   : > { %919 = vrot.lane.b32.xlu0 %v918_v60, %s2731_s11 }
 0x154   : > { %2628 = vmatpush3.bf16.msra.mxu0 %v2694_v36  ;;  %v2695_v36 = vld [vmem:[%s3422_s5 + $0x10] sm:$0xff]  }
 0x155   : > { %997 = vrot.lane.b32.xlu1 %v995_v3, %s2730_s29  ;;  %2629 = vmatprep.subr.bf16.mxu0 %v2723_v1 }
 0x157   : > { %710 = vrot.lane.b32.xlu0 %v707_v6, %s2727_s24 }
 0x158   : > { %2630 = vmatpush3.bf16.msra.mxu0 %v2695_v36 }
 0x159   : > { %933 = vrot.lane.b32.xlu1 %v931_v12, %s2731_s11  ;;  %2631 = vmatprep.subr.bf16.mxu0 %v2723_v1 }
 0x15b   : > { %1144 = vrot.lane.b32.xlu0 %v1143_v13, %s2732_s19  ;;  %v2684_v13 = vld [vmem:[#allocation4 + $0x4] ss:$8 sps:$4 sm:$0xff]  }
 0x15d   : > { %1158 = vrot.lane.b32.xlu1 %v1156_v14, %s2732_s19 }
 0x15f   : > { %835 = vrot.lane.b32.xlu0 %v832_v15, %s2729_s28 }
 0x161   : > { %774 = vrot.lane.b32.xlu1 %v771_v16, %s2726_s23 }
 0x163   : > { %999 = vrot.lane.b32.xlu0 %v996_v21, %s2730_s29 }
 0x164   : > { %v783_v23 = vpop.permute.xlu0 %782 }
 0x165   : > { %786 = vst.msk [vmem:[#allocation4] sm:$0x7] %vm3459_vm8, %v783_v23  ;;  %935 = vrot.lane.b32.xlu1 %v932_v20, %s2731_s11  ;;  %vm3463_vm8 = vcmask 650753  }
 0x167   : > { %v730_v35 = vpop.permute.xlu1 %729  ;;  %1160 = vrot.lane.b32.xlu0 %v1157_v22, %s2732_s19 }
 0x169   : > { %v946_v39 = vpop.permute.xlu0 %945  ;;  %1060 = vrot.lane.b32.xlu1 %v1057_v24, %s2728_s25 }
 0x16b   : > { %v744_v19 = vpop.permute.xlu1 %743 }
 0x16d   : > { %v732_v26 = vpop.permute.xlu0 %731 }
 0x16f   : > { %v792_v29 = vpop.permute.xlu1 %791 }
 0x171   : > { %v1008_v30 = vpop.permute.xlu0 %1007 }
 0x173   : > { %v955_v33 = vpop.permute.xlu1 %954 }
 0x175   : > { %v642_v34 = vpop.permute.xlu0 %641 }
 0x176   : > { %648 = vst.msk [vmem:[#allocation4] sm:$0x8] %vm647_vm9, %v642_v34 }
 0x177   : > { %736 = vst.msk [vmem:[#allocation4] sm:$0x8] %vm3470_vm11, %v730_v35  ;;  %v644_v37 = vpop.permute.xlu1 %643 }
 0x178   : > { %798 = vst.msk [vmem:[#allocation4] sm:$0x8] %vm3454_vm12, %v792_v29  ;;  %vm3462_vm12 = vcmask 519553  }
 0x179   : > { %650 = vst.msk [vmem:[#allocation4 + $0x8] sm:$0x3] %vm3435_vm14, %v644_v37  ;;  %v852_v41 = vpop.permute.xlu0 %851  ;;  %vm3441_vm14 = vcmask 388354   ;;  %v2696_v37 = vld [vmem:[%s3422_s5 + $0x8] sm:$0xff]  }
 0x17a   : > { %855 = vst.msk [vmem:[#allocation4] sm:$0x7] %vm3445_vm6, %v852_v41  ;;  %vm3451_vm6 = vcmask 385280   ;;  %2632 = vmatpush3.bf16.msra.mxu0 %v2696_v37  ;;  %v2697_v41 = vld [vmem:[%s3422_s5] sm:$0xff]  }
 0x17b   : > { %738 = vst.msk [vmem:[#allocation4 + $0x8] sm:$0x3] %vm3436_vm2, %v732_v26  ;;  %v3076_v42 = vpop.permute.xlu1 %755  ;;  %vm3442_vm2 = vcmask 519554   ;;  %2633 = vmatprep.subr.bf16.mxu0 %v2723_v1 }
 0x17c   : > { %949 = vst.msk [vmem:[#allocation4] sm:$0x7] %vm3438_vm1, %v946_v39  ;;  %vm3444_vm1 = vcmask 781955  }
 0x17d   : > { %1011 = vst.msk [vmem:[#allocation4] sm:$0x7] %vm3437_vm15, %v1008_v30  ;;  %v794_v43 = vpop.permute.xlu0 %793  ;;  %vm3443_vm15 = vcmask 650755  }
 0x17e   : > { %800 = vst.msk [vmem:[#allocation4 + $0x8] sm:$0x3] %vm3439_vm3, %v794_v43  ;;  %vm3448_vm3 = vcmask 648704   ;;  %2634 = vmatpush3.bf16.msra.mxu0 %v2697_v41 }
 0x17f   : > { %v3081_v28 = vpop.permute.xlu1 %980 }
 0x181   : > { %v957_v44 = vpop.permute.xlu0 %956 }
 0x183   : > { %v662_v45 = vpop.permute.xlu1 %661 }
 0x184   : > { %668 = vst.msk [vmem:[#allocation4 + $0x8] sm:$0xc] %vm3440_vm0, %v662_v45  ;;  %vm3446_vm0 = vcmask 779904  }
 0x185   : > { %v746_v46 = vpop.permute.xlu0 %745  ;;  %750 = vst.msk [vmem:[#allocation4 + $0x8] sm:$0xc] %vm3441_vm14, %v744_v19  ;;  %vm3449_vm14 = vcmask 913155  }
 0x187   : > { %v806_v47 = vpop.permute.xlu1 %805 }
 0x188   : > { %812 = vst.msk [vmem:[#allocation4 + $0x8] sm:$0xc] %vm3442_vm2, %v806_v47  ;;  %vm3447_vm2 = vcmask 911104  }
 0x189   : > { %v3086_v48 = vpop.permute.xlu0 %764 }
 0x18b   : > { %v867_v49 = vpop.permute.xlu1 %866 }
 0x18c   : > { %873 = vst.msk [vmem:[#allocation4] sm:$0x8] %vm3443_vm15, %v867_v49  ;;  %vm3450_vm15 = vcmask 1043328  }
 0x18d   : > { %v3089_v50 = vpop.permute.xlu0 %825  ;;  %961 = vst.msk [vmem:[#allocation4] sm:$0x8] %vm3444_vm1, %v955_v33  ;;  %vm3453_vm1 = vcmask 254080  }
 0x18f   : > { %v969_v32 = vpop.permute.xlu1 %968 }
 0x191   : > { %v869_v38 = vpop.permute.xlu0 %868 }
 0x192   : > { %875 = vst.msk [vmem:[#allocation4 + $0x8] sm:$0x3] %vm3448_vm3, %v869_v38  ;;  %vm3455_vm3 = vcmask 781954  }
 0x193   : > { %963 = vst.msk [vmem:[#allocation4 + $0x8] sm:$0x3] %vm3446_vm0, %v957_v44  ;;  %v1017_v51 = vpop.permute.xlu1 %1016  ;;  %vm3452_vm0 = vcmask 516480  }
 0x194   : > { %1023 = vst.msk [vmem:[#allocation4] sm:$0x8] %vm3449_vm14, %v1017_v51  ;;  %vm3457_vm14 = vcmask 913154  }
 0x195   : > { %v1019_v52 = vpop.permute.xlu0 %1018 }
 0x196   : > { %1025 = vst.msk [vmem:[#allocation4 + $0x8] sm:$0x3] %vm3447_vm2, %v1019_v52  ;;  %vm3456_vm2 = vcmask 650754  }
 0x197   : > { %v1031_v55 = vpop.permute.xlu1 %1030 }
 0x199   : > { %v1077_v56 = vpop.permute.xlu0 %1076 }
 0x19a   : > { %1080 = vst.msk [vmem:[#allocation4] sm:$0x7] %vm3450_vm15, %v1077_v56  ;;  %vm3458_vm15 = vcmask 1044355  }
 0x19b   : > { %v819_v57 = vpop.permute.xlu1 %818 }
 0x19d   : > { %v664_v58 = vpop.permute.xlu0 %663 }
 0x19e   : > { %670 = vst.msk [vmem:[#allocation4 + $0x10] sm:$0x1] %vm3453_vm1, %v664_v58  ;;  %vm1099_vm1 = vcmask 1042304  }
 0x19f   : > { %752 = vst.msk [vmem:[#allocation4 + $0x10] sm:$0x1] %vm3451_vm6, %v746_v46  ;;  %v773_v59 = vpop.permute.xlu1 %772  ;;  %vm3460_vm6 = vcmask 257153  }
 0x1a1   : > { %v808_v54 = vpop.permute.xlu0 %807 }
 0x1a2   : > { %814 = vst.msk [vmem:[#allocation4 + $0x10] sm:$0x1] %vm3452_vm0, %v808_v54  ;;  %vm3461_vm0 = vcmask 388353  }
 0x1a3   : > { %v1044_v60 = vpop.permute.xlu1 %1043 }
 0x1a5   : > { %v971_v61 = vpop.permute.xlu0 %970 }
 0x1a7   : > { %v887_v62 = vpop.permute.xlu1 %886 }
 0x1a8   : > { %893 = vst.msk [vmem:[#allocation4 + $0x8] sm:$0xc] %vm3456_vm2, %v887_v62  ;;  %vm3469_vm2 = vcmask 647680  }
 0x1a9   : > { %v990_v63 = vpop.permute.xlu0 %989  ;;  %975 = vst.msk [vmem:[#allocation4 + $0x8] sm:$0xc] %vm3455_vm3, %v969_v32  ;;  %vm3466_vm3 = vcmask 1044354  }
 0x1aa   : > { %1037 = vst.msk [vmem:[#allocation4 + $0x8] sm:$0xc] %vm3457_vm14, %v1031_v55  ;;  %vm3468_vm14 = vcmask 778880  }
 0x1ab   : > { %v1092_v0 = vpop.permute.xlu1 %1091 }
 0x1ac   : > { %1098 = vst.msk [vmem:[#allocation4] sm:$0x8] %vm3458_vm15, %v1092_v0  ;;  %vm3467_vm15 = vcmask 910080  }
 0x1ad   : > { %v1033_v2 = vpop.permute.xlu0 %1032 }
 0x1af   : > { %v680_v3 = vpop.permute.xlu1 %679 }
 0x1b0   : > { %683 = vst.msk [vmem:[#allocation4 + $0x10] sm:$0xe] %vm3460_vm6, %v680_v3  ;;  %vm3464_vm6 = vcmask 781953   ;;  %v1656_v3 = vld [vmem:[#allocation3] sm:$0xf] }
 0x1b1   : > { %v1094_v4 = vpop.permute.xlu0 %1093  ;;  %759 = vst.msk [vmem:[#allocation4 + $0x10] sm:$0xe] %vm3461_vm0, %v3076_v42  ;;  %vm3465_vm0 = vcmask 913153   ;;  %v2490_v42 = vld [vmem:[%s3421_s4] ss:$0 sm:$0xff] }
 0x1b2   : > { %1100 = vst.msk [vmem:[#allocation4 + $0x8] sm:$0x3] %vm1099_vm1, %v1094_v4  ;;  %v3164_v4 = vld [vmem:[#allocation3 + $0x1c] sm:$0x7] }
 0x1b3   : > { %822 = vst.msk [vmem:[#allocation4 + $0x10] sm:$0xe] %vm3462_vm12, %v819_v57  ;;  %v1112_v5 = vpop.permute.xlu1 %1111  ;;  %vm1312_vm12 = vcmask 130048  }
 0x1b4   : > { %1118 = vst.msk [vmem:[#allocation4 + $0x8] sm:$0xc] %vm3466_vm3, %v1112_v5  ;;  %2506 = vmatprep.mubr.msk.bf16.mxu1 %vm1312_vm12, %v2684_v13  ;;  %vm3480_vm3 = vcmask 519555   ;;  %v1658_v5 = vshrl.u32 %v1656_v3, 16 }
 0x1b5   : > { %v889_v6 = vpop.permute.xlu0 %888 }
 0x1b6   : > { %895 = vst.msk [vmem:[#allocation4 + $0x10] sm:$0x1] %vm3469_vm2, %v889_v6  ;;  %vm3483_vm2 = vcmask 912128   ;;  %v1661_v6 = vshll.u32 %v1656_v3, 16  ;;  %v1660_v13 = vrot.slane %v1658_v5, 4 }
 0x1b7   : > { %977 = vst.msk [vmem:[#allocation4 + $0x10] sm:$0x1] %vm3468_vm14, %v971_v61  ;;  %v905_v7 = vpop.permute.xlu1 %904  ;;  %vm3482_vm14 = vcmask 780928  }
 0x1b8   : > { %1039 = vst.msk [vmem:[#allocation4 + $0x10] sm:$0x1] %vm3467_vm15, %v1033_v2  ;;  %vm3481_vm15 = vcmask 649728  }
 0x1b9   : > { %908 = vst.msk [vmem:[#allocation4 + $0x10] sm:$0xe] %vm3463_vm8, %v905_v7  ;;  %v1051_v9 = vpop.permute.xlu0 %1050  ;;  %vm3471_vm8 = vcmask 1044353   ;;  %v2060_v7 = vrot.slane %v3164_v4, 5 }
 0x1ba   : > { %984 = vst.msk [vmem:[#allocation4 + $0x10] sm:$0xe] %vm3464_vm6, %v3081_v28  ;;  %vm3472_vm6 = vcmask 1041280  }
 0x1bb   : > { %1047 = vst.msk [vmem:[#allocation4 + $0x10] sm:$0xe] %vm3465_vm0, %v1044_v60  ;;  %v709_v10 = vpop.permute.xlu1 %708  ;;  %v2682_v12 = vld [vmem:[#allocation4] ss:$8 sps:$4 sm:$0xff]   ;;  %vm3479_vm0 = vcmask 518528   ;;  %2062 = vrot.lane.b32.xlu0 %v2060_v7, %s2728_s25 }
 0x1bc   : > { %714 = vst.msk [vmem:[#allocation4 + $0x18] sm:$0x8] %vm647_vm9, %v709_v10  ;;  %1355 = vmatmul.mubr.bf16.vlgmr.msra.gmra.mxu1 %v2682_v12 }
 0x1bd   : > { %v695_v14 = vpop.permute.xlu0 %694  ;;  %778 = vst.msk [vmem:[#allocation4 + $0x18] sm:$0x8] %vm3470_vm11, %v773_v59  ;;  %vm3484_vm11 = vcmask 255104   ;;  %2507 = vmatprep.mubr.msk.bf16.mxu1 %vm1312_vm12, %v2685_v27 }
 0x1be   : > { %697 = vst.msk [vmem:[#allocation4 + $0x18] sm:$0x7] %vm629_vm4, %v695_v14 }
 0x1bf   : > { %767 = vst.msk [vmem:[#allocation4 + $0x18] sm:$0x7] %vm723_vm5, %v3086_v48  ;;  %v1130_v15 = vpop.permute.xlu1 %1129 }
 0x1c0   : > { %828 = vst.msk [vmem:[#allocation4 + $0x18] sm:$0x7] %vm3479_vm0, %v3089_v50  ;;  %vm3485_vm0 = vcmask 650755  }
 0x1c1   : > { %1133 = vst.msk [vmem:[#allocation4 + $0x10] sm:$0xe] %vm3471_vm8, %v1130_v15  ;;  %v1114_v16 = vpop.permute.xlu0 %1113  ;;  %vm3486_vm8 = vcmask 781955  }
 0x1c2   : > { %1120 = vst.msk [vmem:[#allocation4 + $0x10] sm:$0x1] %vm3472_vm6, %v1114_v16  ;;  %vm3487_vm6 = vcmask 1043328  }
 0x1c3   : > { %v834_v21 = vpop.permute.xlu1 %833 }
 0x1c4   : > { %839 = vst.msk [vmem:[#allocation4 + $0x18] sm:$0x8] %vm3480_vm3, %v834_v21  ;;  %vm3488_vm3 = vcmask 913155   ;;  %v1750_v21 = vld [vmem:[#allocation3] sm:$0xe] }
 0x1c5   : > { %v920_v22 = vpop.permute.xlu0 %919 }
 0x1c6   : > { %922 = vst.msk [vmem:[#allocation4 + $0x18] sm:$0x7] %vm3481_vm15, %v920_v22  ;;  %vm3489_vm15 = vcmask 1044355  }
 0x1c7   : > { %992 = vst.msk [vmem:[#allocation4 + $0x18] sm:$0x7] %vm3482_vm14, %v990_v63  ;;  %v998_v20 = vpop.permute.xlu1 %997  ;;  %vm3490_vm14 = vcmask 386304  }
 0x1c8   : > { %1053 = vst.msk [vmem:[#allocation4 + $0x18] sm:$0x7] %vm3483_vm2, %v1051_v9  ;;  %vm3491_vm2 = vcmask 517504   ;;  %v2146_v9 = vld [vmem:[#allocation3 + $0x1c] sm:$0xf] }
 0x1c9   : > { %v711_v23 = vpop.permute.xlu0 %710  ;;  %v2148_v10 = vshrl.u32 %v2146_v9, 16  ;;  %v2151_v12 = vshll.u32 %v2146_v9, 16 }
 0x1ca   : > { %715 = vst.msk [vmem:[#allocation4 + $0x20] sm:$0x3] %vm3484_vm11, %v711_v23  ;;  %vm3492_vm11 = vcmask 648704   ;;  %v2523_v23 = vrot.slane %v1750_v21, 9 }
 0x1cb   : > { %v934_v24 = vpop.permute.xlu1 %933  ;;  %v2150_v14 = vrot.slane %v2148_v10, 5  ;;  %v2153_v15 = vrot.slane %v2151_v12, 6 }
 0x1cc   : > { %939 = vst.msk [vmem:[#allocation4 + $0x18] sm:$0x8] %vm3485_vm0, %v934_v24  ;;  %vm3495_vm0 = vmmov 0   ;;  %v3179_v24 = vld [vmem:[%s3423_s6] ss:$0 sm:$0xff] }
 0x1cd   : > { %v1145_v35 = vpop.permute.xlu0 %1144  ;;  %1003 = vst.msk [vmem:[#allocation4 + $0x18] sm:$0x8] %vm3486_vm8, %v998_v20  ;;  %vm3493_vm8 = vcmask 779904   ;;  %v3170_v22 = vor.u32 %v2153_v15, %v2150_v14 }
 0x1ce   : > { %1147 = vst.msk [vmem:[#allocation4 + $0x18] sm:$0x7] %vm3487_vm6, %v1145_v35  ;;  %vm3494_vm6 = vcmask 911104   ;;  %v1623_v35 = vld [vmem:[#allocation3] sm:$0x7] }
 0x1cf   : > { %1064 = vst.msk [vmem:[#allocation4 + $0x18] sm:$0x8] %vm3488_vm3, %v3040_v17  ;;  %v1159_v39 = vpop.permute.xlu1 %1158  ;;  %2156 = vrot.lane.b32.xlu0 %v3170_v22, %s2732_s19  ;;  %vm3496_vm3 = vcmask 124928  }
 0x1d0   : > { %1164 = vst.msk [vmem:[#allocation4 + $0x18] sm:$0x8] %vm3489_vm15, %v1159_v39  ;;  %vm3497_vm15 = vcmask 125955  }
 0x1d1   : > { %v836_v25 = vpop.permute.xlu0 %835  ;;  %1624 = vst.msk [vmem:[#allocation5] sm:$0x7] %vm3496_vm3, %v1623_v35 }
 0x1d3   : > { %v775_v18 = vpop.permute.xlu1 %774 }
 0x1d4   : > { %779 = vst.msk [vmem:[#allocation4 + $0x20] sm:$0x3] %vm3490_vm14, %v775_v18  ;;  %vm3498_vm14 = vcmask 123904  }
 0x1d5   : > { %840 = vst.msk [vmem:[#allocation4 + $0x20] sm:$0x3] %vm3491_vm2, %v836_v25  ;;  %v1000_v19 = vpop.permute.xlu0 %999  ;;  %vm3499_vm2 = vcmask 125954  }
 0x1d7   : > { %v936_v26 = vpop.permute.xlu1 %935  ;;  %v2687_v29 = vld [vmem:[#allocation4 + $0x10] ss:$8 sps:$4 sm:$0xff]  }
 0x1d8   : > { %940 = vst.msk [vmem:[#allocation4 + $0x20] sm:$0x3] %vm3492_vm11, %v936_v26  ;;  %1363 = vmatmul.mubr.bf16.gmra.mxu1 %v2687_v29  ;;  %vm3500_vm11 = vmmov %vm3496_vm3 }
 0x1d9   : > { %1004 = vst.msk [vmem:[#allocation4 + $0x20] sm:$0x3] %vm3493_vm8, %v1000_v19  ;;  %v1161_v17 = vpop.permute.xlu0 %1160  ;;  %vm3501_vm8 = vcmask 122880  }
 0x1db   : > { %v1061_v30 = vpop.permute.xlu1 %1060 }
 0x1dc   : > { %1065 = vst.msk [vmem:[#allocation4 + $0x20] sm:$0x3] %vm3494_vm6, %v1061_v30  ;;  %vm3505_vm6 = vmmov %vm3497_vm15 }
 0x1dd   : > { %1165 = vst.msk [vmem:[#allocation4 + $0x20] sm:$0x3] %vm1099_vm1, %v1161_v17 }
 0x1e4   : > { %v1208_v31 = vld [vmem:[#allocation4 + $0x20] sm:$0x33] }
 0x1e5   : > { %v2496_v33 = vcombine.high %v1208_v31, %v1208_v31  ;;  %v2495_v34 = vcombine.low %v1208_v31, %v1208_v31 }
 0x1e7   : > { %2508 = vmatprep.mubr.msk.bf16.mxu1 %vm1312_vm12, %v2496_v33 }
 0x1e8   : > { %1371 = vmatmul.mubr.bf16.gmra.mxu1 %v2495_v34 }
 0x27c   : > { %v1356_v43 = vpop.f32.mrf.mxu1 }
 0x27d   : > { %v1357_v44 = vadd.f32 %v2490_v42, %v1356_v43 }
 0x27e   : > { %v1358_v28 = vpop.f32.mrf.mxu1 }
 0x27f   : > { %v1378_v48 = vmax.f32 %v1357_v44, 0.0 }
 0x280   : > { %v1359_v45 = vpop.f32.mrf.mxu1 }
 0x281   : > { %v1360_v46 = vadd.f32 %v2490_v42, %v1359_v45 }
 0x282   : > { %v1361_v47 = vpop.f32.mrf.mxu1 }
 0x283   : > { %v1379_v49 = vmax.f32 %v1360_v46, 0.0 }
 0x285   : > { %v1383_v50 = vpack.c.bf16 %v1379_v49, %v1378_v48 }
 0x287   : > { %2636 = vmatmul.mubr.bf16.vlgmr.msra.gmra.mxu0 %v1383_v50 }
 0x288   : > { %2639 = vmatprep.mubr.msk.bf16.mxu0 %vm3495_vm0, %v2723_v1 }
 0x298   : > { %v1364_v32 = vpop.f32.mrf.mxu1 }
 0x299   : > { %v1365_v51 = vadd.f32 %v2490_v42, %v1364_v32 }
 0x29a   : > { %v1366_v38 = vpop.f32.mrf.mxu1 }
 0x29b   : > { %v1380_v57 = vmax.f32 %v1365_v51, 0.0  ;;  %v1559_v38 = vld [vmem:[#allocation3 + $0x8] sm:$0xf] }
 0x29c   : > { %v1367_v52 = vpop.f32.mrf.mxu1 }
 0x29d   : > { %v1368_v55 = vadd.f32 %v2490_v42, %v1367_v52 }
 0x29e   : > { %v1369_v56 = vpop.f32.mrf.mxu1 }
 0x29f   : > { %v1381_v58 = vmax.f32 %v1368_v55, 0.0 }
 0x2a1   : > { %v1384_v59 = vpack.c.bf16 %v1381_v58, %v1380_v57 }
 0x2a3   : > { %2640 = vmatmul.mubr.bf16.gmra.mxu0 %v1384_v59 }
 0x2a4   : > { %2643 = vmatprep.mubr.msk.bf16.mxu0 %vm3495_vm0, %v2723_v1  ;;  %v1663_v1 = vrot.slane %v1661_v6, 5  ;;  %vm3506_vm0 = vmmov %vm3505_vm6 }
 0x2a6   : > { %v1664_v16 = vor.u32 %v1663_v1, %v1660_v13 }
 0x2a8   : > { %v1372_v54 = vpop.f32.mrf.mxu1  ;;  %v1665_v20 = vrot.slane %v1664_v16, 4 }
 0x2a9   : > { %v1373_v60 = vadd.f32 %v2490_v42, %v1372_v54  ;;  %v1540_v42 = vld [vmem:[#allocation3 + $0x4] sm:$0xf] }
 0x2aa   : > { %v1374_v61 = vpop.f32.mrf.mxu1  ;;  %1666 = vrot.lane.b32.xlu1 %v1665_v20, %s2727_s24 }
 0x2ab   : > { %v1382_v62 = vmax.f32 %v1373_v60, 0.0 }
 0x2ac   : > { %v1375_v63 = vpop.f32.mrf.mxu1 }
 0x2ad   : > { %v1385_v0 = vpack.c.bf16 %v1382_v62, %v1382_v62 }
 0x2ae   : > { %v1376_v2 = vpop.f32.mrf.mxu1  ;;  %1754 = vrot.lane.b32.xlu1 %v2523_v23, %s2726_s23 }
 0x2af   : > { %2644 = vmatmul.mubr.bf16.gmra.mxu0 %v1385_v0 }
 0x31c   : > { %v1667_v49 = vpop.permute.xlu1 %1666 }
 0x31d   : > { %1669 = vst.msk [vmem:[#allocation5] sm:$0x7] %vm629_vm4, %v1667_v49 }
 0x320   : > { %v1755_v55 = vpop.permute.xlu1 %1754 }
 0x321   : > { %1757 = vst.msk [vmem:[#allocation5] sm:$0x7] %vm723_vm5, %v1755_v55  ;;  %v1579_v55 = vld [vmem:[#allocation3 + $0xc] sm:$0xf] }
 0x347   : > { %v1491_v39 = vpop.f32.mrf.mxu0 }
 0x348   : > { %v1492_v25 = vadd.f32 %v3179_v24, %v1491_v39 }
 0x349   : > { %v2637_v18 = vpop.f32.mrf.mxu0 }
 0x34a   : > { %v1513_v19 = vmax.f32 %v1492_v25, 0.0 }
 0x34b   : > { %v1494_v26 = vpop.f32.mrf.mxu0 }
 0x34c   : > { %v2560_v27 = vpack.c.bf16 %v1513_v19, %v1513_v19  ;;  %v1495_v29 = vadd.f32 %v3179_v24, %v1494_v26 }
 0x34d   : > { %v2638_v17 = vpop.f32.mrf.mxu0 }
 0x34e   : > { %v1533_v30 = vshrl.u32 %v2560_v27, 16  ;;  %v1536_v31 = vshll.u32 %v2560_v27, 16  ;;  %v1514_v33 = vmax.f32 %v1495_v29, 0.0 }
 0x350   : > { %v1535_v34 = vrot.slane %v1533_v30, 7  ;;  %v1545_v36 = vrot.slane %v1533_v30, 6  ;;  %v1546_v37 = vrot.slane %v1536_v31, 7  ;;  %v2561_v41 = vpack.c.bf16 %v1514_v33, %v1514_v33 }
 0x352   : > { %v1538_v43 = vor.u32 %v1536_v31, %v1535_v34  ;;  %v1547_v28 = vor.u32 %v1546_v37, %v1545_v36  ;;  %v1550_v44 = vshrl.u32 %v2561_v41, 16  ;;  %v1553_v45 = vshll.u32 %v2561_v41, 16 }
 0x354   : > { %v1541_v46 = vsel %vm2872_vm7, %v1538_v43, %v1540_v42  ;;  %v1552_v47 = vrot.slane %v1550_v44, 6  ;;  %v1555_v48 = vrot.slane %v1553_v45, 7  ;;  %v1548_v50 = vrot.slane %v1547_v28, 4 }
 0x355   : > { %1542 = vst [vmem:[#allocation3 + $0x4] sm:$0xf] %v1541_v46  ;;  %v1565_v16 = vrot.slane %v1550_v44, 5  ;;  %v1566_v21 = vrot.slane %v1553_v45, 6 }
 0x356   : > { %v1556_v32 = vor.u32 %v1555_v48, %v1552_v47 }
 0x357   : > { %v1567_v34 = vor.u32 %v1566_v21, %v1565_v16 }
 0x358   : > { %v1557_v51 = vsel %vm2878_vm10, %v1548_v50, %v1556_v32 }
 0x359   : > { %v1560_v52 = vsel %vm2872_vm7, %v1557_v51, %v1559_v38  ;;  %v1568_v32 = vrot.slane %v1567_v34, 4 }
 0x35a   : > { %1561 = vst [vmem:[#allocation3 + $0x8] sm:$0xf] %v1560_v52 }
 0x35c   : > { %v1808_v56 = vld [vmem:[#allocation3 + $0x4] sm:$0x7] }
 0x35d   : > { %v1758_v57 = vld [vmem:[#allocation3 + $0x4] sm:$0xe]  ;;  %1810 = vrot.lane.b32.xlu1 %v1808_v56, %s2729_s28 }
 0x35e   : > { %v1957_v58 = vld [vmem:[#allocation3 + $0x4] sm:$0xe]  ;;  %v1760_v59 = vrot.slane %v1758_v57, 6 }
 0x35f   : > { %v1670_v54 = vld [vmem:[#allocation3 + $0x4] sm:$0xf]  ;;  %v2525_v63 = vrot.slane %v1957_v58, 9 }
 0x360   : > { %v1672_v60 = vshrl.u32 %v1670_v54, 16  ;;  %v1675_v61 = vshll.u32 %v1670_v54, 16  ;;  %v1625_v62 = vld [vmem:[#allocation3 + $0x4] sm:$0x7]  ;;  %1762 = vrot.lane.b32.xlu0 %v1760_v59, %s2726_s23  ;;  %v1761_v10 = vrot.slane %v1760_v59, 4 }
 0x361   : > { %v1627_v0 = vrot.slane %v1625_v62, 5  ;;  %v1863_v5 = vld [vmem:[#allocation3 + $0x4] sm:$0xf]  ;;  %1961 = vrot.lane.b32.xlu1 %v2525_v63, %s2730_s29  ;;  %v3196_v12 = vld [vmem:[#allocation3 + $0x8] sm:$0xe] }
 0x362   : > { %v1674_v2 = vrot.slane %v1672_v60, 5  ;;  %v1677_v3 = vrot.slane %v1675_v61, 6  ;;  %v1865_v13 = vshrl.u32 %v1863_v5, 16  ;;  %v1868_v1 = vshll.u32 %v1863_v5, 16  ;;  %v1633_v23 = vld [vmem:[#allocation3 + $0x8] sm:$0x7] }
 0x363   : > { %1631 = vst.msk [vmem:[#allocation5] sm:$0x8] %vm3497_vm15, %v1627_v0  ;;  %v1499_v9 = vpop.f32.mrf.mxu0  ;;  %v1628_v14 = vrot.slane %v1627_v0, 4  ;;  %v1772_v39 = vrot.slane %v3196_v12, 7  ;;  %v2164_v25 = vld [vmem:[#allocation3 + $0x8] sm:$0xe]  ;;  %vm3508_vm15 = vmmov %vm3498_vm14 }
 0x364   : > { %v1678_v6 = vor.u32 %v1677_v3, %v1674_v2  ;;  %v1500_v15 = vadd.f32 %v3179_v24, %v1499_v9  ;;  %v1814_v19 = vld [vmem:[#allocation3 + $0x8] sm:$0x7]  ;;  %v1867_v26 = vrot.slane %v1865_v13, 4  ;;  %v1870_v27 = vrot.slane %v1868_v1, 5  ;;  %v1587_v59 = vld [vmem:[#allocation3 + $0x10] sm:$0xf] }
 0x365   : > { %1764 = vrot.lane.b32.xlu1 %v1761_v10, %s2726_s23  ;;  %v2641_v20 = vpop.f32.mrf.mxu0  ;;  %1632 = vst.msk [vmem:[#allocation5 + $0x8] sm:$0x3] %vm3498_vm14, %v1628_v14  ;;  %v1635_v29 = vrot.slane %v1633_v23, 6  ;;  %v2527_v17 = vrot.slane %v2164_v25, 9  ;;  %v2015_v33 = vld [vmem:[#allocation3 + $0x8] sm:$0x7] }
 0x366   : > { %1680 = vrot.lane.b32.xlu0 %v1678_v6, %s2727_s24  ;;  %v1515_v35 = vmax.f32 %v1500_v15, 0.0  ;;  %v1816_v28 = vrot.slane %v1814_v19, 5  ;;  %v1679_v44 = vrot.slane %v1678_v6, 4  ;;  %v1965_v45 = vld [vmem:[#allocation3 + $0x8] sm:$0xe]  ;;  %v1871_v46 = vor.u32 %v1870_v27, %v1867_v26 }
 0x367   : > { %v1502_v18 = vpop.f32.mrf.mxu0  ;;  %1639 = vst.msk [vmem:[#allocation5 + $0x8] sm:$0xc] %vm3499_vm2, %v1635_v29  ;;  %v1636_v37 = vrot.slane %v1635_v29, 4  ;;  %v1967_v58 = vrot.slane %v1965_v45, 6  ;;  %v1600_v13 = vld [vmem:[#allocation3 + $0x14] sm:$0xf] }
 0x368   : > { %v2562_v30 = vpack.c.bf16 %v1515_v35, %v1515_v35  ;;  %v1503_v31 = vadd.f32 %v3179_v24, %v1502_v18  ;;  %2169 = vst.msk [vmem:[#allocation5 + $0x4] sm:$0x7] %vm3500_vm11, %v2527_v17  ;;  %v1872_v61 = vrot.slane %v1871_v46, 4  ;;  %v1817_v14 = vrot.slane %v1816_v28, 4  ;;  %v1688_v35 = vld [vmem:[#allocation3 + $0x8] sm:$0xf] }
 0x369   : > { %2017 = vrot.lane.b32.xlu1 %v2015_v33, %s2728_s25  ;;  %v2642_v36 = vpop.f32.mrf.mxu0  ;;  %1640 = vst.msk [vmem:[#allocation5 + $0x10] sm:$0x1] %vm3501_vm8, %v1636_v37  ;;  %v1620_v19 = vld [vmem:[#allocation3 + $0x18] sm:$0xf]  ;;  %v1968_v26 = vrot.slane %v1967_v58, 4  ;;  %v1690_v17 = vshrl.u32 %v1688_v35, 16 }
 0x36a   : > { %1774 = vrot.lane.b32.xlu0 %v1772_v39, %s2726_s23  ;;  %v1570_v41 = vshrl.u32 %v2562_v30, 16  ;;  %v1573_v42 = vshll.u32 %v2562_v30, 16  ;;  %v1516_v43 = vmax.f32 %v1503_v31, 0.0  ;;  %v1693_v30 = vshll.u32 %v1688_v35, 16  ;;  %v1877_v31 = vld [vmem:[#allocation3 + $0x8] sm:$0xf] }
 0x36b   : > { %v1773_v37 = vrot.slane %v1772_v39, 4  ;;  %v2070_v40 = vld [vmem:[#allocation3 + $0x8] sm:$0xf] }
 0x36c   : > { %v1572_v47 = vrot.slane %v1570_v41, 5  ;;  %v1575_v48 = vrot.slane %v1573_v42, 6  ;;  %v1582_v49 = vrot.slane %v1570_v41, 4  ;;  %v1583_v50 = vrot.slane %v1573_v42, 5 }
 0x36d   : > { %v2563_v38 = vpack.c.bf16 %v1516_v43, %v1516_v43  ;;  %1682 = vrot.lane.b32.xlu1 %v1679_v44, %s2727_s24  ;;  %v1879_v41 = vshrl.u32 %v1877_v31, 16  ;;  %v1882_v42 = vshll.u32 %v1877_v31, 16  ;;  %v1695_v44 = vrot.slane %v1693_v30, 7 }
 0x36e   : > { %1818 = vrot.lane.b32.xlu0 %v1816_v28, %s2729_s28  ;;  %v1576_v52 = vor.u32 %v1575_v48, %v1572_v47  ;;  %v1584_v56 = vor.u32 %v1583_v50, %v1582_v49  ;;  %v1692_v28 = vrot.slane %v1690_v17, 6  ;;  %v2072_v49 = vshrl.u32 %v2070_v40, 16 }
 0x36f   : > { %v1507_v51 = vpop.f32.mrf.mxu0  ;;  %v1593_v54 = vshrl.u32 %v2563_v38, 16  ;;  %v1596_v60 = vshll.u32 %v2563_v38, 16  ;;  %v1881_v46 = vrot.slane %v1879_v41, 5  ;;  %v1884_v47 = vrot.slane %v1882_v42, 6 }
 0x370   : > { %v1508_v57 = vadd.f32 %v3179_v24, %v1507_v51  ;;  %v1577_v63 = vsel %vm2886_vm13, %v1568_v32, %v1576_v52  ;;  %v1585_v0 = vrot.slane %v1584_v56, 4  ;;  %v1696_v48 = vor.u32 %v1695_v44, %v1692_v28  ;;  %v2702_v28 = vld [vmem:[%s3424_s7 + $0x18] sm:$0xff]  }
 0x371   : > { %v2645_v62 = vpop.f32.mrf.mxu0  ;;  %v1580_v3 = vsel %vm2872_vm7, %v1577_v63, %v1579_v55  ;;  %v1595_v5 = vrot.slane %v1593_v54, 7  ;;  %v1606_v6 = vrot.slane %v1593_v54, 6  ;;  %v1607_v9 = vrot.slane %v1596_v60, 7  ;;  %1873 = vrot.lane.b32.xlu1 %v1872_v61, %s2731_s11  ;;  %v2698_v61 = vld [vmem:[%s3424_s7 + $0x38] sm:$0xff]  }
 0x372   : > { %v1517_v2 = vmax.f32 %v1508_v57, 0.0  ;;  %1969 = vrot.lane.b32.xlu0 %v1967_v58, %s2730_s29  ;;  %1581 = vst [vmem:[#allocation3 + $0xc] sm:$0xf] %v1580_v3  ;;  %v1588_v10 = vsel %vm2872_vm7, %v1585_v0, %v1587_v59  ;;  %v1885_v39 = vor.u32 %v1884_v47, %v1881_v46  ;;  %v2075_v50 = vshll.u32 %v2070_v40, 16  ;;  %2320 = vmatpush1.bf16.msra.mxu1 %v2698_v61 }
 0x373   : > { %v1510_v24 = vpop.f32.mrf.mxu0  ;;  %1589 = vst [vmem:[#allocation3 + $0x10] sm:$0xf] %v1588_v10  ;;  %v1598_v1 = vor.u32 %v1596_v60, %v1595_v5  ;;  %v1608_v16 = vor.u32 %v1607_v9, %v1606_v6  ;;  %v2074_v56 = vrot.slane %v2072_v49, 4  ;;  %2321 = vmatprep.subr.bf16.mxu1 %v2725_v8  ;;  %v2699_v9 = vld [vmem:[%s3424_s7 + $0x30] sm:$0xff]  }
 0x374   : > { %v2564_v11 = vpack.c.bf16 %v1517_v2, %v1517_v2  ;;  %v1886_v52 = vrot.slane %v1885_v39, 4  ;;  %v2077_v57 = vrot.slane %v2075_v50, 5  ;;  %v2703_v49 = vld [vmem:[%s3424_s7 + $0x10] sm:$0xff]  }
 0x375   : > { %v2646_v15 = vpop.f32.mrf.mxu0  ;;  %v1601_v23 = vsel %vm2872_vm7, %v1598_v1, %v1600_v13  ;;  %1820 = vrot.lane.b32.xlu1 %v1817_v14, %s2729_s28  ;;  %v1609_v27 = vrot.slane %v1608_v16, 4 }
 0x376   : > { %v1611_v21 = vshrl.u32 %v2564_v11, 16  ;;  %v1614_v20 = vshll.u32 %v2564_v11, 16  ;;  %1602 = vst [vmem:[#allocation3 + $0x14] sm:$0xf] %v1601_v23  ;;  %v2078_v54 = vor.u32 %v2077_v57, %v2074_v56  ;;  %2322 = vmatpush1.bf16.msra.mxu1 %v2699_v9 }
 0x377   : > { %2323 = vmatprep.subr.bf16.mxu1 %v2725_v8 }
 0x378   : > { %v1613_v25 = vrot.slane %v1611_v21, 6  ;;  %v1616_v18 = vrot.slane %v1614_v20, 7  ;;  %v2079_v3 = vrot.slane %v2078_v54, 4  ;;  %v1697_v21 = vrot.slane %v1696_v48, 4 }
 0x379   : > { %1971 = vrot.lane.b32.xlu1 %v1968_v26, %s2730_s29  ;;  %v1782_v33 = vld [vmem:[#allocation3 + $0xc] sm:$0xe] }
 0x37a   : > { %v1617_v29 = vor.u32 %v1616_v18, %v1613_v25  ;;  %1784 = vrot.lane.b32.xlu0 %v1782_v33, %s2726_s23  ;;  %v1788_v43 = vld [vmem:[#allocation3 + $0x10] sm:$0xe]  ;;  %v3236_v12 = vld [vmem:[#allocation3 + $0xc] sm:$0x7] }
 0x37b   : > { %v1989_v45 = vld [vmem:[#allocation3 + $0x10] sm:$0xe]  ;;  %v2524_v53 = vrot.slane %v1788_v43, 9  ;;  %v1828_v38 = vrot.slane %v3236_v12, 6  ;;  %v2021_v51 = vld [vmem:[#allocation3 + $0xc] sm:$0x7] }
 0x37c   : > { %v1618_v34 = vsel %vm2878_vm10, %v1609_v27, %v1617_v29  ;;  %v2023_v55 = vrot.slane %v2021_v51, 5  ;;  %v1977_v58 = vld [vmem:[#allocation3 + $0xc] sm:$0xe]  ;;  %v1646_v63 = vld [vmem:[#allocation3 + $0x10] sm:$0x7]  ;;  %vm3503_vm10 = vcmask 125953  }
 0x37d   : > { %v1621_v36 = vsel %vm2872_vm7, %v1618_v34, %v1620_v19  ;;  %1776 = vrot.lane.b32.xlu1 %v1773_v37, %s2726_s23  ;;  %v1845_v32 = vld [vmem:[#allocation3 + $0x14] sm:$0x7]  ;;  %v1979_v60 = vrot.slane %v1977_v58, 7  ;;  %v1641_v62 = vld [vmem:[#allocation3 + $0xc] sm:$0x7]  ;;  %vm3502_vm7 = vmmov %vm3496_vm3  ;;  %v1829_v19 = vrot.slane %v1828_v38, 4 }
 0x37e   : > { %1622 = vst [vmem:[#allocation3 + $0x18] sm:$0xf] %v1621_v36  ;;  %1991 = vrot.lane.b32.xlu0 %v1989_v45, %s2730_s29  ;;  %v2024_v59 = vrot.slane %v2023_v55, 4  ;;  %v1648_v0 = vld [vmem:[#allocation3 + $0x14] sm:$0x7]  ;;  %v1643_v5 = vrot.slane %v1641_v62, 7  ;;  %vm3504_vm13 = vmmov %vm3503_vm10 }
 0x37f   : > { %1647 = vst.msk [vmem:[#allocation5 + $0x18] sm:$0x7] %vm3502_vm7, %v1646_v63  ;;  %v2170_v2 = vld [vmem:[#allocation3 + $0xc] sm:$0xe]  ;;  %v2178_v6 = vld [vmem:[#allocation3 + $0x10] sm:$0xe]  ;;  %vm3507_vm3 = vmmov %vm3499_vm2 }
 0x380   : > { %v1650_v24 = vrot.slane %v1648_v0, 5  ;;  %v2172_v10 = vrot.slane %v2170_v2, 6  ;;  %v2186_v13 = vld [vmem:[#allocation3 + $0x14] sm:$0xe]  ;;  %v2033_v11 = vld [vmem:[#allocation3 + $0x10] sm:$0x7]  ;;  %vm3509_vm2 = vmmov %vm3501_vm8 }
 0x381   : > { %1792 = vrot.lane.b32.xlu1 %v2524_v53, %s2726_s23  ;;  %1645 = vst.msk [vmem:[#allocation5 + $0x10] sm:$0xe] %vm3503_vm10, %v1643_v5  ;;  %v2180_v1 = vrot.slane %v2178_v6, 7  ;;  %v2035_v35 = vrot.slane %v2033_v11, 6  ;;  %v2700_v25 = vld [vmem:[%s3424_s7 + $0x28] sm:$0xff]   ;;  %vm3510_vm11 = vmmov %vm3502_vm7  ;;  %v1980_v30 = vrot.slane %v1979_v60, 4 }
 0x382   : > { %1698 = vrot.lane.b32.xlu0 %v1696_v48, %s2727_s24  ;;  %2187 = vst.msk [vmem:[#allocation5 + $0x14] sm:$0xe] %vm3504_vm13, %v2186_v13  ;;  %v2173_v15 = vrot.slane %v2172_v10, 4  ;;  %v1651_v16 = vrot.slane %v1650_v24, 4  ;;  %v1838_v18 = vld [vmem:[#allocation3 + $0x10] sm:$0x7]  ;;  %2324 = vmatpush1.bf16.msra.mxu1 %v2700_v25 }
 0x383   : > { %1654 = vst.msk [vmem:[#allocation5 + $0x18] sm:$0x8] %vm3505_vm6, %v1650_v24  ;;  %v2181_v20 = vrot.slane %v2180_v1, 4  ;;  %2325 = vmatprep.subr.bf16.mxu1 %v2725_v8  ;;  %v1840_v26 = vrot.slane %v1838_v18, 7  ;;  %v2084_v27 = vld [vmem:[#allocation3 + $0xc] sm:$0xf] }
 0x384   : > { %2176 = vst.msk [vmem:[#allocation5 + $0x4] sm:$0x8] %vm3506_vm0, %v2172_v10  ;;  %v3273_v29 = vld [vmem:[#allocation3 + $0x14] sm:$0xe]  ;;  %v1895_v17 = vld [vmem:[#allocation3 + $0xc] sm:$0xf] }
 0x385   : > { %1847 = vrot.lane.b32.xlu1 %v1845_v32, %s2729_s28  ;;  %v2188_v14 = vld [vmem:[#allocation3 + $0x18] sm:$0xe]  ;;  %2184 = vst.msk [vmem:[#allocation5 + $0xc] sm:$0xc] %vm3507_vm3, %v2180_v1  ;;  %v2086_v31 = vshrl.u32 %v2084_v27, 16  ;;  %v2089_v33 = vshll.u32 %v2084_v27, 16 }
 0x386   : > { %1830 = vrot.lane.b32.xlu0 %v1828_v38, %s2729_s28  ;;  %v2528_v23 = vrot.slane %v2188_v14, 9  ;;  %2177 = vst.msk [vmem:[#allocation5 + $0xc] sm:$0x3] %vm3508_vm15, %v2173_v15  ;;  %v2701_v34 = vld [vmem:[%s3424_s7 + $0x20] sm:$0xff]   ;;  %v1798_v36 = vrot.slane %v3273_v29, 6  ;;  %v1897_v41 = vshrl.u32 %v1895_v17, 16 }
 0x387   : > { %1655 = vst.msk [vmem:[#allocation5 + $0x20] sm:$0x3] %vm3498_vm14, %v1651_v16  ;;  %v1995_v37 = vld [vmem:[#allocation3 + $0x14] sm:$0xe]  ;;  %v1900_v42 = vshll.u32 %v1895_v17, 16  ;;  %2326 = vmatpush1.bf16.msra.mxu1 %v2701_v34  ;;  %v2088_v45 = vrot.slane %v2086_v31, 5 }
 0x388   : > { %2185 = vst.msk [vmem:[#allocation5 + $0x14] sm:$0x1] %vm3509_vm2, %v2181_v20  ;;  %v2045_v43 = vld [vmem:[#allocation3 + $0x14] sm:$0x7]  ;;  %2327 = vmatprep.subr.bf16.mxu1 %v2725_v8  ;;  %v2526_v44 = vrot.slane %v1995_v37, 9  ;;  %v2091_v53 = vrot.slane %v2089_v33, 6 }
 0x389   : > { %1889 = vrot.lane.b32.xlu1 %v1886_v52, %s2731_s11  ;;  %2193 = vst.msk [vmem:[#allocation5 + $0x1c] sm:$0x7] %vm3510_vm11, %v2528_v23  ;;  %v2047_v46 = vrot.slane %v2045_v43, 7  ;;  %v1899_v47 = vrot.slane %v1897_v41, 6  ;;  %v1902_v48 = vrot.slane %v1900_v42, 7  ;;  %v2036_v12 = vrot.slane %v2035_v35, 4 }
 0x38a   : > { %1887 = vrot.lane.b32.xlu0 %v1885_v39, %s2731_s11  ;;  %v1706_v40 = vld [vmem:[#allocation3 + $0xc] sm:$0xf]  ;;  %v2092_v39 = vor.u32 %v2091_v53, %v2088_v45  ;;  %v1718_v38 = vld [vmem:[#allocation3 + $0x10] sm:$0xf]  ;;  %v2705_v2 = vld [vmem:[%s3424_s7] sm:$0xff]   ;;  %vm3511_vm8 = vcmask 518528  }
 0x38b   : > { %2328 = vmatpush1.bf16.msra.mxu1 %v2702_v28  ;;  %v1903_v50 = vor.u32 %v1902_v48, %v1899_v47  ;;  %v1708_v32 = vshrl.u32 %v1706_v40, 16  ;;  %v2102_v51 = vld [vmem:[#allocation3 + $0x10] sm:$0xf]  ;;  %v2704_v52 = vld [vmem:[%s3424_s7 + $0x8] sm:$0xff]   ;;  %v1720_v56 = vshrl.u32 %v1718_v38, 16  ;;  %v1723_v57 = vshll.u32 %v1718_v38, 16 }
 0x38c   : > { %2329 = vmatprep.subr.bf16.mxu1 %v2725_v8  ;;  %v2107_v54 = vshll.u32 %v2102_v51, 16  ;;  %v1711_v61 = vshll.u32 %v1706_v40, 16  ;;  %v1925_v24 = vld [vmem:[#allocation3 + $0x14] sm:$0xf]  ;;  %v2706_v13 = vld [vmem:[%s3424_s7 + $0x40] sm:$0xff]   ;;  %vm3512_vm7 = vcmask 388355  }
 0x38d   : > { %2027 = vrot.lane.b32.xlu1 %v2024_v59, %s2728_s25  ;;  %v1710_v58 = vrot.slane %v1708_v32, 7  ;;  %v2104_v59 = vshrl.u32 %v2102_v51, 16  ;;  %v1904_v62 = vrot.slane %v1903_v50, 4  ;;  %v1722_v63 = vrot.slane %v1720_v56, 4  ;;  %v1732_v10 = vld [vmem:[#allocation3 + $0x14] sm:$0xf]  ;;  %v3323_v56 = vpop.permute.xlu0 %2062 }
 0x38e   : > { %1981 = vrot.lane.b32.xlu0 %v1979_v60, %s2730_s29  ;;  %v1913_v60 = vld [vmem:[#allocation3 + $0x10] sm:$0xf]  ;;  %v1725_v0 = vrot.slane %v1723_v57, 5  ;;  %v2109_v6 = vrot.slane %v2107_v54, 7  ;;  %v1927_v1 = vshrl.u32 %v1925_v24, 16  ;;  %v1930_v14 = vshll.u32 %v1925_v24, 16 }
 0x38f   : > { %2330 = vmatpush1.bf16.msra.mxu1 %v2703_v49  ;;  %v2106_v5 = vrot.slane %v2104_v59, 6  ;;  %v1915_v9 = vshrl.u32 %v1913_v60, 16  ;;  %v2052_v15 = vld [vmem:[#allocation3 + $0x18] sm:$0x7]  ;;  %v1734_v20 = vshrl.u32 %v1732_v10, 16  ;;  %v1737_v23 = vshll.u32 %v1732_v10, 16 }
 0x390   : > { %2331 = vmatprep.subr.bf16.mxu1 %v2725_v8  ;;  %v1726_v11 = vor.u32 %v1725_v0, %v1722_v63  ;;  %v1918_v25 = vshll.u32 %v1913_v60, 16  ;;  %v1929_v18 = vrot.slane %v1927_v1, 4  ;;  %v2132_v41 = vld [vmem:[#allocation3 + $0x18] sm:$0xf]  ;;  %v1799_v60 = vrot.slane %v1798_v36, 4 }
 0x391   : > { %2080 = vrot.lane.b32.xlu1 %v2079_v3, %s2732_s19  ;;  %v1713_v3 = vor.u32 %v1711_v61, %v1710_v58  ;;  %v2110_v16 = vor.u32 %v2109_v6, %v2106_v5  ;;  %v1736_v27 = vrot.slane %v1734_v20, 5  ;;  %v1739_v17 = vrot.slane %v1737_v23, 6  ;;  %v1851_v53 = vld [vmem:[#allocation3 + $0x18] sm:$0x7]  ;;  %v3328_v59 = vpop.permute.xlu0 %2156 }
 0x392   : > { %2025 = vrot.lane.b32.xlu0 %v2023_v55, %s2728_s25  ;;  %v2093_v55 = vrot.slane %v2092_v39, 4  ;;  %v2134_v28 = vshrl.u32 %v2132_v41, 16  ;;  %v1853_v48 = vrot.slane %v1851_v53, 5  ;;  %v2155_v61 = vrot.slane %v3170_v22, 4 }
 0x393   : > { %2332 = vmatpush1.bf16.msra.mxu1 %v2704_v52  ;;  %v2111_v31 = vrot.slane %v2110_v16, 4  ;;  %v1740_v34 = vor.u32 %v1739_v17, %v1736_v27  ;;  %vm3513_vm10 = vcmask 519555   ;;  %vm3514_vm13 = vcmask 255104  }
 0x394   : > { %2333 = vmatprep.subr.bf16.mxu1 %v2725_v8  ;;  %v2136_v40 = vrot.slane %v2134_v28, 4  ;;  %v1854_v32 = vrot.slane %v1853_v48, 4  ;;  %vm3515_vm6 = vcmask 386304   ;;  %vm3516_vm0 = vcmask 649728  }
 0x395   : > { %1700 = vrot.lane.b32.xlu1 %v1697_v21, %s2727_s24  ;;  %v1917_v21 = vrot.slane %v1915_v9, 7  ;;  %v1741_v47 = vrot.slane %v1740_v34, 4  ;;  %vm3517_vm3 = vcmask 780928   ;;  %vm3518_vm15 = vcmask 912128  }
 0x396   : > { %2037 = vrot.lane.b32.xlu0 %v2035_v35, %s2728_s25  ;;  %v2120_v35 = vld [vmem:[#allocation3 + $0x14] sm:$0xf]  ;;  %vm3519_vm14 = vcmask 517504   ;;  %vm3520_vm2 = vcmask 257154   ;;  %vm3521_vm11 = vcmask 388354  }
 0x397   : > { %2334 = vmatpush1.bf16.msra.mxu1 %v2705_v2  ;;  %v2125_v42 = vshll.u32 %v2120_v35, 16  ;;  %v2061_v2 = vrot.slane %v2060_v7, 4 }
 0x398   : > { %2349 = vmatprep.subr.bf16.mxu1 %v2725_v8  ;;  %v1727_v8 = vrot.slane %v1726_v11, 4 }
 0x399   : > { %1832 = vrot.lane.b32.xlu1 %v1829_v19, %s2729_s28  ;;  %v1932_v19 = vrot.slane %v1930_v14, 5 }
 0x39a   : > { %1841 = vrot.lane.b32.xlu0 %v1840_v26, %s2729_s28  ;;  %v1920_v26 = vor.u32 %v1918_v25, %v1917_v21 }
 0x39b   : > { %2350 = vmatpush2.bf16.msra.mxu1 %v2706_v13  ;;  %v1933_v33 = vor.u32 %v1932_v19, %v1929_v18 }
 0x39d   : > { %1983 = vrot.lane.b32.xlu1 %v1980_v30, %s2730_s29  ;;  %v2122_v30 = vshrl.u32 %v2120_v35, 16  ;;  %v1934_v43 = vrot.slane %v1933_v33, 4 }
 0x39e   : > { %1800 = vrot.lane.b32.xlu0 %v1798_v36, %s2726_s23 }
 0x39f   : > { %v2124_v37 = vrot.slane %v2122_v30, 7 }
 0x3a1   : > { %1999 = vrot.lane.b32.xlu1 %v2526_v44, %s2730_s29  ;;  %v2137_v44 = vshll.u32 %v2132_v41, 16  ;;  %v2127_v45 = vor.u32 %v2125_v42, %v2124_v37 }
 0x3a2   : > { %2048 = vrot.lane.b32.xlu0 %v2047_v46, %s2728_s25  ;;  %v1939_v46 = vld [vmem:[#allocation3 + $0x18] sm:$0xf] }
 0x3a3   : > { %v1944_v49 = vshll.u32 %v1939_v46, 16 }
 0x3a5   : > { %2039 = vrot.lane.b32.xlu1 %v2036_v12, %s2728_s25  ;;  %v2139_v12 = vrot.slane %v2137_v44, 5 }
 0x3a6   : > { %1905 = vrot.lane.b32.xlu0 %v1903_v50, %s2731_s11  ;;  %v2003_v50 = vld [vmem:[#allocation3 + $0x18] sm:$0xe] }
 0x3a7   : > { %v2140_v38 = vor.u32 %v2139_v12, %v2136_v40  ;;  %v2005_v51 = vrot.slane %v2003_v50, 6 }
 0x3a9   : > { %2096 = vrot.lane.b32.xlu1 %v2093_v55, %s2732_s19  ;;  %v1946_v55 = vrot.slane %v1944_v49, 6  ;;  %v2141_v57 = vrot.slane %v2140_v38, 4  ;;  %v2006_v54 = vrot.slane %v2005_v51, 4 }
 0x3aa   : > { %2094 = vrot.lane.b32.xlu0 %v2092_v39, %s2732_s19  ;;  %v1941_v39 = vshrl.u32 %v1939_v46, 16 }
 0x3ac   : > { %v1943_v52 = vrot.slane %v1941_v39, 5  ;;  %v2709_v39 = vld [vmem:[#allocation5 + $0x4] ss:$8 sps:$4 sm:$0xff]  }
 0x3ad   : > { %1907 = vrot.lane.b32.xlu1 %v1904_v62, %s2731_s11  ;;  %2545 = vmatprep.mubr.msk.bf16.mxu1 %vm1312_vm12, %v2709_v39 }
 0x3ae   : > { %1714 = vrot.lane.b32.xlu0 %v1713_v3, %s2727_s24  ;;  %v1947_v58 = vor.u32 %v1946_v55, %v1943_v52 }
 0x3b0   : > { %v1948_v63 = vrot.slane %v1947_v58, 4 }
 0x3b1   : > { %2054 = vrot.lane.b32.xlu1 %v2052_v15, %s2728_s25 }
 0x3b2   : > { %2112 = vrot.lane.b32.xlu0 %v2110_v16, %s2732_s19 }
 0x3b5   : > { %1728 = vrot.lane.b32.xlu1 %v1727_v8, %s2727_s24 }
 0x3b6   : > { %1921 = vrot.lane.b32.xlu0 %v1920_v26, %s2731_s11 }
 0x3b9   : > { %2114 = vrot.lane.b32.xlu1 %v2111_v31, %s2732_s19 }
 0x3ba   : > { %1742 = vrot.lane.b32.xlu0 %v1740_v34, %s2727_s24 }
 0x3bd   : > { %1935 = vrot.lane.b32.xlu1 %v1934_v43, %s2731_s11 }
 0x3be   : > { %2128 = vrot.lane.b32.xlu0 %v2127_v45, %s2732_s19 }
 0x3c1   : > { %1744 = vrot.lane.b32.xlu1 %v1741_v47, %s2727_s24 }
 0x3c2   : > { %1855 = vrot.lane.b32.xlu0 %v1853_v48, %s2729_s28 }
 0x3c5   : > { %1857 = vrot.lane.b32.xlu1 %v1854_v32, %s2729_s28 }
 0x3c6   : > { %2007 = vrot.lane.b32.xlu0 %v2005_v51, %s2730_s29 }
 0x3c9   : > { %2142 = vrot.lane.b32.xlu1 %v2141_v57, %s2732_s19 }
 0x3ca   : > { %1949 = vrot.lane.b32.xlu0 %v1947_v58, %s2731_s11 }
 0x3cd   : > { %2009 = vrot.lane.b32.xlu1 %v2006_v54, %s2730_s29  ;;  %s332_s29 = scalar_lea.vmem %s3426_s9, %s2647_s17 }
 0x3ce   : > { %1802 = vrot.lane.b32.xlu0 %v1799_v60, %s2726_s23 }
 0x3cf   : > { %v1811_v62 = vpop.permute.xlu1 %1810 }
 0x3d0   : > { %1813 = vst.msk [vmem:[#allocation5] sm:$0x7] %vm3511_vm8, %v1811_v62  ;;  %vm3522_vm8 = vcmask 519554   ;;  %v2710_v62 = vld [vmem:[#allocation5 + $0x14] ss:$8 sps:$4 sm:$0xff]  }
 0x3d1   : > { %2158 = vrot.lane.b32.xlu1 %v2155_v61, %s2732_s19 }
 0x3d2   : > { %v1763_v0 = vpop.permute.xlu0 %1762  ;;  %1951 = vrot.lane.b32.xlu0 %v1948_v63, %s2731_s11 }
 0x3d3   : > { %v1962_v29 = vpop.permute.xlu1 %1961 }
 0x3d6   : > { %2064 = vrot.lane.b32.xlu0 %v2061_v2, %s2728_s25 }
 0x3d7   : > { %v1765_v22 = vpop.permute.xlu1 %1764 }
 0x3d8   : > { %v1681_v36 = vpop.permute.xlu0 %1680 }
 0x3d9   : > { %1686 = vst.msk [vmem:[#allocation5] sm:$0x8] %vm647_vm9, %v1681_v36 }
 0x3da   : > { %1768 = vst.msk [vmem:[#allocation5] sm:$0x8] %vm3512_vm7, %v1763_v0  ;;  %vm3523_vm7 = vcmask 648704  }
 0x3db   : > { %v2018_v5 = vpop.permute.xlu1 %2017 }
 0x3dc   : > { %v1775_v3 = vpop.permute.xlu0 %1774 }
 0x3df   : > { %v1683_v9 = vpop.permute.xlu1 %1682 }
 0x3e0   : > { %v1819_v6 = vpop.permute.xlu0 %1818  ;;  %1687 = vst.msk [vmem:[#allocation5 + $0x8] sm:$0x3] %vm3514_vm13, %v1683_v9  ;;  %vm3525_vm13 = vcmask 650755  }
 0x3e1   : > { %1824 = vst.msk [vmem:[#allocation5] sm:$0x8] %vm3513_vm10, %v1819_v6  ;;  %vm3524_vm10 = vcmask 779904  }
 0x3e2   : > { %1769 = vst.msk [vmem:[#allocation5 + $0x8] sm:$0x3] %vm3515_vm6, %v1765_v22  ;;  %vm3526_vm6 = vcmask 781955  }
 0x3e3   : > { %v1874_v4 = vpop.permute.xlu1 %1873 }
 0x3e4   : > { %1876 = vst.msk [vmem:[#allocation5] sm:$0x7] %vm3516_vm0, %v1874_v4  ;;  %v1970_v24 = vpop.permute.xlu0 %1969  ;;  %vm3527_vm0 = vcmask 911104  }
 0x3e5   : > { %1964 = vst.msk [vmem:[#allocation5] sm:$0x7] %vm3517_vm3, %v1962_v29  ;;  %vm3528_vm3 = vcmask 1043328   ;;  %v2529_v29 = vld [vmem:[%s3425_s8] ss:$0 sm:$0xff] }
 0x3e6   : > { %2020 = vst.msk [vmem:[#allocation5] sm:$0x7] %vm3518_vm15, %v2018_v5  ;;  %vm3529_vm15 = vcmask 913155  }
 0x3e7   : > { %v1821_v7 = vpop.permute.xlu1 %1820 }
 0x3e8   : > { %1825 = vst.msk [vmem:[#allocation5 + $0x8] sm:$0x3] %vm3519_vm14, %v1821_v7  ;;  %vm3530_vm14 = vcmask 254080  }
 0x3eb   : > { %v1972_v10 = vpop.permute.xlu1 %1971 }
 0x3ec   : > { %v1785_v13 = vpop.permute.xlu0 %1784 }
 0x3ef   : > { %v1777_v11 = vpop.permute.xlu1 %1776 }
 0x3f0   : > { %v1992_v1 = vpop.permute.xlu0 %1991 }
 0x3f3   : > { %v1793_v14 = vpop.permute.xlu1 %1792 }
 0x3f4   : > { %v1699_v15 = vpop.permute.xlu0 %1698 }
 0x3f5   : > { %1704 = vst.msk [vmem:[#allocation5 + $0x8] sm:$0xc] %vm3520_vm2, %v1699_v15  ;;  %vm3531_vm2 = vcmask 385280  }
 0x3f6   : > { %1780 = vst.msk [vmem:[#allocation5 + $0x8] sm:$0xc] %vm3521_vm11, %v1775_v3  ;;  %vm3532_vm11 = vcmask 516480  }
 0x3f7   : > { %v1848_v16 = vpop.permute.xlu1 %1847 }
 0x3f8   : > { %v1831_v21 = vpop.permute.xlu0 %1830 }
 0x3f9   : > { %1836 = vst.msk [vmem:[#allocation5 + $0x8] sm:$0xc] %vm3522_vm8, %v1831_v21  ;;  %vm3533_vm8 = vcmask 650754  }
 0x3fb   : > { %v1890_v20 = vpop.permute.xlu1 %1889 }
 0x3fc   : > { %1894 = vst.msk [vmem:[#allocation5 + $0x8] sm:$0x3] %vm3523_vm7, %v1890_v20  ;;  %v1888_v23 = vpop.permute.xlu0 %1887  ;;  %vm3534_vm7 = vcmask 781954  }
 0x3fd   : > { %1976 = vst.msk [vmem:[#allocation5 + $0x8] sm:$0x3] %vm3524_vm10, %v1972_v10  ;;  %vm3535_vm10 = vcmask 913154  }
 0x3fe   : > { %1893 = vst.msk [vmem:[#allocation5] sm:$0x8] %vm3525_vm13, %v1888_v23  ;;  %vm3536_vm13 = vcmask 1044355  }
 0x3ff   : > { %1975 = vst.msk [vmem:[#allocation5] sm:$0x8] %vm3526_vm6, %v1970_v24  ;;  %v2028_v35 = vpop.permute.xlu1 %2027  ;;  %vm3537_vm6 = vcmask 647680  }
 0x400   : > { %2032 = vst.msk [vmem:[#allocation5 + $0x8] sm:$0x3] %vm3527_vm0, %v2028_v35  ;;  %v1982_v25 = vpop.permute.xlu0 %1981  ;;  %vm3538_vm0 = vcmask 778880  }
 0x403   : > { %v2081_v8 = vpop.permute.xlu1 %2080 }
 0x404   : > { %2083 = vst.msk [vmem:[#allocation5] sm:$0x7] %vm3528_vm3, %v2081_v8  ;;  %v2026_v18 = vpop.permute.xlu0 %2025  ;;  %vm3539_vm3 = vcmask 257153  }
 0x405   : > { %2031 = vst.msk [vmem:[#allocation5] sm:$0x8] %vm3529_vm15, %v2026_v18  ;;  %vm3540_vm15 = vcmask 910080  }
 0x407   : > { %v1701_v19 = vpop.permute.xlu1 %1700 }
 0x408   : > { %1705 = vst.msk [vmem:[#allocation5 + $0x10] sm:$0x1] %vm3530_vm14, %v1701_v19  ;;  %v2038_v26 = vpop.permute.xlu0 %2037  ;;  %vm3541_vm14 = vcmask 388353  }
 0x409   : > { %1781 = vst.msk [vmem:[#allocation5 + $0x10] sm:$0x1] %vm3531_vm2, %v1777_v11  ;;  %vm3542_vm2 = vcmask 519553  }
 0x40b   : > { %v1833_v27 = vpop.permute.xlu1 %1832 }
 0x40c   : > { %1837 = vst.msk [vmem:[#allocation5 + $0x10] sm:$0x1] %vm3532_vm11, %v1833_v27  ;;  %v1842_v17 = vpop.permute.xlu0 %1841  ;;  %vm3543_vm11 = vcmask 1044354  }
 0x40f   : > { %v1984_v30 = vpop.permute.xlu1 %1983 }
 0x410   : > { %v1801_v31 = vpop.permute.xlu0 %1800 }
 0x413   : > { %v2000_v33 = vpop.permute.xlu1 %1999 }
 0x414   : > { %v2049_v34 = vpop.permute.xlu0 %2048 }
 0x417   : > { %v2040_v37 = vpop.permute.xlu1 %2039 }
 0x418   : > { %v1906_v41 = vpop.permute.xlu0 %1905 }
 0x419   : > { %1911 = vst.msk [vmem:[#allocation5 + $0x8] sm:$0xc] %vm3533_vm8, %v1906_v41  ;;  %vm3544_vm8 = vcmask 650753  }
 0x41a   : > { %1987 = vst.msk [vmem:[#allocation5 + $0x8] sm:$0xc] %vm3534_vm7, %v1982_v25  ;;  %vm3545_vm7 = vcmask 518528  }
 0x41b   : > { %2043 = vst.msk [vmem:[#allocation5 + $0x8] sm:$0xc] %vm3535_vm10, %v2038_v26  ;;  %v2097_v42 = vpop.permute.xlu1 %2096  ;;  %vm3546_vm10 = vcmask 781953  }
 0x41c   : > { %2101 = vst.msk [vmem:[#allocation5 + $0x8] sm:$0x3] %vm1099_vm1, %v2097_v42  ;;  %v2095_v43 = vpop.permute.xlu0 %2094 }
 0x41d   : > { %2100 = vst.msk [vmem:[#allocation5] sm:$0x8] %vm3536_vm13, %v2095_v43  ;;  %vm3547_vm13 = vcmask 913153  }
 0x41f   : > { %v1908_v28 = vpop.permute.xlu1 %1907 }
 0x420   : > { %1912 = vst.msk [vmem:[#allocation5 + $0x10] sm:$0x1] %vm3537_vm6, %v1908_v28  ;;  %v1715_v44 = vpop.permute.xlu0 %1714  ;;  %vm3548_vm6 = vcmask 1041280  }
 0x421   : > { %1988 = vst.msk [vmem:[#allocation5 + $0x10] sm:$0x1] %vm3538_vm0, %v1984_v30  ;;  %vm3551_vm0 = vcmask 780928  }
 0x422   : > { %1717 = vst.msk [vmem:[#allocation5 + $0x10] sm:$0xe] %vm3539_vm3, %v1715_v44  ;;  %vm3552_vm3 = vcmask 1044353  }
 0x423   : > { %2044 = vst.msk [vmem:[#allocation5 + $0x10] sm:$0x1] %vm3540_vm15, %v2040_v37  ;;  %v2055_v45 = vpop.permute.xlu1 %2054  ;;  %vm3553_vm15 = vcmask 912128  }
 0x424   : > { %1787 = vst.msk [vmem:[#allocation5 + $0x10] sm:$0xe] %vm3541_vm14, %v1785_v13  ;;  %v2113_v53 = vpop.permute.xlu0 %2112  ;;  %vm3554_vm14 = vcmask 255104  }
 0x425   : > { %1844 = vst.msk [vmem:[#allocation5 + $0x10] sm:$0xe] %vm3542_vm2, %v1842_v17  ;;  %vm3556_vm2 = vcmask 1043328  }
 0x426   : > { %2118 = vst.msk [vmem:[#allocation5 + $0x8] sm:$0xc] %vm3543_vm11, %v2113_v53  ;;  %vm3557_vm11 = vcmask 650755  }
 0x427   : > { %v1729_v46 = vpop.permute.xlu1 %1728 }
 0x428   : > { %1731 = vst.msk [vmem:[#allocation5 + $0x18] sm:$0x7] %vm629_vm4, %v1729_v46  ;;  %v1922_v47 = vpop.permute.xlu0 %1921  ;;  %vm3549_vm4 = vcmask 388355  }
 0x429   : > { %1795 = vst.msk [vmem:[#allocation5 + $0x18] sm:$0x7] %vm723_vm5, %v1793_v14  ;;  %vm3550_vm5 = vcmask 649728  }
 0x42a   : > { %1924 = vst.msk [vmem:[#allocation5 + $0x10] sm:$0xe] %vm3544_vm8, %v1922_v47  ;;  %vm3558_vm8 = vcmask 781955  }
 0x42b   : > { %1850 = vst.msk [vmem:[#allocation5 + $0x18] sm:$0x7] %vm3545_vm7, %v1848_v16  ;;  %v2115_v48 = vpop.permute.xlu1 %2114  ;;  %vm3559_vm7 = vcmask 913155  }
 0x42c   : > { %1994 = vst.msk [vmem:[#allocation5 + $0x10] sm:$0xe] %vm3546_vm10, %v1992_v1  ;;  %v1743_v40 = vpop.permute.xlu0 %1742  ;;  %vm3560_vm10 = vcmask 1044355  }
 0x42d   : > { %2051 = vst.msk [vmem:[#allocation5 + $0x10] sm:$0xe] %vm3547_vm13, %v2049_v34  ;;  %v2707_v12 = vld [vmem:[#allocation5] ss:$8 sps:$4 sm:$0xff]   ;;  %vm3561_vm13 = vcmask 386304  }
 0x42e   : > { %2119 = vst.msk [vmem:[#allocation5 + $0x10] sm:$0x1] %vm3548_vm6, %v2115_v48  ;;  %2352 = vmatmul.mubr.bf16.vlgmr.msra.gmra.mxu1 %v2707_v12  ;;  %vm3562_vm6 = vcmask 517504  }
 0x42f   : > { %1748 = vst.msk [vmem:[#allocation5 + $0x18] sm:$0x8] %vm647_vm9, %v1743_v40  ;;  %v1936_v49 = vpop.permute.xlu1 %1935  ;;  %vm3555_vm9 = vcmask 519555   ;;  %2546 = vmatprep.mubr.msk.bf16.mxu1 %vm1312_vm12, %v2710_v62 }
 0x430   : > { %1806 = vst.msk [vmem:[#allocation5 + $0x18] sm:$0x8] %vm3549_vm4, %v1801_v31  ;;  %v2129_v50 = vpop.permute.xlu0 %2128  ;;  %vm3563_vm4 = vcmask 648704  }
 0x431   : > { %1938 = vst.msk [vmem:[#allocation5 + $0x18] sm:$0x7] %vm3550_vm5, %v1936_v49  ;;  %vm3564_vm5 = vcmask 779904  }
 0x432   : > { %2002 = vst.msk [vmem:[#allocation5 + $0x18] sm:$0x7] %vm3551_vm0, %v2000_v33  ;;  %vm3565_vm0 = vcmask 911104  }
 0x433   : > { %2131 = vst.msk [vmem:[#allocation5 + $0x10] sm:$0xe] %vm3552_vm3, %v2129_v50  ;;  %v1745_v32 = vpop.permute.xlu1 %1744 }
 0x434   : > { %2057 = vst.msk [vmem:[#allocation5 + $0x18] sm:$0x7] %vm3553_vm15, %v2055_v45  ;;  %v1856_v38 = vpop.permute.xlu0 %1855 }
 0x435   : > { %1749 = vst.msk [vmem:[#allocation5 + $0x20] sm:$0x3] %vm3554_vm14, %v1745_v32 }
 0x436   : > { %1861 = vst.msk [vmem:[#allocation5 + $0x18] sm:$0x8] %vm3555_vm9, %v1856_v38 }
 0x437   : > { %v1858_v51 = vpop.permute.xlu1 %1857 }
 0x438   : > { %v2008_v52 = vpop.permute.xlu0 %2007 }
 0x43b   : > { %v2143_v55 = vpop.permute.xlu1 %2142 }
 0x43c   : > { %2145 = vst.msk [vmem:[#allocation5 + $0x18] sm:$0x7] %vm3556_vm2, %v2143_v55  ;;  %v1950_v57 = vpop.permute.xlu0 %1949 }
 0x43d   : > { %1955 = vst.msk [vmem:[#allocation5 + $0x18] sm:$0x8] %vm3557_vm11, %v1950_v57 }
 0x43e   : > { %2013 = vst.msk [vmem:[#allocation5 + $0x18] sm:$0x8] %vm3558_vm8, %v2008_v52 }
 0x43f   : > { %2068 = vst.msk [vmem:[#allocation5 + $0x18] sm:$0x8] %vm3559_vm7, %v3323_v56  ;;  %v2010_v54 = vpop.permute.xlu1 %2009 }
 0x440   : > { %2162 = vst.msk [vmem:[#allocation5 + $0x18] sm:$0x8] %vm3560_vm10, %v3328_v59  ;;  %v1803_v58 = vpop.permute.xlu0 %1802 }
 0x441   : > { %1807 = vst.msk [vmem:[#allocation5 + $0x20] sm:$0x3] %vm3561_vm13, %v1803_v58 }
 0x442   : > { %1862 = vst.msk [vmem:[#allocation5 + $0x20] sm:$0x3] %vm3562_vm6, %v1858_v51 }
 0x443   : > { %v2159_v61 = vpop.permute.xlu1 %2158 }
 0x444   : > { %v1952_v60 = vpop.permute.xlu0 %1951 }
 0x445   : > { %1956 = vst.msk [vmem:[#allocation5 + $0x20] sm:$0x3] %vm3563_vm4, %v1952_v60 }
 0x446   : > { %2014 = vst.msk [vmem:[#allocation5 + $0x20] sm:$0x3] %vm3564_vm5, %v2010_v54 }
 0x447   : > { %v2712_v63 = vld [vmem:[#allocation5 + $0x10] ss:$8 sps:$4 sm:$0xff]  }
 0x448   : > { %v2065_v0 = vpop.permute.xlu0 %2064  ;;  %2360 = vmatmul.mubr.bf16.gmra.mxu1 %v2712_v63 }
 0x449   : > { %2069 = vst.msk [vmem:[#allocation5 + $0x20] sm:$0x3] %vm3565_vm0, %v2065_v0 }
 0x44a   : > { %2163 = vst.msk [vmem:[#allocation5 + $0x20] sm:$0x3] %vm1099_vm1, %v2159_v61 }
 0x451   : > { %v2206_v56 = vld [vmem:[#allocation5 + $0x20] sm:$0x33] }
 0x452   : > { %v2535_v59 = vcombine.high %v2206_v56, %v2206_v56  ;;  %v2534_v2 = vcombine.low %v2206_v56, %v2206_v56 }
 0x454   : > { %2547 = vmatprep.mubr.msk.bf16.mxu1 %vm1312_vm12, %v2535_v59 }
 0x455   : > { %2368 = vmatmul.mubr.bf16.gmra.mxu1 %v2534_v2 }
 0x4ee   : > { %v2353_v36 = vpop.f32.mrf.mxu1 }
 0x4ef   : > { %v2354_v3 = vadd.f32 %v2529_v29, %v2353_v36 }
 0x4f0   : > { %v2355_v22 = vpop.f32.mrf.mxu1 }
 0x4f1   : > { %v2375_v4 = vmax.f32 %v2354_v3, 0.0 }
 0x4f2   : > { %v2356_v5 = vpop.f32.mrf.mxu1 }
 0x4f3   : > { %v2357_v6 = vadd.f32 %v2529_v29, %v2356_v5 }
 0x4f4   : > { %v2358_v9 = vpop.f32.mrf.mxu1 }
 0x4f5   : > { %v2376_v7 = vmax.f32 %v2357_v6, 0.0 }
 0x4f7   : > { %v2573_v24 = vpack.c.bf16 %v2376_v7, %v2375_v4 }
 0x4f9   : > { %2574 = vst [vmem:[%s332_s29] sm:$0xff] %v2573_v24  }
 0x508   : > { %v2361_v10 = vpop.f32.mrf.mxu1 }
 0x509   : > { %v2362_v11 = vadd.f32 %v2529_v29, %v2361_v10 }
 0x50a   : > { %v2363_v13 = vpop.f32.mrf.mxu1 }
 0x50b   : > { %v2377_v16 = vmax.f32 %v2362_v11, 0.0 }
 0x50c   : > { %v2364_v1 = vpop.f32.mrf.mxu1 }
 0x50d   : > { %v2365_v14 = vadd.f32 %v2529_v29, %v2364_v1 }
 0x50e   : > { %v2366_v15 = vpop.f32.mrf.mxu1 }
 0x50f   : > { %v2378_v21 = vmax.f32 %v2365_v14, 0.0 }
 0x511   : > { %v2578_v20 = vpack.c.bf16 %v2378_v21, %v2377_v16 }
 0x513   : > { %2580 = vst [vmem:[%s332_s29 + $0x8] sm:$0xff] %v2578_v20  }
 0x515   : > { %v2369_v23 = vpop.f32.mrf.mxu1 }
 0x516   : > { %v2370_v35 = vadd.f32 %v2529_v29, %v2369_v23 }
 0x517   : > { %v2371_v25 = vpop.f32.mrf.mxu1 }
 0x518   : > { %v2379_v8 = vmax.f32 %v2370_v35, 0.0 }
 0x519   : > { %v2372_v18 = vpop.f32.mrf.mxu1 }
 0x51a   : > { %v2569_v19 = vpack.c.bf16 %v2379_v8, %v2379_v8 }
 0x51b   : > { %v2373_v26 = vpop.f32.mrf.mxu1 }
 0x51c   : > { %2405 = vst [vmem:[%s332_s29 + $0x10] sm:$0x3] %v2569_v19 }
 0x51d PF: > { %s19_s30 = sadd.s32 1, %s2721_s30  }
 0x51e   : > { %p16_p4 = scmp.ge.s32.totalorder %s19_s30, 4  }
 0x520   :  { %18 = sbr.rel (!%p16_p4) target bundleno = 1 (0x1), region = 86 }

// kernel: squeezenet_forward.9
= control target key start
LH: loop header
LB: loop body
LE: loop exit
PB: predicated region body
PF: predicated region fallthrough
CT: control target
= control target key end

     0   :  { %v100_v30 = vlaneseq  ;;  %v540_v34 = vmov 1966171168   ;;  %s667_s0 = inlined_call_operand.vmem [shape: bf16[2,512], index: 0, kind: input, shape index: {}]   ;;  %s668_s1 = inlined_call_operand.vmem [shape: bf16[512,10], index: 1, kind: input, shape index: {}]   ;;  %s669_s2 = inlined_call_operand.vmem [shape: f32[1,10], index: 2, kind: input, shape index: {}]   ;;  %s670_s3 = inlined_call_operand.hbm [shape: f32[2,10], index: 3, kind: output, shape index: {}]  }
   0x1   :  { %v486_v0 = vld [vmem:[%s668_s1 + $0x78] sm:$0xff]   ;;  %v490_v4 = vld [vmem:[%s668_s1 + $0x70] sm:$0xff]   ;;  %v494_v8 = vld [vmem:[%s668_s1 + $0x68] sm:$0xff]   ;;  %v98_v35 = vunpack.c.l.s4 %v540_v34 }
   0x2   :  { %v487_v1 = vld [vmem:[%s668_s1 + $0xf8] sm:$0xff]   ;;  %440 = vmatprep.subr.bf16.mxu0 %v486_v0  ;;  %v491_v5 = vld [vmem:[%s668_s1 + $0xf0] sm:$0xff]   ;;  %v495_v9 = vld [vmem:[%s668_s1 + $0xe8] sm:$0xff]   ;;  %v101_v36 = vshrl.u32 %v100_v30, 7 }
   0x3   :  { %v488_v2 = vld [vmem:[%s668_s1 + $0x38] sm:$0xff]   ;;  %462 = vmatprep.subr.bf16.mxu1 %v487_v1  ;;  %v492_v6 = vld [vmem:[%s668_s1 + $0x30] sm:$0xff]   ;;  %v496_v10 = vld [vmem:[%s668_s1 + $0x28] sm:$0xff]  }
   0x4   :  { %v489_v3 = vld [vmem:[%s668_s1 + $0xb8] sm:$0xff]   ;;  %441 = vmatpush3.bf16.msra.mxu0 %v488_v2  ;;  %v493_v7 = vld [vmem:[%s668_s1 + $0xb0] sm:$0xff]   ;;  %v497_v11 = vld [vmem:[%s668_s1 + $0xa8] sm:$0xff]  }
   0x5   :  { %463 = vmatpush3.bf16.msra.mxu1 %v489_v3  ;;  %442 = vmatprep.subr.bf16.mxu0 %v490_v4  ;;  %v498_v12 = vld [vmem:[%s668_s1 + $0x60] sm:$0xff]   ;;  %v502_v16 = vld [vmem:[%s668_s1 + $0x58] sm:$0xff]   ;;  %v506_v20 = vld [vmem:[%s668_s1 + $0x50] sm:$0xff]  }
   0x6   :  { %464 = vmatprep.subr.bf16.mxu1 %v491_v5  ;;  %v499_v13 = vld [vmem:[%s668_s1 + $0xe0] sm:$0xff]   ;;  %v503_v17 = vld [vmem:[%s668_s1 + $0xd8] sm:$0xff]   ;;  %v507_v21 = vld [vmem:[%s668_s1 + $0xd0] sm:$0xff]  }
   0x7   :  { %v500_v14 = vld [vmem:[%s668_s1 + $0x20] sm:$0xff]   ;;  %v504_v18 = vld [vmem:[%s668_s1 + $0x18] sm:$0xff]   ;;  %v508_v22 = vld [vmem:[%s668_s1 + $0x10] sm:$0xff]  }
   0x8   :  { %443 = vmatpush3.bf16.msra.mxu0 %v492_v6  ;;  %v501_v15 = vld [vmem:[%s668_s1 + $0xa0] sm:$0xff]   ;;  %v505_v19 = vld [vmem:[%s668_s1 + $0x98] sm:$0xff]   ;;  %v509_v23 = vld [vmem:[%s668_s1 + $0x90] sm:$0xff]  }
   0x9   :  { %465 = vmatpush3.bf16.msra.mxu1 %v493_v7  ;;  %444 = vmatprep.subr.bf16.mxu0 %v494_v8  ;;  %v510_v24 = vld [vmem:[%s668_s1 + $0x48] sm:$0xff]   ;;  %v514_v28 = vld [vmem:[%s668_s1 + $0x40] sm:$0xff]  }
   0xa   :  { %466 = vmatprep.subr.bf16.mxu1 %v495_v9  ;;  %v511_v25 = vld [vmem:[%s668_s1 + $0xc8] sm:$0xff]   ;;  %v515_v29 = vld [vmem:[%s668_s1 + $0xc0] sm:$0xff]  }
   0xb   :  { %v512_v26 = vld [vmem:[%s668_s1 + $0x8] sm:$0xff]   ;;  %v516_v31 = vld [vmem:[%s668_s1] sm:$0xff]  }
   0xc   :  { %445 = vmatpush3.bf16.msra.mxu0 %v496_v10  ;;  %v513_v27 = vld [vmem:[%s668_s1 + $0x88] sm:$0xff]   ;;  %v517_v32 = vld [vmem:[%s668_s1 + $0x80] sm:$0xff]  }
   0xd   :  { %467 = vmatpush3.bf16.msra.mxu1 %v497_v11  ;;  %446 = vmatprep.subr.bf16.mxu0 %v498_v12  ;;  %v407_v33 = vld.sshfl [vmem:[%s667_s0] sm:$0x33 pattern:$0x75316420] }
   0xe   :  { %468 = vmatprep.subr.bf16.mxu1 %v499_v13 }
  0x10   :  { %447 = vmatpush3.bf16.msra.mxu0 %v500_v14 }
  0x11   :  { %469 = vmatpush3.bf16.msra.mxu1 %v501_v15  ;;  %448 = vmatprep.subr.bf16.mxu0 %v502_v16 }
  0x12   :  { %470 = vmatprep.subr.bf16.mxu1 %v503_v17 }
  0x14   :  { %449 = vmatpush3.bf16.msra.mxu0 %v504_v18 }
  0x15   :  { %471 = vmatpush3.bf16.msra.mxu1 %v505_v19  ;;  %450 = vmatprep.subr.bf16.mxu0 %v506_v20 }
  0x16   :  { %472 = vmatprep.subr.bf16.mxu1 %v507_v21 }
  0x18   :  { %451 = vmatpush3.bf16.msra.mxu0 %v508_v22 }
  0x19   :  { %473 = vmatpush3.bf16.msra.mxu1 %v509_v23  ;;  %452 = vmatprep.subr.bf16.mxu0 %v510_v24 }
  0x1a   :  { %474 = vmatprep.subr.bf16.mxu1 %v511_v25 }
  0x1c   :  { %453 = vmatpush3.bf16.msra.mxu0 %v512_v26 }
  0x1d   :  { %475 = vmatpush3.bf16.msra.mxu1 %v513_v27  ;;  %454 = vmatprep.subr.bf16.mxu0 %v514_v28 }
  0x1e   :  { %476 = vmatprep.subr.bf16.mxu1 %v515_v29 }
  0x20   :  { %455 = vmatpush3.bf16.msra.mxu0 %v516_v31 }
  0x21   :  { %477 = vmatpush3.bf16.msra.mxu1 %v517_v32 }
  0x22   :  { %8 = vsyncpa [#allocation3], 0  ;;  %v96_v37 = vcombine.high %v407_v33, %v407_v33  ;;  %v99_v38 = vunpack.c.0.s8 %v98_v35  ;;  %v406_v46 = vld [vmem:[%s669_s2] ss:$0 sm:$0xff]  ;;  %s541_s24 = smov [#allocation2]   ;;  %vm390_vm0 = vcmask 74752  }
  0x23   :  { %s398_s25 = sshll.u32 %s541_s24, 4  ;;  %s399_s25 = int_to_ptr.vmem [resolvable:$true] %s398_s25 }
  0x24   :  { %v102_v39 = vsub.s32 %v99_v38, %v101_v36  ;;  %s518_s26 = scalar_lea.vmem %s399_s25, 32  ;;  %p523_p1 = scmp.lt.s32.totalorder %s399_s25, %s399_s25 }
  0x25   :  { %p519_p0 = scmp.ne.s32.totalorder %s399_s25, %s518_s26  ;;  %p524_p2 = scmp.lt.s32.totalorder %s518_s26, %s518_s26 }
  0x26   :  { %v110_v40 = vrot.slane %v96_v37, %v102_v39  ;;  %v103_v41 = vrot.slane %v407_v33, %v102_v39 }
  0x27   :  { %p525_p3 = por %p524_p2, %p523_p1 }
  0x28   :  { %341 = vmatprep.mubr.bf16.mxu0 %v110_v40  ;;  %v112_v42 = vcombine.high %v110_v40, %v110_v40  ;;  %v111_v43 = vcombine.high %v103_v41, %v103_v41 }
  0x29   :  { %342 = vmatmul.mubr.bf16.vlgmr.msra.gmra.mxu0 %v103_v41  ;;  %p526_p4 = pnand %p525_p3, %p519_p0 }
  0x2a   :  { %381 = vmatprep.mubr.bf16.mxu1 %v112_v42 }
  0x2b   :  { %382 = vmatmul.mubr.bf16.vlgmr.msra.gmra.mxu1 %v111_v43 }
  0xe9   :  { %v456_v44 = vpop.f32.mrf.mxu0 }
  0xeb   :  { %v478_v45 = vpop.f32.mrf.mxu1  ;;  %v457_v47 = vpop.f32.mrf.mxu0 }
  0xec   :  { %v458_v48 = vadd.f32 %v457_v47, %v456_v44 }
  0xed   :  { %v479_v49 = vpop.f32.mrf.mxu1  ;;  %v459_v50 = vpop.f32.mrf.mxu0 }
  0xee   :  { %v344_v51 = vadd.f32 %v458_v48, %v406_v46  ;;  %v480_v52 = vadd.f32 %v479_v49, %v478_v45 }
  0xef   :  { %v481_v53 = vpop.f32.mrf.mxu1  ;;  %v460_v54 = vpop.f32.mrf.mxu0 }
  0xf0   :  { %v384_v55 = vadd.f32 %v480_v52, %v344_v51 }
  0xf1   :  { %v482_v56 = vpop.f32.mrf.mxu1 }
  0xf2   :  { %v389_v57 = vmax.f32 %v384_v55, 0.0 }
  0xf4   :  { %391 = vst.msk [vmem:[#allocation2] sm:$0x3] %vm390_vm0, %v389_v57 }
  0xf5   :  { %529 = shalt.err (!%p526_p4)
}
  0xf6   :  { %401 = dma.vmem_to_hbm [thread:$0]  %s399_s25, 32, %s670_s3, [#allocation3]  }
  0xf7   :  { %538 = dma.done.wait [#allocation3], 32  }
  0xf8   :  { %539 = vsyncadd [#allocation3], 4294967264 }
  0xf9   :  { %405 = vsyncpa [#allocation3], 1 }

// kernel: squeezenet_forward.8
= control target key start
LH: loop header
LB: loop body
LE: loop exit
PB: predicated region body
PF: predicated region fallthrough
CT: control target
= control target key end

     0   :  { %s8167_s24 = smov 0   ;;  %s10249_s0 = inlined_call_operand.vmem [shape: bf16[2,1,256], index: 0, kind: input, shape index: {}]   ;;  %s10250_s1 = inlined_call_operand.vmem [shape: bf16[256,48], index: 1, kind: input, shape index: {}]   ;;  %s10251_s2 = inlined_call_operand.vmem [shape: f32[1,48], index: 2, kind: input, shape index: {}]   ;;  %s10252_s3 = inlined_call_operand.vmem [shape: bf16[432,384], index: 3, kind: input, shape index: {}]   ;;  %s10253_s4 = inlined_call_operand.vmem [shape: f32[1,384], index: 4, kind: input, shape index: {}]   ;;  %s10254_s5 = inlined_call_operand.vmem [shape: bf16[384,48], index: 5, kind: input, shape index: {}]   ;;  %s10255_s6 = inlined_call_operand.vmem [shape: f32[1,48], index: 6, kind: input, shape index: {}]   ;;  %s10256_s7 = inlined_call_operand.vmem [shape: bf16[432,384], index: 7, kind: input, shape index: {}]   ;;  %s10257_s8 = inlined_call_operand.vmem [shape: f32[1,384], index: 8, kind: input, shape index: {}]   ;;  %s10258_s9 = inlined_call_operand.vmem [shape: bf16[384,64], index: 9, kind: input, shape index: {}]   ;;  %s10259_s10 = inlined_call_operand.vmem [shape: f32[1,64], index: 10, kind: input, shape index: {}]   ;;  %s10260_s11 = inlined_call_operand.vmem [shape: bf16[576,512], index: 11, kind: input, shape index: {}]   ;;  %s10261_s12 = inlined_call_operand.vmem [shape: f32[1,512], index: 12, kind: input, shape index: {}]   ;;  %s10262_s13 = inlined_call_operand.vmem [shape: bf16[512,64], index: 13, kind: input, shape index: {}]   ;;  %s10263_s14 = inlined_call_operand.vmem [shape: f32[1,64], index: 14, kind: input, shape index: {}]   ;;  %s10264_s15 = inlined_call_operand.vmem [shape: bf16[576,512], index: 15, kind: input, shape index: {}]   ;;  %s10265_s16 = inlined_call_operand.vmem [shape: f32[1,512], index: 16, kind: input, shape index: {}]   ;;  %s10266_s17 = inlined_call_operand.vmem [shape: bf16[2,1,512], index: 17, kind: output, shape index: {}]  }
   0x1   :  { %10278 = sst [smem:[#allocation11_spill]] %s10249_s0 }
   0x2   :  { %10279 = sst [smem:[#allocation12_spill]] %s10250_s1 }
   0x3 LB: > { %10280 = sst [smem:[#allocation10_spill]] %s8064_s24  ;;  %s6461_s25 = sadd.s32 4294967295, %s8064_s24   ;;  %s8064_s24 = sphi %s8167_s24, %s27_s24  }
   0x4   : > { %p6465_p0 = scmp.ge.s32.totalorder %s8064_s24, 1  ;;  %p486_p1 = scmp.lt.s32.totalorder %s8064_s24, 3 }
   0x6   : > { %p487_p2 = pnand %p6465_p0, %p486_p1 }
   0x7   : > { %s10281_s28 = sld [smem:[#allocation12_spill]] (!%p487_p2)  ;;  %p536_p3 = scmp.lt.s32.totalorder (!%p487_p2), %s6461_s25, 1 }
   0x8   : > { %490 = sbr.rel (%p487_p2) target bundleno = 2553 (0x9f9), region = 88  ;;  %s10282_s21 = sld [smem:[#allocation11_spill]] (!%p487_p2) }
   0x9   : > { %s8068_s23 = smov (!%p487_p2), 48   ;;  %s8069_s26 = smov (!%p487_p2), 96  }
   0xa   : > { %s8070_s27 = smov (!%p487_p2), 16   ;;  %s10271_s24 = smov (!%p487_p2), 64  }
   0xb   : > { %s10269_s20 = smov (!%p487_p2), 112   ;;  %s10270_s0 = smov (!%p487_p2), 32  }
   0xc   : > { %s10273_s1 = smov (!%p487_p2), 80   ;;  %s10309_s19 = smov (!%p487_p2), 80  }
   0xd   : > { %v7312_v0 = vld [vmem:[%s10281_s28 + $0x78] sm:$0xff]   ;;  %v7314_v2 = vld [vmem:[%s10281_s28 + $0x70] sm:$0xff]   ;;  %v7316_v4 = vld [vmem:[%s10281_s28 + $0x68] sm:$0xff]   ;;  %vm742_vm0 = vcmask 388096   ;;  %s10326_s25 = smov (!%p536_p3, %s6461_s25), 1  ;;  %v8066_v6 = vmov 0   ;;  %v591_v10 = vlaneseq }
   0xe   : > { %v7313_v1 = vld [vmem:[%s10281_s28 + $0x38] sm:$0xff]   ;;  %7081 = vmatprep.subr.bf16.mxu0 %v7312_v0  ;;  %v7315_v3 = vld [vmem:[%s10281_s28 + $0x30] sm:$0xff]   ;;  %v7317_v5 = vld [vmem:[%s10281_s28 + $0x28] sm:$0xff]   ;;  %743 = vst.msk [vmem:[#allocation2] sm:$0xf] %vm742_vm0, %v8066_v6  ;;  %s6466_s29 = sshll.u32 %s10326_s25, 1 }
   0xf   : > { %7082 = vmatpush3.bf16.msra.mxu0 %v7313_v1  ;;  %2011 = vst.msk [vmem:[#allocation3] sm:$0xf] %vm742_vm0, %v8066_v6  ;;  %v7318_v7 = vld [vmem:[%s10281_s28 + $0x60] sm:$0xff]   ;;  %v7320_v9 = vld [vmem:[%s10281_s28 + $0x58] sm:$0xff]   ;;  %s539_s22 = scalar_lea.vmem %s10282_s21, %s6466_s29  ;;  %v7322_v12 = vld [vmem:[%s10281_s28 + $0x50] sm:$0xff]   ;;  %v8219_v17 = vshrl.u32 %v591_v10, 7 }
  0x10   : > { %7083 = vmatprep.subr.bf16.mxu0 %v7314_v2  ;;  %v7319_v8 = vld [vmem:[%s10281_s28 + $0x20] sm:$0xff]   ;;  %v7321_v11 = vld [vmem:[%s10281_s28 + $0x18] sm:$0xff]   ;;  %v7323_v14 = vld [vmem:[%s10281_s28 + $0x10] sm:$0xff]   ;;  %v8067_v15 = vmov 1966171168   ;;  %vm744_vm1 = vcmask 385024  }
  0x11   : > { %v6468_v13 = vld.sshfl [vmem:[%s539_s22] sm:$0x11 pattern:$0x75316420]  ;;  %v589_v16 = vunpack.c.l.s4 %v8067_v15  ;;  %v7324_v18 = vld [vmem:[%s10281_s28 + $0x48] sm:$0xff]   ;;  %vm789_vm4 = vcmask 778624  }
  0x12   : > { %v587_v20 = vcombine.high %v6468_v13, %v6468_v13  ;;  %v7325_v22 = vld [vmem:[%s10281_s28 + $0x8] sm:$0xff]   ;;  %v7326_v24 = vld [vmem:[%s10281_s28 + $0x40] sm:$0xff]   ;;  %vm745_vm2 = vsmask.f32 256  ;;  %v7333_v45 = vld [vmem:[%s10252_s3 + $0x90] ss:$12 sps:$4 sm:$0xff]  }
  0x13   : > { %7084 = vmatpush3.bf16.msra.mxu0 %v7315_v3  ;;  %v590_v21 = vunpack.c.0.s8 %v589_v16  ;;  %v7327_v27 = vld [vmem:[%s10281_s28] sm:$0xff]   ;;  %vm8244_vm3 = vmand %vm744_vm1, %vm745_vm2  ;;  %v2012_v40 = vld [vmem:[#allocation3 + $0x4] sm:$0x1]  ;;  %vm817_vm6 = vcmask 1041152   ;;  %vm819_vm7 = vcmask 123905   ;;  %vm851_vm12 = vcmask 516224  }
  0x14   : > { %7085 = vmatprep.subr.bf16.mxu0 %v7316_v4  ;;  %v747_v34 = vld [vmem:[#allocation2 + $0x4] sm:$0x1]  ;;  %v762_v37 = vld [vmem:[#allocation6] sm:$0x1]  ;;  %v2013_v41 = vsel %vm8244_vm3, 0, %v2012_v40  ;;  %vm8270_vm5 = vmand %vm789_vm4, %vm745_vm2  ;;  %vm814_vm13 = vcmask 785408  }
  0x15   : > { %v6486_v19 = vld.sshfl [vmem:[#allocation2] sm:$0x1 pattern:$0x75316420]  ;;  %v8228_v23 = vsub.s32 %v590_v21, %v8219_v17  ;;  %v748_v38 = vsel %vm8244_vm3, 0, %v747_v34  ;;  %vm8308_vm9 = vmand %vm817_vm6, %vm745_vm2  ;;  %vm755_vm15 = vcmask 387074  }
  0x16   : > { %v6488_v30 = vld.sshfl [vmem:[#allocation2] sm:$0x10 pattern:$0x75316420]  ;;  %v761_v36 = vld [vmem:[#allocation2] sm:$0x1]  ;;  %vm8322_vm14 = vmand %vm851_vm12, %vm745_vm2 }
  0x17   : > { %7086 = vmatpush3.bf16.msra.mxu0 %v7317_v5  ;;  %v601_v25 = vrot.slane %v587_v20, %v8228_v23  ;;  %v780_v26 = vrot.slane %v6486_v19, %v8228_v23  ;;  %v594_v29 = vrot.slane %v6468_v13, %v8228_v23  ;;  %v803_v31 = vcombine.high %v6488_v30, %v6488_v30  ;;  %v7328_v42 = vld [vmem:[%s10252_s3 + $0xac] ss:$12 sps:$4 sm:$0xff]   ;;  %v7330_v43 = vld [vmem:[%s10252_s3 + $0xa8] ss:$12 sps:$4 sm:$0xff]   ;;  %v975_v46 = vld [vmem:[#allocation6 + $0x3] sm:$0x1] }
  0x18   : > { %7087 = vmatprep.subr.bf16.mxu0 %v7318_v7  ;;  %v763_v39 = vsel %vm8244_vm3, %v761_v36, %v762_v37  ;;  %749 = vst [vmem:[#allocation2 + $0x4] sm:$0x1] %v748_v38  ;;  %2014 = vst [vmem:[#allocation3 + $0x4] sm:$0x1] %v2013_v41  ;;  %1568 = vmatprep.subr.bf16.mxu1 %v7328_v42  ;;  %v7331_v44 = vld [vmem:[%s10252_s3 + $0x94] ss:$12 sps:$4 sm:$0xff]  }
  0x19   : > { %732 = vmatprep.mubr.bf16.mxu0 %v601_v25  ;;  %v782_v28 = vshrl.u32 %v780_v26, 16  ;;  %v810_v32 = vrot.slane %v803_v31, %v8228_v23  ;;  %764 = vst [vmem:[#allocation6] sm:$0x1] %v763_v39  ;;  %1569 = vmatpush1.bf16.msra.mxu1 %v7330_v43  ;;  %v7334_v47 = vld [vmem:[%s10252_s3 + $0x7c] ss:$12 sps:$4 sm:$0xff]   ;;  %vm876_vm4 = vcmask 909824  }
  0x1a   : > { %1570 = vmatprep.subr.bf16.mxu1 %v7331_v44  ;;  %v2214_v49 = vld [vmem:[#allocation7 + $0x3] sm:$0x1]  ;;  %v7346_v59 = vld [vmem:[%s10252_s3 + $0x228] ss:$12 sps:$4 sm:$0xff]   ;;  %v7348_v60 = vld [vmem:[%s10252_s3 + $0x22c] ss:$12 sps:$4 sm:$0xff]  }
  0x1b   : > { %7088 = vmatpush3.bf16.msra.mxu0 %v7319_v8  ;;  %786 = vrot.lane.b32.xlu0 %v782_v28, %s8068_s23  ;;  %v844_v33 = vshrl.u32 %v810_v32, 16  ;;  %v7336_v55 = vld [vmem:[%s10252_s3 + $0x78] ss:$12 sps:$4 sm:$0xff]   ;;  %v7339_v61 = vld [vmem:[%s10252_s3 + $0x60] ss:$12 sps:$4 sm:$0xff]   ;;  %vm8475_vm6 = vmand %vm876_vm4, %vm745_vm2  ;;  %vm911_vm12 = vcmask 254977  }
  0x1c   : > { %7089 = vmatprep.subr.bf16.mxu0 %v7320_v9  ;;  %v7337_v58 = vld [vmem:[%s10252_s3 + $0x64] ss:$12 sps:$4 sm:$0xff]   ;;  %v7340_v62 = vld [vmem:[%s10252_s3 + $0x4c] ss:$12 sps:$4 sm:$0xff]   ;;  %v7342_v63 = vld [vmem:[%s10252_s3 + $0x48] ss:$12 sps:$4 sm:$0xff]  }
  0x1d   : > { %848 = vrot.lane.b32.xlu1 %v844_v33, %s8070_s27  ;;  %1571 = vmatpush1.bf16.msra.mxu1 %v7333_v45  ;;  %v7343_v0 = vld [vmem:[%s10252_s3 + $0x34] ss:$12 sps:$4 sm:$0xff]   ;;  %v7345_v1 = vld [vmem:[%s10252_s3 + $0x30] ss:$12 sps:$4 sm:$0xff]   ;;  %vm10276_vm8 = vsmask.f32 1280 }
  0x1e   : > { %1572 = vmatprep.subr.bf16.mxu1 %v7334_v47  ;;  %vm8313_vm10 = vmand %vm819_vm7, %vm10276_vm8  ;;  %vm10274_vm0 = vsmask.f32 2304  ;;  %v7349_v28 = vld [vmem:[%s10252_s3 + $0x1c] ss:$12 sps:$4 sm:$0xff]   ;;  %v7355_v34 = vld [vmem:[%s10252_s3 + $0x4] ss:$12 sps:$4 sm:$0xff]  }
  0x1f   : > { %7090 = vmatpush3.bf16.msra.mxu0 %v7321_v11  ;;  %811 = vrot.lane.b32.xlu0 %v810_v32, %s8069_s26  ;;  %v974_v51 = vld [vmem:[#allocation2 + $0x4] sm:$0x1]  ;;  %v2213_v53 = vld [vmem:[#allocation3 + $0x4] sm:$0x1]  ;;  %vm10275_vm11 = vmor %vm8313_vm10, %vm8308_vm9  ;;  %vm909_vm7 = vcmask 1041280   ;;  %vm10277_vm4 = vcmask 916480  }
  0x20   : > { %7091 = vmatprep.subr.bf16.mxu0 %v7322_v12  ;;  %v791_v50 = vld [vmem:[#allocation6] sm:$0x1]  ;;  %v976_v52 = vsel %vm8244_vm3, %v974_v51, %v975_v46  ;;  %v2215_v56 = vsel %vm8244_vm3, %v2213_v53, %v2214_v49  ;;  %vm8338_vm1 = vmand %vm755_vm15, %vm10274_vm0  ;;  %v6494_v31 = vld.sshfl [vmem:[#allocation2] sm:$0x20 pattern:$0x75316420] }
  0x21   : > { %977 = vst [vmem:[#allocation6 + $0x3] sm:$0x1] %v976_v52  ;;  %2216 = vst [vmem:[#allocation7 + $0x3] sm:$0x1] %v2215_v56  ;;  %1573 = vmatpush1.bf16.msra.mxu1 %v7336_v55  ;;  %v578_v12 = vld [vmem:[%s10251_s2] sm:$0x1]  ;;  %v926_v38 = vcombine.high %v6494_v31, %v6494_v31 }
  0x22   : > { %1574 = vmatprep.subr.bf16.mxu1 %v7337_v58  ;;  %v7354_v32 = vld [vmem:[%s10252_s3 + $0x214] ss:$12 sps:$4 sm:$0xff]   ;;  %v7352_v33 = vld [vmem:[%s10252_s3 + $0x210] ss:$12 sps:$4 sm:$0xff]   ;;  %v7358_v39 = vld [vmem:[%s10252_s3 + $0x1f8] ss:$12 sps:$4 sm:$0xff]  }
  0x23   : > { %7092 = vmatpush3.bf16.msra.mxu0 %v7323_v14  ;;  %v7357_v36 = vld [vmem:[%s10252_s3] ss:$12 sps:$4 sm:$0xff]   ;;  %v7360_v37 = vld [vmem:[%s10252_s3 + $0x1fc] ss:$12 sps:$4 sm:$0xff]   ;;  %v7366_v43 = vld [vmem:[%s10252_s3 + $0x1e4] ss:$12 sps:$4 sm:$0xff]   ;;  %v933_v45 = vrot.slane %v926_v38, %v8228_v23 }
  0x24   : > { %7093 = vmatprep.subr.bf16.mxu0 %v7324_v18  ;;  %v7361_v40 = vld [vmem:[%s10252_s3 + $0x16c] ss:$12 sps:$4 sm:$0xff]   ;;  %v7363_v41 = vld [vmem:[%s10252_s3 + $0x168] ss:$12 sps:$4 sm:$0xff]   ;;  %v7369_v49 = vld [vmem:[%s10252_s3 + $0x150] ss:$12 sps:$4 sm:$0xff]  }
  0x25   : > { %1575 = vmatpush1.bf16.msra.mxu1 %v7339_v61  ;;  %v7364_v46 = vld [vmem:[%s10252_s3 + $0x1e0] ss:$12 sps:$4 sm:$0xff]   ;;  %v7370_v51 = vld [vmem:[%s10252_s3 + $0x1c8] ss:$12 sps:$4 sm:$0xff]   ;;  %v934_v55 = vcombine.high %v933_v45, %v933_v45  ;;  %v7375_v56 = vld [vmem:[%s10252_s3 + $0x138] ss:$12 sps:$4 sm:$0xff]  }
  0x26   : > { %1576 = vmatprep.subr.bf16.mxu1 %v7340_v62  ;;  %v7367_v47 = vld [vmem:[%s10252_s3 + $0x154] ss:$12 sps:$4 sm:$0xff]   ;;  %v7372_v52 = vld [vmem:[%s10252_s3 + $0x1cc] ss:$12 sps:$4 sm:$0xff]   ;;  %v7373_v53 = vld [vmem:[%s10252_s3 + $0x13c] ss:$12 sps:$4 sm:$0xff]  }
  0x27   : > { %7094 = vmatpush3.bf16.msra.mxu0 %v7325_v22  ;;  %v7378_v58 = vld [vmem:[%s10252_s3 + $0x1b4] ss:$12 sps:$4 sm:$0xff]   ;;  %v7382_v62 = vld [vmem:[%s10252_s3 + $0x198] ss:$12 sps:$4 sm:$0xff]   ;;  %vm8482_vm15 = vmand %vm909_vm7, %vm745_vm2  ;;  %vm938_vm7 = vcmask 647424   ;;  %s10306_s21 = smov 64  }
  0x28   : > { %7095 = vmatprep.subr.bf16.mxu0 %v7326_v24  ;;  %v758_v24 = vld [vmem:[#allocation2] sm:$0x4]  ;;  %vm8487_vm0 = vmand %vm911_vm12, %vm10276_vm8  ;;  %vm969_vm8 = vcmask 1041024   ;;  %v7468_v35 = vld [vmem:[%s10256_s7 + $0x7c] ss:$12 sps:$4 sm:$0xff]   ;;  %s6467_s29 = sshll.u32 %s10326_s25, 2 }
  0x29   : > { %1577 = vmatpush1.bf16.msra.mxu1 %v7342_v63  ;;  %v7381_v61 = vld [vmem:[%s10252_s3 + $0x120] ss:$12 sps:$4 sm:$0xff]   ;;  %v7384_v63 = vld [vmem:[%s10252_s3 + $0x19c] ss:$12 sps:$4 sm:$0xff]   ;;  %vm8502_vm12 = vmand %vm938_vm7, %vm745_vm2  ;;  %vm8076_vm7 = vmmov 0  }
  0x2a   : > { %1578 = vmatprep.subr.bf16.mxu1 %v7343_v0  ;;  %v7385_v0 = vld [vmem:[%s10252_s3 + $0x10c] ss:$12 sps:$4 sm:$0xff]  }
  0x2b   : > { %7096 = vmatpush3.bf16.msra.mxu0 %v7327_v27  ;;  %v7481_v8 = vld [vmem:[%s10256_s7 + $0x18] ss:$12 sps:$4 sm:$0xff]   ;;  %v7487_v26 = vld [vmem:[%s10256_s7] ss:$12 sps:$4 sm:$0xff]  }
  0x2c   : > { %1609 = vmatprep.subr.bf16.mxu0 %v7348_v60  ;;  %v7379_v60 = vld [vmem:[%s10252_s3 + $0x124] ss:$12 sps:$4 sm:$0xff]  }
  0x2d   : > { %1579 = vmatpush1.bf16.msra.mxu1 %v7345_v1  ;;  %v7387_v1 = vld [vmem:[%s10252_s3 + $0x108] ss:$12 sps:$4 sm:$0xff]  }
  0x2e   : > { %733 = vmatmul.mubr.bf16.vlgmr.msra.gmra.mxu0 %v594_v29  ;;  %v7351_v29 = vld [vmem:[%s10252_s3 + $0x18] ss:$12 sps:$4 sm:$0xff]   ;;  %1580 = vmatprep.subr.bf16.mxu1 %v7349_v28 }
  0x2f   : > { %1610 = vmatpush1.bf16.msra.mxu0 %v7346_v59  ;;  %v7376_v59 = vld [vmem:[%s10252_s3 + $0x1b0] ss:$12 sps:$4 sm:$0xff]  }
  0x30   : > { %1611 = vmatprep.subr.bf16.mxu0 %v7354_v32 }
  0x31   : > { %1581 = vmatpush1.bf16.msra.mxu1 %v7351_v29 }
  0x32   : > { %1582 = vmatprep.subr.bf16.mxu1 %v7355_v34 }
  0x33   : > { %1612 = vmatpush1.bf16.msra.mxu0 %v7352_v33 }
  0x34   : > { %1613 = vmatprep.subr.bf16.mxu0 %v7360_v37 }
  0x35   : > { %1583 = vmatpush1.bf16.msra.mxu1 %v7357_v36 }
  0x36   : > { %1584 = vmatprep.subr.bf16.mxu1 %v7361_v40  ;;  %v7544_v40 = vld [vmem:[%s10256_s7 + $0x158] ss:$12 sps:$4 sm:$0xff]  }
  0x37   : > { %1614 = vmatpush1.bf16.msra.mxu0 %v7358_v39 }
  0x38   : > { %1615 = vmatprep.subr.bf16.mxu0 %v7366_v43 }
  0x39   : > { %1585 = vmatpush2.bf16.msra.mxu1 %v7363_v41 }
  0x3a   : > { %1586 = vmatprep.subr.bf16.mxu1 %v7367_v47 }
  0x3b   : > { %1616 = vmatpush1.bf16.msra.mxu0 %v7364_v46 }
  0x3c   : > { %1617 = vmatprep.subr.bf16.mxu0 %v7372_v52  ;;  %v7412_v52 = vld [vmem:[%s10252_s3 + $0x158] ss:$12 sps:$4 sm:$0xff]  }
  0x3d   : > { %1587 = vmatpush2.bf16.msra.mxu1 %v7369_v49  ;;  %v7410_v49 = vld [vmem:[%s10252_s3 + $0xb0] ss:$12 sps:$4 sm:$0xff]  }
  0x3e   : > { %1588 = vmatprep.subr.bf16.mxu1 %v7373_v53 }
  0x3f   : > { %1618 = vmatpush1.bf16.msra.mxu0 %v7370_v51  ;;  %v7411_v51 = vld [vmem:[%s10252_s3 + $0x230] ss:$12 sps:$4 sm:$0xff]  }
  0x40   : > { %1619 = vmatprep.subr.bf16.mxu0 %v7378_v58  ;;  %v7418_v58 = vld [vmem:[%s10252_s3 + $0x128] ss:$12 sps:$4 sm:$0xff]  }
  0x41   : > { %1589 = vmatpush2.bf16.msra.mxu1 %v7375_v56  ;;  %v7414_v56 = vld [vmem:[%s10252_s3 + $0x218] ss:$12 sps:$4 sm:$0xff]  }
  0x42   : > { %1590 = vmatprep.subr.bf16.mxu1 %v7379_v60  ;;  %v7419_v60 = vld [vmem:[%s10252_s3 + $0x68] ss:$12 sps:$4 sm:$0xff]  }
  0x43   : > { %1620 = vmatpush1.bf16.msra.mxu0 %v7376_v59  ;;  %v7417_v59 = vld [vmem:[%s10252_s3 + $0x200] ss:$12 sps:$4 sm:$0xff]  }
  0x44   : > { %1621 = vmatprep.subr.bf16.mxu0 %v7384_v63  ;;  %v7422_v63 = vld [vmem:[%s10252_s3 + $0x50] ss:$12 sps:$4 sm:$0xff]  }
  0x45   : > { %1591 = vmatpush2.bf16.msra.mxu1 %v7381_v61  ;;  %v7421_v61 = vld [vmem:[%s10252_s3 + $0x110] ss:$12 sps:$4 sm:$0xff]  }
  0x46   : > { %1592 = vmatprep.subr.bf16.mxu1 %v7385_v0  ;;  %v7424_v0 = vld [vmem:[%s10252_s3 + $0xf8] ss:$12 sps:$4 sm:$0xff]  }
  0x47   : > { %1622 = vmatpush1.bf16.msra.mxu0 %v7382_v62  ;;  %v7420_v62 = vld [vmem:[%s10252_s3 + $0x1e8] ss:$12 sps:$4 sm:$0xff]  }
  0x49   : > { %1593 = vmatpush2.bf16.msra.mxu1 %v7387_v1  ;;  %v7423_v1 = vld [vmem:[%s10252_s3 + $0x1d0] ss:$12 sps:$4 sm:$0xff]  }
  0x8d   : > { %v787_v54 = vpop.permute.xlu0 %786 }
  0x8e   : > { %v792_v57 = vsel %vm8270_vm5, %v787_v54, %v791_v50 }
  0x8f   : > { %793 = vst [vmem:[#allocation6] sm:$0x1] %v792_v57  ;;  %v849_v13 = vpop.permute.xlu1 %848  ;;  %v962_v57 = vshrl.u32 %v934_v55, 16 }
  0x91   : > { %v812_v5 = vpop.permute.xlu0 %811 }
  0x92   : > { %v813_v7 = vrot.slane %v812_v5, 7 }
  0x94   : > { %v815_v9 = vsel %vm814_vm13, %v813_v7, %v812_v5  ;;  %v7388_v5 = vld [vmem:[%s10252_s3 + $0x180] ss:$12 sps:$4 sm:$0xff]  }
  0x95   : > { %v7391_v7 = vld [vmem:[%s10252_s3 + $0xf4] ss:$12 sps:$4 sm:$0xff]  }
  0x96   : > { %v823_v4 = vld [vmem:[#allocation6] sm:$0x3]  ;;  %1594 = vmatprep.subr.bf16.mxu1 %v7391_v7  ;;  %v7426_v7 = vld [vmem:[%s10252_s3 + $0x1b8] ss:$12 sps:$4 sm:$0xff]  }
  0x97   : > { %v824_v10 = vsel %vm10275_vm11, %v815_v9, %v823_v4  ;;  %v7390_v4 = vld [vmem:[%s10252_s3 + $0x184] ss:$12 sps:$4 sm:$0xff]   ;;  %vm913_vm11 = vmor %vm8487_vm0, %vm8482_vm15  ;;  %vm3261_vm0 = vcmask 518146   ;;  %vm4383_vm15 = vcmask 523264  }
  0x98   : > { %825 = vst [vmem:[#allocation6] sm:$0x3] %v824_v10  ;;  %1623 = vmatprep.subr.bf16.mxu0 %v7390_v4  ;;  %v7393_v9 = vld [vmem:[%s10252_s3 + $0xf0] ss:$12 sps:$4 sm:$0xff]   ;;  %v7425_v4 = vld [vmem:[%s10252_s3 + $0x38] ss:$12 sps:$4 sm:$0xff]  }
  0x99   : > { %1624 = vmatpush1.bf16.msra.mxu0 %v7388_v5  ;;  %v7394_v10 = vld [vmem:[%s10252_s3 + $0x270] ss:$12 sps:$4 sm:$0xff]   ;;  %1595 = vmatpush2.bf16.msra.mxu1 %v7393_v9  ;;  %v7427_v5 = vld [vmem:[%s10252_s3 + $0xe0] ss:$12 sps:$4 sm:$0xff]  }
  0x9a   : > { %v7428_v9 = vld [vmem:[%s10252_s3 + $0x20] ss:$12 sps:$4 sm:$0xff]  }
  0x9f   : > { %v853_v14 = vld [vmem:[#allocation6 + $0x1] sm:$0x1] }
  0xa0   : > { %v854_v16 = vsel %vm8322_vm14, %v849_v13, %v853_v14  ;;  %v7399_v13 = vld [vmem:[%s10252_s3 + $0xd8] ss:$12 sps:$4 sm:$0xff]   ;;  %v7402_v14 = vld [vmem:[%s10252_s3 + $0x25c] ss:$12 sps:$4 sm:$0xff]  }
  0xa1   : > { %855 = vst [vmem:[#allocation6 + $0x1] sm:$0x1] %v854_v16  ;;  %v7403_v16 = vld [vmem:[%s10252_s3 + $0xc4] ss:$12 sps:$4 sm:$0xff]  }
  0xee   : > { %v7097_v11 = vpop.f32.mrf.mxu0 }
  0xf0   : > { %v7098_v15 = vpop.f32.mrf.mxu0 }
  0xf1   : > { %v7099_v18 = vadd.f32 %v7098_v15, %v7097_v11  ;;  %v7396_v11 = vld [vmem:[%s10252_s3 + $0x274] ss:$12 sps:$4 sm:$0xff]   ;;  %v7400_v15 = vld [vmem:[%s10252_s3 + $0x258] ss:$12 sps:$4 sm:$0xff]  }
  0xf2   : > { %v7100_v19 = vpop.f32.mrf.mxu0  ;;  %1635 = vmatprep.subr.bf16.mxu0 %v7396_v11  ;;  %v7429_v11 = vld [vmem:[%s10252_s3 + $0x1a0] ss:$12 sps:$4 sm:$0xff]  }
  0xf3   : > { %v735_v20 = vadd.f32 %v7099_v18, %v578_v12  ;;  %v7397_v12 = vld [vmem:[%s10252_s3 + $0xdc] ss:$12 sps:$4 sm:$0xff]   ;;  %1636 = vmatpush2.bf16.msra.mxu0 %v7394_v10  ;;  %v7405_v18 = vld [vmem:[%s10252_s3 + $0xc0] ss:$12 sps:$4 sm:$0xff]   ;;  %v7408_v19 = vld [vmem:[%s10252_s3 + $0x244] ss:$12 sps:$4 sm:$0xff]  }
  0xf4   : > { %v7101_v21 = vpop.f32.mrf.mxu0  ;;  %1596 = vmatprep.subr.bf16.mxu1 %v7397_v12  ;;  %1637 = vmatprep.subr.bf16.mxu0 %v7402_v14  ;;  %v7430_v10 = vld [vmem:[%s10252_s3 + $0xc8] ss:$12 sps:$4 sm:$0xff]  }
  0xf5   : > { %v740_v22 = vmax.f32 %v735_v20, 0.0  ;;  %1597 = vmatpush2.bf16.msra.mxu1 %v7399_v13  ;;  %v7406_v20 = vld [vmem:[%s10252_s3 + $0x240] ss:$12 sps:$4 sm:$0xff]   ;;  %v7409_v21 = vld [vmem:[%s10252_s3 + $0x170] ss:$12 sps:$4 sm:$0xff]  }
  0xf6   : > { %1598 = vmatprep.subr.bf16.mxu1 %v7403_v16  ;;  %v7431_v12 = vld [vmem:[%s10252_s3 + $0x8] ss:$12 sps:$4 sm:$0xff]   ;;  %v7436_v13 = vld [vmem:[%s10254_s5 + $0x78] sm:$0xff]  }
  0xf7   : > { %v7077_v25 = vpack.c.bf16 %v740_v22, %v740_v22  ;;  %1638 = vmatpush2.bf16.msra.mxu0 %v7400_v15  ;;  %v7432_v14 = vld [vmem:[%s10252_s3 + $0x188] ss:$12 sps:$4 sm:$0xff]   ;;  %v7437_v15 = vld [vmem:[%s10254_s5 + $0x38] sm:$0xff]  }
  0xf8   : > { %1639 = vmatprep.subr.bf16.mxu0 %v7408_v19  ;;  %v7438_v16 = vld [vmem:[%s10254_s5 + $0x70] sm:$0xff]  }
  0xf9   : > { %v753_v27 = vrot.slane %v7077_v25, 6  ;;  %1599 = vmatpush2.bf16.msra.mxu1 %v7405_v18  ;;  %v7433_v18 = vld [vmem:[%s10252_s3 + $0x278] ss:$12 sps:$4 sm:$0xff]   ;;  %v7439_v19 = vld [vmem:[%s10254_s5 + $0x30] sm:$0xff]  }
  0xfa   : > { %7103 = vmatprep.subr.bf16.mxu1 %v7409_v21  ;;  %v7434_v21 = vld [vmem:[%s10252_s3 + $0x260] ss:$12 sps:$4 sm:$0xff]  }
  0xfb   : > { %v759_v30 = vsel %vm8338_vm1, %v753_v27, %v758_v24  ;;  %1640 = vmatpush2.bf16.msra.mxu0 %v7406_v20  ;;  %v878_v24 = vld [vmem:[#allocation6 + $0x1] sm:$0x1]  ;;  %v7440_v20 = vld [vmem:[%s10254_s5 + $0x68] sm:$0xff]  }
  0xfc   : > { %760 = vst [vmem:[#allocation2] sm:$0x4] %v759_v30  ;;  %1690 = vmatprep.subr.bf16.mxu0 %v8066_v6 }
 0x103   : > { %v6491_v42 = vld.sshfl [vmem:[#allocation2] sm:$0x2 pattern:$0x75316420] }
 0x104   : > { %v871_v44 = vrot.slane %v6491_v42, %v8228_v23 }
 0x106   : > { %v872_v50 = vcombine.high %v871_v44, %v871_v44 }
 0x108   : > { %873 = vrot.lane.b32.xlu1 %v872_v50, %s10271_s24  ;;  %v899_v54 = vshrl.u32 %v872_v50, 16  ;;  %s10307_s24 = smov 112  }
 0x10a   : > { %903 = vrot.lane.b32.xlu0 %v899_v54, %s10269_s20  ;;  %v7413_v54 = vld [vmem:[%s10252_s3 + $0x98] ss:$12 sps:$4 sm:$0xff]   ;;  %s543_s20 = scalar_lea.vmem %s10266_s17, %s6467_s29 }
 0x10c   : > { %935 = vrot.lane.b32.xlu1 %v934_v55, %s10270_s0  ;;  %v7415_v55 = vld [vmem:[%s10252_s3 + $0x140] ss:$12 sps:$4 sm:$0xff]  }
 0x10e   : > { %966 = vrot.lane.b32.xlu0 %v962_v57, %s10273_s1  ;;  %v7416_v57 = vld [vmem:[%s10252_s3 + $0x80] ss:$12 sps:$4 sm:$0xff]  }
 0x17a   : > { %v874_v25 = vpop.permute.xlu1 %873 }
 0x17b   : > { %v879_v27 = vsel %vm8475_vm6, %v874_v25, %v878_v24  ;;  %v7441_v24 = vld [vmem:[%s10254_s5 + $0x28] sm:$0xff]   ;;  %v7442_v25 = vld [vmem:[%s10254_s5 + $0x60] sm:$0xff]  }
 0x17c   : > { %880 = vst [vmem:[#allocation6 + $0x1] sm:$0x1] %v879_v27  ;;  %v904_v28 = vpop.permute.xlu0 %903  ;;  %v7435_v27 = vld [vmem:[%s10252_s3 + $0x248] ss:$12 sps:$4 sm:$0xff]  }
 0x17d   : > { %v905_v31 = vrot.slane %v904_v28, 7 }
 0x17e   : > { %v936_v37 = vpop.permute.xlu1 %935 }
 0x17f   : > { %v907_v32 = vsel %vm10277_vm4, %v905_v31, %v904_v28  ;;  %vm8509_vm4 = vmand %vm969_vm8, %vm745_vm2  ;;  %vm1564_vm8 = vcmask 392192   ;;  %v7443_v28 = vld [vmem:[%s10254_s5 + $0x20] sm:$0xff]   ;;  %v7444_v31 = vld [vmem:[%s10254_s5 + $0x58] sm:$0xff]  }
 0x180   : > { %v967_v41 = vpop.permute.xlu0 %966 }
 0x183   : > { %v914_v33 = vld [vmem:[#allocation6 + $0x1] sm:$0x3] }
 0x184   : > { %v915_v34 = vsel %vm913_vm11, %v907_v32, %v914_v33  ;;  %v7445_v32 = vld [vmem:[%s10254_s5 + $0x18] sm:$0xff]   ;;  %v7446_v33 = vld [vmem:[%s10254_s5 + $0x50] sm:$0xff]  }
 0x185   : > { %916 = vst [vmem:[#allocation6 + $0x1] sm:$0x3] %v915_v34  ;;  %v7447_v34 = vld [vmem:[%s10254_s5 + $0x10] sm:$0xff]  }
 0x18c   : > { %v940_v38 = vld [vmem:[#allocation6 + $0x2] sm:$0x1] }
 0x18d   : > { %v941_v39 = vsel %vm8502_vm12, %v936_v37, %v940_v38  ;;  %v7448_v37 = vld [vmem:[%s10254_s5 + $0x48] sm:$0xff]  }
 0x18e   : > { %942 = vst [vmem:[#allocation6 + $0x2] sm:$0x1] %v941_v39  ;;  %v7449_v38 = vld [vmem:[%s10254_s5 + $0x8] sm:$0xff]   ;;  %v7450_v39 = vld [vmem:[%s10254_s5 + $0x40] sm:$0xff]  }
 0x195   : > { %v971_v42 = vld [vmem:[#allocation6 + $0x2] sm:$0x1] }
 0x196   : > { %v972_v43 = vsel %vm8509_vm4, %v967_v41, %v971_v42  ;;  %v7451_v41 = vld [vmem:[%s10254_s5] sm:$0xff]   ;;  %v7452_v42 = vld [vmem:[%s10254_s5 + $0xb8] sm:$0xff]  }
 0x197   : > { %973 = vst [vmem:[#allocation6 + $0x2] sm:$0x1] %v972_v43  ;;  %v8075_v43 = vmov 0.0  }
 0x19e   : > { %v6497_v44 = vld.sshfl [vmem:[#allocation6] sm:$0x33 pattern:$0x75316420] }
 0x19f   : > { %v1096_v45 = vcombine.high %v6497_v44, %v6497_v44  ;;  %v8516_v46 = vrot.slane %v6497_v44, %v8228_v23  ;;  %v7453_v44 = vld [vmem:[%s10254_s5 + $0xb0] sm:$0xff]  }
 0x1a1   : > { %v1110_v47 = vrot.slane %v1096_v45, %v8228_v23  ;;  %v8531_v53 = vcombine.high %v8516_v46, %v8516_v46  ;;  %v7454_v45 = vld [vmem:[%s10254_s5 + $0xa8] sm:$0xff]  }
 0x1a3   : > { %1600 = vmatprep.mubr.bf16.mxu1 %v1110_v47  ;;  %v1112_v50 = vcombine.high %v1110_v47, %v1110_v47 }
 0x1a4   : > { %1601 = vmatmul.mubr.bf16.vlgmr.msra.gmra.mxu1 %v8516_v46 }
 0x1a5   : > { %7104 = vmatpush3.bf16.msra.mxu1 %v7410_v49  ;;  %6579 = vmatprep.mubr.msk.bf16.mxu0 %vm1564_vm8, %v1112_v50  ;;  %v7457_v49 = vld [vmem:[%s10254_s5 + $0x90] sm:$0xff]  }
 0x1a6   : > { %1682 = vmatprep.mubr.bf16.mxu1 %v1110_v47  ;;  %1642 = vmatmul.mubr.bf16.vlgmr.msra.gmra.mxu0 %v8531_v53  ;;  %v7456_v47 = vld [vmem:[%s10254_s5 + $0x98] sm:$0xff]  }
 0x1a7   : > { %1691 = vmatpush1.bf16.msra.mxu0 %v7411_v51  ;;  %7105 = vmatprep.subr.bf16.mxu1 %v7412_v52  ;;  %v7459_v51 = vld [vmem:[%s10254_s5 + $0x80] sm:$0xff]   ;;  %v8700_v52 = vsub.s32 0, %v8219_v17 }
 0x1a8   : > { %6580 = vmatprep.mubr.msk.bf16.mxu0 %vm1564_vm8, %v1112_v50  ;;  %1692 = vmatprep.subr.bf16.mxu0 %v8066_v6  ;;  %v7458_v50 = vld [vmem:[%s10254_s5 + $0x88] sm:$0xff]  }
 0x1a9   : > { %7106 = vmatpush3.bf16.msra.mxu1 %v7413_v54  ;;  %v8706_v54 = vsub.s32 1, %v8219_v17 }
 0x1aa   : > { %7107 = vmatprep.subr.bf16.mxu1 %v7415_v55 }
 0x1ab   : > { %1693 = vmatpush1.bf16.msra.mxu0 %v7414_v56 }
 0x1ac   : > { %1694 = vmatprep.subr.bf16.mxu0 %v8066_v6 }
 0x1ad   : > { %7108 = vmatpush3.bf16.msra.mxu1 %v7416_v57 }
 0x1ae   : > { %7109 = vmatprep.subr.bf16.mxu1 %v7418_v58 }
 0x1af   : > { %1695 = vmatpush1.bf16.msra.mxu0 %v7417_v59 }
 0x1b0   : > { %1696 = vmatprep.subr.bf16.mxu0 %v8066_v6 }
 0x1b1   : > { %7110 = vmatpush3.bf16.msra.mxu1 %v7419_v60 }
 0x1b2   : > { %7111 = vmatprep.subr.bf16.mxu1 %v7421_v61 }
 0x1b3   : > { %1697 = vmatpush1.bf16.msra.mxu0 %v7420_v62 }
 0x1b4   : > { %1698 = vmatprep.subr.bf16.mxu0 %v8066_v6 }
 0x1b5   : > { %7112 = vmatpush3.bf16.msra.mxu1 %v7422_v63 }
 0x1b6   : > { %7113 = vmatprep.subr.bf16.mxu1 %v7424_v0 }
 0x1b7   : > { %1699 = vmatpush1.bf16.msra.mxu0 %v7423_v1 }
 0x1b8   : > { %1700 = vmatprep.subr.bf16.mxu0 %v8066_v6 }
 0x1b9   : > { %7114 = vmatpush3.bf16.msra.mxu1 %v7425_v4 }
 0x1ba   : > { %7115 = vmatprep.subr.bf16.mxu1 %v7427_v5 }
 0x1bb   : > { %1701 = vmatpush1.bf16.msra.mxu0 %v7426_v7 }
 0x1bc   : > { %1702 = vmatprep.subr.bf16.mxu0 %v8066_v6 }
 0x1bd   : > { %7116 = vmatpush3.bf16.msra.mxu1 %v7428_v9 }
 0x1be   : > { %7117 = vmatprep.subr.bf16.mxu1 %v7430_v10 }
 0x1bf   : > { %1703 = vmatpush1.bf16.msra.mxu0 %v7429_v11 }
 0x1c0   : > { %1704 = vmatprep.subr.bf16.mxu0 %v8066_v6 }
 0x1c1   : > { %7118 = vmatpush3.bf16.msra.mxu1 %v7431_v12 }
 0x1c2   : > { %7125 = vmatprep.subr.bf16.mxu1 %v7436_v13 }
 0x1c3   : > { %1705 = vmatpush1.bf16.msra.mxu0 %v7432_v14 }
 0x1c4   : > { %1683 = vmatmul.mubr.bf16.vlgmr.msra.gmra.mxu1 %v8516_v46  ;;  %1716 = vmatprep.subr.bf16.mxu0 %v8066_v6  ;;  %v7455_v46 = vld [vmem:[%s10254_s5 + $0xa0] sm:$0xff]  }
 0x1c5   : > { %7126 = vmatpush3.bf16.msra.mxu1 %v7437_v15 }
 0x1c6   : > { %7127 = vmatprep.subr.bf16.mxu1 %v7438_v16  ;;  %v8711_v16 = vsub.s32 2, %v8219_v17 }
 0x1c7   : > { %1717 = vmatpush2.bf16.msra.mxu0 %v7433_v18 }
 0x1c8   : > { %1718 = vmatprep.subr.bf16.mxu0 %v8066_v6 }
 0x1c9   : > { %7128 = vmatpush3.bf16.msra.mxu1 %v7439_v19 }
 0x1ca   : > { %7129 = vmatprep.subr.bf16.mxu1 %v7440_v20 }
 0x1cb   : > { %1719 = vmatpush2.bf16.msra.mxu0 %v7434_v21 }
 0x1cc   : > { %1720 = vmatprep.subr.bf16.mxu0 %v8066_v6 }
 0x1cd   : > { %7130 = vmatpush3.bf16.msra.mxu1 %v7441_v24 }
 0x1ce   : > { %7131 = vmatprep.subr.bf16.mxu1 %v7442_v25 }
 0x1cf   : > { %1721 = vmatpush2.bf16.msra.mxu0 %v7435_v27 }
 0x1d0   : > { %7253 = vmatprep.subr.bf16.mxu0 %v8075_v43 }
 0x1d1   : > { %7132 = vmatpush3.bf16.msra.mxu1 %v7443_v28 }
 0x1d2   : > { %1723 = vmatmul.mubr.bf16.vlgmr.msra.gmra.mxu0 %v8531_v53  ;;  %7133 = vmatprep.subr.bf16.mxu1 %v7444_v31  ;;  %v1087_v53 = vld [vmem:[%s10253_s4] sm:$0x7] }
 0x1d3   : > { %7254 = vmatpush3.bf16.msra.mxu0 %v7452_v42  ;;  %7269 = vmatprep.mubr.msk.bf16.mxu0 %vm8076_vm7, %v8075_v43  ;;  %v1552_v55 = vrot.slane %v1087_v53, %v8700_v52  ;;  %v1556_v56 = vrot.slane %v1087_v53, %v8706_v54  ;;  %v1560_v20 = vrot.slane %v1087_v53, %v8711_v16  ;;  %v7463_v53 = vld [vmem:[%s10256_s7 + $0x90] ss:$12 sps:$4 sm:$0xff]  }
 0x1d4   : > { %7255 = vmatprep.subr.bf16.mxu0 %v8075_v43 }
 0x1d5   : > { %7134 = vmatpush3.bf16.msra.mxu1 %v7445_v32 }
 0x1d6   : > { %7135 = vmatprep.subr.bf16.mxu1 %v7446_v33 }
 0x1d7   : > { %7256 = vmatpush3.bf16.msra.mxu0 %v7453_v44 }
 0x1d8   : > { %7257 = vmatprep.subr.bf16.mxu0 %v8075_v43 }
 0x1d9   : > { %7136 = vmatpush3.bf16.msra.mxu1 %v7447_v34  ;;  %v6606_v34 = vld.sshfl [vmem:[#allocation3] sm:$0x1 pattern:$0x75316420] }
 0x1da   : > { %7137 = vmatprep.subr.bf16.mxu1 %v7448_v37  ;;  %v2042_v37 = vrot.slane %v6606_v34, %v8228_v23 }
 0x1db   : > { %7258 = vmatpush3.bf16.msra.mxu0 %v7454_v45  ;;  %v2023_v45 = vld [vmem:[#allocation3] sm:$0x1] }
 0x1dc   : > { %7259 = vmatprep.subr.bf16.mxu0 %v8075_v43 }
 0x1dd   : > { %7138 = vmatpush3.bf16.msra.mxu1 %v7449_v38  ;;  %v6608_v38 = vld.sshfl [vmem:[#allocation3] sm:$0x10 pattern:$0x75316420] }
 0x1de   : > { %7139 = vmatprep.subr.bf16.mxu1 %v7450_v39  ;;  %v2063_v39 = vcombine.high %v6608_v38, %v6608_v38 }
 0x1df   : > { %7260 = vmatpush3.bf16.msra.mxu0 %v7455_v46  ;;  %v2024_v46 = vld [vmem:[#allocation7] sm:$0x1] }
 0x1e0   : > { %7261 = vmatprep.subr.bf16.mxu0 %v8075_v43  ;;  %v2070_v42 = vrot.slane %v2063_v39, %v8228_v23  ;;  %v7486_v39 = vld [vmem:[%s10256_s7 + $0x214] ss:$12 sps:$4 sm:$0xff]  }
 0x1e1   : > { %7140 = vmatpush3.bf16.msra.mxu1 %v7451_v41  ;;  %v2044_v41 = vshrl.u32 %v2042_v37, 16  ;;  %v7483_v37 = vld [vmem:[%s10256_s7 + $0x1c] ss:$12 sps:$4 sm:$0xff]  }
 0x1e2   : > { %2071 = vrot.lane.b32.xlu0 %v2070_v42, %s8069_s26  ;;  %v2097_v44 = vshrl.u32 %v2070_v42, 16  ;;  %v6614_v42 = vld.sshfl [vmem:[#allocation3] sm:$0x20 pattern:$0x75316420] }
 0x1e3   : > { %7262 = vmatpush3.bf16.msra.mxu0 %v7456_v47  ;;  %2048 = vrot.lane.b32.xlu1 %v2044_v41, %s8068_s23  ;;  %v7460_v47 = vld [vmem:[%s10256_s7 + $0xa8] ss:$12 sps:$4 sm:$0xff]   ;;  %v7484_v41 = vld [vmem:[%s10256_s7 + $0x210] ss:$12 sps:$4 sm:$0xff]   ;;  %s10308_s23 = smov 32  }
 0x1e4   : > { %7263 = vmatprep.subr.bf16.mxu0 %v8075_v43 }
 0x1e7   : > { %7264 = vmatpush3.bf16.msra.mxu0 %v7457_v49  ;;  %2101 = vrot.lane.b32.xlu1 %v2097_v44, %s8070_s27  ;;  %v2025_v49 = vsel %vm8244_vm3, %v2023_v45, %v2024_v46  ;;  %vm10305_vm3 = vmor %vm8313_vm10, %vm8308_vm9  ;;  %v7489_v44 = vld [vmem:[%s10256_s7 + $0x4] ss:$12 sps:$4 sm:$0xff]   ;;  %v7492_v45 = vld [vmem:[%s10256_s7 + $0x1fc] ss:$12 sps:$4 sm:$0xff]   ;;  %v2169_v46 = vcombine.high %v6614_v42, %v6614_v42  ;;  %vm3249_vm9 = vcmask 519168   ;;  %vm3251_vm10 = vcmask 516096  }
 0x1e8   : > { %7265 = vmatprep.subr.bf16.mxu0 %v8075_v43  ;;  %2026 = vst [vmem:[#allocation7] sm:$0x1] %v2025_v49  ;;  %v7495_v49 = vld [vmem:[%s10256_s7 + $0x16c] ss:$12 sps:$4 sm:$0xff]   ;;  %3250 = vst.msk [vmem:[#allocation4] sm:$0xf] %vm3249_vm9, %v8066_v6 }
 0x1e9   : > { %4980 = vst.msk [vmem:[#allocation5] sm:$0xf] %vm3249_vm9, %v8066_v6 }
 0x1eb   : > { %7266 = vmatpush3.bf16.msra.mxu0 %v7458_v50  ;;  %v7462_v50 = vld [vmem:[%s10256_s7 + $0xac] ss:$12 sps:$4 sm:$0xff]  }
 0x1ec   : > { %7267 = vmatprep.subr.bf16.mxu0 %v8075_v43  ;;  %2806 = vmatprep.subr.bf16.mxu1 %v7462_v50  ;;  %v7493_v50 = vld [vmem:[%s10256_s7 + $0x168] ss:$12 sps:$4 sm:$0xff]  }
 0x1ef   : > { %7268 = vmatpush3.bf16.msra.mxu0 %v7459_v51  ;;  %v7465_v51 = vld [vmem:[%s10256_s7 + $0x94] ss:$12 sps:$4 sm:$0xff]  }
 0x264   : > { %v1602_v57 = vpop.f32.mrf.mxu1 }
 0x265   : > { %v1603_v58 = vadd.f32 %v1602_v57, %v1552_v55  ;;  %v7478_v55 = vld [vmem:[%s10256_s7 + $0x228] ss:$12 sps:$4 sm:$0xff]   ;;  %v7466_v57 = vld [vmem:[%s10256_s7 + $0x78] ss:$12 sps:$4 sm:$0xff]  }
 0x266   : > { %v1604_v59 = vpop.f32.mrf.mxu1  ;;  %v1643_v60 = vpop.f32.mrf.mxu0 }
 0x267   : > { %v1605_v61 = vadd.f32 %v1604_v59, %v1556_v56  ;;  %v1644_v62 = vadd.f32 %v1643_v60, %v1603_v58  ;;  %v7480_v56 = vld [vmem:[%s10256_s7 + $0x22c] ss:$12 sps:$4 sm:$0xff]   ;;  %v7471_v58 = vld [vmem:[%s10256_s7 + $0x64] ss:$12 sps:$4 sm:$0xff]  }
 0x268   : > { %v1606_v63 = vpop.f32.mrf.mxu1  ;;  %v1645_v0 = vpop.f32.mrf.mxu0  ;;  %2847 = vmatprep.subr.bf16.mxu0 %v7480_v56  ;;  %v7469_v59 = vld [vmem:[%s10256_s7 + $0x60] ss:$12 sps:$4 sm:$0xff]  }
 0x269   : > { %v1646_v1 = vadd.f32 %v1645_v0, %v1605_v61  ;;  %v1730_v4 = vmax.f32 %v1644_v62, 0.0  ;;  %v7474_v60 = vld [vmem:[%s10256_s7 + $0x4c] ss:$12 sps:$4 sm:$0xff]   ;;  %v7472_v61 = vld [vmem:[%s10256_s7 + $0x48] ss:$12 sps:$4 sm:$0xff]  }
 0x26a   : > { %v1607_v5 = vpop.f32.mrf.mxu1  ;;  %v1647_v7 = vpop.f32.mrf.mxu0  ;;  %v7477_v62 = vld [vmem:[%s10256_s7 + $0x34] ss:$12 sps:$4 sm:$0xff]   ;;  %v7475_v63 = vld [vmem:[%s10256_s7 + $0x30] ss:$12 sps:$4 sm:$0xff]   ;;  %v2051_v0 = vld [vmem:[#allocation7] sm:$0x1] }
 0x26b   : > { %v1731_v9 = vmax.f32 %v1646_v1, 0.0  ;;  %v1733_v12 = vpack.c.bf16 %v1730_v4, %v1730_v4  ;;  %v2049_v1 = vpop.permute.xlu1 %2048  ;;  %v2072_v5 = vpop.permute.xlu0 %2071  ;;  %v7496_v56 = vld [vmem:[%s10256_s7 + $0x1e0] ss:$12 sps:$4 sm:$0xff]  }
 0x26c   : > { %v1648_v10 = vpop.f32.mrf.mxu0  ;;  %v2052_v4 = vsel %vm8270_vm5, %v2049_v1, %v2051_v0  ;;  %v7505_v1 = vld [vmem:[%s10256_s7 + $0x138] ss:$12 sps:$4 sm:$0xff]   ;;  %vm10310_vm5 = vcmask 916480  }
 0x26d   : > { %v1734_v11 = vpack.c.bf16 %v1731_v9, %v1731_v9  ;;  %2053 = vst [vmem:[#allocation7] sm:$0x1] %v2052_v4  ;;  %v2073_v9 = vrot.slane %v2072_v5, 7 }
 0x26f   : > { %1961 = vmatprep.mubr.bf16.mxu1 %v1734_v11 }
 0x270   : > { %1962 = vmatmul.mubr.bf16.vlgmr.msra.gmra.mxu1 %v1733_v12  ;;  %v2074_v12 = vsel %vm814_vm13, %v2073_v9, %v2072_v5  ;;  %v7510_v5 = vld [vmem:[%s10256_s7 + $0x1b4] ss:$12 sps:$4 sm:$0xff]   ;;  %v7513_v9 = vld [vmem:[%s10256_s7 + $0x124] ss:$12 sps:$4 sm:$0xff]   ;;  %vm3294_vm13 = vcmask 1040896  }
 0x271   : > { %2807 = vmatpush1.bf16.msra.mxu1 %v7460_v47  ;;  %v7490_v47 = vld [vmem:[%s10256_s7 + $0x1f8] ss:$12 sps:$4 sm:$0xff]  }
 0x272   : > { %2808 = vmatprep.subr.bf16.mxu1 %v7465_v51 }
 0x275   : > { %2809 = vmatpush1.bf16.msra.mxu1 %v7463_v53  ;;  %v7498_v53 = vld [vmem:[%s10256_s7 + $0x1e4] ss:$12 sps:$4 sm:$0xff]  }
 0x276   : > { %2810 = vmatprep.subr.bf16.mxu1 %v7468_v35 }
 0x279   : > { %2811 = vmatpush1.bf16.msra.mxu1 %v7466_v57  ;;  %v7499_v57 = vld [vmem:[%s10256_s7 + $0x150] ss:$12 sps:$4 sm:$0xff]  }
 0x27a   : > { %2812 = vmatprep.subr.bf16.mxu1 %v7471_v58  ;;  %v7501_v58 = vld [vmem:[%s10256_s7 + $0x154] ss:$12 sps:$4 sm:$0xff]  }
 0x27d   : > { %2813 = vmatpush1.bf16.msra.mxu1 %v7469_v59 }
 0x27e   : > { %2814 = vmatprep.subr.bf16.mxu1 %v7474_v60  ;;  %v7502_v60 = vld [vmem:[%s10256_s7 + $0x1c8] ss:$12 sps:$4 sm:$0xff]  }
 0x281   : > { %2815 = vmatpush1.bf16.msra.mxu1 %v7472_v61  ;;  %v7504_v61 = vld [vmem:[%s10256_s7 + $0x1cc] ss:$12 sps:$4 sm:$0xff]  }
 0x282   : > { %2816 = vmatprep.subr.bf16.mxu1 %v7477_v62  ;;  %v7507_v62 = vld [vmem:[%s10256_s7 + $0x13c] ss:$12 sps:$4 sm:$0xff]  }
 0x284   : > { %v7119_v13 = vpop.f32.mrf.mxu1 }
 0x285   : > { %2817 = vmatpush1.bf16.msra.mxu1 %v7475_v63 }
 0x286   : > { %v7120_v14 = vpop.f32.mrf.mxu1  ;;  %2818 = vmatprep.subr.bf16.mxu1 %v7483_v37 }
 0x287   : > { %v7121_v19 = vadd.f32 %v7120_v14, %v7119_v13  ;;  %v2076_v14 = vld [vmem:[#allocation7] sm:$0x3] }
 0x288   : > { %v7122_v15 = vpop.f32.mrf.mxu1 }
 0x289   : > { %v1685_v21 = vadd.f32 %v7121_v19, %v1560_v20  ;;  %v2077_v15 = vsel %vm10305_vm3, %v2074_v12, %v2076_v14  ;;  %v1784_v19 = vld [vmem:[%s10255_s6] sm:$0x1]  ;;  %v2102_v20 = vpop.permute.xlu1 %2101  ;;  %2819 = vmatpush1.bf16.msra.mxu1 %v7481_v8  ;;  %v7516_v12 = vld [vmem:[%s10256_s7 + $0x19c] ss:$12 sps:$4 sm:$0xff]  }
 0x28a   : > { %v7123_v18 = vpop.f32.mrf.mxu1  ;;  %2078 = vst [vmem:[#allocation7] sm:$0x3] %v2077_v15  ;;  %2820 = vmatprep.subr.bf16.mxu1 %v7489_v44  ;;  %v7517_v14 = vld [vmem:[%s10256_s7 + $0x108] ss:$12 sps:$4 sm:$0xff]   ;;  %v7522_v15 = vld [vmem:[%s10256_s7 + $0x184] ss:$12 sps:$4 sm:$0xff]  }
 0x28d   : > { %2821 = vmatpush1.bf16.msra.mxu1 %v7487_v26 }
 0x28e   : > { %2822 = vmatprep.subr.bf16.mxu1 %v7495_v49 }
 0x291   : > { %v2104_v48 = vld [vmem:[#allocation7 + $0x1] sm:$0x1]  ;;  %2823 = vmatpush2.bf16.msra.mxu1 %v7493_v50 }
 0x292   : > { %v1724_v24 = vpop.f32.mrf.mxu0  ;;  %2824 = vmatprep.subr.bf16.mxu1 %v7501_v58  ;;  %v7546_v58 = vld [vmem:[%s10256_s7 + $0x218] ss:$12 sps:$4 sm:$0xff]  }
 0x293   : > { %v1725_v25 = vadd.f32 %v1724_v24, %v1685_v21  ;;  %v2105_v21 = vsel %vm8322_vm14, %v2102_v20, %v2104_v48  ;;  %v7525_v48 = vld [vmem:[%s10256_s7 + $0xf4] ss:$12 sps:$4 sm:$0xff]   ;;  %v7526_v20 = vld [vmem:[%s10256_s7 + $0x270] ss:$12 sps:$4 sm:$0xff]   ;;  %vm9284_vm14 = vmand %vm3294_vm13, %vm745_vm2  ;;  %vm6402_vm13 = vsmask.f32 3328 }
 0x294   : > { %v1726_v27 = vpop.f32.mrf.mxu0  ;;  %2106 = vst [vmem:[#allocation7 + $0x1] sm:$0x1] %v2105_v21  ;;  %v7528_v21 = vld [vmem:[%s10256_s7 + $0x274] ss:$12 sps:$4 sm:$0xff]  }
 0x295   : > { %v1732_v28 = vmax.f32 %v1725_v25, 0.0  ;;  %2825 = vmatpush2.bf16.msra.mxu1 %v7499_v57  ;;  %v7547_v57 = vld [vmem:[%s10256_s7 + $0x140] ss:$12 sps:$4 sm:$0xff]  }
 0x296   : > { %v1727_v31 = vpop.f32.mrf.mxu0  ;;  %2826 = vmatprep.subr.bf16.mxu1 %v7507_v62  ;;  %v7551_v62 = vld [vmem:[%s10256_s7 + $0x68] ss:$12 sps:$4 sm:$0xff]  }
 0x297   : > { %v1735_v32 = vpack.c.bf16 %v1732_v28, %v1732_v28 }
 0x298   : > { %v1728_v33 = vpop.f32.mrf.mxu0 }
 0x299   : > { %7270 = vmatmul.mubr.bf16.vlgmr.msra.gmra.mxu0 %v1735_v32  ;;  %v2020_v32 = vld [vmem:[#allocation3] sm:$0x4]  ;;  %2827 = vmatpush2.bf16.msra.mxu1 %v7505_v1  ;;  %v7554_v1 = vld [vmem:[%s10256_s7 + $0x50] ss:$12 sps:$4 sm:$0xff]  }
 0x29a   : > { %2848 = vmatpush1.bf16.msra.mxu0 %v7478_v55  ;;  %v2176_v55 = vrot.slane %v2169_v46, %v8228_v23  ;;  %2828 = vmatprep.subr.bf16.mxu1 %v7513_v9  ;;  %v7559_v9 = vld [vmem:[%s10256_s7 + $0xe0] ss:$12 sps:$4 sm:$0xff]  }
 0x29b   : > { %2849 = vmatprep.subr.bf16.mxu0 %v7486_v39  ;;  %v2127_v37 = vld [vmem:[#allocation7 + $0x1] sm:$0x1] }
 0x29c   : > { %v2177_v0 = vcombine.high %v2176_v55, %v2176_v55 }
 0x29e   : > { %2850 = vmatpush1.bf16.msra.mxu0 %v7484_v41  ;;  %v2203_v4 = vshrl.u32 %v2177_v0, 16 }
 0x29f   : > { %2851 = vmatprep.subr.bf16.mxu0 %v7492_v45 }
 0x2a2   : > { %2852 = vmatpush1.bf16.msra.mxu0 %v7490_v47 }
 0x2a3   : > { %2853 = vmatprep.subr.bf16.mxu0 %v7498_v53  ;;  %v7542_v53 = vld [vmem:[%s10256_s7 + $0xb0] ss:$12 sps:$4 sm:$0xff]  }
 0x2a6   : > { %2854 = vmatpush1.bf16.msra.mxu0 %v7496_v56  ;;  %v7545_v56 = vld [vmem:[%s10256_s7 + $0x98] ss:$12 sps:$4 sm:$0xff]  }
 0x2a7   : > { %2855 = vmatprep.subr.bf16.mxu0 %v7504_v61  ;;  %v7549_v61 = vld [vmem:[%s10256_s7 + $0x200] ss:$12 sps:$4 sm:$0xff]  }
 0x2aa   : > { %2856 = vmatpush1.bf16.msra.mxu0 %v7502_v60  ;;  %v7550_v60 = vld [vmem:[%s10256_s7 + $0x128] ss:$12 sps:$4 sm:$0xff]  }
 0x2ab   : > { %2857 = vmatprep.subr.bf16.mxu0 %v7510_v5  ;;  %v7555_v5 = vld [vmem:[%s10256_s7 + $0x1d0] ss:$12 sps:$4 sm:$0xff]  }
 0x330   : > { %v7141_v7 = vpop.f32.mrf.mxu1 }
 0x332   : > { %v7142_v10 = vpop.f32.mrf.mxu1 }
 0x333   : > { %v7143_v18 = vadd.f32 %v7142_v10, %v7141_v7  ;;  %v7508_v7 = vld [vmem:[%s10256_s7 + $0x1b0] ss:$12 sps:$4 sm:$0xff]   ;;  %v7511_v10 = vld [vmem:[%s10256_s7 + $0x120] ss:$12 sps:$4 sm:$0xff]  }
 0x334   : > { %v7144_v11 = vpop.f32.mrf.mxu1  ;;  %2858 = vmatpush1.bf16.msra.mxu0 %v7508_v7  ;;  %2829 = vmatpush2.bf16.msra.mxu1 %v7511_v10  ;;  %v7557_v7 = vld [vmem:[%s10256_s7 + $0x38] ss:$12 sps:$4 sm:$0xff]  }
 0x335   : > { %v1964_v24 = vadd.f32 %v7143_v18, %v1784_v19  ;;  %v7514_v11 = vld [vmem:[%s10256_s7 + $0x198] ss:$12 sps:$4 sm:$0xff]   ;;  %2859 = vmatprep.subr.bf16.mxu0 %v7516_v12  ;;  %v7520_v18 = vld [vmem:[%s10256_s7 + $0x180] ss:$12 sps:$4 sm:$0xff]   ;;  %v7523_v19 = vld [vmem:[%s10256_s7 + $0xf0] ss:$12 sps:$4 sm:$0xff]  }
 0x336   : > { %v7145_v13 = vpop.f32.mrf.mxu1  ;;  %v7558_v10 = vld [vmem:[%s10256_s7 + $0x1b8] ss:$12 sps:$4 sm:$0xff]   ;;  %v7562_v12 = vld [vmem:[%s10256_s7 + $0xc8] ss:$12 sps:$4 sm:$0xff]  }
 0x337   : > { %v7519_v13 = vld [vmem:[%s10256_s7 + $0x10c] ss:$12 sps:$4 sm:$0xff]  }
 0x338   : > { %2830 = vmatprep.subr.bf16.mxu1 %v7519_v13  ;;  %2860 = vmatpush1.bf16.msra.mxu0 %v7514_v11  ;;  %v7560_v11 = vld [vmem:[%s10256_s7 + $0x20] ss:$12 sps:$4 sm:$0xff]  }
 0x339   : > { %2861 = vmatprep.subr.bf16.mxu0 %v7522_v15  ;;  %2831 = vmatpush2.bf16.msra.mxu1 %v7517_v14  ;;  %v7561_v13 = vld [vmem:[%s10256_s7 + $0x1a0] ss:$12 sps:$4 sm:$0xff]   ;;  %v7563_v14 = vld [vmem:[%s10256_s7 + $0x8] ss:$12 sps:$4 sm:$0xff]   ;;  %v7568_v15 = vld [vmem:[%s10258_s9 + $0x78] sm:$0xff]  }
 0x33a   : > { %2832 = vmatprep.subr.bf16.mxu1 %v7525_v48  ;;  %v7569_v48 = vld [vmem:[%s10258_s9 + $0x38] sm:$0xff]  }
 0x33c   : > { %2862 = vmatpush1.bf16.msra.mxu0 %v7520_v18  ;;  %v7564_v18 = vld [vmem:[%s10256_s7 + $0x188] ss:$12 sps:$4 sm:$0xff]  }
 0x33d   : > { %2833 = vmatpush2.bf16.msra.mxu1 %v7523_v19  ;;  %2873 = vmatprep.subr.bf16.mxu0 %v7528_v21  ;;  %v7570_v19 = vld [vmem:[%s10258_s9 + $0x70] sm:$0xff]  }
 0x33e   : > { %v7571_v21 = vld [vmem:[%s10258_s9 + $0x30] sm:$0xff]  }
 0x340   : > { %2874 = vmatpush2.bf16.msra.mxu0 %v7526_v20  ;;  %v7565_v20 = vld [vmem:[%s10256_s7 + $0x278] ss:$12 sps:$4 sm:$0xff]  }
 0x359   : > { %v2003_v25 = vpop.f32.mrf.mxu0 }
 0x35a   : > { %v2004_v27 = vadd.f32 %v2003_v25, %v1964_v24  ;;  %v7529_v24 = vld [vmem:[%s10256_s7 + $0xd8] ss:$12 sps:$4 sm:$0xff]   ;;  %v7531_v25 = vld [vmem:[%s10256_s7 + $0xdc] ss:$12 sps:$4 sm:$0xff]  }
 0x35b   : > { %v7271_v3 = vpop.f32.mrf.mxu0  ;;  %2834 = vmatprep.subr.bf16.mxu1 %v7531_v25  ;;  %v7566_v25 = vld [vmem:[%s10256_s7 + $0x260] ss:$12 sps:$4 sm:$0xff]  }
 0x35c   : > { %v2009_v28 = vmax.f32 %v2004_v27, 0.0  ;;  %v7534_v27 = vld [vmem:[%s10256_s7 + $0x25c] ss:$12 sps:$4 sm:$0xff]   ;;  %v7537_v3 = vld [vmem:[%s10256_s7 + $0xc4] ss:$12 sps:$4 sm:$0xff]   ;;  %2835 = vmatpush2.bf16.msra.mxu1 %v7529_v24 }
 0x35d   : > { %v2006_v2 = vpop.f32.mrf.mxu0  ;;  %2875 = vmatprep.subr.bf16.mxu0 %v7534_v27  ;;  %2836 = vmatprep.subr.bf16.mxu1 %v7537_v3  ;;  %v7572_v24 = vld [vmem:[%s10258_s9 + $0x68] sm:$0xff]   ;;  %v7574_v3 = vld [vmem:[%s10258_s9 + $0x60] sm:$0xff]  }
 0x35e   : > { %v7078_v31 = vpack.c.bf16 %v2009_v28, %v2009_v28  ;;  %v7532_v28 = vld [vmem:[%s10256_s7 + $0x258] ss:$12 sps:$4 sm:$0xff]   ;;  %v7573_v27 = vld [vmem:[%s10258_s9 + $0x28] sm:$0xff]  }
 0x35f   : > { %v7272_v33 = vpop.f32.mrf.mxu0  ;;  %v7540_v2 = vld [vmem:[%s10256_s7 + $0x244] ss:$12 sps:$4 sm:$0xff]   ;;  %2876 = vmatpush2.bf16.msra.mxu0 %v7532_v28  ;;  %v7567_v28 = vld [vmem:[%s10256_s7 + $0x248] ss:$12 sps:$4 sm:$0xff]  }
 0x360   : > { %v2018_v34 = vrot.slane %v7078_v31, 6  ;;  %v7535_v31 = vld [vmem:[%s10256_s7 + $0xc0] ss:$12 sps:$4 sm:$0xff]   ;;  %2877 = vmatprep.subr.bf16.mxu0 %v7540_v2  ;;  %v7541_v33 = vld [vmem:[%s10256_s7 + $0x170] ss:$12 sps:$4 sm:$0xff]  }
 0x361   : > { %2837 = vmatpush2.bf16.msra.mxu1 %v7535_v31  ;;  %v7575_v2 = vld [vmem:[%s10258_s9 + $0x20] sm:$0xff]   ;;  %v7576_v31 = vld [vmem:[%s10258_s9 + $0x58] sm:$0xff]  }
 0x362   : > { %v2021_v38 = vsel %vm8338_vm1, %v2018_v34, %v2020_v32  ;;  %v7538_v32 = vld [vmem:[%s10256_s7 + $0x240] ss:$12 sps:$4 sm:$0xff]   ;;  %7156 = vmatprep.subr.bf16.mxu1 %v7541_v33  ;;  %v7578_v33 = vld [vmem:[%s10258_s9 + $0x50] sm:$0xff]   ;;  %vm10315_vm1 = vsmask.f32 2304 }
 0x363   : > { %2022 = vst [vmem:[#allocation3] sm:$0x4] %v2021_v38  ;;  %2878 = vmatpush2.bf16.msra.mxu0 %v7538_v32  ;;  %v7577_v32 = vld [vmem:[%s10258_s9 + $0x18] sm:$0xff]   ;;  %vm10323_vm9 = vmmov %vm10315_vm1 }
 0x364   : > { %2928 = vmatprep.subr.bf16.mxu0 %v8066_v6 }
 0x36a   : > { %v6611_v51 = vld.sshfl [vmem:[#allocation3] sm:$0x2 pattern:$0x75316420] }
 0x36b   : > { %v2122_v35 = vrot.slane %v6611_v51, %v8228_v23 }
 0x36d   : > { %v2123_v59 = vcombine.high %v2122_v35, %v2122_v35  ;;  %v7543_v35 = vld [vmem:[%s10256_s7 + $0x230] ss:$12 sps:$4 sm:$0xff]  }
 0x36f   : > { %2124 = vrot.lane.b32.xlu0 %v2123_v59, %s10306_s21  ;;  %v2148_v63 = vshrl.u32 %v2123_v59, 16  ;;  %v7548_v59 = vld [vmem:[%s10256_s7 + $0x80] ss:$12 sps:$4 sm:$0xff]  }
 0x371   : > { %2152 = vrot.lane.b32.xlu1 %v2148_v63, %s10307_s24  ;;  %v7553_v63 = vld [vmem:[%s10256_s7 + $0x110] ss:$12 sps:$4 sm:$0xff]  }
 0x373   : > { %2178 = vrot.lane.b32.xlu0 %v2177_v0, %s10308_s23  ;;  %v7552_v0 = vld [vmem:[%s10256_s7 + $0x1e8] ss:$12 sps:$4 sm:$0xff]  }
 0x375   : > { %2207 = vrot.lane.b32.xlu1 %v2203_v4, %s10309_s19  ;;  %v7556_v4 = vld [vmem:[%s10256_s7 + $0xf8] ss:$12 sps:$4 sm:$0xff]  }
 0x3e1   : > { %v2125_v34 = vpop.permute.xlu0 %2124 }
 0x3e2   : > { %v2128_v8 = vsel %vm8475_vm6, %v2125_v34, %v2127_v37  ;;  %v7579_v34 = vld [vmem:[%s10258_s9 + $0x10] sm:$0xff]   ;;  %v7580_v37 = vld [vmem:[%s10258_s9 + $0x48] sm:$0xff]   ;;  %vm9298_vm6 = vmand %vm3261_vm0, %vm10315_vm1 }
 0x3e3   : > { %2129 = vst [vmem:[#allocation7 + $0x1] sm:$0x1] %v2128_v8  ;;  %v2153_v38 = vpop.permute.xlu1 %2152  ;;  %v7581_v8 = vld [vmem:[%s10258_s9 + $0x8] sm:$0xff]  }
 0x3e4   : > { %v2154_v39 = vrot.slane %v2153_v38, 7 }
 0x3e5   : > { %v2179_v26 = vpop.permute.xlu0 %2178 }
 0x3e6   : > { %v2155_v42 = vsel %vm10310_vm5, %v2154_v39, %v2153_v38  ;;  %v7582_v38 = vld [vmem:[%s10258_s9 + $0x40] sm:$0xff]   ;;  %vm6398_vm5 = vcmask 1042434  }
 0x3e7   : > { %v2208_v22 = vpop.permute.xlu1 %2207  ;;  %v7583_v39 = vld [vmem:[%s10258_s9] sm:$0xff]  }
 0x3ea   : > { %v2157_v41 = vld [vmem:[#allocation7 + $0x1] sm:$0x3] }
 0x3eb   : > { %v2158_v44 = vsel %vm913_vm11, %v2155_v42, %v2157_v41  ;;  %v7584_v41 = vld [vmem:[%s10258_s9 + $0xb8] sm:$0xff]   ;;  %v7585_v42 = vld [vmem:[%s10258_s9 + $0xb0] sm:$0xff]   ;;  %vm9179_vm11 = vmand %vm3251_vm10, %vm745_vm2 }
 0x3ec   : > { %2159 = vst [vmem:[#allocation7 + $0x1] sm:$0x3] %v2158_v44  ;;  %v7586_v44 = vld [vmem:[%s10258_s9 + $0xa8] sm:$0xff]   ;;  %vm6399_vm10 = vmand %vm6398_vm5, %vm10323_vm9 }
 0x3f3   : > { %v2181_v45 = vld [vmem:[#allocation7 + $0x2] sm:$0x1] }
 0x3f4   : > { %v2182_v46 = vsel %vm8502_vm12, %v2179_v26, %v2181_v45  ;;  %v7587_v26 = vld [vmem:[%s10258_s9 + $0xa0] sm:$0xff]   ;;  %v7588_v45 = vld [vmem:[%s10258_s9 + $0x98] sm:$0xff]   ;;  %vm6395_vm12 = vcmask 1041409  }
 0x3f5   : > { %2183 = vst [vmem:[#allocation7 + $0x2] sm:$0x1] %v2182_v46  ;;  %v7589_v46 = vld [vmem:[%s10258_s9 + $0x90] sm:$0xff]  }
 0x3fc   : > { %v2210_v47 = vld [vmem:[#allocation7 + $0x2] sm:$0x1] }
 0x3fd   : > { %v2211_v49 = vsel %vm8509_vm4, %v2208_v22, %v2210_v47  ;;  %v7590_v22 = vld [vmem:[%s10258_s9 + $0x88] sm:$0xff]   ;;  %v7591_v47 = vld [vmem:[%s10258_s9 + $0x80] sm:$0xff]   ;;  %vm6393_vm4 = vcmask 1040384  }
 0x3fe   : > { %2212 = vst [vmem:[#allocation7 + $0x2] sm:$0x1] %v2211_v49  ;;  %v2326_v49 = vld [vmem:[%s10257_s8] sm:$0x7] }
 0x405   : > { %v6617_v50 = vld.sshfl [vmem:[#allocation7] sm:$0x33 pattern:$0x75316420] }
 0x406   : > { %v2335_v51 = vcombine.high %v6617_v50, %v6617_v50  ;;  %v8921_v30 = vrot.slane %v6617_v50, %v8228_v23  ;;  %v2791_v50 = vrot.slane %v2326_v49, %v8700_v52 }
 0x408   : > { %v2349_v29 = vrot.slane %v2335_v51, %v8228_v23  ;;  %v8936_v55 = vcombine.high %v8921_v30, %v8921_v30  ;;  %v2795_v51 = vrot.slane %v2326_v49, %v8706_v54 }
 0x40a   : > { %2838 = vmatprep.mubr.bf16.mxu1 %v2349_v29  ;;  %v2351_v36 = vcombine.high %v2349_v29, %v2349_v29 }
 0x40b   : > { %2839 = vmatmul.mubr.bf16.vlgmr.msra.gmra.mxu1 %v8921_v30 }
 0x40c   : > { %7157 = vmatpush3.bf16.msra.mxu1 %v7542_v53  ;;  %6699 = vmatprep.mubr.msk.bf16.mxu0 %vm1564_vm8, %v2351_v36 }
 0x40d   : > { %2920 = vmatprep.mubr.bf16.mxu1 %v2349_v29  ;;  %2880 = vmatmul.mubr.bf16.vlgmr.msra.gmra.mxu0 %v8936_v55 }
 0x40e   : > { %2929 = vmatpush1.bf16.msra.mxu0 %v7543_v35  ;;  %7158 = vmatprep.subr.bf16.mxu1 %v7544_v40 }
 0x40f   : > { %6700 = vmatprep.mubr.msk.bf16.mxu0 %vm1564_vm8, %v2351_v36  ;;  %2930 = vmatprep.subr.bf16.mxu0 %v8066_v6  ;;  %vm10225_vm8 = vmand %vm6393_vm4, %vm745_vm2 }
 0x410   : > { %7159 = vmatpush3.bf16.msra.mxu1 %v7545_v56 }
 0x411   : > { %7160 = vmatprep.subr.bf16.mxu1 %v7547_v57 }
 0x412   : > { %2931 = vmatpush1.bf16.msra.mxu0 %v7546_v58 }
 0x413   : > { %2932 = vmatprep.subr.bf16.mxu0 %v8066_v6 }
 0x414   : > { %7161 = vmatpush3.bf16.msra.mxu1 %v7548_v59 }
 0x415   : > { %7162 = vmatprep.subr.bf16.mxu1 %v7550_v60 }
 0x416   : > { %2933 = vmatpush1.bf16.msra.mxu0 %v7549_v61 }
 0x417   : > { %2934 = vmatprep.subr.bf16.mxu0 %v8066_v6 }
 0x418   : > { %7163 = vmatpush3.bf16.msra.mxu1 %v7551_v62 }
 0x419   : > { %7164 = vmatprep.subr.bf16.mxu1 %v7553_v63 }
 0x41a   : > { %2935 = vmatpush1.bf16.msra.mxu0 %v7552_v0 }
 0x41b   : > { %2936 = vmatprep.subr.bf16.mxu0 %v8066_v6 }
 0x41c   : > { %7165 = vmatpush3.bf16.msra.mxu1 %v7554_v1 }
 0x41d   : > { %7166 = vmatprep.subr.bf16.mxu1 %v7556_v4 }
 0x41e   : > { %2937 = vmatpush1.bf16.msra.mxu0 %v7555_v5 }
 0x41f   : > { %2938 = vmatprep.subr.bf16.mxu0 %v8066_v6 }
 0x420   : > { %7167 = vmatpush3.bf16.msra.mxu1 %v7557_v7 }
 0x421   : > { %7168 = vmatprep.subr.bf16.mxu1 %v7559_v9  ;;  %v2799_v9 = vrot.slane %v2326_v49, %v8711_v16  ;;  %v7615_v49 = vld [vmem:[%s10260_s11 + $0x284] ss:$16 sps:$4 sm:$0xff]  }
 0x422   : > { %2939 = vmatpush1.bf16.msra.mxu0 %v7558_v10 }
 0x423   : > { %2940 = vmatprep.subr.bf16.mxu0 %v8066_v6 }
 0x424   : > { %7169 = vmatpush3.bf16.msra.mxu1 %v7560_v11 }
 0x425   : > { %7170 = vmatprep.subr.bf16.mxu1 %v7562_v12 }
 0x426   : > { %2941 = vmatpush1.bf16.msra.mxu0 %v7561_v13 }
 0x427   : > { %2942 = vmatprep.subr.bf16.mxu0 %v8066_v6 }
 0x428   : > { %7171 = vmatpush3.bf16.msra.mxu1 %v7563_v14 }
 0x429   : > { %7178 = vmatprep.subr.bf16.mxu1 %v7568_v15 }
 0x42a   : > { %2943 = vmatpush1.bf16.msra.mxu0 %v7564_v18 }
 0x42b   : > { %2921 = vmatmul.mubr.bf16.vlgmr.msra.gmra.mxu1 %v8921_v30  ;;  %2954 = vmatprep.subr.bf16.mxu0 %v8066_v6 }
 0x42c   : > { %7179 = vmatpush3.bf16.msra.mxu1 %v7569_v48 }
 0x42d   : > { %7180 = vmatprep.subr.bf16.mxu1 %v7570_v19  ;;  %v6729_v19 = vld.sshfl [vmem:[#allocation4] sm:$0x10 pattern:$0x75316420] }
 0x42e   : > { %2955 = vmatpush2.bf16.msra.mxu0 %v7565_v20  ;;  %v3329_v20 = vcombine.high %v6729_v19, %v6729_v19  ;;  %v7654_v19 = vld [vmem:[%s10260_s11 + $0x1a4] ss:$16 sps:$4 sm:$0xff]  }
 0x42f   : > { %2956 = vmatprep.subr.bf16.mxu0 %v8066_v6 }
 0x430   : > { %7181 = vmatpush3.bf16.msra.mxu1 %v7571_v21  ;;  %v6726_v21 = vld.sshfl [vmem:[#allocation4] sm:$0x1 pattern:$0x75316420] }
 0x431   : > { %7182 = vmatprep.subr.bf16.mxu1 %v7572_v24  ;;  %v3285_v24 = vrot.slane %v6726_v21, %v8228_v23  ;;  %v7652_v21 = vld [vmem:[%s10260_s11 + $0x1a0] ss:$16 sps:$4 sm:$0xff]  }
 0x432   : > { %2957 = vmatpush2.bf16.msra.mxu0 %v7566_v25  ;;  %v6735_v25 = vld.sshfl [vmem:[#allocation4] sm:$0x20 pattern:$0x75316420] }
 0x433   : > { %2958 = vmatprep.subr.bf16.mxu0 %v8066_v6 }
 0x434   : > { %7183 = vmatpush3.bf16.msra.mxu1 %v7573_v27  ;;  %v3336_v27 = vrot.slane %v3329_v20, %v8228_v23  ;;  %v7657_v20 = vld [vmem:[%s10260_s11 + $0x3a4] ss:$16 sps:$4 sm:$0xff]  }
 0x435   : > { %7184 = vmatprep.subr.bf16.mxu1 %v7574_v3  ;;  %v3428_v3 = vcombine.high %v6735_v25, %v6735_v25  ;;  %v7660_v25 = vld [vmem:[%s10260_s11 + $0x184] ss:$16 sps:$4 sm:$0xff]  }
 0x436   : > { %2959 = vmatpush2.bf16.msra.mxu0 %v7567_v28  ;;  %v3287_v28 = vshrl.u32 %v3285_v24, 16  ;;  %v7655_v24 = vld [vmem:[%s10260_s11 + $0x3a0] ss:$16 sps:$4 sm:$0xff]  }
 0x437   : > { %7273 = vmatprep.subr.bf16.mxu0 %v8075_v43 }
 0x438   : > { %7185 = vmatpush3.bf16.msra.mxu1 %v7575_v2  ;;  %v3338_v2 = vshrl.u32 %v3336_v27, 16  ;;  %3291 = vrot.lane.b32.xlu0 %v3287_v28, %s10306_s21  ;;  %v7661_v28 = vld [vmem:[%s10260_s11 + $0x380] ss:$16 sps:$4 sm:$0xff]  }
 0x439   : > { %2961 = vmatmul.mubr.bf16.vlgmr.msra.gmra.mxu0 %v8936_v55  ;;  %7186 = vmatprep.subr.bf16.mxu1 %v7576_v31  ;;  %v3435_v31 = vrot.slane %v3428_v3, %v8228_v23  ;;  %v7658_v3 = vld [vmem:[%s10260_s11 + $0x180] ss:$16 sps:$4 sm:$0xff]  }
 0x43a   : > { %7289 = vmatprep.mubr.msk.bf16.mxu0 %vm8076_vm7, %v8075_v43  ;;  %7274 = vmatpush3.bf16.msra.mxu0 %v7584_v41  ;;  %v7603_v41 = vld [vmem:[%s10260_s11 + $0x2c4] ss:$16 sps:$4 sm:$0xff]   ;;  %vm10320_vm7 = vsmask.f32 1280 }
 0x43b   : > { %7275 = vmatprep.subr.bf16.mxu0 %v8075_v43  ;;  %3342 = vrot.lane.b32.xlu1 %v3338_v2, %s10306_s21  ;;  %v7666_v2 = vld [vmem:[%s10260_s11 + $0x164] ss:$16 sps:$4 sm:$0xff]   ;;  %vm10230_vm3 = vmand %vm6395_vm12, %vm10320_vm7 }
 0x43c   : > { %7187 = vmatpush3.bf16.msra.mxu1 %v7577_v32  ;;  %v9117_v32 = vcombine.high %v3435_v31, %v3435_v31  ;;  %v7664_v31 = vld [vmem:[%s10260_s11 + $0x160] ss:$16 sps:$4 sm:$0xff]   ;;  %vm6397_vm2 = vmor %vm10230_vm3, %vm10225_vm8 }
 0x43d   : > { %7188 = vmatprep.subr.bf16.mxu1 %v7578_v33 }
 0x43e   : > { %7276 = vmatpush3.bf16.msra.mxu0 %v7585_v42  ;;  %v3438_v33 = vshrl.u32 %v9117_v32, 16  ;;  %v7598_v42 = vld [vmem:[%s10260_s11 + $0xc0] ss:$16 sps:$4 sm:$0xff]  }
 0x43f   : > { %7277 = vmatprep.subr.bf16.mxu0 %v8075_v43 }
 0x440   : > { %7189 = vmatpush3.bf16.msra.mxu1 %v7579_v34  ;;  %3442 = vrot.lane.b32.xlu1 %v3438_v33, %s10306_s21  ;;  %v7592_v34 = vld [vmem:[%s10260_s11 + $0xe0] ss:$16 sps:$4 sm:$0xff]  }
 0x441   : > { %7190 = vmatprep.subr.bf16.mxu1 %v7580_v37  ;;  %v7594_v37 = vld [vmem:[%s10260_s11 + $0xe4] ss:$16 sps:$4 sm:$0xff]  }
 0x442   : > { %7278 = vmatpush3.bf16.msra.mxu0 %v7586_v44  ;;  %v7601_v44 = vld [vmem:[%s10260_s11 + $0x2c0] ss:$16 sps:$4 sm:$0xff]  }
 0x443   : > { %7279 = vmatprep.subr.bf16.mxu0 %v8075_v43 }
 0x444   : > { %7191 = vmatpush3.bf16.msra.mxu1 %v7581_v8  ;;  %v7595_v8 = vld [vmem:[%s10260_s11 + $0x2e0] ss:$16 sps:$4 sm:$0xff]  }
 0x445   : > { %7192 = vmatprep.subr.bf16.mxu1 %v7582_v38  ;;  %v7597_v38 = vld [vmem:[%s10260_s11 + $0x2e4] ss:$16 sps:$4 sm:$0xff]  }
 0x446   : > { %7280 = vmatpush3.bf16.msra.mxu0 %v7587_v26  ;;  %v7606_v26 = vld [vmem:[%s10260_s11 + $0xa4] ss:$16 sps:$4 sm:$0xff]  }
 0x447   : > { %7281 = vmatprep.subr.bf16.mxu0 %v8075_v43 }
 0x448   : > { %7193 = vmatpush3.bf16.msra.mxu1 %v7583_v39  ;;  %v7600_v39 = vld [vmem:[%s10260_s11 + $0xc4] ss:$16 sps:$4 sm:$0xff]  }
 0x449   : > { %4387 = vmatprep.subr.bf16.mxu1 %v7594_v37 }
 0x44a   : > { %7282 = vmatpush3.bf16.msra.mxu0 %v7588_v45  ;;  %v7609_v45 = vld [vmem:[%s10260_s11 + $0x2a4] ss:$16 sps:$4 sm:$0xff]  }
 0x44b   : > { %7283 = vmatprep.subr.bf16.mxu0 %v8075_v43 }
 0x44e   : > { %7284 = vmatpush3.bf16.msra.mxu0 %v7589_v46  ;;  %v7604_v46 = vld [vmem:[%s10260_s11 + $0xa0] ss:$16 sps:$4 sm:$0xff]  }
 0x44f   : > { %7285 = vmatprep.subr.bf16.mxu0 %v8075_v43 }
 0x452   : > { %7286 = vmatpush3.bf16.msra.mxu0 %v7590_v22  ;;  %v7607_v22 = vld [vmem:[%s10260_s11 + $0x2a0] ss:$16 sps:$4 sm:$0xff]  }
 0x453   : > { %7287 = vmatprep.subr.bf16.mxu0 %v8075_v43 }
 0x456   : > { %7288 = vmatpush3.bf16.msra.mxu0 %v7591_v47  ;;  %v7612_v47 = vld [vmem:[%s10260_s11 + $0x84] ss:$16 sps:$4 sm:$0xff]  }
 0x457   : > { %4428 = vmatprep.subr.bf16.mxu0 %v7597_v38 }
 0x4cb   : > { %v2840_v30 = vpop.f32.mrf.mxu1 }
 0x4cc   : > { %v2841_v29 = vadd.f32 %v2840_v30, %v2791_v50  ;;  %v7610_v50 = vld [vmem:[%s10260_s11 + $0x80] ss:$16 sps:$4 sm:$0xff]   ;;  %v7618_v30 = vld [vmem:[%s10260_s11 + $0x64] ss:$16 sps:$4 sm:$0xff]  }
 0x4cd   : > { %v2842_v53 = vpop.f32.mrf.mxu1  ;;  %v2881_v36 = vpop.f32.mrf.mxu0 }
 0x4ce   : > { %v2843_v35 = vadd.f32 %v2842_v53, %v2795_v51  ;;  %v2882_v40 = vadd.f32 %v2881_v36, %v2841_v29  ;;  %v7613_v51 = vld [vmem:[%s10260_s11 + $0x280] ss:$16 sps:$4 sm:$0xff]   ;;  %v7621_v29 = vld [vmem:[%s10260_s11 + $0x264] ss:$16 sps:$4 sm:$0xff]  }
 0x4cf   : > { %v2844_v43 = vpop.f32.mrf.mxu1  ;;  %v2883_v55 = vpop.f32.mrf.mxu0  ;;  %v3266_v53 = vld [vmem:[#allocation4] sm:$0x1] }
 0x4d0   : > { %v2884_v56 = vadd.f32 %v2883_v55, %v2843_v35  ;;  %v2968_v57 = vmax.f32 %v2882_v40, 0.0  ;;  %v7616_v36 = vld [vmem:[%s10260_s11 + $0x60] ss:$16 sps:$4 sm:$0xff]   ;;  %v3267_v40 = vld [vmem:[#allocation8] sm:$0x1] }
 0x4d1   : > { %v2845_v58 = vpop.f32.mrf.mxu1  ;;  %v2885_v59 = vpop.f32.mrf.mxu0  ;;  %v7619_v43 = vld [vmem:[%s10260_s11 + $0x260] ss:$16 sps:$4 sm:$0xff]   ;;  %v7624_v55 = vld [vmem:[%s10260_s11 + $0x44] ss:$16 sps:$4 sm:$0xff]  }
 0x4d2   : > { %v2969_v60 = vmax.f32 %v2884_v56, 0.0  ;;  %v2971_v63 = vpack.c.bf16 %v2968_v57, %v2968_v57  ;;  %v3268_v56 = vsel %vm9179_vm11, %v3266_v53, %v3267_v40  ;;  %v3317_v57 = vld [vmem:[#allocation8 + $0x1] sm:$0x1]  ;;  %v7627_v58 = vld [vmem:[%s10260_s11 + $0x244] ss:$16 sps:$4 sm:$0xff]  }
 0x4d3   : > { %v2886_v61 = vpop.f32.mrf.mxu0  ;;  %3269 = vst [vmem:[#allocation8] sm:$0x1] %v3268_v56  ;;  %v3318_v59 = vsel %vm9179_vm11, %v3336_v27, %v3317_v57  ;;  %v7663_v27 = vld [vmem:[%s10260_s11 + $0x384] ss:$16 sps:$4 sm:$0xff]   ;;  %v3263_v56 = vld [vmem:[#allocation4] sm:$0x4] }
 0x4d4   : > { %v2972_v62 = vpack.c.bf16 %v2969_v60, %v2969_v60  ;;  %3319 = vst [vmem:[#allocation8 + $0x1] sm:$0x1] %v3318_v59  ;;  %v7622_v60 = vld [vmem:[%s10260_s11 + $0x40] ss:$16 sps:$4 sm:$0xff]  }
 0x4d5   : > { %v7625_v61 = vld [vmem:[%s10260_s11 + $0x240] ss:$16 sps:$4 sm:$0xff]  }
 0x4d6   : > { %3199 = vmatprep.mubr.bf16.mxu1 %v2972_v62  ;;  %v7630_v62 = vld [vmem:[%s10260_s11 + $0x24] ss:$16 sps:$4 sm:$0xff]  }
 0x4d7   : > { %3200 = vmatmul.mubr.bf16.vlgmr.msra.gmra.mxu1 %v2971_v63  ;;  %v7633_v63 = vld [vmem:[%s10260_s11 + $0x224] ss:$16 sps:$4 sm:$0xff]  }
 0x4d8   : > { %4388 = vmatpush1.bf16.msra.mxu1 %v7592_v34 }
 0x4d9   : > { %4389 = vmatprep.subr.bf16.mxu1 %v7600_v39  ;;  %v3022_v39 = vld [vmem:[%s10259_s10] sm:$0x1] }
 0x4dc   : > { %4390 = vmatpush1.bf16.msra.mxu1 %v7598_v42 }
 0x4dd   : > { %4391 = vmatprep.subr.bf16.mxu1 %v7606_v26  ;;  %v3296_v26 = vld [vmem:[#allocation8] sm:$0x1] }
 0x4e0   : > { %4392 = vmatpush1.bf16.msra.mxu1 %v7604_v46  ;;  %v3345_v46 = vld [vmem:[#allocation8 + $0x1] sm:$0x1] }
 0x4e1   : > { %4393 = vmatprep.subr.bf16.mxu1 %v7612_v47  ;;  %v3253_v47 = vld [vmem:[#allocation4 + $0x4] sm:$0x1] }
 0x4e4   : > { %4394 = vmatpush1.bf16.msra.mxu1 %v7610_v50  ;;  %v3292_v50 = vpop.permute.xlu0 %3291 }
 0x4e5   : > { %4395 = vmatprep.subr.bf16.mxu1 %v7618_v30  ;;  %v3254_v30 = vsel %vm9179_vm11, 0, %v3253_v47  ;;  %v3297_v53 = vsel %vm9284_vm14, %v3292_v50, %v3296_v26  ;;  %v7689_v26 = vld [vmem:[%s10260_s11 + $0x460] ss:$16 sps:$4 sm:$0xff]  }
 0x4e6   : > { %3255 = vst [vmem:[#allocation4 + $0x4] sm:$0x1] %v3254_v30  ;;  %3298 = vst [vmem:[#allocation8] sm:$0x1] %v3297_v53  ;;  %v7695_v50 = vld [vmem:[%s10260_s11 + $0x440] ss:$16 sps:$4 sm:$0xff]  }
 0x4e7   : > { %v7698_v30 = vld [vmem:[%s10260_s11 + $0xc8] ss:$16 sps:$4 sm:$0xff]   ;;  %v7701_v53 = vld [vmem:[%s10260_s11 + $0x420] ss:$16 sps:$4 sm:$0xff]  }
 0x4e8   : > { %4396 = vmatpush1.bf16.msra.mxu1 %v7616_v36  ;;  %v3343_v36 = vpop.permute.xlu1 %3342 }
 0x4e9   : > { %4397 = vmatprep.subr.bf16.mxu1 %v7624_v55 }
 0x4eb   : > { %v7172_v0 = vpop.f32.mrf.mxu1 }
 0x4ec   : > { %4398 = vmatpush1.bf16.msra.mxu1 %v7622_v60 }
 0x4ed   : > { %v7173_v1 = vpop.f32.mrf.mxu1  ;;  %4399 = vmatprep.subr.bf16.mxu1 %v7630_v62  ;;  %v7669_v62 = vld [vmem:[%s10260_s11 + $0x364] ss:$16 sps:$4 sm:$0xff]  }
 0x4ee   : > { %v7174_v7 = vadd.f32 %v7173_v1, %v7172_v0  ;;  %v7628_v0 = vld [vmem:[%s10260_s11 + $0x20] ss:$16 sps:$4 sm:$0xff]  }
 0x4ef   : > { %v7175_v4 = vpop.f32.mrf.mxu1  ;;  %v7631_v1 = vld [vmem:[%s10260_s11 + $0x220] ss:$16 sps:$4 sm:$0xff]  }
 0x4f0   : > { %v2923_v10 = vadd.f32 %v7174_v7, %v2799_v9  ;;  %v7636_v4 = vld [vmem:[%s10260_s11 + $0x4] ss:$16 sps:$4 sm:$0xff]   ;;  %4400 = vmatpush1.bf16.msra.mxu1 %v7628_v0  ;;  %v7634_v7 = vld [vmem:[%s10260_s11] ss:$16 sps:$4 sm:$0xff]  }
 0x4f1   : > { %v7176_v5 = vpop.f32.mrf.mxu1  ;;  %4401 = vmatprep.subr.bf16.mxu1 %v7636_v4  ;;  %v7637_v9 = vld [vmem:[%s10260_s11 + $0x200] ss:$16 sps:$4 sm:$0xff]   ;;  %v3449_v4 = vld [vmem:[#allocation8 + $0x4] sm:$0x1] }
 0x4f2   : > { %v7639_v5 = vld [vmem:[%s10260_s11 + $0x204] ss:$16 sps:$4 sm:$0xff]  }
 0x4f4   : > { %4402 = vmatpush1.bf16.msra.mxu1 %v7634_v7  ;;  %v7672_v7 = vld [vmem:[%s10260_s11 + $0x144] ss:$16 sps:$4 sm:$0xff]  }
 0x4f9   : > { %v2962_v11 = vpop.f32.mrf.mxu0 }
 0x4fa   : > { %v2963_v12 = vadd.f32 %v2962_v11, %v2923_v10  ;;  %v7642_v10 = vld [vmem:[%s10260_s11 + $0x1e4] ss:$16 sps:$4 sm:$0xff]  }
 0x4fb   : > { %v2964_v13 = vpop.f32.mrf.mxu0  ;;  %v7645_v11 = vld [vmem:[%s10260_s11 + $0x3e4] ss:$16 sps:$4 sm:$0xff]   ;;  %4403 = vmatprep.subr.bf16.mxu1 %v7642_v10  ;;  %v7673_v10 = vld [vmem:[%s10260_s11 + $0x340] ss:$16 sps:$4 sm:$0xff]  }
 0x4fc   : > { %v2970_v14 = vmax.f32 %v2963_v12, 0.0  ;;  %v7640_v12 = vld [vmem:[%s10260_s11 + $0x1e0] ss:$16 sps:$4 sm:$0xff]  }
 0x4fd   : > { %v2965_v15 = vpop.f32.mrf.mxu0  ;;  %v7643_v13 = vld [vmem:[%s10260_s11 + $0x3e0] ss:$16 sps:$4 sm:$0xff]   ;;  %4404 = vmatpush2.bf16.msra.mxu1 %v7640_v12  ;;  %v7678_v12 = vld [vmem:[%s10260_s11 + $0x124] ss:$16 sps:$4 sm:$0xff]  }
 0x4fe   : > { %v2973_v18 = vpack.c.bf16 %v2970_v14, %v2970_v14  ;;  %v7648_v14 = vld [vmem:[%s10260_s11 + $0x1c4] ss:$16 sps:$4 sm:$0xff]  }
 0x4ff   : > { %v2966_v48 = vpop.f32.mrf.mxu0  ;;  %v7651_v15 = vld [vmem:[%s10260_s11 + $0x3c4] ss:$16 sps:$4 sm:$0xff]   ;;  %4405 = vmatprep.subr.bf16.mxu1 %v7648_v14  ;;  %v7676_v14 = vld [vmem:[%s10260_s11 + $0x120] ss:$16 sps:$4 sm:$0xff]  }
 0x500   : > { %7290 = vmatmul.mubr.bf16.vlgmr.msra.gmra.mxu0 %v2973_v18  ;;  %v7646_v18 = vld [vmem:[%s10260_s11 + $0x1c0] ss:$16 sps:$4 sm:$0xff]  }
 0x501   : > { %4429 = vmatpush1.bf16.msra.mxu0 %v7595_v8  ;;  %v7649_v48 = vld [vmem:[%s10260_s11 + $0x3c0] ss:$16 sps:$4 sm:$0xff]   ;;  %4406 = vmatpush2.bf16.msra.mxu1 %v7646_v18 }
 0x502   : > { %4430 = vmatprep.subr.bf16.mxu0 %v7603_v41  ;;  %4407 = vmatprep.subr.bf16.mxu1 %v7654_v19 }
 0x505   : > { %4431 = vmatpush1.bf16.msra.mxu0 %v7601_v44  ;;  %4408 = vmatpush2.bf16.msra.mxu1 %v7652_v21  ;;  %v3366_v21 = vld [vmem:[#allocation8 + $0x2] sm:$0x1] }
 0x506   : > { %4432 = vmatprep.subr.bf16.mxu0 %v7609_v45  ;;  %4409 = vmatprep.subr.bf16.mxu1 %v7660_v25 }
 0x509   : > { %4433 = vmatpush1.bf16.msra.mxu0 %v7607_v22  ;;  %4410 = vmatpush2.bf16.msra.mxu1 %v7658_v3  ;;  %v3416_v22 = vld [vmem:[#allocation8 + $0x3] sm:$0x1] }
 0x50a   : > { %4434 = vmatprep.subr.bf16.mxu0 %v7615_v49  ;;  %4411 = vmatprep.subr.bf16.mxu1 %v7666_v2  ;;  %v7691_v2 = vld [vmem:[%s10260_s11 + $0x464] ss:$16 sps:$4 sm:$0xff]  }
 0x50d   : > { %4435 = vmatpush1.bf16.msra.mxu0 %v7613_v51  ;;  %4412 = vmatpush2.bf16.msra.mxu1 %v7664_v31  ;;  %v3417_v51 = vsel %vm9179_vm11, %v9117_v32, %v3416_v22  ;;  %v7694_v31 = vld [vmem:[%s10260_s11 + $0xec] ss:$16 sps:$4 sm:$0xff]   ;;  %v7692_v22 = vld [vmem:[%s10260_s11 + $0xe8] ss:$16 sps:$4 sm:$0xff]   ;;  %v7919_v32 = vld [vmem:[%s10264_s15 + $0x140] ss:$16 sps:$4 sm:$0xff]  }
 0x50e   : > { %4436 = vmatprep.subr.bf16.mxu0 %v7621_v29  ;;  %3418 = vst [vmem:[#allocation8 + $0x3] sm:$0x1] %v3417_v51  ;;  %4413 = vmatprep.subr.bf16.mxu1 %v7672_v7  ;;  %v7703_v51 = vld [vmem:[%s10260_s11 + $0x424] ss:$16 sps:$4 sm:$0xff]   ;;  %v7722_v7 = vld [vmem:[%s10260_s11 + $0x48] ss:$16 sps:$4 sm:$0xff]  }
 0x511   : > { %4437 = vmatpush1.bf16.msra.mxu0 %v7619_v43  ;;  %v3346_v43 = vsel %vm9284_vm14, %v3343_v36, %v3345_v46 }
 0x512   : > { %4438 = vmatprep.subr.bf16.mxu0 %v7627_v58  ;;  %3347 = vst [vmem:[#allocation8 + $0x1] sm:$0x1] %v3346_v43  ;;  %v7704_v43 = vld [vmem:[%s10260_s11 + $0xa8] ss:$16 sps:$4 sm:$0xff]  }
 0x515   : > { %4439 = vmatpush1.bf16.msra.mxu0 %v7625_v61  ;;  %v3445_v60 = vld [vmem:[#allocation8 + $0x3] sm:$0x1]  ;;  %v3443_v61 = vpop.permute.xlu1 %3442 }
 0x516   : > { %4440 = vmatprep.subr.bf16.mxu0 %v7633_v63  ;;  %v3448_v63 = vld [vmem:[#allocation4 + $0x4] sm:$0x1]  ;;  %v3446_v0 = vsel %vm9284_vm14, %v3443_v61, %v3445_v60  ;;  %v7718_v60 = vld [vmem:[%s10260_s11 + $0x6c] ss:$16 sps:$4 sm:$0xff]   ;;  %v7713_v61 = vld [vmem:[%s10260_s11 + $0x2e8] ss:$16 sps:$4 sm:$0xff]  }
 0x517   : > { %3447 = vst [vmem:[#allocation8 + $0x3] sm:$0x1] %v3446_v0  ;;  %v7716_v0 = vld [vmem:[%s10260_s11 + $0x68] ss:$16 sps:$4 sm:$0xff]  }
 0x519   : > { %4441 = vmatpush1.bf16.msra.mxu0 %v7631_v1  ;;  %v7667_v1 = vld [vmem:[%s10260_s11 + $0x360] ss:$16 sps:$4 sm:$0xff]  }
 0x51a   : > { %4442 = vmatprep.subr.bf16.mxu0 %v7639_v5  ;;  %v7670_v5 = vld [vmem:[%s10260_s11 + $0x140] ss:$16 sps:$4 sm:$0xff]  }
 0x51b   : > { %4414 = vmatpush2.bf16.msra.mxu1 %v7670_v5  ;;  %v7727_v5 = vld [vmem:[%s10260_s11 + $0x2ac] ss:$16 sps:$4 sm:$0xff]  }
 0x51c   : > { %4415 = vmatprep.subr.bf16.mxu1 %v7678_v12  ;;  %v7728_v12 = vld [vmem:[%s10260_s11 + $0x28] ss:$16 sps:$4 sm:$0xff]  }
 0x51d   : > { %4443 = vmatpush1.bf16.msra.mxu0 %v7637_v9  ;;  %v3450_v9 = vsel %vm9179_vm11, %v3448_v63, %v3449_v4  ;;  %v7721_v63 = vld [vmem:[%s10260_s11 + $0x2cc] ss:$16 sps:$4 sm:$0xff]   ;;  %v7719_v4 = vld [vmem:[%s10260_s11 + $0x2c8] ss:$16 sps:$4 sm:$0xff]  }
 0x51e   : > { %4444 = vmatprep.subr.bf16.mxu0 %v7645_v11  ;;  %v7675_v11 = vld [vmem:[%s10260_s11 + $0x344] ss:$16 sps:$4 sm:$0xff]   ;;  %3451 = vst [vmem:[#allocation8 + $0x4] sm:$0x1] %v3450_v9  ;;  %v7730_v9 = vld [vmem:[%s10260_s11 + $0x2c] ss:$16 sps:$4 sm:$0xff]  }
 0x51f   : > { %4416 = vmatpush2.bf16.msra.mxu1 %v7676_v14  ;;  %v7731_v14 = vld [vmem:[%s10260_s11 + $0x288] ss:$16 sps:$4 sm:$0xff]  }
 0x521   : > { %4445 = vmatpush2.bf16.msra.mxu0 %v7643_v13  ;;  %v7681_v13 = vld [vmem:[%s10260_s11 + $0x324] ss:$16 sps:$4 sm:$0xff]  }
 0x522   : > { %4446 = vmatprep.subr.bf16.mxu0 %v7651_v15  ;;  %v7684_v15 = vld [vmem:[%s10260_s11 + $0x104] ss:$16 sps:$4 sm:$0xff]  }
 0x523   : > { %4417 = vmatprep.subr.bf16.mxu1 %v7684_v15  ;;  %v7739_v15 = vld [vmem:[%s10260_s11 + $0x26c] ss:$16 sps:$4 sm:$0xff]  }
 0x525   : > { %4447 = vmatpush2.bf16.msra.mxu0 %v7649_v48  ;;  %v7679_v48 = vld [vmem:[%s10260_s11 + $0x320] ss:$16 sps:$4 sm:$0xff]  }
 0x526   : > { %4448 = vmatprep.subr.bf16.mxu0 %v7657_v20  ;;  %v7687_v20 = vld [vmem:[%s10260_s11 + $0x304] ss:$16 sps:$4 sm:$0xff]  }
 0x529   : > { %4449 = vmatpush2.bf16.msra.mxu0 %v7655_v24  ;;  %v7682_v24 = vld [vmem:[%s10260_s11 + $0x100] ss:$16 sps:$4 sm:$0xff]  }
 0x52a   : > { %4450 = vmatprep.subr.bf16.mxu0 %v7663_v27  ;;  %v7685_v27 = vld [vmem:[%s10260_s11 + $0x300] ss:$16 sps:$4 sm:$0xff]   ;;  %4418 = vmatpush2.bf16.msra.mxu1 %v7682_v24  ;;  %v7748_v24 = vld [vmem:[%s10260_s11 + $0x1cc] ss:$16 sps:$4 sm:$0xff]  }
 0x52b   : > { %4477 = vmatprep.subr.bf16.mxu1 %v7691_v2  ;;  %v7749_v2 = vld [vmem:[%s10260_s11 + $0x228] ss:$16 sps:$4 sm:$0xff]  }
 0x52d   : > { %4451 = vmatpush2.bf16.msra.mxu0 %v7661_v28 }
 0x52e   : > { %4452 = vmatprep.subr.bf16.mxu0 %v7669_v62 }
 0x531   : > { %4453 = vmatpush2.bf16.msra.mxu0 %v7667_v1  ;;  %v7724_v1 = vld [vmem:[%s10260_s11 + $0x4c] ss:$16 sps:$4 sm:$0xff]  }
 0x532   : > { %4454 = vmatprep.subr.bf16.mxu0 %v7675_v11  ;;  %v7733_v11 = vld [vmem:[%s10260_s11 + $0x28c] ss:$16 sps:$4 sm:$0xff]  }
 0x535   : > { %4455 = vmatpush2.bf16.msra.mxu0 %v7673_v10  ;;  %v7725_v10 = vld [vmem:[%s10260_s11 + $0x2a8] ss:$16 sps:$4 sm:$0xff]  }
 0x536   : > { %4456 = vmatprep.subr.bf16.mxu0 %v7681_v13  ;;  %v7736_v13 = vld [vmem:[%s10260_s11 + $0xc] ss:$16 sps:$4 sm:$0xff]  }
 0x539   : > { %4457 = vmatpush2.bf16.msra.mxu0 %v7679_v48  ;;  %v7742_v48 = vld [vmem:[%s10260_s11 + $0x1ec] ss:$16 sps:$4 sm:$0xff]  }
 0x53a   : > { %4458 = vmatprep.subr.bf16.mxu0 %v7687_v20  ;;  %v7745_v20 = vld [vmem:[%s10260_s11 + $0x24c] ss:$16 sps:$4 sm:$0xff]  }
 0x53d   : > { %4459 = vmatpush2.bf16.msra.mxu0 %v7685_v27  ;;  %v7751_v27 = vld [vmem:[%s10260_s11 + $0x22c] ss:$16 sps:$4 sm:$0xff]  }
 0x53e   : > { %4510 = vmatprep.subr.bf16.mxu0 %v7694_v31  ;;  %v7757_v31 = vld [vmem:[%s10260_s11 + $0x20c] ss:$16 sps:$4 sm:$0xff]  }
 0x597   : > { %v7194_v33 = vpop.f32.mrf.mxu1 }
 0x599   : > { %v7195_v34 = vpop.f32.mrf.mxu1 }
 0x59a   : > { %v7196_v38 = vadd.f32 %v7195_v34, %v7194_v33 }
 0x59b   : > { %v7197_v37 = vpop.f32.mrf.mxu1 }
 0x59c   : > { %v3202_v41 = vadd.f32 %v7196_v38, %v3022_v39 }
 0x59d   : > { %v7198_v8 = vpop.f32.mrf.mxu1 }
 0x5c0   : > { %v3241_v42 = vpop.f32.mrf.mxu0 }
 0x5c1   : > { %v3242_v45 = vadd.f32 %v3241_v42, %v3202_v41 }
 0x5c2   : > { %v7291_v49 = vpop.f32.mrf.mxu0 }
 0x5c3   : > { %v3247_v29 = vmax.f32 %v3242_v45, 0.0  ;;  %v7697_v45 = vld [vmem:[%s10260_s11 + $0x444] ss:$16 sps:$4 sm:$0xff]   ;;  %v7700_v49 = vld [vmem:[%s10260_s11 + $0xcc] ss:$16 sps:$4 sm:$0xff]  }
 0x5c4   : > { %v3244_v40 = vpop.f32.mrf.mxu0 }
 0x5c5   : > { %v7079_v55 = vpack.c.bf16 %v3247_v29, %v3247_v29  ;;  %v7706_v29 = vld [vmem:[%s10260_s11 + $0xac] ss:$16 sps:$4 sm:$0xff]   ;;  %v7709_v40 = vld [vmem:[%s10260_s11 + $0x404] ss:$16 sps:$4 sm:$0xff]  }
 0x5c6   : > { %v7292_v57 = vpop.f32.mrf.mxu0 }
 0x5c7   : > { %v3259_v58 = vrot.slane %v7079_v55, 6  ;;  %v7712_v55 = vld [vmem:[%s10260_s11 + $0x8c] ss:$16 sps:$4 sm:$0xff]  }
 0x5c9   : > { %v3264_v59 = vsel %vm9298_vm6, %v3259_v58, %v3263_v56  ;;  %v7707_v56 = vld [vmem:[%s10260_s11 + $0x400] ss:$16 sps:$4 sm:$0xff]   ;;  %v7715_v58 = vld [vmem:[%s10260_s11 + $0x2ec] ss:$16 sps:$4 sm:$0xff]  }
 0x5ca   : > { %3265 = vst [vmem:[#allocation4] sm:$0x4] %v3264_v59  ;;  %v7710_v59 = vld [vmem:[%s10260_s11 + $0x88] ss:$16 sps:$4 sm:$0xff]  }
 0x5d1   : > { %v6732_v18 = vld.sshfl [vmem:[#allocation4] sm:$0x2 pattern:$0x75316420] }
 0x5d2   : > { %v3384_v19 = vrot.slane %v6732_v18, %v8228_v23  ;;  %v7734_v18 = vld [vmem:[%s10260_s11 + $0x8] ss:$16 sps:$4 sm:$0xff]  }
 0x5d4   : > { %v3385_v25 = vcombine.high %v3384_v19, %v3384_v19  ;;  %v7737_v19 = vld [vmem:[%s10260_s11 + $0x268] ss:$16 sps:$4 sm:$0xff]  }
 0x5d6   : > { %v3387_v3 = vshrl.u32 %v3385_v25, 16  ;;  %v3367_v28 = vsel %vm9179_vm11, %v3385_v25, %v3366_v21  ;;  %v7740_v21 = vld [vmem:[%s10260_s11 + $0x1e8] ss:$16 sps:$4 sm:$0xff]  }
 0x5d7   : > { %3368 = vst [vmem:[#allocation8 + $0x2] sm:$0x1] %v3367_v28  ;;  %v7743_v25 = vld [vmem:[%s10260_s11 + $0x248] ss:$16 sps:$4 sm:$0xff]   ;;  %v7754_v28 = vld [vmem:[%s10260_s11 + $0x1ac] ss:$16 sps:$4 sm:$0xff]  }
 0x5d8   : > { %3391 = vrot.lane.b32.xlu0 %v3387_v3, %s10306_s21  ;;  %v7746_v3 = vld [vmem:[%s10260_s11 + $0x1c8] ss:$16 sps:$4 sm:$0xff]  }
 0x5de   : > { %v3394_v34 = vld [vmem:[#allocation8 + $0x2] sm:$0x1] }
 0x64a   : > { %v3392_v33 = vpop.permute.xlu0 %3391 }
 0x64b   : > { %v3395_v37 = vsel %vm9284_vm14, %v3392_v33, %v3394_v34  ;;  %v7752_v33 = vld [vmem:[%s10260_s11 + $0x1a8] ss:$16 sps:$4 sm:$0xff]   ;;  %v7760_v34 = vld [vmem:[%s10260_s11 + $0x18c] ss:$16 sps:$4 sm:$0xff]  }
 0x64c   : > { %3396 = vst [vmem:[#allocation8 + $0x2] sm:$0x1] %v3395_v37  ;;  %v7755_v37 = vld [vmem:[%s10260_s11 + $0x208] ss:$16 sps:$4 sm:$0xff]  }
 0x653   : > { %v3452_v8 = vld [vmem:[#allocation8] sm:$0x1f] }
 0x654   : > { %v3606_v38 = vrot.slane %v3452_v8, %v8228_v23  ;;  %v3599_v36 = vcombine.high %v3452_v8, %v3452_v8  ;;  %v7763_v8 = vld [vmem:[%s10260_s11 + $0x3ec] ss:$16 sps:$4 sm:$0xff]  }
 0x656   : > { %v3614_v39 = vcombine.high %v3606_v38, %v3606_v38  ;;  %v9364_v41 = vrot.slane %v3606_v38, %v8228_v23  ;;  %v3613_v57 = vrot.slane %v3599_v36, %v8228_v23  ;;  %v7758_v38 = vld [vmem:[%s10260_s11 + $0x188] ss:$16 sps:$4 sm:$0xff]   ;;  %v7784_v36 = vld [vmem:[%s10260_s11 + $0x10c] ss:$16 sps:$4 sm:$0xff]  }
 0x658   : > { %v3635_v42 = vrot.slane %v3614_v39, %v8228_v23  ;;  %v9379_v47 = vcombine.high %v9364_v41, %v9364_v41  ;;  %v9427_v62 = vrot.slane %v3613_v57, %v8228_v23  ;;  %v7766_v39 = vld [vmem:[%s10260_s11 + $0x16c] ss:$16 sps:$4 sm:$0xff]   ;;  %v7785_v57 = vld [vmem:[%s10260_s11 + $0x368] ss:$16 sps:$4 sm:$0xff]  }
 0x65a   : > { %4419 = vmatprep.mubr.bf16.mxu1 %v3635_v42  ;;  %v3637_v46 = vcombine.high %v3635_v42, %v3635_v42 }
 0x65b   : > { %4420 = vmatmul.mubr.bf16.vlgmr.msra.gmra.mxu1 %v9364_v41 }
 0x65c   : > { %4478 = vmatpush1.bf16.msra.mxu1 %v7689_v26  ;;  %4460 = vmatprep.mubr.bf16.mxu0 %v3637_v46  ;;  %v7769_v26 = vld [vmem:[%s10260_s11 + $0x3cc] ss:$16 sps:$4 sm:$0xff]  }
 0x65d   : > { %4461 = vmatmul.mubr.bf16.vlgmr.msra.gmra.mxu0 %v9379_v47  ;;  %4479 = vmatprep.subr.bf16.mxu1 %v7697_v45  ;;  %v7764_v45 = vld [vmem:[%s10260_s11 + $0x168] ss:$16 sps:$4 sm:$0xff]  }
 0x65e   : > { %4511 = vmatpush1.bf16.msra.mxu0 %v7692_v22  ;;  %4542 = vmatprep.mubr.bf16.mxu0 %v3635_v42  ;;  %v7761_v42 = vld [vmem:[%s10260_s11 + $0x3e8] ss:$16 sps:$4 sm:$0xff]  }
 0x65f   : > { %4512 = vmatprep.subr.bf16.mxu0 %v7700_v49  ;;  %4501 = vmatprep.mubr.bf16.mxu1 %v8066_v6  ;;  %v7767_v22 = vld [vmem:[%s10260_s11 + $0x3c8] ss:$16 sps:$4 sm:$0xff]   ;;  %v7775_v49 = vld [vmem:[%s10260_s11 + $0x3ac] ss:$16 sps:$4 sm:$0xff]  }
 0x660   : > { %4480 = vmatpush1.bf16.msra.mxu1 %v7695_v50  ;;  %v7770_v50 = vld [vmem:[%s10260_s11 + $0x148] ss:$16 sps:$4 sm:$0xff]  }
 0x661   : > { %4481 = vmatprep.subr.bf16.mxu1 %v7703_v51  ;;  %v7778_v51 = vld [vmem:[%s10260_s11 + $0x12c] ss:$16 sps:$4 sm:$0xff]  }
 0x662   : > { %4513 = vmatpush1.bf16.msra.mxu0 %v7698_v30  ;;  %v7773_v30 = vld [vmem:[%s10260_s11 + $0x3a8] ss:$16 sps:$4 sm:$0xff]  }
 0x663   : > { %4514 = vmatprep.subr.bf16.mxu0 %v7706_v29  ;;  %v7781_v29 = vld [vmem:[%s10260_s11 + $0x38c] ss:$16 sps:$4 sm:$0xff]  }
 0x664   : > { %4482 = vmatpush1.bf16.msra.mxu1 %v7701_v53  ;;  %v7776_v53 = vld [vmem:[%s10260_s11 + $0x128] ss:$16 sps:$4 sm:$0xff]  }
 0x665   : > { %4483 = vmatprep.subr.bf16.mxu1 %v7709_v40  ;;  %v7779_v40 = vld [vmem:[%s10260_s11 + $0x388] ss:$16 sps:$4 sm:$0xff]  }
 0x666   : > { %4515 = vmatpush1.bf16.msra.mxu0 %v7704_v43  ;;  %v7787_v43 = vld [vmem:[%s10260_s11 + $0x36c] ss:$16 sps:$4 sm:$0xff]  }
 0x667   : > { %4516 = vmatprep.subr.bf16.mxu0 %v7712_v55  ;;  %v7782_v55 = vld [vmem:[%s10260_s11 + $0x108] ss:$16 sps:$4 sm:$0xff]  }
 0x668   : > { %4484 = vmatpush1.bf16.msra.mxu1 %v7707_v56  ;;  %v7790_v56 = vld [vmem:[%s10260_s11 + $0x46c] ss:$16 sps:$4 sm:$0xff]  }
 0x669   : > { %4551 = vmatprep.subr.bf16.mxu1 %v7715_v58  ;;  %v7793_v58 = vld [vmem:[%s10260_s11 + $0x34c] ss:$16 sps:$4 sm:$0xff]  }
 0x66a   : > { %4517 = vmatpush1.bf16.msra.mxu0 %v7710_v59  ;;  %v7788_v59 = vld [vmem:[%s10260_s11 + $0x468] ss:$16 sps:$4 sm:$0xff]  }
 0x66b   : > { %6881 = vmatmul.mubr.msk.bf16.vlgmr.msra.gmra.mxu1 %vm4383_vm15, %v9427_v62  ;;  %4518 = vmatprep.subr.bf16.mxu0 %v7718_v60  ;;  %v7796_v60 = vld [vmem:[%s10260_s11 + $0x44c] ss:$16 sps:$4 sm:$0xff]  }
 0x66c   : > { %4552 = vmatpush1.bf16.msra.mxu1 %v7713_v61  ;;  %4583 = vmatprep.mubr.bf16.mxu1 %v3637_v46  ;;  %v7772_v46 = vld [vmem:[%s10260_s11 + $0x14c] ss:$16 sps:$4 sm:$0xff]   ;;  %v7791_v61 = vld [vmem:[%s10260_s11 + $0x348] ss:$16 sps:$4 sm:$0xff]  }
 0x66d   : > { %4553 = vmatprep.subr.bf16.mxu1 %v7721_v63  ;;  %v7799_v63 = vld [vmem:[%s10260_s11 + $0x32c] ss:$16 sps:$4 sm:$0xff]  }
 0x66e   : > { %4519 = vmatpush1.bf16.msra.mxu0 %v7716_v0  ;;  %v7794_v0 = vld [vmem:[%s10260_s11 + $0x448] ss:$16 sps:$4 sm:$0xff]  }
 0x66f   : > { %4520 = vmatprep.subr.bf16.mxu0 %v7724_v1  ;;  %v7802_v1 = vld [vmem:[%s10260_s11 + $0x42c] ss:$16 sps:$4 sm:$0xff]  }
 0x670   : > { %4554 = vmatpush1.bf16.msra.mxu1 %v7719_v4  ;;  %v7805_v4 = vld [vmem:[%s10260_s11 + $0x30c] ss:$16 sps:$4 sm:$0xff]  }
 0x671   : > { %4555 = vmatprep.subr.bf16.mxu1 %v7727_v5  ;;  %v7800_v5 = vld [vmem:[%s10260_s11 + $0x428] ss:$16 sps:$4 sm:$0xff]  }
 0x672   : > { %4521 = vmatpush1.bf16.msra.mxu0 %v7722_v7  ;;  %v7808_v7 = vld [vmem:[%s10260_s11 + $0x40c] ss:$16 sps:$4 sm:$0xff]  }
 0x673   : > { %4522 = vmatprep.subr.bf16.mxu0 %v7730_v9  ;;  %v7803_v9 = vld [vmem:[%s10260_s11 + $0x308] ss:$16 sps:$4 sm:$0xff]  }
 0x674   : > { %4556 = vmatpush1.bf16.msra.mxu1 %v7725_v10  ;;  %v7809_v10 = vld [vmem:[%s10262_s13 + $0x78] sm:$0xff]  }
 0x675   : > { %4557 = vmatprep.subr.bf16.mxu1 %v7733_v11  ;;  %v7806_v11 = vld [vmem:[%s10260_s11 + $0x408] ss:$16 sps:$4 sm:$0xff]  }
 0x676   : > { %4523 = vmatpush1.bf16.msra.mxu0 %v7728_v12  ;;  %v7810_v12 = vld [vmem:[%s10262_s13 + $0x38] sm:$0xff]  }
 0x677   : > { %4524 = vmatprep.subr.bf16.mxu0 %v7736_v13  ;;  %v7811_v13 = vld [vmem:[%s10262_s13 + $0x70] sm:$0xff]  }
 0x678   : > { %4558 = vmatpush1.bf16.msra.mxu1 %v7731_v14  ;;  %v7812_v14 = vld [vmem:[%s10262_s13 + $0x30] sm:$0xff]  }
 0x679   : > { %4559 = vmatprep.subr.bf16.mxu1 %v7739_v15  ;;  %v7813_v15 = vld [vmem:[%s10262_s13 + $0x68] sm:$0xff]  }
 0x67a   : > { %4525 = vmatpush1.bf16.msra.mxu0 %v7734_v18  ;;  %v7814_v18 = vld [vmem:[%s10262_s13 + $0x28] sm:$0xff]  }
 0x67b   : > { %4526 = vmatprep.subr.bf16.mxu0 %v7742_v48  ;;  %v7817_v48 = vld [vmem:[%s10262_s13 + $0x58] sm:$0xff]  }
 0x67c   : > { %4560 = vmatpush1.bf16.msra.mxu1 %v7737_v19  ;;  %v7825_v19 = vld [vmem:[%s10262_s13 + $0xf8] sm:$0xff]  }
 0x67d   : > { %4561 = vmatprep.subr.bf16.mxu1 %v7745_v20  ;;  %v7826_v20 = vld [vmem:[%s10262_s13 + $0xb8] sm:$0xff]  }
 0x67e   : > { %4527 = vmatpush2.bf16.msra.mxu0 %v7740_v21  ;;  %v7827_v21 = vld [vmem:[%s10262_s13 + $0xf0] sm:$0xff]  }
 0x67f   : > { %4528 = vmatprep.subr.bf16.mxu0 %v7748_v24  ;;  %v7818_v24 = vld [vmem:[%s10262_s13 + $0x18] sm:$0xff]  }
 0x680   : > { %4562 = vmatpush1.bf16.msra.mxu1 %v7743_v25  ;;  %v7828_v25 = vld [vmem:[%s10262_s13 + $0xb0] sm:$0xff]  }
 0x681   : > { %4563 = vmatprep.subr.bf16.mxu1 %v7751_v27  ;;  %v7819_v27 = vld [vmem:[%s10262_s13 + $0x50] sm:$0xff]  }
 0x682   : > { %4529 = vmatpush2.bf16.msra.mxu0 %v7746_v3  ;;  %v7820_v3 = vld [vmem:[%s10262_s13 + $0x10] sm:$0xff]  }
 0x683   : > { %4530 = vmatprep.subr.bf16.mxu0 %v7754_v28  ;;  %v7821_v28 = vld [vmem:[%s10262_s13 + $0x48] sm:$0xff]  }
 0x684   : > { %4564 = vmatpush1.bf16.msra.mxu1 %v7749_v2  ;;  %v7822_v2 = vld [vmem:[%s10262_s13 + $0x8] sm:$0xff]  }
 0x685   : > { %4565 = vmatprep.subr.bf16.mxu1 %v7757_v31  ;;  %v7823_v31 = vld [vmem:[%s10262_s13 + $0x40] sm:$0xff]  }
 0x686   : > { %4531 = vmatpush2.bf16.msra.mxu0 %v7752_v33  ;;  %v7824_v33 = vld [vmem:[%s10262_s13] sm:$0xff]  }
 0x687   : > { %4532 = vmatprep.subr.bf16.mxu0 %v7760_v34  ;;  %v7829_v34 = vld [vmem:[%s10262_s13 + $0xe8] sm:$0xff]  }
 0x688   : > { %4566 = vmatpush1.bf16.msra.mxu1 %v7755_v37  ;;  %v7830_v37 = vld [vmem:[%s10262_s13 + $0xa8] sm:$0xff]  }
 0x689   : > { %4567 = vmatprep.subr.bf16.mxu1 %v7763_v8  ;;  %v7831_v8 = vld [vmem:[%s10262_s13 + $0xe0] sm:$0xff]  }
 0x68a   : > { %4533 = vmatpush2.bf16.msra.mxu0 %v7758_v38  ;;  %v7832_v38 = vld [vmem:[%s10262_s13 + $0xa0] sm:$0xff]  }
 0x68b   : > { %4534 = vmatprep.subr.bf16.mxu0 %v7766_v39  ;;  %v7833_v39 = vld [vmem:[%s10262_s13 + $0xd8] sm:$0xff]  }
 0x68c   : > { %4568 = vmatpush2.bf16.msra.mxu1 %v7761_v42  ;;  %v7834_v42 = vld [vmem:[%s10262_s13 + $0x98] sm:$0xff]  }
 0x68d   : > { %4569 = vmatprep.subr.bf16.mxu1 %v7769_v26  ;;  %v7835_v26 = vld [vmem:[%s10262_s13 + $0xd0] sm:$0xff]  }
 0x68e   : > { %4535 = vmatpush2.bf16.msra.mxu0 %v7764_v45  ;;  %v7836_v45 = vld [vmem:[%s10262_s13 + $0x90] sm:$0xff]  }
 0x68f   : > { %4536 = vmatprep.subr.bf16.mxu0 %v7772_v46  ;;  %v7837_v46 = vld [vmem:[%s10262_s13 + $0xc8] sm:$0xff]  }
 0x690   : > { %4570 = vmatpush2.bf16.msra.mxu1 %v7767_v22  ;;  %v7838_v22 = vld [vmem:[%s10262_s13 + $0x88] sm:$0xff]  }
 0x691   : > { %4571 = vmatprep.subr.bf16.mxu1 %v7775_v49  ;;  %v7839_v49 = vld [vmem:[%s10262_s13 + $0xc0] sm:$0xff]  }
 0x692   : > { %4537 = vmatpush2.bf16.msra.mxu0 %v7770_v50  ;;  %v7840_v50 = vld [vmem:[%s10262_s13 + $0x80] sm:$0xff]  }
 0x693   : > { %4538 = vmatprep.subr.bf16.mxu0 %v7778_v51 }
 0x694   : > { %4572 = vmatpush2.bf16.msra.mxu1 %v7773_v30 }
 0x695   : > { %4573 = vmatprep.subr.bf16.mxu1 %v7781_v29 }
 0x696   : > { %4539 = vmatpush2.bf16.msra.mxu0 %v7776_v53  ;;  %v3597_v53 = vld [vmem:[%s10261_s12] sm:$0xf] }
 0x697   : > { %4540 = vmatprep.subr.bf16.mxu0 %v7784_v36 }
 0x698   : > { %4574 = vmatpush2.bf16.msra.mxu1 %v7779_v40 }
 0x699   : > { %4575 = vmatprep.subr.bf16.mxu1 %v7787_v43 }
 0x69a   : > { %4541 = vmatpush2.bf16.msra.mxu0 %v7782_v55 }
 0x69b   : > { %4600 = vmatprep.subr.bf16.mxu0 %v7790_v56  ;;  %v4366_v56 = vrot.slane %v3597_v53, %v8700_v52 }
 0x69c   : > { %4576 = vmatpush2.bf16.msra.mxu1 %v7785_v57 }
 0x69d   : > { %4543 = vmatmul.mubr.bf16.vlgmr.msra.gmra.mxu0 %v9364_v41  ;;  %4577 = vmatprep.subr.bf16.mxu1 %v7793_v58  ;;  %v7797_v41 = vld [vmem:[%s10260_s11 + $0x328] ss:$16 sps:$4 sm:$0xff]   ;;  %v4370_v58 = vrot.slane %v3597_v53, %v8706_v54 }
 0x69e   : > { %4601 = vmatpush1.bf16.msra.mxu0 %v7788_v59  ;;  %4624 = vmatprep.mubr.bf16.mxu0 %v8066_v6 }
 0x69f   : > { %4602 = vmatprep.subr.bf16.mxu0 %v7796_v60 }
 0x6a0   : > { %4578 = vmatpush2.bf16.msra.mxu1 %v7791_v61 }
 0x6a1   : > { %4579 = vmatprep.subr.bf16.mxu1 %v7799_v63 }
 0x6a2   : > { %4603 = vmatpush1.bf16.msra.mxu0 %v7794_v0 }
 0x6a3   : > { %4604 = vmatprep.subr.bf16.mxu0 %v7802_v1 }
 0x6a4   : > { %4580 = vmatpush2.bf16.msra.mxu1 %v7797_v41 }
 0x6a5   : > { %4581 = vmatprep.subr.bf16.mxu1 %v7805_v4 }
 0x6a6   : > { %4605 = vmatpush1.bf16.msra.mxu0 %v7800_v5 }
 0x6a7   : > { %4606 = vmatprep.subr.bf16.mxu0 %v7808_v7 }
 0x6a8   : > { %4582 = vmatpush2.bf16.msra.mxu1 %v7803_v9 }
 0x6a9   : > { %7209 = vmatprep.subr.bf16.mxu1 %v7809_v10 }
 0x6aa   : > { %4607 = vmatpush1.bf16.msra.mxu0 %v7806_v11 }
 0x6ab   : > { %4584 = vmatmul.mubr.bf16.vlgmr.msra.gmra.mxu1 %v9379_v47  ;;  %v7815_v47 = vld [vmem:[%s10262_s13 + $0x60] sm:$0xff]   ;;  %7231 = vmatprep.subr.bf16.mxu0 %v7825_v19 }
 0x6ac   : > { %7210 = vmatpush3.bf16.msra.mxu1 %v7810_v12 }
 0x6ad   : > { %6882 = vmatmul.mubr.msk.bf16.vlgmr.msra.gmra.mxu0 %vm4383_vm15, %v9427_v62  ;;  %7211 = vmatprep.subr.bf16.mxu1 %v7811_v13  ;;  %v7816_v62 = vld [vmem:[%s10262_s13 + $0x20] sm:$0xff]  }
 0x6ae   : > { %7232 = vmatpush3.bf16.msra.mxu0 %v7826_v20 }
 0x6af   : > { %7233 = vmatprep.subr.bf16.mxu0 %v7827_v21 }
 0x6b0   : > { %7212 = vmatpush3.bf16.msra.mxu1 %v7812_v14 }
 0x6b1   : > { %7213 = vmatprep.subr.bf16.mxu1 %v7813_v15 }
 0x6b2   : > { %7234 = vmatpush3.bf16.msra.mxu0 %v7828_v25 }
 0x6b3   : > { %7235 = vmatprep.subr.bf16.mxu0 %v7829_v34 }
 0x6b4   : > { %7214 = vmatpush3.bf16.msra.mxu1 %v7814_v18 }
 0x6b5   : > { %7215 = vmatprep.subr.bf16.mxu1 %v7815_v47  ;;  %v4377_v47 = vsub.s32 3, %v8219_v17 }
 0x6b6   : > { %7236 = vmatpush3.bf16.msra.mxu0 %v7830_v37 }
 0x6b7   : > { %7237 = vmatprep.subr.bf16.mxu0 %v7831_v8 }
 0x6b8   : > { %7216 = vmatpush3.bf16.msra.mxu1 %v7816_v62  ;;  %v4374_v62 = vrot.slane %v3597_v53, %v8711_v16 }
 0x6b9   : > { %7217 = vmatprep.subr.bf16.mxu1 %v7817_v48  ;;  %v4378_v48 = vrot.slane %v3597_v53, %v4377_v47 }
 0x6ba   : > { %7238 = vmatpush3.bf16.msra.mxu0 %v7832_v38 }
 0x6bb   : > { %7239 = vmatprep.subr.bf16.mxu0 %v7833_v39 }
 0x6bc   : > { %7218 = vmatpush3.bf16.msra.mxu1 %v7818_v24 }
 0x6bd   : > { %7219 = vmatprep.subr.bf16.mxu1 %v7819_v27 }
 0x6be   : > { %7240 = vmatpush3.bf16.msra.mxu0 %v7834_v42 }
 0x6bf   : > { %7241 = vmatprep.subr.bf16.mxu0 %v7835_v26 }
 0x6c0   : > { %7220 = vmatpush3.bf16.msra.mxu1 %v7820_v3 }
 0x6c1   : > { %7221 = vmatprep.subr.bf16.mxu1 %v7821_v28 }
 0x6c2   : > { %7242 = vmatpush3.bf16.msra.mxu0 %v7836_v45  ;;  %v6919_v45 = vld.sshfl [vmem:[#allocation5] sm:$0x10 pattern:$0x75316420] }
 0x6c3   : > { %7243 = vmatprep.subr.bf16.mxu0 %v7837_v46  ;;  %v5053_v46 = vcombine.high %v6919_v45, %v6919_v45  ;;  %v7900_v45 = vld [vmem:[%s10264_s15 + $0x3c4] ss:$16 sps:$4 sm:$0xff]  }
 0x6c4   : > { %7222 = vmatpush3.bf16.msra.mxu1 %v7822_v2 }
 0x6c5   : > { %7223 = vmatprep.subr.bf16.mxu1 %v7823_v31 }
 0x6c6   : > { %7244 = vmatpush3.bf16.msra.mxu0 %v7838_v22  ;;  %v6916_v22 = vld.sshfl [vmem:[#allocation5] sm:$0x1 pattern:$0x75316420] }
 0x6c7   : > { %7245 = vmatprep.subr.bf16.mxu0 %v7839_v49  ;;  %v5011_v49 = vrot.slane %v6916_v22, %v8228_v23  ;;  %v7895_v22 = vld [vmem:[%s10264_s15 + $0x1c0] ss:$16 sps:$4 sm:$0xff]  }
 0x6c8   : > { %7224 = vmatpush3.bf16.msra.mxu1 %v7824_v33 }
 0x6ca   : > { %7246 = vmatpush3.bf16.msra.mxu0 %v7840_v50  ;;  %v6925_v50 = vld.sshfl [vmem:[#allocation5] sm:$0x20 pattern:$0x75316420] }
 0x71b   : > { %v4421_v51 = vpop.f32.mrf.mxu1 }
 0x71c   : > { %v4422_v59 = vadd.f32 %v4421_v51, %v4366_v56  ;;  %v5060_v51 = vrot.slane %v5053_v46, %v8228_v23  ;;  %v7843_v56 = vld [vmem:[%s10264_s15 + $0xe4] ss:$16 sps:$4 sm:$0xff]  }
 0x71d   : > { %v4423_v30 = vpop.f32.mrf.mxu1  ;;  %v4462_v29 = vpop.f32.mrf.mxu0  ;;  %6110 = vmatprep.subr.bf16.mxu1 %v7843_v56  ;;  %v7909_v56 = vld [vmem:[%s10264_s15 + $0x184] ss:$16 sps:$4 sm:$0xff]  }
 0x71e   : > { %v4424_v60 = vadd.f32 %v4423_v30, %v4370_v58  ;;  %v4463_v61 = vadd.f32 %v4462_v29, %v4422_v59  ;;  %v5152_v30 = vcombine.high %v6925_v50, %v6925_v50  ;;  %v5013_v29 = vshrl.u32 %v5011_v49, 16  ;;  %v7846_v58 = vld [vmem:[%s10264_s15 + $0x2e4] ss:$16 sps:$4 sm:$0xff]   ;;  %v7898_v50 = vld [vmem:[%s10264_s15 + $0x3c0] ss:$16 sps:$4 sm:$0xff]  }
 0x71f   : > { %v4425_v36 = vpop.f32.mrf.mxu1  ;;  %v4464_v40 = vpop.f32.mrf.mxu0  ;;  %v5062_v53 = vshrl.u32 %v5060_v51, 16  ;;  %v7849_v59 = vld [vmem:[%s10264_s15 + $0xc4] ss:$16 sps:$4 sm:$0xff]   ;;  %6151 = vmatprep.subr.bf16.mxu0 %v7846_v58  ;;  %v7907_v58 = vld [vmem:[%s10264_s15 + $0x180] ss:$16 sps:$4 sm:$0xff]  }
 0x720   : > { %v4465_v0 = vadd.f32 %v4464_v40, %v4424_v60  ;;  %v5159_v36 = vrot.slane %v5152_v30, %v8228_v23  ;;  %5017 = vrot.lane.b32.xlu0 %v5013_v29, %s10306_s21  ;;  %v7852_v60 = vld [vmem:[%s10264_s15 + $0x2c4] ss:$16 sps:$4 sm:$0xff]  }
 0x721   : > { %v4426_v43 = vpop.f32.mrf.mxu1  ;;  %v4466_v55 = vpop.f32.mrf.mxu0  ;;  %5066 = vrot.lane.b32.xlu1 %v5062_v53, %s10306_s21  ;;  %v7906_v29 = vld [vmem:[%s10264_s15 + $0x3a4] ss:$16 sps:$4 sm:$0xff]  }
 0x722   : > { %v9729_v40 = vcombine.high %v5159_v36, %v5159_v36  ;;  %v7841_v55 = vld [vmem:[%s10264_s15 + $0xe0] ss:$16 sps:$4 sm:$0xff]  }
 0x723   : > { %v4467_v57 = vpop.f32.mrf.mxu0  ;;  %v7901_v36 = vld [vmem:[%s10264_s15 + $0x1a0] ss:$16 sps:$4 sm:$0xff]  }
 0x724   : > { %v5162_v43 = vshrl.u32 %v9729_v40, 16  ;;  %v7844_v57 = vld [vmem:[%s10264_s15 + $0x2e0] ss:$16 sps:$4 sm:$0xff]  }
 0x726   : > { %5166 = vrot.lane.b32.xlu1 %v5162_v43, %s10306_s21 }
 0x72b   : > { %v4503_v63 = vpop.f32.mrf.mxu1 }
 0x72c   : > { %v4504_v1 = vadd.f32 %v4503_v63, %v4463_v61  ;;  %v7847_v61 = vld [vmem:[%s10264_s15 + $0xc0] ss:$16 sps:$4 sm:$0xff]  }
 0x72d   : > { %v4505_v41 = vpop.f32.mrf.mxu1  ;;  %v7850_v63 = vld [vmem:[%s10264_s15 + $0x2c0] ss:$16 sps:$4 sm:$0xff]  }
 0x72e   : > { %v4506_v4 = vadd.f32 %v4505_v41, %v4465_v0  ;;  %v4633_v5 = vmax.f32 %v4504_v1, 0.0  ;;  %v7855_v0 = vld [vmem:[%s10264_s15 + $0xa4] ss:$16 sps:$4 sm:$0xff]   ;;  %v7853_v41 = vld [vmem:[%s10264_s15 + $0xa0] ss:$16 sps:$4 sm:$0xff]  }
 0x72f   : > { %v4507_v7 = vpop.f32.mrf.mxu1  ;;  %v7858_v1 = vld [vmem:[%s10264_s15 + $0x2a4] ss:$16 sps:$4 sm:$0xff]  }
 0x730   : > { %v4634_v9 = vmax.f32 %v4506_v4, 0.0  ;;  %v4637_v12 = vpack.c.bf16 %v4633_v5, %v4633_v5  ;;  %v7856_v4 = vld [vmem:[%s10264_s15 + $0x2a0] ss:$16 sps:$4 sm:$0xff]   ;;  %v7861_v5 = vld [vmem:[%s10264_s15 + $0x84] ss:$16 sps:$4 sm:$0xff]  }
 0x731   : > { %v4508_v10 = vpop.f32.mrf.mxu1  ;;  %v7864_v7 = vld [vmem:[%s10264_s15 + $0x284] ss:$16 sps:$4 sm:$0xff]  }
 0x732   : > { %v4638_v11 = vpack.c.bf16 %v4634_v9, %v4634_v9  ;;  %v7859_v9 = vld [vmem:[%s10264_s15 + $0x80] ss:$16 sps:$4 sm:$0xff]  }
 0x733   : > { %v7862_v10 = vld [vmem:[%s10264_s15 + $0x280] ss:$16 sps:$4 sm:$0xff]  }
 0x734   : > { %4930 = vmatprep.mubr.bf16.mxu1 %v4638_v11  ;;  %v7867_v11 = vld [vmem:[%s10264_s15 + $0x64] ss:$16 sps:$4 sm:$0xff]  }
 0x735   : > { %4931 = vmatmul.mubr.bf16.vlgmr.msra.gmra.mxu1 %v4637_v12  ;;  %v7870_v12 = vld [vmem:[%s10264_s15 + $0x264] ss:$16 sps:$4 sm:$0xff]  }
 0x736   : > { %6111 = vmatpush1.bf16.msra.mxu1 %v7841_v55  ;;  %v7904_v55 = vld [vmem:[%s10264_s15 + $0x3a0] ss:$16 sps:$4 sm:$0xff]  }
 0x737   : > { %6112 = vmatprep.subr.bf16.mxu1 %v7849_v59  ;;  %v7910_v59 = vld [vmem:[%s10264_s15 + $0x380] ss:$16 sps:$4 sm:$0xff]  }
 0x73a   : > { %6113 = vmatpush1.bf16.msra.mxu1 %v7847_v61  ;;  %v7913_v61 = vld [vmem:[%s10264_s15 + $0x160] ss:$16 sps:$4 sm:$0xff]  }
 0x73b   : > { %6114 = vmatprep.subr.bf16.mxu1 %v7855_v0 }
 0x73e   : > { %6115 = vmatpush1.bf16.msra.mxu1 %v7853_v41 }
 0x73f   : > { %6116 = vmatprep.subr.bf16.mxu1 %v7861_v5 }
 0x742   : > { %6117 = vmatpush1.bf16.msra.mxu1 %v7859_v9 }
 0x743   : > { %6118 = vmatprep.subr.bf16.mxu1 %v7867_v11  ;;  %v5140_v11 = vld [vmem:[#allocation9 + $0x3] sm:$0x1] }
 0x75d   : > { %v4544_v13 = vpop.f32.mrf.mxu0 }
 0x75e   : > { %v4545_v19 = vadd.f32 %v4544_v13, %v4374_v62  ;;  %v4992_v13 = vld [vmem:[#allocation5] sm:$0x1]  ;;  %v7873_v62 = vld [vmem:[%s10264_s15 + $0x44] ss:$16 sps:$4 sm:$0xff]  }
 0x75f   : > { %v4546_v14 = vpop.f32.mrf.mxu0 }
 0x760   : > { %v4547_v21 = vadd.f32 %v4546_v14, %v4378_v48  ;;  %v7865_v14 = vld [vmem:[%s10264_s15 + $0x60] ss:$16 sps:$4 sm:$0xff]  }
 0x761   : > { %v4548_v15 = vpop.f32.mrf.mxu0  ;;  %6119 = vmatpush1.bf16.msra.mxu1 %v7865_v14 }
 0x762   : > { %v4993_v15 = vld [vmem:[#allocation9] sm:$0x1]  ;;  %6120 = vmatprep.subr.bf16.mxu1 %v7873_v62 }
 0x763   : > { %v4549_v18 = vpop.f32.mrf.mxu0  ;;  %v4994_v48 = vsel %vm9179_vm11, %v4992_v13, %v4993_v15  ;;  %v5141_v15 = vsel %vm9179_vm11, %v9729_v40, %v5140_v11  ;;  %v7952_v11 = vld [vmem:[%s10264_s15 + $0x424] ss:$16 sps:$4 sm:$0xff]  }
 0x764   : > { %v7868_v18 = vld [vmem:[%s10264_s15 + $0x260] ss:$16 sps:$4 sm:$0xff]   ;;  %4995 = vst [vmem:[#allocation9] sm:$0x1] %v4994_v48  ;;  %5142 = vst [vmem:[#allocation9 + $0x3] sm:$0x1] %v5141_v15 }
 0x76b   : > { %v4585_v20 = vpop.f32.mrf.mxu1 }
 0x76c   : > { %v4586_v24 = vadd.f32 %v4585_v20, %v4545_v19  ;;  %v5041_v19 = vld [vmem:[#allocation9 + $0x1] sm:$0x1]  ;;  %v7876_v20 = vld [vmem:[%s10264_s15 + $0x244] ss:$16 sps:$4 sm:$0xff]  }
 0x76d   : > { %v4587_v25 = vpop.f32.mrf.mxu1  ;;  %v4626_v27 = vpop.f32.mrf.mxu0 }
 0x76e   : > { %v4588_v3 = vadd.f32 %v4587_v25, %v4547_v21  ;;  %v4627_v28 = vadd.f32 %v4626_v27, %v4586_v24  ;;  %v5042_v21 = vsel %vm9179_vm11, %v5060_v51, %v5041_v19  ;;  %v7871_v24 = vld [vmem:[%s10264_s15 + $0x40] ss:$16 sps:$4 sm:$0xff]   ;;  %v7879_v27 = vld [vmem:[%s10264_s15 + $0x24] ss:$16 sps:$4 sm:$0xff]  }
 0x76f   : > { %v4589_v2 = vpop.f32.mrf.mxu1  ;;  %v4628_v31 = vpop.f32.mrf.mxu0  ;;  %5043 = vst [vmem:[#allocation9 + $0x1] sm:$0x1] %v5042_v21  ;;  %v7874_v25 = vld [vmem:[%s10264_s15 + $0x240] ss:$16 sps:$4 sm:$0xff]   ;;  %6121 = vmatpush1.bf16.msra.mxu1 %v7871_v24  ;;  %v7903_v51 = vld [vmem:[%s10264_s15 + $0x1a4] ss:$16 sps:$4 sm:$0xff]  }
 0x770   : > { %v4629_v33 = vadd.f32 %v4628_v31, %v4588_v3  ;;  %v4635_v34 = vmax.f32 %v4627_v28, 0.0  ;;  %v7882_v3 = vld [vmem:[%s10264_s15 + $0x224] ss:$16 sps:$4 sm:$0xff]   ;;  %v7877_v28 = vld [vmem:[%s10264_s15 + $0x20] ss:$16 sps:$4 sm:$0xff]   ;;  %6122 = vmatprep.subr.bf16.mxu1 %v7879_v27 }
 0x771   : > { %v4590_v37 = vpop.f32.mrf.mxu1  ;;  %v4630_v8 = vpop.f32.mrf.mxu0  ;;  %v7880_v2 = vld [vmem:[%s10264_s15 + $0x220] ss:$16 sps:$4 sm:$0xff]   ;;  %v7885_v31 = vld [vmem:[%s10264_s15 + $0x4] ss:$16 sps:$4 sm:$0xff]   ;;  %v4989_v24 = vld [vmem:[#allocation5] sm:$0x4] }
 0x772   : > { %v4636_v38 = vmax.f32 %v4629_v33, 0.0  ;;  %v4639_v26 = vpack.c.bf16 %v4635_v34, %v4635_v34  ;;  %v7888_v33 = vld [vmem:[%s10264_s15 + $0x204] ss:$16 sps:$4 sm:$0xff]   ;;  %v7883_v34 = vld [vmem:[%s10264_s15] ss:$16 sps:$4 sm:$0xff]  }
 0x773   : > { %v4631_v39 = vpop.f32.mrf.mxu0  ;;  %6123 = vmatpush1.bf16.msra.mxu1 %v7877_v28  ;;  %v7886_v37 = vld [vmem:[%s10264_s15 + $0x200] ss:$16 sps:$4 sm:$0xff]   ;;  %v7891_v8 = vld [vmem:[%s10264_s15 + $0x1e4] ss:$16 sps:$4 sm:$0xff]  }
 0x774   : > { %v4640_v42 = vpack.c.bf16 %v4636_v38, %v4636_v38  ;;  %6124 = vmatprep.subr.bf16.mxu1 %v7885_v31  ;;  %v7894_v38 = vld [vmem:[%s10264_s15 + $0x3e4] ss:$16 sps:$4 sm:$0xff]   ;;  %v7889_v39 = vld [vmem:[%s10264_s15 + $0x1e0] ss:$16 sps:$4 sm:$0xff]  }
 0x775   : > { %v5169_v27 = vld [vmem:[#allocation9 + $0x3] sm:$0x1]  ;;  %v7918_v28 = vld [vmem:[%s10264_s15 + $0x364] ss:$16 sps:$4 sm:$0xff]  }
 0x776   : > { %4970 = vmatprep.mubr.bf16.mxu0 %v4640_v42  ;;  %v7892_v42 = vld [vmem:[%s10264_s15 + $0x3e0] ss:$16 sps:$4 sm:$0xff]  }
 0x777   : > { %4971 = vmatmul.mubr.bf16.vlgmr.msra.gmra.mxu0 %v4639_v26  ;;  %6125 = vmatpush1.bf16.msra.mxu1 %v7883_v34  ;;  %v7897_v26 = vld [vmem:[%s10264_s15 + $0x1c4] ss:$16 sps:$4 sm:$0xff]   ;;  %v5173_v34 = vld [vmem:[#allocation9 + $0x4] sm:$0x1] }
 0x778   : > { %6152 = vmatpush1.bf16.msra.mxu0 %v7844_v57  ;;  %6126 = vmatprep.subr.bf16.mxu1 %v7891_v8  ;;  %v7912_v57 = vld [vmem:[%s10264_s15 + $0x384] ss:$16 sps:$4 sm:$0xff]  }
 0x779   : > { %6153 = vmatprep.subr.bf16.mxu0 %v7852_v60  ;;  %v7915_v60 = vld [vmem:[%s10264_s15 + $0x164] ss:$16 sps:$4 sm:$0xff]  }
 0x77b   : > { %6127 = vmatpush2.bf16.msra.mxu1 %v7889_v39  ;;  %v7924_v39 = vld [vmem:[%s10264_s15 + $0x344] ss:$16 sps:$4 sm:$0xff]  }
 0x77c   : > { %6154 = vmatpush1.bf16.msra.mxu0 %v7850_v63  ;;  %6128 = vmatprep.subr.bf16.mxu1 %v7897_v26  ;;  %v4705_v63 = vld [vmem:[%s10263_s14] sm:$0x1]  ;;  %v7930_v26 = vld [vmem:[%s10264_s15 + $0x324] ss:$16 sps:$4 sm:$0xff]  }
 0x77d   : > { %6155 = vmatprep.subr.bf16.mxu0 %v7858_v1 }
 0x77f   : > { %6129 = vmatpush2.bf16.msra.mxu1 %v7895_v22 }
 0x780   : > { %6156 = vmatpush1.bf16.msra.mxu0 %v7856_v4  ;;  %6130 = vmatprep.subr.bf16.mxu1 %v7903_v51  ;;  %v7936_v51 = vld [vmem:[%s10264_s15 + $0x304] ss:$16 sps:$4 sm:$0xff]  }
 0x781   : > { %6157 = vmatprep.subr.bf16.mxu0 %v7864_v7  ;;  %v5020_v7 = vld [vmem:[#allocation9] sm:$0x1] }
 0x783   : > { %6131 = vmatpush2.bf16.msra.mxu1 %v7901_v36  ;;  %v7934_v36 = vld [vmem:[%s10264_s15 + $0x300] ss:$16 sps:$4 sm:$0xff]  }
 0x784   : > { %6158 = vmatpush1.bf16.msra.mxu0 %v7862_v10  ;;  %6132 = vmatprep.subr.bf16.mxu1 %v7909_v56  ;;  %v5069_v10 = vld [vmem:[#allocation9 + $0x1] sm:$0x1]  ;;  %v7940_v56 = vld [vmem:[%s10264_s15 + $0x464] ss:$16 sps:$4 sm:$0xff]  }
 0x785   : > { %6159 = vmatprep.subr.bf16.mxu0 %v7870_v12  ;;  %v4981_v12 = vld [vmem:[#allocation5 + $0x4] sm:$0x1] }
 0x787   : > { %6133 = vmatpush2.bf16.msra.mxu1 %v7907_v58 }
 0x788   : > { %6160 = vmatpush1.bf16.msra.mxu0 %v7868_v18  ;;  %6134 = vmatprep.subr.bf16.mxu1 %v7915_v60  ;;  %v4982_v18 = vsel %vm9179_vm11, 0, %v4981_v12  ;;  %v7947_v12 = vld [vmem:[%s10264_s15 + $0xc8] ss:$16 sps:$4 sm:$0xff]  }
 0x789   : > { %6161 = vmatprep.subr.bf16.mxu0 %v7876_v20  ;;  %4983 = vst [vmem:[#allocation5 + $0x4] sm:$0x1] %v4982_v18  ;;  %v7958_v18 = vld [vmem:[%s10264_s15 + $0x404] ss:$16 sps:$4 sm:$0xff]  }
 0x78b   : > { %6135 = vmatpush2.bf16.msra.mxu1 %v7913_v61 }
 0x78c   : > { %6162 = vmatpush1.bf16.msra.mxu0 %v7874_v25 }
 0x78d   : > { %6163 = vmatprep.subr.bf16.mxu0 %v7882_v3 }
 0x790   : > { %6164 = vmatpush1.bf16.msra.mxu0 %v7880_v2  ;;  %v5172_v2 = vld [vmem:[#allocation5 + $0x4] sm:$0x1] }
 0x791   : > { %6165 = vmatprep.subr.bf16.mxu0 %v7888_v33  ;;  %v7916_v33 = vld [vmem:[%s10264_s15 + $0x360] ss:$16 sps:$4 sm:$0xff]   ;;  %v5174_v8 = vsel %vm9179_vm11, %v5172_v2, %v5173_v34  ;;  %v7973_v2 = vld [vmem:[%s10264_s15 + $0x4c] ss:$16 sps:$4 sm:$0xff]   ;;  %v7971_v34 = vld [vmem:[%s10264_s15 + $0x48] ss:$16 sps:$4 sm:$0xff]  }
 0x792   : > { %v5018_v14 = vpop.permute.xlu0 %5017  ;;  %5175 = vst [vmem:[#allocation9 + $0x4] sm:$0x1] %v5174_v8  ;;  %v7982_v8 = vld [vmem:[%s10264_s15 + $0x28c] ss:$16 sps:$4 sm:$0xff]  }
 0x793   : > { %v5021_v48 = vsel %vm9284_vm14, %v5018_v14, %v5020_v7  ;;  %v5067_v19 = vpop.permute.xlu1 %5066  ;;  %v7950_v14 = vld [vmem:[%s10264_s15 + $0x420] ss:$16 sps:$4 sm:$0xff]  }
 0x794   : > { %6166 = vmatpush1.bf16.msra.mxu0 %v7886_v37  ;;  %5022 = vst [vmem:[#allocation9] sm:$0x1] %v5021_v48  ;;  %v5070_v20 = vsel %vm9284_vm14, %v5067_v19, %v5069_v10  ;;  %v7921_v37 = vld [vmem:[%s10264_s15 + $0x144] ss:$16 sps:$4 sm:$0xff]   ;;  %v7944_v10 = vld [vmem:[%s10264_s15 + $0x440] ss:$16 sps:$4 sm:$0xff]  }
 0x795   : > { %6167 = vmatprep.subr.bf16.mxu0 %v7894_v38  ;;  %5071 = vst [vmem:[#allocation9 + $0x1] sm:$0x1] %v5070_v20  ;;  %v7922_v38 = vld [vmem:[%s10264_s15 + $0x340] ss:$16 sps:$4 sm:$0xff]   ;;  %6136 = vmatprep.subr.bf16.mxu1 %v7921_v37  ;;  %v7961_v48 = vld [vmem:[%s10264_s15 + $0x8c] ss:$16 sps:$4 sm:$0xff]  }
 0x796   : > { %6137 = vmatpush2.bf16.msra.mxu1 %v7919_v32  ;;  %v7956_v19 = vld [vmem:[%s10264_s15 + $0x400] ss:$16 sps:$4 sm:$0xff]   ;;  %v7979_v32 = vld [vmem:[%s10264_s15 + $0x2c] ss:$16 sps:$4 sm:$0xff]   ;;  %v7974_v37 = vld [vmem:[%s10264_s15 + $0x2a8] ss:$16 sps:$4 sm:$0xff]  }
 0x798   : > { %6168 = vmatpush2.bf16.msra.mxu0 %v7892_v42  ;;  %v5167_v3 = vpop.permute.xlu1 %5166  ;;  %v7927_v42 = vld [vmem:[%s10264_s15 + $0x124] ss:$16 sps:$4 sm:$0xff]  }
 0x799   : > { %6169 = vmatprep.subr.bf16.mxu0 %v7900_v45  ;;  %v5170_v31 = vsel %vm9284_vm14, %v5167_v3, %v5169_v27  ;;  %v7925_v45 = vld [vmem:[%s10264_s15 + $0x120] ss:$16 sps:$4 sm:$0xff]   ;;  %6138 = vmatprep.subr.bf16.mxu1 %v7927_v42  ;;  %v7970_v3 = vld [vmem:[%s10264_s15 + $0x2cc] ss:$16 sps:$4 sm:$0xff]   ;;  %v7980_v42 = vld [vmem:[%s10264_s15 + $0x288] ss:$16 sps:$4 sm:$0xff]  }
 0x79a   : > { %5171 = vst [vmem:[#allocation9 + $0x3] sm:$0x1] %v5170_v31  ;;  %6139 = vmatpush2.bf16.msra.mxu1 %v7925_v45  ;;  %v7968_v31 = vld [vmem:[%s10264_s15 + $0x2c8] ss:$16 sps:$4 sm:$0xff]  }
 0x79b   : > { %v7983_v45 = vld [vmem:[%s10264_s15 + $0x8] ss:$16 sps:$4 sm:$0xff]  }
 0x79c   : > { %6170 = vmatpush2.bf16.msra.mxu0 %v7898_v50 }
 0x79d   : > { %6171 = vmatprep.subr.bf16.mxu0 %v7906_v29  ;;  %v7931_v29 = vld [vmem:[%s10264_s15 + $0x100] ss:$16 sps:$4 sm:$0xff]  }
 0x7a0   : > { %6172 = vmatpush2.bf16.msra.mxu0 %v7904_v55 }
 0x7a1   : > { %6173 = vmatprep.subr.bf16.mxu0 %v7912_v57  ;;  %v7943_v57 = vld [vmem:[%s10264_s15 + $0xec] ss:$16 sps:$4 sm:$0xff]  }
 0x7a4   : > { %6174 = vmatpush2.bf16.msra.mxu0 %v7910_v59 }
 0x7a5   : > { %6175 = vmatprep.subr.bf16.mxu0 %v7918_v28  ;;  %v7965_v28 = vld [vmem:[%s10264_s15 + $0x68] ss:$16 sps:$4 sm:$0xff]  }
 0x7a8   : > { %6176 = vmatpush2.bf16.msra.mxu0 %v7916_v33  ;;  %v7976_v33 = vld [vmem:[%s10264_s15 + $0x2ac] ss:$16 sps:$4 sm:$0xff]  }
 0x7a9   : > { %6177 = vmatprep.subr.bf16.mxu0 %v7924_v39  ;;  %v7985_v39 = vld [vmem:[%s10264_s15 + $0xc] ss:$16 sps:$4 sm:$0xff]  }
 0x7ac   : > { %6178 = vmatpush2.bf16.msra.mxu0 %v7922_v38  ;;  %v7977_v38 = vld [vmem:[%s10264_s15 + $0x28] ss:$16 sps:$4 sm:$0xff]  }
 0x7ad   : > { %6179 = vmatprep.subr.bf16.mxu0 %v7930_v26  ;;  %v7988_v26 = vld [vmem:[%s10264_s15 + $0x26c] ss:$16 sps:$4 sm:$0xff]  }
 0x7f5   : > { %v7225_v46 = vpop.f32.mrf.mxu1 }
 0x7f7   : > { %v7226_v49 = vpop.f32.mrf.mxu1 }
 0x7f8   : > { %v7227_v30 = vadd.f32 %v7226_v49, %v7225_v46  ;;  %v7933_v46 = vld [vmem:[%s10264_s15 + $0x104] ss:$16 sps:$4 sm:$0xff]   ;;  %v7928_v49 = vld [vmem:[%s10264_s15 + $0x320] ss:$16 sps:$4 sm:$0xff]  }
 0x7f9   : > { %v7228_v53 = vpop.f32.mrf.mxu1  ;;  %6140 = vmatprep.subr.bf16.mxu1 %v7933_v46  ;;  %6180 = vmatpush2.bf16.msra.mxu0 %v7928_v49  ;;  %v7991_v46 = vld [vmem:[%s10264_s15 + $0x1ec] ss:$16 sps:$4 sm:$0xff]  }
 0x7fa   : > { %v4933_v41 = vadd.f32 %v7227_v30, %v4705_v63  ;;  %v5090_v30 = vld [vmem:[#allocation9 + $0x2] sm:$0x1]  ;;  %6181 = vmatprep.subr.bf16.mxu0 %v7936_v51  ;;  %6141 = vmatpush2.bf16.msra.mxu1 %v7931_v29 }
 0x7fb   : > { %v7229_v43 = vpop.f32.mrf.mxu1  ;;  %6200 = vmatprep.subr.bf16.mxu1 %v7940_v56  ;;  %v7994_v49 = vld [vmem:[%s10264_s15 + $0x24c] ss:$16 sps:$4 sm:$0xff]   ;;  %v8001_v56 = vld [vmem:[%s10264_s15 + $0x1a8] ss:$16 sps:$4 sm:$0xff]  }
 0x7fc   : > { %v7997_v51 = vld [vmem:[%s10264_s15 + $0x1cc] ss:$16 sps:$4 sm:$0xff]  }
 0x7fd   : > { %6182 = vmatpush2.bf16.msra.mxu0 %v7934_v36  ;;  %v8000_v29 = vld [vmem:[%s10264_s15 + $0x22c] ss:$16 sps:$4 sm:$0xff]  }
 0x7fe   : > { %6233 = vmatprep.subr.bf16.mxu0 %v7943_v57  ;;  %v8003_v36 = vld [vmem:[%s10264_s15 + $0x1ac] ss:$16 sps:$4 sm:$0xff]  }
 0x7ff   : > { %v8009_v57 = vld [vmem:[%s10264_s15 + $0x18c] ss:$16 sps:$4 sm:$0xff]  }
 0x837   : > { %v7247_v0 = vpop.f32.mrf.mxu0 }
 0x839   : > { %v7248_v1 = vpop.f32.mrf.mxu0 }
 0x83a   : > { %v7249_v4 = vadd.f32 %v7248_v1, %v7247_v0 }
 0x83b   : > { %v7250_v5 = vpop.f32.mrf.mxu0 }
 0x83c   : > { %v4973_v9 = vadd.f32 %v7249_v4, %v4933_v41  ;;  %v7938_v41 = vld [vmem:[%s10264_s15 + $0x460] ss:$16 sps:$4 sm:$0xff]   ;;  %v7946_v4 = vld [vmem:[%s10264_s15 + $0x444] ss:$16 sps:$4 sm:$0xff]   ;;  %v7941_v5 = vld [vmem:[%s10264_s15 + $0xe8] ss:$16 sps:$4 sm:$0xff]  }
 0x83d   : > { %v7251_v13 = vpop.f32.mrf.mxu0 }
 0x83e   : > { %v4978_v62 = vmax.f32 %v4973_v9, 0.0  ;;  %v7949_v9 = vld [vmem:[%s10264_s15 + $0xcc] ss:$16 sps:$4 sm:$0xff]  }
 0x83f   : > { %v7955_v13 = vld [vmem:[%s10264_s15 + $0xac] ss:$16 sps:$4 sm:$0xff]  }
 0x840   : > { %v7080_v21 = vpack.c.bf16 %v4978_v62, %v4978_v62  ;;  %v7953_v62 = vld [vmem:[%s10264_s15 + $0xa8] ss:$16 sps:$4 sm:$0xff]  }
 0x842   : > { %v4987_v25 = vrot.slane %v7080_v21, 6  ;;  %v7964_v21 = vld [vmem:[%s10264_s15 + $0x2ec] ss:$16 sps:$4 sm:$0xff]  }
 0x844   : > { %v4990_v40 = vsel %vm9298_vm6, %v4987_v25, %v4989_v24  ;;  %v7959_v24 = vld [vmem:[%s10264_s15 + $0x88] ss:$16 sps:$4 sm:$0xff]   ;;  %v7967_v25 = vld [vmem:[%s10264_s15 + $0x6c] ss:$16 sps:$4 sm:$0xff]  }
 0x845   : > { %4991 = vst [vmem:[#allocation5] sm:$0x4] %v4990_v40  ;;  %v7962_v40 = vld [vmem:[%s10264_s15 + $0x2e8] ss:$16 sps:$4 sm:$0xff]  }
 0x84c   : > { %v6922_v22 = vld.sshfl [vmem:[#allocation5] sm:$0x2 pattern:$0x75316420] }
 0x84d   : > { %v5108_v50 = vrot.slane %v6922_v22, %v8228_v23  ;;  %v7986_v22 = vld [vmem:[%s10264_s15 + $0x268] ss:$16 sps:$4 sm:$0xff]  }
 0x84f   : > { %v5109_v53 = vcombine.high %v5108_v50, %v5108_v50  ;;  %v7989_v50 = vld [vmem:[%s10264_s15 + $0x1e8] ss:$16 sps:$4 sm:$0xff]  }
 0x851   : > { %v5111_v43 = vshrl.u32 %v5109_v53, 16  ;;  %v5091_v55 = vsel %vm9179_vm11, %v5109_v53, %v5090_v30  ;;  %v7992_v30 = vld [vmem:[%s10264_s15 + $0x248] ss:$16 sps:$4 sm:$0xff]   ;;  %vm6401_vm11 = vcmask 1043459  }
 0x852   : > { %5092 = vst [vmem:[#allocation9 + $0x2] sm:$0x1] %v5091_v55  ;;  %v7995_v53 = vld [vmem:[%s10264_s15 + $0x1c8] ss:$16 sps:$4 sm:$0xff]   ;;  %v8006_v55 = vld [vmem:[%s10264_s15 + $0x20c] ss:$16 sps:$4 sm:$0xff]   ;;  %vm6403_vm0 = vmand %vm6401_vm11, %vm6402_vm13 }
 0x853   : > { %5115 = vrot.lane.b32.xlu0 %v5111_v43, %s10306_s21  ;;  %v7998_v43 = vld [vmem:[%s10264_s15 + $0x228] ss:$16 sps:$4 sm:$0xff]  }
 0x859   : > { %v5118_v59 = vld [vmem:[#allocation9 + $0x2] sm:$0x1] }
 0x8c5   : > { %v5116_v58 = vpop.permute.xlu0 %5115 }
 0x8c6   : > { %v5119_v35 = vsel %vm9284_vm14, %v5116_v58, %v5118_v59  ;;  %v8004_v58 = vld [vmem:[%s10264_s15 + $0x208] ss:$16 sps:$4 sm:$0xff]   ;;  %v8012_v59 = vld [vmem:[%s10264_s15 + $0x3ec] ss:$16 sps:$4 sm:$0xff]   ;;  %vm6400_vm14 = vmor %vm6399_vm10, %vm6397_vm2 }
 0x8c7   : > { %5120 = vst [vmem:[#allocation9 + $0x2] sm:$0x1] %v5119_v35  ;;  %v8007_v35 = vld [vmem:[%s10264_s15 + $0x188] ss:$16 sps:$4 sm:$0xff]   ;;  %vm6404_vm1 = vmor %vm6403_vm0, %vm6400_vm14 }
 0x8ce   : > { %v5176_v60 = vld [vmem:[#allocation9] sm:$0x1f] }
 0x8cf   : > { %v5330_v61 = vrot.slane %v5176_v60, %v8228_v23  ;;  %v5323_v15 = vcombine.high %v5176_v60, %v5176_v60  ;;  %v8015_v60 = vld [vmem:[%s10264_s15 + $0x16c] ss:$16 sps:$4 sm:$0xff]  }
 0x8d1   : > { %v5338_v63 = vcombine.high %v5330_v61, %v5330_v61  ;;  %v9961_v0 = vrot.slane %v5330_v61, %v8228_v23  ;;  %v5337_v20 = vrot.slane %v5323_v15, %v8228_v23  ;;  %v8010_v61 = vld [vmem:[%s10264_s15 + $0x3e8] ss:$16 sps:$4 sm:$0xff]   ;;  %v8036_v15 = vld [vmem:[%s10264_s15 + $0x36c] ss:$16 sps:$4 sm:$0xff]  }
 0x8d3   : > { %v5359_v1 = vrot.slane %v5338_v63, %v8228_v23  ;;  %v9976_v7 = vcombine.high %v9961_v0, %v9961_v0  ;;  %v10024_v27 = vrot.slane %v5337_v20, %v8228_v23  ;;  %v8018_v63 = vld [vmem:[%s10264_s15 + $0x3cc] ss:$16 sps:$4 sm:$0xff]   ;;  %v8037_v20 = vld [vmem:[%s10264_s15 + $0x468] ss:$16 sps:$4 sm:$0xff]  }
 0x8d5   : > { %6142 = vmatprep.mubr.bf16.mxu1 %v5359_v1  ;;  %v5361_v44 = vcombine.high %v5359_v1, %v5359_v1 }
 0x8d6   : > { %6143 = vmatmul.mubr.bf16.vlgmr.msra.gmra.mxu1 %v9961_v0 }
 0x8d7   : > { %6201 = vmatpush1.bf16.msra.mxu1 %v7938_v41  ;;  %6183 = vmatprep.mubr.bf16.mxu0 %v5361_v44  ;;  %v8021_v41 = vld [vmem:[%s10264_s15 + $0x14c] ss:$16 sps:$4 sm:$0xff]  }
 0x8d8   : > { %6184 = vmatmul.mubr.bf16.vlgmr.msra.gmra.mxu0 %v9976_v7  ;;  %6202 = vmatprep.subr.bf16.mxu1 %v7946_v4  ;;  %v8016_v4 = vld [vmem:[%s10264_s15 + $0x3c8] ss:$16 sps:$4 sm:$0xff]  }
 0x8d9   : > { %6234 = vmatpush1.bf16.msra.mxu0 %v7941_v5  ;;  %6265 = vmatprep.mubr.bf16.mxu0 %v5359_v1  ;;  %v8013_v1 = vld [vmem:[%s10264_s15 + $0x168] ss:$16 sps:$4 sm:$0xff]  }
 0x8da   : > { %6235 = vmatprep.subr.bf16.mxu0 %v7949_v9  ;;  %6224 = vmatprep.mubr.bf16.mxu1 %v8066_v6  ;;  %v8019_v5 = vld [vmem:[%s10264_s15 + $0x148] ss:$16 sps:$4 sm:$0xff]   ;;  %v8027_v9 = vld [vmem:[%s10264_s15 + $0x12c] ss:$16 sps:$4 sm:$0xff]  }
 0x8db   : > { %6203 = vmatpush1.bf16.msra.mxu1 %v7944_v10  ;;  %v8022_v10 = vld [vmem:[%s10264_s15 + $0x3a8] ss:$16 sps:$4 sm:$0xff]  }
 0x8dc   : > { %6204 = vmatprep.subr.bf16.mxu1 %v7952_v11  ;;  %v8030_v11 = vld [vmem:[%s10264_s15 + $0x38c] ss:$16 sps:$4 sm:$0xff]  }
 0x8dd   : > { %6236 = vmatpush1.bf16.msra.mxu0 %v7947_v12  ;;  %v8025_v12 = vld [vmem:[%s10264_s15 + $0x128] ss:$16 sps:$4 sm:$0xff]  }
 0x8de   : > { %6237 = vmatprep.subr.bf16.mxu0 %v7955_v13  ;;  %v8033_v13 = vld [vmem:[%s10264_s15 + $0x10c] ss:$16 sps:$4 sm:$0xff]  }
 0x8df   : > { %6205 = vmatpush1.bf16.msra.mxu1 %v7950_v14  ;;  %v8028_v14 = vld [vmem:[%s10264_s15 + $0x388] ss:$16 sps:$4 sm:$0xff]  }
 0x8e0   : > { %6206 = vmatprep.subr.bf16.mxu1 %v7958_v18  ;;  %v8031_v18 = vld [vmem:[%s10264_s15 + $0x108] ss:$16 sps:$4 sm:$0xff]  }
 0x8e1   : > { %6238 = vmatpush1.bf16.msra.mxu0 %v7953_v62  ;;  %v8039_v62 = vld [vmem:[%s10264_s15 + $0x46c] ss:$16 sps:$4 sm:$0xff]  }
 0x8e2   : > { %6239 = vmatprep.subr.bf16.mxu0 %v7961_v48  ;;  %v8034_v48 = vld [vmem:[%s10264_s15 + $0x368] ss:$16 sps:$4 sm:$0xff]  }
 0x8e3   : > { %6207 = vmatpush1.bf16.msra.mxu1 %v7956_v19  ;;  %v8042_v19 = vld [vmem:[%s10264_s15 + $0x34c] ss:$16 sps:$4 sm:$0xff]  }
 0x8e4   : > { %6274 = vmatprep.subr.bf16.mxu1 %v7964_v21  ;;  %v8045_v21 = vld [vmem:[%s10264_s15 + $0x44c] ss:$16 sps:$4 sm:$0xff]  }
 0x8e5   : > { %6240 = vmatpush1.bf16.msra.mxu0 %v7959_v24  ;;  %v8040_v24 = vld [vmem:[%s10264_s15 + $0x348] ss:$16 sps:$4 sm:$0xff]  }
 0x8e6   : > { %7071 = vmatmul.mubr.msk.bf16.vlgmr.msra.gmra.mxu1 %vm4383_vm15, %v10024_v27  ;;  %6241 = vmatprep.subr.bf16.mxu0 %v7967_v25  ;;  %v8048_v25 = vld [vmem:[%s10264_s15 + $0x32c] ss:$16 sps:$4 sm:$0xff]  }
 0x8e7   : > { %6275 = vmatpush1.bf16.msra.mxu1 %v7962_v40  ;;  %6306 = vmatprep.mubr.bf16.mxu1 %v5361_v44  ;;  %v8024_v44 = vld [vmem:[%s10264_s15 + $0x3ac] ss:$16 sps:$4 sm:$0xff]   ;;  %v8043_v40 = vld [vmem:[%s10264_s15 + $0x448] ss:$16 sps:$4 sm:$0xff]  }
 0x8e8   : > { %6276 = vmatprep.subr.bf16.mxu1 %v7970_v3  ;;  %v8051_v3 = vld [vmem:[%s10264_s15 + $0x42c] ss:$16 sps:$4 sm:$0xff]  }
 0x8e9   : > { %6242 = vmatpush1.bf16.msra.mxu0 %v7965_v28  ;;  %v8054_v28 = vld [vmem:[%s10264_s15 + $0x30c] ss:$16 sps:$4 sm:$0xff]  }
 0x8ea   : > { %6243 = vmatprep.subr.bf16.mxu0 %v7973_v2  ;;  %v8057_v2 = vld [vmem:[%s10264_s15 + $0x40c] ss:$16 sps:$4 sm:$0xff]  }
 0x8eb   : > { %6277 = vmatpush1.bf16.msra.mxu1 %v7968_v31  ;;  %v8052_v31 = vld [vmem:[%s10264_s15 + $0x308] ss:$16 sps:$4 sm:$0xff]  }
 0x8ec   : > { %6278 = vmatprep.subr.bf16.mxu1 %v7976_v33  ;;  %v8055_v33 = vld [vmem:[%s10264_s15 + $0x408] ss:$16 sps:$4 sm:$0xff]  }
 0x8ed   : > { %6244 = vmatpush1.bf16.msra.mxu0 %v7971_v34  ;;  %v5321_v34 = vld [vmem:[%s10265_s16] sm:$0xf] }
 0x8ee   : > { %6245 = vmatprep.subr.bf16.mxu0 %v7979_v32  ;;  %v6090_v32 = vrot.slane %v5321_v34, %v8700_v52 }
 0x8ef   : > { %6279 = vmatpush1.bf16.msra.mxu1 %v7974_v37  ;;  %v6094_v37 = vrot.slane %v5321_v34, %v8706_v54 }
 0x8f0   : > { %6280 = vmatprep.subr.bf16.mxu1 %v7982_v8 }
 0x8f1   : > { %6246 = vmatpush1.bf16.msra.mxu0 %v7977_v38 }
 0x8f2   : > { %6247 = vmatprep.subr.bf16.mxu0 %v7985_v39 }
 0x8f3   : > { %6281 = vmatpush1.bf16.msra.mxu1 %v7980_v42 }
 0x8f4   : > { %6282 = vmatprep.subr.bf16.mxu1 %v7988_v26 }
 0x8f5   : > { %6248 = vmatpush1.bf16.msra.mxu0 %v7983_v45 }
 0x8f6   : > { %6249 = vmatprep.subr.bf16.mxu0 %v7991_v46 }
 0x8f7   : > { %6283 = vmatpush1.bf16.msra.mxu1 %v7986_v22 }
 0x8f8   : > { %6284 = vmatprep.subr.bf16.mxu1 %v7994_v49 }
 0x8f9   : > { %6250 = vmatpush2.bf16.msra.mxu0 %v7989_v50 }
 0x8fa   : > { %6251 = vmatprep.subr.bf16.mxu0 %v7997_v51 }
 0x8fb   : > { %6285 = vmatpush1.bf16.msra.mxu1 %v7992_v30 }
 0x8fc   : > { %6286 = vmatprep.subr.bf16.mxu1 %v8000_v29 }
 0x8fd   : > { %6252 = vmatpush2.bf16.msra.mxu0 %v7995_v53 }
 0x8fe   : > { %6253 = vmatprep.subr.bf16.mxu0 %v8003_v36 }
 0x8ff   : > { %6287 = vmatpush1.bf16.msra.mxu1 %v7998_v43 }
 0x900   : > { %6288 = vmatprep.subr.bf16.mxu1 %v8006_v55 }
 0x901   : > { %6254 = vmatpush2.bf16.msra.mxu0 %v8001_v56 }
 0x902   : > { %6255 = vmatprep.subr.bf16.mxu0 %v8009_v57 }
 0x903   : > { %6289 = vmatpush1.bf16.msra.mxu1 %v8004_v58 }
 0x904   : > { %6290 = vmatprep.subr.bf16.mxu1 %v8012_v59 }
 0x905   : > { %6256 = vmatpush2.bf16.msra.mxu0 %v8007_v35  ;;  %v6098_v35 = vrot.slane %v5321_v34, %v8711_v16 }
 0x906   : > { %6257 = vmatprep.subr.bf16.mxu0 %v8015_v60  ;;  %v6102_v60 = vrot.slane %v5321_v34, %v4377_v47 }
 0x907   : > { %6291 = vmatpush2.bf16.msra.mxu1 %v8010_v61 }
 0x908   : > { %6292 = vmatprep.subr.bf16.mxu1 %v8018_v63 }
 0x909   : > { %6258 = vmatpush2.bf16.msra.mxu0 %v8013_v1 }
 0x90a   : > { %6259 = vmatprep.subr.bf16.mxu0 %v8021_v41 }
 0x90b   : > { %6293 = vmatpush2.bf16.msra.mxu1 %v8016_v4 }
 0x90c   : > { %6294 = vmatprep.subr.bf16.mxu1 %v8024_v44 }
 0x90d   : > { %6260 = vmatpush2.bf16.msra.mxu0 %v8019_v5 }
 0x90e   : > { %6261 = vmatprep.subr.bf16.mxu0 %v8027_v9 }
 0x90f   : > { %6295 = vmatpush2.bf16.msra.mxu1 %v8022_v10 }
 0x910   : > { %6296 = vmatprep.subr.bf16.mxu1 %v8030_v11 }
 0x911   : > { %6262 = vmatpush2.bf16.msra.mxu0 %v8025_v12 }
 0x912   : > { %6263 = vmatprep.subr.bf16.mxu0 %v8033_v13 }
 0x913   : > { %6297 = vmatpush2.bf16.msra.mxu1 %v8028_v14 }
 0x914   : > { %6298 = vmatprep.subr.bf16.mxu1 %v8036_v15 }
 0x915   : > { %6264 = vmatpush2.bf16.msra.mxu0 %v8031_v18 }
 0x916   : > { %6323 = vmatprep.subr.bf16.mxu0 %v8039_v62 }
 0x917   : > { %6299 = vmatpush2.bf16.msra.mxu1 %v8034_v48 }
 0x918   : > { %6266 = vmatmul.mubr.bf16.vlgmr.msra.gmra.mxu0 %v9961_v0  ;;  %6300 = vmatprep.subr.bf16.mxu1 %v8042_v19  ;;  %v8046_v0 = vld [vmem:[%s10264_s15 + $0x328] ss:$16 sps:$4 sm:$0xff]  }
 0x919   : > { %6324 = vmatpush1.bf16.msra.mxu0 %v8037_v20  ;;  %6347 = vmatprep.mubr.bf16.mxu0 %v8066_v6  ;;  %v8049_v6 = vld [vmem:[%s10264_s15 + $0x428] ss:$16 sps:$4 sm:$0xff]  }
 0x91a   : > { %6325 = vmatprep.subr.bf16.mxu0 %v8045_v21  ;;  %v6405_v21 = vld [vmem:[%s543_s20] sm:$0xf] }
 0x91b   : > { %6301 = vmatpush2.bf16.msra.mxu1 %v8040_v24 }
 0x91c   : > { %6302 = vmatprep.subr.bf16.mxu1 %v8048_v25 }
 0x91d   : > { %6326 = vmatpush1.bf16.msra.mxu0 %v8043_v40 }
 0x91e   : > { %6327 = vmatprep.subr.bf16.mxu0 %v8051_v3 }
 0x91f   : > { %6303 = vmatpush2.bf16.msra.mxu1 %v8046_v0 }
 0x920   : > { %6304 = vmatprep.subr.bf16.mxu1 %v8054_v28 }
 0x921   : > { %6328 = vmatpush1.bf16.msra.mxu0 %v8049_v6 }
 0x922   : > { %6329 = vmatprep.subr.bf16.mxu0 %v8057_v2 }
 0x923   : > { %6305 = vmatpush2.bf16.msra.mxu1 %v8052_v31 }
 0x925   : > { %6330 = vmatpush1.bf16.msra.mxu0 %v8055_v33 }
 0x926   : > { %6307 = vmatmul.mubr.bf16.vlgmr.msra.gmra.mxu1 %v9976_v7 }
 0x928   : > { %7072 = vmatmul.mubr.msk.bf16.vlgmr.msra.gmra.mxu0 %vm4383_vm15, %v10024_v27 }
 0x996   : > { %v6144_v8 = vpop.f32.mrf.mxu1 }
 0x997   : > { %v6145_v38 = vadd.f32 %v6144_v8, %v6090_v32 }
 0x998   : > { %v6146_v39 = vpop.f32.mrf.mxu1  ;;  %v6185_v42 = vpop.f32.mrf.mxu0 }
 0x999   : > { %v6147_v26 = vadd.f32 %v6146_v39, %v6094_v37  ;;  %v6186_v45 = vadd.f32 %v6185_v42, %v6145_v38 }
 0x99a   : > { %v6148_v46 = vpop.f32.mrf.mxu1  ;;  %v6187_v22 = vpop.f32.mrf.mxu0 }
 0x99b   : > { %v6188_v7 = vadd.f32 %v6187_v22, %v6147_v26 }
 0x99c   : > { %v6149_v49 = vpop.f32.mrf.mxu1  ;;  %v6189_v50 = vpop.f32.mrf.mxu0 }
 0x99e   : > { %v6190_v27 = vpop.f32.mrf.mxu0 }
 0x9a6   : > { %v6226_v51 = vpop.f32.mrf.mxu1 }
 0x9a7   : > { %v6227_v30 = vadd.f32 %v6226_v51, %v6186_v45 }
 0x9a8   : > { %v6228_v29 = vpop.f32.mrf.mxu1 }
 0x9a9   : > { %v6229_v53 = vadd.f32 %v6228_v29, %v6188_v7  ;;  %v6356_v52 = vmax.f32 %v6227_v30, 0.0 }
 0x9aa   : > { %v6230_v36 = vpop.f32.mrf.mxu1 }
 0x9ab   : > { %v6357_v43 = vmax.f32 %v6229_v53, 0.0 }
 0x9ac   : > { %v6231_v54 = vpop.f32.mrf.mxu1 }
 0x9ad   : > { %v7073_v55 = vpack.c.bf16 %v6357_v43, %v6356_v52 }
 0x9af   : > { %v6376_v48 = vrot.slane %v7073_v55, %v8228_v23 }
 0x9d8   : > { %v6267_v56 = vpop.f32.mrf.mxu0 }
 0x9d9   : > { %v6268_v61 = vadd.f32 %v6267_v56, %v6098_v35 }
 0x9da   : > { %v6269_v57 = vpop.f32.mrf.mxu0 }
 0x9db   : > { %v6270_v1 = vadd.f32 %v6269_v57, %v6102_v60 }
 0x9dc   : > { %v6271_v58 = vpop.f32.mrf.mxu0 }
 0x9de   : > { %v6272_v59 = vpop.f32.mrf.mxu0 }
 0x9e6   : > { %v6308_v63 = vpop.f32.mrf.mxu1 }
 0x9e7   : > { %v6309_v41 = vadd.f32 %v6308_v63, %v6268_v61 }
 0x9e8   : > { %v6310_v44 = vpop.f32.mrf.mxu1  ;;  %v6349_v5 = vpop.f32.mrf.mxu0 }
 0x9e9   : > { %v6311_v17 = vadd.f32 %v6310_v44, %v6270_v1  ;;  %v6350_v47 = vadd.f32 %v6349_v5, %v6309_v41 }
 0x9ea   : > { %v6312_v9 = vpop.f32.mrf.mxu1  ;;  %v6351_v10 = vpop.f32.mrf.mxu0 }
 0x9eb   : > { %v6352_v11 = vadd.f32 %v6351_v10, %v6311_v17  ;;  %v6358_v14 = vmax.f32 %v6350_v47, 0.0 }
 0x9ec   : > { %v6313_v12 = vpop.f32.mrf.mxu1  ;;  %v6353_v13 = vpop.f32.mrf.mxu0 }
 0x9ed   : > { %v6359_v15 = vmax.f32 %v6352_v11, 0.0 }
 0x9ee   : > { %v6354_v18 = vpop.f32.mrf.mxu0 }
 0x9ef   : > { %v7074_v62 = vpack.c.bf16 %v6359_v15, %v6358_v14 }
 0x9f1   : > { %v6383_v19 = vrot.slane %v7074_v62, %v8228_v23 }
 0x9f3   : > { %v6384_v20 = vcombine.low %v6376_v48, %v6383_v19 }
 0x9f5   : > { %v6391_v24 = vrot.slane %v6384_v20, %v8228_v23 }
 0x9f7   : > { %v6406_v25 = vsel %vm6404_vm1, %v6391_v24, %v6405_v21 }
 0x9f8   : > { %6407 = vst [vmem:[%s543_s20] sm:$0xf] %v6406_v25 }
 0x9f9 PF: > { %s10324_s25 = sld [smem:[#allocation10_spill]] }
 0x9ff   : > { %s27_s24 = sadd.s32 1, %s10324_s25  }
 0xa00   : > { %p24_p4 = scmp.ge.s32.totalorder %s27_s24, 4  }
 0xa02   :  { %26 = sbr.rel (!%p24_p4) target bundleno = 3 (0x3), region = 118 }

</bundles_post_ra>
